<compile_context>
chip_gen: v7x
topology: tpu7x:2x2x1
jax: 0.10.0
libtpu: 0.0.40
codegen_flags: <defaults>
</compile_context>

<pallas_src>
import functools

import jax
import jax.numpy as jnp
from jax.experimental import pallas as pl
from jax.experimental.pallas import tpu as pltpu

EPS = 1e-5  # PyTorch BatchNorm2d default eps


# --------------------------------------------------------------------------
# In-kernel helpers
# --------------------------------------------------------------------------
def _bn(y, gamma, beta):
    """Training-mode BatchNorm over the lane axis (B*H*W), biased variance.

    y: [Cout, M] f32, gamma/beta: [Cout, 1] f32.  One pass for the stats.
    """
    n = y.shape[1]
    mean = jnp.sum(y, axis=1, keepdims=True) * (1.0 / n)
    ex2 = jnp.sum(y * y, axis=1, keepdims=True) * (1.0 / n)
    var = jnp.maximum(ex2 - mean * mean, 0.0)
    return (y - mean) * jax.lax.rsqrt(var + EPS) * gamma + beta


# --------------------------------------------------------------------------
# Pallas kernels
# --------------------------------------------------------------------------
def _conv_bn_act_kernel(w_ref, x_ref, g_ref, b_ref, o_ref, *, do_relu):
    # Lane-dense conv-as-matmul: [Cout, K] @ [K, M] -> [Cout, M]  (f32 acc).
    y = jnp.dot(w_ref[...], x_ref[...], preferred_element_type=jnp.float32)
    y = _bn(y, g_ref[...], b_ref[...])          # no conv bias: BN cancels it
    if do_relu:
        y = jnp.maximum(y, 0.0)
    o_ref[...] = y.astype(o_ref.dtype)


def _blk_tail_kernel(wx_ref, x_ref, w2_ref, p2_ref,
                     gx_ref, bx_ref, g2_ref, b2_ref, s_ref, m_ref):
    # Fused ResBlk tail: shortcut = BN(extra_1x1(x)), main = BN(conv2(out1)).
    s = jnp.dot(wx_ref[...], x_ref[...], preferred_element_type=jnp.float32)
    s_ref[...] = _bn(s, gx_ref[...], bx_ref[...]).astype(s_ref.dtype)
    m = jnp.dot(w2_ref[...], p2_ref[...], preferred_element_type=jnp.float32)
    m_ref[...] = _bn(m, g2_ref[...], b2_ref[...]).astype(m_ref.dtype)


def _linear_kernel(x_ref, w_ref, b_ref, o_ref):
    # K-streamed matmul with the output block resident as the accumulator.
    k = pl.program_id(0)

    @pl.when(k == 0)
    def _init():
        o_ref[...] = jnp.broadcast_to(b_ref[...], o_ref.shape).astype(o_ref.dtype)

    o_ref[...] += jnp.dot(x_ref[...], w_ref[...],
                          preferred_element_type=jnp.float32)


# --------------------------------------------------------------------------
# pallas_call wrappers
# --------------------------------------------------------------------------
def conv_bn_act(patches, layer, *, do_relu):
    """patches: [K, M] bf16, layer = (w_t [Cout,K] bf16, gamma, beta [Cout,1])."""
    w_t, gamma, beta = layer
    cout, k = w_t.shape
    _, m = patches.shape
    kern = functools.partial(_conv_bn_act_kernel, do_relu=do_relu)
    return pl.pallas_call(
        kern,
        out_shape=jax.ShapeDtypeStruct((cout, m), jnp.bfloat16),
        grid=(1,),
        in_specs=[pl.BlockSpec((cout, k), lambda i: (0, 0)),
                  pl.BlockSpec((k, m), lambda i: (0, 0)),
                  pl.BlockSpec((cout, 1), lambda i: (0, 0)),
                  pl.BlockSpec((cout, 1), lambda i: (0, 0))],
        out_specs=pl.BlockSpec((cout, m), lambda i: (0, 0)),
    )(w_t, patches, gamma, beta)


def blk_tail(x2d, pat2, extra_layer, conv2_layer):
    """Fused extra(1x1)+BN and conv2+BN.  x2d: [Cin, Ms], pat2: [K2, Mm]."""
    wx, gx, bx = extra_layer
    w2, g2, b2 = conv2_layer
    cout, cin = wx.shape
    _, ms = x2d.shape
    k2, mm = pat2.shape
    return pl.pallas_call(
        _blk_tail_kernel,
        out_shape=(jax.ShapeDtypeStruct((cout, ms), jnp.bfloat16),
                   jax.ShapeDtypeStruct((cout, mm), jnp.bfloat16)),
        grid=(1,),
        in_specs=[pl.BlockSpec((cout, cin), lambda i: (0, 0)),
                  pl.BlockSpec((cin, ms), lambda i: (0, 0)),
                  pl.BlockSpec((cout, k2), lambda i: (0, 0)),
                  pl.BlockSpec((k2, mm), lambda i: (0, 0)),
                  pl.BlockSpec((cout, 1), lambda i: (0, 0)),
                  pl.BlockSpec((cout, 1), lambda i: (0, 0)),
                  pl.BlockSpec((cout, 1), lambda i: (0, 0)),
                  pl.BlockSpec((cout, 1), lambda i: (0, 0))],
        out_specs=(pl.BlockSpec((cout, ms), lambda i: (0, 0)),
                   pl.BlockSpec((cout, mm), lambda i: (0, 0))),
    )(wx, x2d, w2, pat2, gx, bx, g2, b2)


def linear(x_flat, layer, *, tk=4096):
    """x_flat: [B, K] bf16, layer = (w [K, N] bf16, b [1, N] f32)."""
    w, b = layer
    bsz, kdim = x_flat.shape
    n = w.shape[1]
    nk = kdim // tk
    return pl.pallas_call(
        _linear_kernel,
        out_shape=jax.ShapeDtypeStruct((bsz, n), jnp.float32),
        grid=(nk,),
        in_specs=[pl.BlockSpec((bsz, tk), lambda k: (0, k)),
                  pl.BlockSpec((tk, n), lambda k: (k, 0)),
                  pl.BlockSpec((1, n), lambda k: (0, 0))],
        out_specs=pl.BlockSpec((bsz, n), lambda k: (0, 0)),
        compiler_params=pltpu.CompilerParams(
            dimension_semantics=("arbitrary",)),
    )(x_flat, w, b)


# --------------------------------------------------------------------------
# XLA glue (im2col in channel-major layout, residual combine) — plain JAX
# --------------------------------------------------------------------------
def im2col_cm(x_cm, k, stride, pad):
    """x_cm: [C, B, H, W] -> (patches [k*k*C, B*Ho*Wo], Ho, Wo)."""
    c, b, h, w = x_cm.shape
    xp = jnp.pad(x_cm, ((0, 0), (0, 0), (pad, pad), (pad, pad)))
    ho = (h + 2 * pad - k) // stride + 1
    wo = (w + 2 * pad - k) // stride + 1
    taps = []
    for i in range(k):
        for j in range(k):
            taps.append(xp[:, :, i:i + (ho - 1) * stride + 1:stride,
                           j:j + (wo - 1) * stride + 1:stride])
    p = jnp.stack(taps, axis=0)                       # [k*k, C, B, Ho, Wo]
    return p.reshape(k * k * c, b * ho * wo), ho, wo


def resblk(x_cm, prm, cpad):
    """out = relu(bn1(conv1(x))); out = bn2(conv2(out)); out = extra(x) + out."""
    c, b, h, w = x_cm.shape
    # conv1: k=5, s=2, p=3 (+BN+ReLU), lane-dense kernel
    pat1, h1, w1 = im2col_cm(x_cm, 5, 2, 3)
    y1 = conv_bn_act(pat1, prm['conv1'], do_relu=True)        # [C1, B*17*17]
    c1 = y1.shape[0]
    # conv2 patches (k=3, s=2, p=3) from conv1's output
    pat2, h2, w2 = im2col_cm(y1.reshape(c1, b, h1, w1), 3, 2, 3)
    # fused tail: shortcut (extra 1x1 + BN) and main (conv2 + BN)
    x2d = x_cm.reshape(c, b * h * w)
    s, m = blk_tail(x2d, pat2, prm['extra'], prm['conv2'])
    cout = s.shape[0]
    # TODO(synk): reference `extra(x) + out` mixes spatial sizes and the
    # blk1 -> blk2 channel widths are inconsistent; keep the documented
    # convention: main path zero-padded top-left to the shortcut resolution,
    # channels zero-padded up to `cpad`.
    out = s.reshape(cout, b, h, w)
    out = out.at[:, :, :h2, :w2].add(m.reshape(cout, b, h2, w2))
    if cpad > cout:
        out = jnp.pad(out, ((0, cpad - cout), (0, 0), (0, 0), (0, 0)))
    return out


def resnet18_forward(x_nchw, p):
    b = x_nchw.shape[0]
    # channel-major internal layout: [C, B, H, W]; bf16 matmul operands
    x = jnp.transpose(x_nchw, (1, 0, 2, 3)).astype(jnp.bfloat16)
    # stem: Conv2d(1,16,k=3,s=1,p=3) + BN + ReLU
    pat, ho, wo = im2col_cm(x, 3, 1, 3)
    a = conv_bn_act(pat, p['conv1'], do_relu=True)            # [16, B*32*32]
    a = a.reshape(16, b, ho, wo)
    a = resblk(a, p['blk1'], cpad=16)                         # [16, B, 32, 32]
    a = resblk(a, p['blk2'], cpad=32)                         # [32, B, 32, 32]
    # flatten in NCHW order to match x.view(B, -1), then Linear(32768, 10)
    flat = jnp.transpose(a.reshape(a.shape[0], b, -1), (1, 0, 2)).reshape(b, -1)
    return linear(flat, p['outlayer'])                        # [B, 10] f32


# --------------------------------------------------------------------------
# Parameters: PyTorch-shaped init + one-time repacking outside the fwd path
# --------------------------------------------------------------------------
def init_params(key):
    def conv_layer(k_, cout, cin, ksz, scale=0.1):
        kw, kb = jax.random.split(k_)
        w = scale * jax.random.normal(kw, (cout, cin, ksz, ksz), jnp.float32)
        bias = scale * jax.random.normal(kb, (cout,), jnp.float32)
        gamma = jnp.ones((cout,), jnp.float32)
        beta = jnp.zeros((cout,), jnp.float32)
        return (w, bias, gamma, beta)

    ks = jax.random.split(key, 8)
    params = {
        'conv1': conv_layer(ks[0], 16, 1, 3),
        'blk1': {
            'conv1': conv_layer(ks[1], 8, 16, 5),
            'conv2': conv_layer(ks[2], 8, 8, 3),
            'extra': conv_layer(ks[3], 8, 16, 1),
        },
        'blk2': {
            'conv1': conv_layer(ks[4], 32, 16, 5),
            'conv2': conv_layer(ks[5], 32, 32, 3),
            'extra': conv_layer(ks[6], 32, 16, 1),
        },
    }
    kw, kb = jax.random.split(ks[7])
    params['outlayer'] = (
        0.01 * jax.random.normal(kw, (10, 32 * 32 * 32), jnp.float32),
        0.01 * jax.random.normal(kb, (10,), jnp.float32),
    )
    return params


def prepare_params(params):
    """One-time repack: [Cout, k*k*Cin] bf16 weights, [Cout,1] f32 BN affine.

    The conv biases are dropped: each conv is followed by training-mode BN,
    whose mean subtraction cancels the bias exactly.
    """
    def conv(layer):
        w, _bias, gamma, beta = layer
        cout = w.shape[0]
        w_t = jnp.transpose(w, (0, 2, 3, 1)).reshape(cout, -1).astype(jnp.bfloat16)
        return (w_t,
                gamma.reshape(cout, 1).astype(jnp.float32),
                beta.reshape(cout, 1).astype(jnp.float32))

    prep = {
        'conv1': conv(params['conv1']),
        'blk1': {k: conv(v) for k, v in params['blk1'].items()},
        'blk2': {k: conv(v) for k, v in params['blk2'].items()},
    }
    w, bias = params['outlayer']
    prep['outlayer'] = (jnp.transpose(w).astype(jnp.bfloat16),
                        bias.reshape(1, -1).astype(jnp.float32))
    return prep


if __name__ == "__main__":
    key = jax.random.PRNGKey(0)
    kx, kp = jax.random.split(key)
    x = jax.random.normal(kx, (2, 1, 28, 28), jnp.float32)   # NCHW, MNIST-like
    params = init_params(kp)
    prep = prepare_params(params)          # weight repack once, outside forward
    out = jax.jit(resnet18_forward)(x, prep)
    jax.block_until_ready(out)
    assert out.shape == (2, 10) and out.dtype == jnp.float32
    print("KERNEL_OK")
</pallas_src>

<mosaic_0001>
module attributes {stable_mosaic.version = 11 : i64} {
  func.func @_conv_bn_act_kernel(%arg0: i32, %arg1: memref<16x9xbf16, #tpu.memory_space<vmem>>, %arg2: memref<9x2048xbf16, #tpu.memory_space<vmem>>, %arg3: memref<16x1xf32, #tpu.memory_space<vmem>>, %arg4: memref<16x1xf32, #tpu.memory_space<vmem>>, %arg5: memref<16x2048xbf16, #tpu.memory_space<vmem>>) attributes {dimension_semantics = [#tpu.dimension_semantics<arbitrary>], iteration_bounds = array<i64: 1>, scalar_prefetch = 0 : i64, scratch_operands = 0 : i64, tpu.core_type = #tpu.core_type<tc>, window_params = [{pipeline_mode = #tpu.pipeline_mode<synchronous>, transform_indices = @transform_0, window_bounds = array<i64: 16, 9>}, {pipeline_mode = #tpu.pipeline_mode<synchronous>, transform_indices = @transform_1, window_bounds = array<i64: 9, 2048>}, {pipeline_mode = #tpu.pipeline_mode<synchronous>, transform_indices = @transform_2, window_bounds = array<i64: 16, 1>}, {pipeline_mode = #tpu.pipeline_mode<synchronous>, transform_indices = @transform_3, window_bounds = array<i64: 16, 1>}, {pipeline_mode = #tpu.pipeline_mode<synchronous>, transform_indices = @transform_4, window_bounds = array<i64: 16, 2048>}]} {
    %c0 = arith.constant 0 : index
    %c0_0 = arith.constant 0 : index
    %0 = vector.load %arg1[%c0, %c0_0] : memref<16x9xbf16, #tpu.memory_space<vmem>>, vector<16x9xbf16>
    %c0_1 = arith.constant 0 : index
    %c0_2 = arith.constant 0 : index
    %1 = vector.load %arg2[%c0_1, %c0_2] : memref<9x2048xbf16, #tpu.memory_space<vmem>>, vector<9x2048xbf16>
    %cst = arith.constant dense<0.000000e+00> : vector<16x2048xf32>
    %2 = tpu.matmul %0, %1, %cst {dimension_numbers = #tpu.dot_dimension_numbers<[1], [0], [0], [1], [0, 0, 1, 1], [], []>} : vector<16x9xbf16>, vector<9x2048xbf16>, vector<16x2048xf32> -> vector<16x2048xf32>
    %c0_3 = arith.constant 0 : index
    %c0_4 = arith.constant 0 : index
    %3 = vector.load %arg3[%c0_3, %c0_4] : memref<16x1xf32, #tpu.memory_space<vmem>>, vector<16x1xf32>
    %c0_5 = arith.constant 0 : index
    %c0_6 = arith.constant 0 : index
    %4 = vector.load %arg4[%c0_5, %c0_6] : memref<16x1xf32, #tpu.memory_space<vmem>>, vector<16x1xf32>
    %cst_7 = arith.constant dense<0.000000e+00> : vector<16xf32>
    %5 = vector.multi_reduction <add>, %2, %cst_7 [1] : vector<16x2048xf32> to vector<16xf32>
    %6 = vector.shape_cast %5 : vector<16xf32> to vector<16x1xf32>
    %cst_8 = arith.constant 4.8828125E-4 : f32
    %7 = vector.broadcast %cst_8 : f32 to vector<16x1xf32>
    %8 = arith.mulf %6, %7 : vector<16x1xf32>
    %9 = arith.mulf %2, %2 : vector<16x2048xf32>
    %cst_9 = arith.constant dense<0.000000e+00> : vector<16xf32>
    %10 = vector.multi_reduction <add>, %9, %cst_9 [1] : vector<16x2048xf32> to vector<16xf32>
    %11 = vector.shape_cast %10 : vector<16xf32> to vector<16x1xf32>
    %cst_10 = arith.constant 4.8828125E-4 : f32
    %12 = vector.broadcast %cst_10 : f32 to vector<16x1xf32>
    %13 = arith.mulf %11, %12 : vector<16x1xf32>
    %14 = arith.mulf %8, %8 : vector<16x1xf32>
    %15 = arith.subf %13, %14 : vector<16x1xf32>
    %cst_11 = arith.constant 0.000000e+00 : f32
    %16 = vector.broadcast %cst_11 : f32 to vector<16x1xf32>
    %17 = arith.maximumf %15, %16 : vector<16x1xf32>
    %18 = vector.broadcast %8 : vector<16x1xf32> to vector<16x2048xf32>
    %19 = arith.subf %2, %18 : vector<16x2048xf32>
    %cst_12 = arith.constant 9.99999974E-6 : f32
    %20 = vector.broadcast %cst_12 : f32 to vector<16x1xf32>
    %21 = arith.addf %17, %20 : vector<16x1xf32>
    %22 = math.rsqrt %21 : vector<16x1xf32>
    %23 = vector.broadcast %22 : vector<16x1xf32> to vector<16x2048xf32>
    %24 = arith.mulf %19, %23 : vector<16x2048xf32>
    %25 = vector.broadcast %3 : vector<16x1xf32> to vector<16x2048xf32>
    %26 = arith.mulf %24, %25 : vector<16x2048xf32>
    %27 = vector.broadcast %4 : vector<16x1xf32> to vector<16x2048xf32>
    %28 = arith.addf %26, %27 : vector<16x2048xf32>
    %cst_13 = arith.constant 0.000000e+00 : f32
    %29 = vector.broadcast %cst_13 : f32 to vector<16x2048xf32>
    %30 = arith.maximumf %28, %29 : vector<16x2048xf32>
    %31 = arith.truncf %30 : vector<16x2048xf32> to vector<16x2048xbf16>
    %c0_14 = arith.constant 0 : index
    %c0_15 = arith.constant 0 : index
    %32 = vector.load %arg5[%c0_14, %c0_15] : memref<16x2048xbf16, #tpu.memory_space<vmem>>, vector<16x2048xbf16>
    tpu.vector_store %arg5[%c0_14, %c0_15], %31 {strides = array<i32>} : memref<16x2048xbf16, #tpu.memory_space<vmem>>, vector<16x2048xbf16>,
    return
  }
  func.func @transform_0(%arg0: i32) -> (i32, i32) {
    %c0_i32 = arith.constant 0 : i32
    %c0_i32_0 = arith.constant 0 : i32
    %c0_i32_1 = arith.constant 0 : i32
    return %c0_i32, %c0_i32_0 : i32, i32
  }
  func.func @transform_1(%arg0: i32) -> (i32, i32) {
    %c0_i32 = arith.constant 0 : i32
    %c0_i32_0 = arith.constant 0 : i32
    %c0_i32_1 = arith.constant 0 : i32
    return %c0_i32, %c0_i32_0 : i32, i32
  }
  func.func @transform_2(%arg0: i32) -> (i32, i32) {
    %c0_i32 = arith.constant 0 : i32
    %c0_i32_0 = arith.constant 0 : i32
    %c0_i32_1 = arith.constant 0 : i32
    return %c0_i32, %c0_i32_0 : i32, i32
  }
  func.func @transform_3(%arg0: i32) -> (i32, i32) {
    %c0_i32 = arith.constant 0 : i32
    %c0_i32_0 = arith.constant 0 : i32
    %c0_i32_1 = arith.constant 0 : i32
    return %c0_i32, %c0_i32_0 : i32, i32
  }
  func.func @transform_4(%arg0: i32) -> (i32, i32) {
    %c0_i32 = arith.constant 0 : i32
    %c0_i32_0 = arith.constant 0 : i32
    %c0_i32_1 = arith.constant 0 : i32
    return %c0_i32, %c0_i32_0 : i32, i32
  }
}

module attributes {stable_mosaic.version = 11 : i64} {
  func.func @_conv_bn_act_kernel(%arg0: i32, %arg1: memref<8x400xbf16, #tpu.memory_space<vmem>>, %arg2: memref<400x578xbf16, #tpu.memory_space<vmem>>, %arg3: memref<8x1xf32, #tpu.memory_space<vmem>>, %arg4: memref<8x1xf32, #tpu.memory_space<vmem>>, %arg5: memref<8x578xbf16, #tpu.memory_space<vmem>>) attributes {dimension_semantics = [#tpu.dimension_semantics<arbitrary>], iteration_bounds = array<i64: 1>, scalar_prefetch = 0 : i64, scratch_operands = 0 : i64, tpu.core_type = #tpu.core_type<tc>, window_params = [{pipeline_mode = #tpu.pipeline_mode<synchronous>, transform_indices = @transform_0, window_bounds = array<i64: 8, 400>}, {pipeline_mode = #tpu.pipeline_mode<synchronous>, transform_indices = @transform_1, window_bounds = array<i64: 400, 578>}, {pipeline_mode = #tpu.pipeline_mode<synchronous>, transform_indices = @transform_2, window_bounds = array<i64: 8, 1>}, {pipeline_mode = #tpu.pipeline_mode<synchronous>, transform_indices = @transform_3, window_bounds = array<i64: 8, 1>}, {pipeline_mode = #tpu.pipeline_mode<synchronous>, transform_indices = @transform_4, window_bounds = array<i64: 8, 578>}]} {
    %c0 = arith.constant 0 : index
    %c0_0 = arith.constant 0 : index
    %0 = vector.load %arg1[%c0, %c0_0] : memref<8x400xbf16, #tpu.memory_space<vmem>>, vector<8x400xbf16>
    %c0_1 = arith.constant 0 : index
    %c0_2 = arith.constant 0 : index
    %1 = vector.load %arg2[%c0_1, %c0_2] : memref<400x578xbf16, #tpu.memory_space<vmem>>, vector<400x578xbf16>
    %cst = arith.constant dense<0.000000e+00> : vector<8x578xf32>
    %2 = tpu.matmul %0, %1, %cst {dimension_numbers = #tpu.dot_dimension_numbers<[1], [0], [0], [1], [0, 0, 1, 1], [], []>} : vector<8x400xbf16>, vector<400x578xbf16>, vector<8x578xf32> -> vector<8x578xf32>
    %c0_3 = arith.constant 0 : index
    %c0_4 = arith.constant 0 : index
    %3 = vector.load %arg3[%c0_3, %c0_4] : memref<8x1xf32, #tpu.memory_space<vmem>>, vector<8x1xf32>
    %c0_5 = arith.constant 0 : index
    %c0_6 = arith.constant 0 : index
    %4 = vector.load %arg4[%c0_5, %c0_6] : memref<8x1xf32, #tpu.memory_space<vmem>>, vector<8x1xf32>
    %cst_7 = arith.constant dense<0.000000e+00> : vector<8xf32>
    %5 = vector.multi_reduction <add>, %2, %cst_7 [1] : vector<8x578xf32> to vector<8xf32>
    %6 = vector.shape_cast %5 : vector<8xf32> to vector<8x1xf32>
    %cst_8 = arith.constant 0.00173010386 : f32
    %7 = vector.broadcast %cst_8 : f32 to vector<8x1xf32>
    %8 = arith.mulf %6, %7 : vector<8x1xf32>
    %9 = arith.mulf %2, %2 : vector<8x578xf32>
    %cst_9 = arith.constant dense<0.000000e+00> : vector<8xf32>
    %10 = vector.multi_reduction <add>, %9, %cst_9 [1] : vector<8x578xf32> to vector<8xf32>
    %11 = vector.shape_cast %10 : vector<8xf32> to vector<8x1xf32>
    %cst_10 = arith.constant 0.00173010386 : f32
    %12 = vector.broadcast %cst_10 : f32 to vector<8x1xf32>
    %13 = arith.mulf %11, %12 : vector<8x1xf32>
    %14 = arith.mulf %8, %8 : vector<8x1xf32>
    %15 = arith.subf %13, %14 : vector<8x1xf32>
    %cst_11 = arith.constant 0.000000e+00 : f32
    %16 = vector.broadcast %cst_11 : f32 to vector<8x1xf32>
    %17 = arith.maximumf %15, %16 : vector<8x1xf32>
    %18 = vector.broadcast %8 : vector<8x1xf32> to vector<8x578xf32>
    %19 = arith.subf %2, %18 : vector<8x578xf32>
    %cst_12 = arith.constant 9.99999974E-6 : f32
    %20 = vector.broadcast %cst_12 : f32 to vector<8x1xf32>
    %21 = arith.addf %17, %20 : vector<8x1xf32>
    %22 = math.rsqrt %21 : vector<8x1xf32>
    %23 = vector.broadcast %22 : vector<8x1xf32> to vector<8x578xf32>
    %24 = arith.mulf %19, %23 : vector<8x578xf32>
    %25 = vector.broadcast %3 : vector<8x1xf32> to vector<8x578xf32>
    %26 = arith.mulf %24, %25 : vector<8x578xf32>
    %27 = vector.broadcast %4 : vector<8x1xf32> to vector<8x578xf32>
    %28 = arith.addf %26, %27 : vector<8x578xf32>
    %cst_13 = arith.constant 0.000000e+00 : f32
    %29 = vector.broadcast %cst_13 : f32 to vector<8x578xf32>
    %30 = arith.maximumf %28, %29 : vector<8x578xf32>
    %31 = arith.truncf %30 : vector<8x578xf32> to vector<8x578xbf16>
    %c0_14 = arith.constant 0 : index
    %c0_15 = arith.constant 0 : index
    %32 = vector.load %arg5[%c0_14, %c0_15] : memref<8x578xbf16, #tpu.memory_space<vmem>>, vector<8x578xbf16>
    tpu.vector_store %arg5[%c0_14, %c0_15], %31 {strides = array<i32>} : memref<8x578xbf16, #tpu.memory_space<vmem>>, vector<8x578xbf16>,
    return
  }
  func.func @transform_0(%arg0: i32) -> (i32, i32) {
    %c0_i32 = arith.constant 0 : i32
    %c0_i32_0 = arith.constant 0 : i32
    %c0_i32_1 = arith.constant 0 : i32
    return %c0_i32, %c0_i32_0 : i32, i32
  }
  func.func @transform_1(%arg0: i32) -> (i32, i32) {
    %c0_i32 = arith.constant 0 : i32
    %c0_i32_0 = arith.constant 0 : i32
    %c0_i32_1 = arith.constant 0 : i32
    return %c0_i32, %c0_i32_0 : i32, i32
  }
  func.func @transform_2(%arg0: i32) -> (i32, i32) {
    %c0_i32 = arith.constant 0 : i32
    %c0_i32_0 = arith.constant 0 : i32
    %c0_i32_1 = arith.constant 0 : i32
    return %c0_i32, %c0_i32_0 : i32, i32
  }
  func.func @transform_3(%arg0: i32) -> (i32, i32) {
    %c0_i32 = arith.constant 0 : i32
    %c0_i32_0 = arith.constant 0 : i32
    %c0_i32_1 = arith.constant 0 : i32
    return %c0_i32, %c0_i32_0 : i32, i32
  }
  func.func @transform_4(%arg0: i32) -> (i32, i32) {
    %c0_i32 = arith.constant 0 : i32
    %c0_i32_0 = arith.constant 0 : i32
    %c0_i32_1 = arith.constant 0 : i32
    return %c0_i32, %c0_i32_0 : i32, i32
  }
}

module attributes {stable_mosaic.version = 11 : i64} {
  func.func @_blk_tail_kernel(%arg0: i32, %arg1: memref<8x16xbf16, #tpu.memory_space<vmem>>, %arg2: memref<16x2048xbf16, #tpu.memory_space<vmem>>, %arg3: memref<8x72xbf16, #tpu.memory_space<vmem>>, %arg4: memref<72x242xbf16, #tpu.memory_space<vmem>>, %arg5: memref<8x1xf32, #tpu.memory_space<vmem>>, %arg6: memref<8x1xf32, #tpu.memory_space<vmem>>, %arg7: memref<8x1xf32, #tpu.memory_space<vmem>>, %arg8: memref<8x1xf32, #tpu.memory_space<vmem>>, %arg9: memref<8x2048xbf16, #tpu.memory_space<vmem>>, %arg10: memref<8x242xbf16, #tpu.memory_space<vmem>>) attributes {dimension_semantics = [#tpu.dimension_semantics<arbitrary>], iteration_bounds = array<i64: 1>, scalar_prefetch = 0 : i64, scratch_operands = 0 : i64, tpu.core_type = #tpu.core_type<tc>, window_params = [{pipeline_mode = #tpu.pipeline_mode<synchronous>, transform_indices = @transform_0, window_bounds = array<i64: 8, 16>}, {pipeline_mode = #tpu.pipeline_mode<synchronous>, transform_indices = @transform_1, window_bounds = array<i64: 16, 2048>}, {pipeline_mode = #tpu.pipeline_mode<synchronous>, transform_indices = @transform_2, window_bounds = array<i64: 8, 72>}, {pipeline_mode = #tpu.pipeline_mode<synchronous>, transform_indices = @transform_3, window_bounds = array<i64: 72, 242>}, {pipeline_mode = #tpu.pipeline_mode<synchronous>, transform_indices = @transform_4, window_bounds = array<i64: 8, 1>}, {pipeline_mode = #tpu.pipeline_mode<synchronous>, transform_indices = @transform_5, window_bounds = array<i64: 8, 1>}, {pipeline_mode = #tpu.pipeline_mode<synchronous>, transform_indices = @transform_6, window_bounds = array<i64: 8, 1>}, {pipeline_mode = #tpu.pipeline_mode<synchronous>, transform_indices = @transform_7, window_bounds = array<i64: 8, 1>}, {pipeline_mode = #tpu.pipeline_mode<synchronous>, transform_indices = @transform_8, window_bounds = array<i64: 8, 2048>}, {pipeline_mode = #tpu.pipeline_mode<synchronous>, transform_indices = @transform_9, window_bounds = array<i64: 8, 242>}]} {
    %c0 = arith.constant 0 : index
    %c0_0 = arith.constant 0 : index
    %0 = vector.load %arg1[%c0, %c0_0] : memref<8x16xbf16, #tpu.memory_space<vmem>>, vector<8x16xbf16>
    %c0_1 = arith.constant 0 : index
    %c0_2 = arith.constant 0 : index
    %1 = vector.load %arg2[%c0_1, %c0_2] : memref<16x2048xbf16, #tpu.memory_space<vmem>>, vector<16x2048xbf16>
    %cst = arith.constant dense<0.000000e+00> : vector<8x2048xf32>
    %2 = tpu.matmul %0, %1, %cst {dimension_numbers = #tpu.dot_dimension_numbers<[1], [0], [0], [1], [0, 0, 1, 1], [], []>} : vector<8x16xbf16>, vector<16x2048xbf16>, vector<8x2048xf32> -> vector<8x2048xf32>
    %c0_3 = arith.constant 0 : index
    %c0_4 = arith.constant 0 : index
    %3 = vector.load %arg5[%c0_3, %c0_4] : memref<8x1xf32, #tpu.memory_space<vmem>>, vector<8x1xf32>
    %c0_5 = arith.constant 0 : index
    %c0_6 = arith.constant 0 : index
    %4 = vector.load %arg6[%c0_5, %c0_6] : memref<8x1xf32, #tpu.memory_space<vmem>>, vector<8x1xf32>
    %cst_7 = arith.constant dense<0.000000e+00> : vector<8xf32>
    %5 = vector.multi_reduction <add>, %2, %cst_7 [1] : vector<8x2048xf32> to vector<8xf32>
    %6 = vector.shape_cast %5 : vector<8xf32> to vector<8x1xf32>
    %cst_8 = arith.constant 4.8828125E-4 : f32
    %7 = vector.broadcast %cst_8 : f32 to vector<8x1xf32>
    %8 = arith.mulf %6, %7 : vector<8x1xf32>
    %9 = arith.mulf %2, %2 : vector<8x2048xf32>
    %cst_9 = arith.constant dense<0.000000e+00> : vector<8xf32>
    %10 = vector.multi_reduction <add>, %9, %cst_9 [1] : vector<8x2048xf32> to vector<8xf32>
    %11 = vector.shape_cast %10 : vector<8xf32> to vector<8x1xf32>
    %cst_10 = arith.constant 4.8828125E-4 : f32
    %12 = vector.broadcast %cst_10 : f32 to vector<8x1xf32>
    %13 = arith.mulf %11, %12 : vector<8x1xf32>
    %14 = arith.mulf %8, %8 : vector<8x1xf32>
    %15 = arith.subf %13, %14 : vector<8x1xf32>
    %cst_11 = arith.constant 0.000000e+00 : f32
    %16 = vector.broadcast %cst_11 : f32 to vector<8x1xf32>
    %17 = arith.maximumf %15, %16 : vector<8x1xf32>
    %18 = vector.broadcast %8 : vector<8x1xf32> to vector<8x2048xf32>
    %19 = arith.subf %2, %18 : vector<8x2048xf32>
    %cst_12 = arith.constant 9.99999974E-6 : f32
    %20 = vector.broadcast %cst_12 : f32 to vector<8x1xf32>
    %21 = arith.addf %17, %20 : vector<8x1xf32>
    %22 = math.rsqrt %21 : vector<8x1xf32>
    %23 = vector.broadcast %22 : vector<8x1xf32> to vector<8x2048xf32>
    %24 = arith.mulf %19, %23 : vector<8x2048xf32>
    %25 = vector.broadcast %3 : vector<8x1xf32> to vector<8x2048xf32>
    %26 = arith.mulf %24, %25 : vector<8x2048xf32>
    %27 = vector.broadcast %4 : vector<8x1xf32> to vector<8x2048xf32>
    %28 = arith.addf %26, %27 : vector<8x2048xf32>
    %29 = arith.truncf %28 : vector<8x2048xf32> to vector<8x2048xbf16>
    %c0_13 = arith.constant 0 : index
    %c0_14 = arith.constant 0 : index
    %30 = vector.load %arg9[%c0_13, %c0_14] : memref<8x2048xbf16, #tpu.memory_space<vmem>>, vector<8x2048xbf16>
    tpu.vector_store %arg9[%c0_13, %c0_14], %29 {strides = array<i32>} : memref<8x2048xbf16, #tpu.memory_space<vmem>>, vector<8x2048xbf16>,
    %c0_15 = arith.constant 0 : index
    %c0_16 = arith.constant 0 : index
    %31 = vector.load %arg3[%c0_15, %c0_16] : memref<8x72xbf16, #tpu.memory_space<vmem>>, vector<8x72xbf16>
    %c0_17 = arith.constant 0 : index
    %c0_18 = arith.constant 0 : index
    %32 = vector.load %arg4[%c0_17, %c0_18] : memref<72x242xbf16, #tpu.memory_space<vmem>>, vector<72x242xbf16>
    %cst_19 = arith.constant dense<0.000000e+00> : vector<8x242xf32>
    %33 = tpu.matmul %31, %32, %cst_19 {dimension_numbers = #tpu.dot_dimension_numbers<[1], [0], [0], [1], [0, 0, 1, 1], [], []>} : vector<8x72xbf16>, vector<72x242xbf16>, vector<8x242xf32> -> vector<8x242xf32>
    %c0_20 = arith.constant 0 : index
    %c0_21 = arith.constant 0 : index
    %34 = vector.load %arg7[%c0_20, %c0_21] : memref<8x1xf32, #tpu.memory_space<vmem>>, vector<8x1xf32>
    %c0_22 = arith.constant 0 : index
    %c0_23 = arith.constant 0 : index
    %35 = vector.load %arg8[%c0_22, %c0_23] : memref<8x1xf32, #tpu.memory_space<vmem>>, vector<8x1xf32>
    %cst_24 = arith.constant dense<0.000000e+00> : vector<8xf32>
    %36 = vector.multi_reduction <add>, %33, %cst_24 [1] : vector<8x242xf32> to vector<8xf32>
    %37 = vector.shape_cast %36 : vector<8xf32> to vector<8x1xf32>
    %cst_25 = arith.constant 0.00413223123 : f32
    %38 = vector.broadcast %cst_25 : f32 to vector<8x1xf32>
    %39 = arith.mulf %37, %38 : vector<8x1xf32>
    %40 = arith.mulf %33, %33 : vector<8x242xf32>
    %cst_26 = arith.constant dense<0.000000e+00> : vector<8xf32>
    %41 = vector.multi_reduction <add>, %40, %cst_26 [1] : vector<8x242xf32> to vector<8xf32>
    %42 = vector.shape_cast %41 : vector<8xf32> to vector<8x1xf32>
    %cst_27 = arith.constant 0.00413223123 : f32
    %43 = vector.broadcast %cst_27 : f32 to vector<8x1xf32>
    %44 = arith.mulf %42, %43 : vector<8x1xf32>
    %45 = arith.mulf %39, %39 : vector<8x1xf32>
    %46 = arith.subf %44, %45 : vector<8x1xf32>
    %cst_28 = arith.constant 0.000000e+00 : f32
    %47 = vector.broadcast %cst_28 : f32 to vector<8x1xf32>
    %48 = arith.maximumf %46, %47 : vector<8x1xf32>
    %49 = vector.broadcast %39 : vector<8x1xf32> to vector<8x242xf32>
    %50 = arith.subf %33, %49 : vector<8x242xf32>
    %cst_29 = arith.constant 9.99999974E-6 : f32
    %51 = vector.broadcast %cst_29 : f32 to vector<8x1xf32>
    %52 = arith.addf %48, %51 : vector<8x1xf32>
    %53 = math.rsqrt %52 : vector<8x1xf32>
    %54 = vector.broadcast %53 : vector<8x1xf32> to vector<8x242xf32>
    %55 = arith.mulf %50, %54 : vector<8x242xf32>
    %56 = vector.broadcast %34 : vector<8x1xf32> to vector<8x242xf32>
    %57 = arith.mulf %55, %56 : vector<8x242xf32>
    %58 = vector.broadcast %35 : vector<8x1xf32> to vector<8x242xf32>
    %59 = arith.addf %57, %58 : vector<8x242xf32>
    %60 = arith.truncf %59 : vector<8x242xf32> to vector<8x242xbf16>
    %c0_30 = arith.constant 0 : index
    %c0_31 = arith.constant 0 : index
    %61 = vector.load %arg10[%c0_30, %c0_31] : memref<8x242xbf16, #tpu.memory_space<vmem>>, vector<8x242xbf16>
    tpu.vector_store %arg10[%c0_30, %c0_31], %60 {strides = array<i32>} : memref<8x242xbf16, #tpu.memory_space<vmem>>, vector<8x242xbf16>,
    return
  }
  func.func @transform_0(%arg0: i32) -> (i32, i32) {
    %c0_i32 = arith.constant 0 : i32
    %c0_i32_0 = arith.constant 0 : i32
    %c0_i32_1 = arith.constant 0 : i32
    return %c0_i32, %c0_i32_0 : i32, i32
  }
  func.func @transform_1(%arg0: i32) -> (i32, i32) {
    %c0_i32 = arith.constant 0 : i32
    %c0_i32_0 = arith.constant 0 : i32
    %c0_i32_1 = arith.constant 0 : i32
    return %c0_i32, %c0_i32_0 : i32, i32
  }
  func.func @transform_2(%arg0: i32) -> (i32, i32) {
    %c0_i32 = arith.constant 0 : i32
    %c0_i32_0 = arith.constant 0 : i32
    %c0_i32_1 = arith.constant 0 : i32
    return %c0_i32, %c0_i32_0 : i32, i32
  }
  func.func @transform_3(%arg0: i32) -> (i32, i32) {
    %c0_i32 = arith.constant 0 : i32
    %c0_i32_0 = arith.constant 0 : i32
    %c0_i32_1 = arith.constant 0 : i32
    return %c0_i32, %c0_i32_0 : i32, i32
  }
  func.func @transform_4(%arg0: i32) -> (i32, i32) {
    %c0_i32 = arith.constant 0 : i32
    %c0_i32_0 = arith.constant 0 : i32
    %c0_i32_1 = arith.constant 0 : i32
    return %c0_i32, %c0_i32_0 : i32, i32
  }
  func.func @transform_5(%arg0: i32) -> (i32, i32) {
    %c0_i32 = arith.constant 0 : i32
    %c0_i32_0 = arith.constant 0 : i32
    %c0_i32_1 = arith.constant 0 : i32
    return %c0_i32, %c0_i32_0 : i32, i32
  }
  func.func @transform_6(%arg0: i32) -> (i32, i32) {
    %c0_i32 = arith.constant 0 : i32
    %c0_i32_0 = arith.constant 0 : i32
    %c0_i32_1 = arith.constant 0 : i32
    return %c0_i32, %c0_i32_0 : i32, i32
  }
  func.func @transform_7(%arg0: i32) -> (i32, i32) {
    %c0_i32 = arith.constant 0 : i32
    %c0_i32_0 = arith.constant 0 : i32
    %c0_i32_1 = arith.constant 0 : i32
    return %c0_i32, %c0_i32_0 : i32, i32
  }
  func.func @transform_8(%arg0: i32) -> (i32, i32) {
    %c0_i32 = arith.constant 0 : i32
    %c0_i32_0 = arith.constant 0 : i32
    %c0_i32_1 = arith.constant 0 : i32
    return %c0_i32, %c0_i32_0 : i32, i32
  }
  func.func @transform_9(%arg0: i32) -> (i32, i32) {
    %c0_i32 = arith.constant 0 : i32
    %c0_i32_0 = arith.constant 0 : i32
    %c0_i32_1 = arith.constant 0 : i32
    return %c0_i32, %c0_i32_0 : i32, i32
  }
}

module attributes {stable_mosaic.version = 11 : i64} {
  func.func @_conv_bn_act_kernel(%arg0: i32, %arg1: memref<32x400xbf16, #tpu.memory_space<vmem>>, %arg2: memref<400x578xbf16, #tpu.memory_space<vmem>>, %arg3: memref<32x1xf32, #tpu.memory_space<vmem>>, %arg4: memref<32x1xf32, #tpu.memory_space<vmem>>, %arg5: memref<32x578xbf16, #tpu.memory_space<vmem>>) attributes {dimension_semantics = [#tpu.dimension_semantics<arbitrary>], iteration_bounds = array<i64: 1>, scalar_prefetch = 0 : i64, scratch_operands = 0 : i64, tpu.core_type = #tpu.core_type<tc>, window_params = [{pipeline_mode = #tpu.pipeline_mode<synchronous>, transform_indices = @transform_0, window_bounds = array<i64: 32, 400>}, {pipeline_mode = #tpu.pipeline_mode<synchronous>, transform_indices = @transform_1, window_bounds = array<i64: 400, 578>}, {pipeline_mode = #tpu.pipeline_mode<synchronous>, transform_indices = @transform_2, window_bounds = array<i64: 32, 1>}, {pipeline_mode = #tpu.pipeline_mode<synchronous>, transform_indices = @transform_3, window_bounds = array<i64: 32, 1>}, {pipeline_mode = #tpu.pipeline_mode<synchronous>, transform_indices = @transform_4, window_bounds = array<i64: 32, 578>}]} {
    %c0 = arith.constant 0 : index
    %c0_0 = arith.constant 0 : index
    %0 = vector.load %arg1[%c0, %c0_0] : memref<32x400xbf16, #tpu.memory_space<vmem>>, vector<32x400xbf16>
    %c0_1 = arith.constant 0 : index
    %c0_2 = arith.constant 0 : index
    %1 = vector.load %arg2[%c0_1, %c0_2] : memref<400x578xbf16, #tpu.memory_space<vmem>>, vector<400x578xbf16>
    %cst = arith.constant dense<0.000000e+00> : vector<32x578xf32>
    %2 = tpu.matmul %0, %1, %cst {dimension_numbers = #tpu.dot_dimension_numbers<[1], [0], [0], [1], [0, 0, 1, 1], [], []>} : vector<32x400xbf16>, vector<400x578xbf16>, vector<32x578xf32> -> vector<32x578xf32>
    %c0_3 = arith.constant 0 : index
    %c0_4 = arith.constant 0 : index
    %3 = vector.load %arg3[%c0_3, %c0_4] : memref<32x1xf32, #tpu.memory_space<vmem>>, vector<32x1xf32>
    %c0_5 = arith.constant 0 : index
    %c0_6 = arith.constant 0 : index
    %4 = vector.load %arg4[%c0_5, %c0_6] : memref<32x1xf32, #tpu.memory_space<vmem>>, vector<32x1xf32>
    %cst_7 = arith.constant dense<0.000000e+00> : vector<32xf32>
    %5 = vector.multi_reduction <add>, %2, %cst_7 [1] : vector<32x578xf32> to vector<32xf32>
    %6 = vector.shape_cast %5 : vector<32xf32> to vector<32x1xf32>
    %cst_8 = arith.constant 0.00173010386 : f32
    %7 = vector.broadcast %cst_8 : f32 to vector<32x1xf32>
    %8 = arith.mulf %6, %7 : vector<32x1xf32>
    %9 = arith.mulf %2, %2 : vector<32x578xf32>
    %cst_9 = arith.constant dense<0.000000e+00> : vector<32xf32>
    %10 = vector.multi_reduction <add>, %9, %cst_9 [1] : vector<32x578xf32> to vector<32xf32>
    %11 = vector.shape_cast %10 : vector<32xf32> to vector<32x1xf32>
    %cst_10 = arith.constant 0.00173010386 : f32
    %12 = vector.broadcast %cst_10 : f32 to vector<32x1xf32>
    %13 = arith.mulf %11, %12 : vector<32x1xf32>
    %14 = arith.mulf %8, %8 : vector<32x1xf32>
    %15 = arith.subf %13, %14 : vector<32x1xf32>
    %cst_11 = arith.constant 0.000000e+00 : f32
    %16 = vector.broadcast %cst_11 : f32 to vector<32x1xf32>
    %17 = arith.maximumf %15, %16 : vector<32x1xf32>
    %18 = vector.broadcast %8 : vector<32x1xf32> to vector<32x578xf32>
    %19 = arith.subf %2, %18 : vector<32x578xf32>
    %cst_12 = arith.constant 9.99999974E-6 : f32
    %20 = vector.broadcast %cst_12 : f32 to vector<32x1xf32>
    %21 = arith.addf %17, %20 : vector<32x1xf32>
    %22 = math.rsqrt %21 : vector<32x1xf32>
    %23 = vector.broadcast %22 : vector<32x1xf32> to vector<32x578xf32>
    %24 = arith.mulf %19, %23 : vector<32x578xf32>
    %25 = vector.broadcast %3 : vector<32x1xf32> to vector<32x578xf32>
    %26 = arith.mulf %24, %25 : vector<32x578xf32>
    %27 = vector.broadcast %4 : vector<32x1xf32> to vector<32x578xf32>
    %28 = arith.addf %26, %27 : vector<32x578xf32>
    %cst_13 = arith.constant 0.000000e+00 : f32
    %29 = vector.broadcast %cst_13 : f32 to vector<32x578xf32>
    %30 = arith.maximumf %28, %29 : vector<32x578xf32>
    %31 = arith.truncf %30 : vector<32x578xf32> to vector<32x578xbf16>
    %c0_14 = arith.constant 0 : index
    %c0_15 = arith.constant 0 : index
    %32 = vector.load %arg5[%c0_14, %c0_15] : memref<32x578xbf16, #tpu.memory_space<vmem>>, vector<32x578xbf16>
    tpu.vector_store %arg5[%c0_14, %c0_15], %31 {strides = array<i32>} : memref<32x578xbf16, #tpu.memory_space<vmem>>, vector<32x578xbf16>,
    return
  }
  func.func @transform_0(%arg0: i32) -> (i32, i32) {
    %c0_i32 = arith.constant 0 : i32
    %c0_i32_0 = arith.constant 0 : i32
    %c0_i32_1 = arith.constant 0 : i32
    return %c0_i32, %c0_i32_0 : i32, i32
  }
  func.func @transform_1(%arg0: i32) -> (i32, i32) {
    %c0_i32 = arith.constant 0 : i32
    %c0_i32_0 = arith.constant 0 : i32
    %c0_i32_1 = arith.constant 0 : i32
    return %c0_i32, %c0_i32_0 : i32, i32
  }
  func.func @transform_2(%arg0: i32) -> (i32, i32) {
    %c0_i32 = arith.constant 0 : i32
    %c0_i32_0 = arith.constant 0 : i32
    %c0_i32_1 = arith.constant 0 : i32
    return %c0_i32, %c0_i32_0 : i32, i32
  }
  func.func @transform_3(%arg0: i32) -> (i32, i32) {
    %c0_i32 = arith.constant 0 : i32
    %c0_i32_0 = arith.constant 0 : i32
    %c0_i32_1 = arith.constant 0 : i32
    return %c0_i32, %c0_i32_0 : i32, i32
  }
  func.func @transform_4(%arg0: i32) -> (i32, i32) {
    %c0_i32 = arith.constant 0 : i32
    %c0_i32_0 = arith.constant 0 : i32
    %c0_i32_1 = arith.constant 0 : i32
    return %c0_i32, %c0_i32_0 : i32, i32
  }
}

module attributes {stable_mosaic.version = 11 : i64} {
  func.func @_blk_tail_kernel(%arg0: i32, %arg1: memref<32x16xbf16, #tpu.memory_space<vmem>>, %arg2: memref<16x2048xbf16, #tpu.memory_space<vmem>>, %arg3: memref<32x288xbf16, #tpu.memory_space<vmem>>, %arg4: memref<288x242xbf16, #tpu.memory_space<vmem>>, %arg5: memref<32x1xf32, #tpu.memory_space<vmem>>, %arg6: memref<32x1xf32, #tpu.memory_space<vmem>>, %arg7: memref<32x1xf32, #tpu.memory_space<vmem>>, %arg8: memref<32x1xf32, #tpu.memory_space<vmem>>, %arg9: memref<32x2048xbf16, #tpu.memory_space<vmem>>, %arg10: memref<32x242xbf16, #tpu.memory_space<vmem>>) attributes {dimension_semantics = [#tpu.dimension_semantics<arbitrary>], iteration_bounds = array<i64: 1>, scalar_prefetch = 0 : i64, scratch_operands = 0 : i64, tpu.core_type = #tpu.core_type<tc>, window_params = [{pipeline_mode = #tpu.pipeline_mode<synchronous>, transform_indices = @transform_0, window_bounds = array<i64: 32, 16>}, {pipeline_mode = #tpu.pipeline_mode<synchronous>, transform_indices = @transform_1, window_bounds = array<i64: 16, 2048>}, {pipeline_mode = #tpu.pipeline_mode<synchronous>, transform_indices = @transform_2, window_bounds = array<i64: 32, 288>}, {pipeline_mode = #tpu.pipeline_mode<synchronous>, transform_indices = @transform_3, window_bounds = array<i64: 288, 242>}, {pipeline_mode = #tpu.pipeline_mode<synchronous>, transform_indices = @transform_4, window_bounds = array<i64: 32, 1>}, {pipeline_mode = #tpu.pipeline_mode<synchronous>, transform_indices = @transform_5, window_bounds = array<i64: 32, 1>}, {pipeline_mode = #tpu.pipeline_mode<synchronous>, transform_indices = @transform_6, window_bounds = array<i64: 32, 1>}, {pipeline_mode = #tpu.pipeline_mode<synchronous>, transform_indices = @transform_7, window_bounds = array<i64: 32, 1>}, {pipeline_mode = #tpu.pipeline_mode<synchronous>, transform_indices = @transform_8, window_bounds = array<i64: 32, 2048>}, {pipeline_mode = #tpu.pipeline_mode<synchronous>, transform_indices = @transform_9, window_bounds = array<i64: 32, 242>}]} {
    %c0 = arith.constant 0 : index
    %c0_0 = arith.constant 0 : index
    %0 = vector.load %arg1[%c0, %c0_0] : memref<32x16xbf16, #tpu.memory_space<vmem>>, vector<32x16xbf16>
    %c0_1 = arith.constant 0 : index
    %c0_2 = arith.constant 0 : index
    %1 = vector.load %arg2[%c0_1, %c0_2] : memref<16x2048xbf16, #tpu.memory_space<vmem>>, vector<16x2048xbf16>
    %cst = arith.constant dense<0.000000e+00> : vector<32x2048xf32>
    %2 = tpu.matmul %0, %1, %cst {dimension_numbers = #tpu.dot_dimension_numbers<[1], [0], [0], [1], [0, 0, 1, 1], [], []>} : vector<32x16xbf16>, vector<16x2048xbf16>, vector<32x2048xf32> -> vector<32x2048xf32>
    %c0_3 = arith.constant 0 : index
    %c0_4 = arith.constant 0 : index
    %3 = vector.load %arg5[%c0_3, %c0_4] : memref<32x1xf32, #tpu.memory_space<vmem>>, vector<32x1xf32>
    %c0_5 = arith.constant 0 : index
    %c0_6 = arith.constant 0 : index
    %4 = vector.load %arg6[%c0_5, %c0_6] : memref<32x1xf32, #tpu.memory_space<vmem>>, vector<32x1xf32>
    %cst_7 = arith.constant dense<0.000000e+00> : vector<32xf32>
    %5 = vector.multi_reduction <add>, %2, %cst_7 [1] : vector<32x2048xf32> to vector<32xf32>
    %6 = vector.shape_cast %5 : vector<32xf32> to vector<32x1xf32>
    %cst_8 = arith.constant 4.8828125E-4 : f32
    %7 = vector.broadcast %cst_8 : f32 to vector<32x1xf32>
    %8 = arith.mulf %6, %7 : vector<32x1xf32>
    %9 = arith.mulf %2, %2 : vector<32x2048xf32>
    %cst_9 = arith.constant dense<0.000000e+00> : vector<32xf32>
    %10 = vector.multi_reduction <add>, %9, %cst_9 [1] : vector<32x2048xf32> to vector<32xf32>
    %11 = vector.shape_cast %10 : vector<32xf32> to vector<32x1xf32>
    %cst_10 = arith.constant 4.8828125E-4 : f32
    %12 = vector.broadcast %cst_10 : f32 to vector<32x1xf32>
    %13 = arith.mulf %11, %12 : vector<32x1xf32>
    %14 = arith.mulf %8, %8 : vector<32x1xf32>
    %15 = arith.subf %13, %14 : vector<32x1xf32>
    %cst_11 = arith.constant 0.000000e+00 : f32
    %16 = vector.broadcast %cst_11 : f32 to vector<32x1xf32>
    %17 = arith.maximumf %15, %16 : vector<32x1xf32>
    %18 = vector.broadcast %8 : vector<32x1xf32> to vector<32x2048xf32>
    %19 = arith.subf %2, %18 : vector<32x2048xf32>
    %cst_12 = arith.constant 9.99999974E-6 : f32
    %20 = vector.broadcast %cst_12 : f32 to vector<32x1xf32>
    %21 = arith.addf %17, %20 : vector<32x1xf32>
    %22 = math.rsqrt %21 : vector<32x1xf32>
    %23 = vector.broadcast %22 : vector<32x1xf32> to vector<32x2048xf32>
    %24 = arith.mulf %19, %23 : vector<32x2048xf32>
    %25 = vector.broadcast %3 : vector<32x1xf32> to vector<32x2048xf32>
    %26 = arith.mulf %24, %25 : vector<32x2048xf32>
    %27 = vector.broadcast %4 : vector<32x1xf32> to vector<32x2048xf32>
    %28 = arith.addf %26, %27 : vector<32x2048xf32>
    %29 = arith.truncf %28 : vector<32x2048xf32> to vector<32x2048xbf16>
    %c0_13 = arith.constant 0 : index
    %c0_14 = arith.constant 0 : index
    %30 = vector.load %arg9[%c0_13, %c0_14] : memref<32x2048xbf16, #tpu.memory_space<vmem>>, vector<32x2048xbf16>
    tpu.vector_store %arg9[%c0_13, %c0_14], %29 {strides = array<i32>} : memref<32x2048xbf16, #tpu.memory_space<vmem>>, vector<32x2048xbf16>,
    %c0_15 = arith.constant 0 : index
    %c0_16 = arith.constant 0 : index
    %31 = vector.load %arg3[%c0_15, %c0_16] : memref<32x288xbf16, #tpu.memory_space<vmem>>, vector<32x288xbf16>
    %c0_17 = arith.constant 0 : index
    %c0_18 = arith.constant 0 : index
    %32 = vector.load %arg4[%c0_17, %c0_18] : memref<288x242xbf16, #tpu.memory_space<vmem>>, vector<288x242xbf16>
    %cst_19 = arith.constant dense<0.000000e+00> : vector<32x242xf32>
    %33 = tpu.matmul %31, %32, %cst_19 {dimension_numbers = #tpu.dot_dimension_numbers<[1], [0], [0], [1], [0, 0, 1, 1], [], []>} : vector<32x288xbf16>, vector<288x242xbf16>, vector<32x242xf32> -> vector<32x242xf32>
    %c0_20 = arith.constant 0 : index
    %c0_21 = arith.constant 0 : index
    %34 = vector.load %arg7[%c0_20, %c0_21] : memref<32x1xf32, #tpu.memory_space<vmem>>, vector<32x1xf32>
    %c0_22 = arith.constant 0 : index
    %c0_23 = arith.constant 0 : index
    %35 = vector.load %arg8[%c0_22, %c0_23] : memref<32x1xf32, #tpu.memory_space<vmem>>, vector<32x1xf32>
    %cst_24 = arith.constant dense<0.000000e+00> : vector<32xf32>
    %36 = vector.multi_reduction <add>, %33, %cst_24 [1] : vector<32x242xf32> to vector<32xf32>
    %37 = vector.shape_cast %36 : vector<32xf32> to vector<32x1xf32>
    %cst_25 = arith.constant 0.00413223123 : f32
    %38 = vector.broadcast %cst_25 : f32 to vector<32x1xf32>
    %39 = arith.mulf %37, %38 : vector<32x1xf32>
    %40 = arith.mulf %33, %33 : vector<32x242xf32>
    %cst_26 = arith.constant dense<0.000000e+00> : vector<32xf32>
    %41 = vector.multi_reduction <add>, %40, %cst_26 [1] : vector<32x242xf32> to vector<32xf32>
    %42 = vector.shape_cast %41 : vector<32xf32> to vector<32x1xf32>
    %cst_27 = arith.constant 0.00413223123 : f32
    %43 = vector.broadcast %cst_27 : f32 to vector<32x1xf32>
    %44 = arith.mulf %42, %43 : vector<32x1xf32>
    %45 = arith.mulf %39, %39 : vector<32x1xf32>
    %46 = arith.subf %44, %45 : vector<32x1xf32>
    %cst_28 = arith.constant 0.000000e+00 : f32
    %47 = vector.broadcast %cst_28 : f32 to vector<32x1xf32>
    %48 = arith.maximumf %46, %47 : vector<32x1xf32>
    %49 = vector.broadcast %39 : vector<32x1xf32> to vector<32x242xf32>
    %50 = arith.subf %33, %49 : vector<32x242xf32>
    %cst_29 = arith.constant 9.99999974E-6 : f32
    %51 = vector.broadcast %cst_29 : f32 to vector<32x1xf32>
    %52 = arith.addf %48, %51 : vector<32x1xf32>
    %53 = math.rsqrt %52 : vector<32x1xf32>
    %54 = vector.broadcast %53 : vector<32x1xf32> to vector<32x242xf32>
    %55 = arith.mulf %50, %54 : vector<32x242xf32>
    %56 = vector.broadcast %34 : vector<32x1xf32> to vector<32x242xf32>
    %57 = arith.mulf %55, %56 : vector<32x242xf32>
    %58 = vector.broadcast %35 : vector<32x1xf32> to vector<32x242xf32>
    %59 = arith.addf %57, %58 : vector<32x242xf32>
    %60 = arith.truncf %59 : vector<32x242xf32> to vector<32x242xbf16>
    %c0_30 = arith.constant 0 : index
    %c0_31 = arith.constant 0 : index
    %61 = vector.load %arg10[%c0_30, %c0_31] : memref<32x242xbf16, #tpu.memory_space<vmem>>, vector<32x242xbf16>
    tpu.vector_store %arg10[%c0_30, %c0_31], %60 {strides = array<i32>} : memref<32x242xbf16, #tpu.memory_space<vmem>>, vector<32x242xbf16>,
    return
  }
  func.func @transform_0(%arg0: i32) -> (i32, i32) {
    %c0_i32 = arith.constant 0 : i32
    %c0_i32_0 = arith.constant 0 : i32
    %c0_i32_1 = arith.constant 0 : i32
    return %c0_i32, %c0_i32_0 : i32, i32
  }
  func.func @transform_1(%arg0: i32) -> (i32, i32) {
    %c0_i32 = arith.constant 0 : i32
    %c0_i32_0 = arith.constant 0 : i32
    %c0_i32_1 = arith.constant 0 : i32
    return %c0_i32, %c0_i32_0 : i32, i32
  }
  func.func @transform_2(%arg0: i32) -> (i32, i32) {
    %c0_i32 = arith.constant 0 : i32
    %c0_i32_0 = arith.constant 0 : i32
    %c0_i32_1 = arith.constant 0 : i32
    return %c0_i32, %c0_i32_0 : i32, i32
  }
  func.func @transform_3(%arg0: i32) -> (i32, i32) {
    %c0_i32 = arith.constant 0 : i32
    %c0_i32_0 = arith.constant 0 : i32
    %c0_i32_1 = arith.constant 0 : i32
    return %c0_i32, %c0_i32_0 : i32, i32
  }
  func.func @transform_4(%arg0: i32) -> (i32, i32) {
    %c0_i32 = arith.constant 0 : i32
    %c0_i32_0 = arith.constant 0 : i32
    %c0_i32_1 = arith.constant 0 : i32
    return %c0_i32, %c0_i32_0 : i32, i32
  }
  func.func @transform_5(%arg0: i32) -> (i32, i32) {
    %c0_i32 = arith.constant 0 : i32
    %c0_i32_0 = arith.constant 0 : i32
    %c0_i32_1 = arith.constant 0 : i32
    return %c0_i32, %c0_i32_0 : i32, i32
  }
  func.func @transform_6(%arg0: i32) -> (i32, i32) {
    %c0_i32 = arith.constant 0 : i32
    %c0_i32_0 = arith.constant 0 : i32
    %c0_i32_1 = arith.constant 0 : i32
    return %c0_i32, %c0_i32_0 : i32, i32
  }
  func.func @transform_7(%arg0: i32) -> (i32, i32) {
    %c0_i32 = arith.constant 0 : i32
    %c0_i32_0 = arith.constant 0 : i32
    %c0_i32_1 = arith.constant 0 : i32
    return %c0_i32, %c0_i32_0 : i32, i32
  }
  func.func @transform_8(%arg0: i32) -> (i32, i32) {
    %c0_i32 = arith.constant 0 : i32
    %c0_i32_0 = arith.constant 0 : i32
    %c0_i32_1 = arith.constant 0 : i32
    return %c0_i32, %c0_i32_0 : i32, i32
  }
  func.func @transform_9(%arg0: i32) -> (i32, i32) {
    %c0_i32 = arith.constant 0 : i32
    %c0_i32_0 = arith.constant 0 : i32
    %c0_i32_1 = arith.constant 0 : i32
    return %c0_i32, %c0_i32_0 : i32, i32
  }
}

module attributes {stable_mosaic.version = 11 : i64} {
  func.func @_linear_kernel(%arg0: i32, %arg1: memref<2x4096xbf16, #tpu.memory_space<vmem>>, %arg2: memref<4096x10xbf16, #tpu.memory_space<vmem>>, %arg3: memref<1x10xf32, #tpu.memory_space<vmem>>, %arg4: memref<2x10xf32, #tpu.memory_space<vmem>>) attributes {dimension_semantics = [#tpu.dimension_semantics<arbitrary>], iteration_bounds = array<i64: 8>, scalar_prefetch = 0 : i64, scratch_operands = 0 : i64, tpu.core_type = #tpu.core_type<tc>, window_params = [{transform_indices = @transform_0, window_bounds = array<i64: 2, 4096>}, {transform_indices = @transform_1, window_bounds = array<i64: 4096, 10>}, {pipeline_mode = #tpu.pipeline_mode<synchronous>, transform_indices = @transform_2, window_bounds = array<i64: 1, 10>}, {pipeline_mode = #tpu.pipeline_mode<synchronous>, transform_indices = @transform_3, window_bounds = array<i64: 2, 10>}]} {
    %c0_i32 = arith.constant 0 : i32
    %0 = arith.cmpi eq, %arg0, %c0_i32 : i32
    %1 = arith.extui %0 : i1 to i32
    %c0_i32_0 = arith.constant 0 : i32
    %2 = arith.cmpi ne, %1, %c0_i32_0 : i32
    scf.if %2 {
      %c0_8 = arith.constant 0 : index
      %c0_9 = arith.constant 0 : index
      %9 = vector.load %arg3[%c0_8, %c0_9] : memref<1x10xf32, #tpu.memory_space<vmem>>, vector<1x10xf32>
      %10 = vector.shape_cast %9 : vector<1x10xf32> to vector<1x10xf32>
      %11 = vector.broadcast %10 : vector<1x10xf32> to vector<2x10xf32>
      %c0_10 = arith.constant 0 : index
      %c0_11 = arith.constant 0 : index
      %12 = vector.load %arg4[%c0_10, %c0_11] : memref<2x10xf32, #tpu.memory_space<vmem>>, vector<2x10xf32>
      tpu.vector_store %arg4[%c0_10, %c0_11], %11 {strides = array<i32>} : memref<2x10xf32, #tpu.memory_space<vmem>>, vector<2x10xf32>,
    } else {
    }
    %c0 = arith.constant 0 : index
    %c0_1 = arith.constant 0 : index
    %3 = vector.load %arg4[%c0, %c0_1] : memref<2x10xf32, #tpu.memory_space<vmem>>, vector<2x10xf32>
    %c0_2 = arith.constant 0 : index
    %c0_3 = arith.constant 0 : index
    %4 = vector.load %arg1[%c0_2, %c0_3] : memref<2x4096xbf16, #tpu.memory_space<vmem>>, vector<2x4096xbf16>
    %c0_4 = arith.constant 0 : index
    %c0_5 = arith.constant 0 : index
    %5 = vector.load %arg2[%c0_4, %c0_5] : memref<4096x10xbf16, #tpu.memory_space<vmem>>, vector<4096x10xbf16>
    %cst = arith.constant dense<0.000000e+00> : vector<2x10xf32>
    %6 = tpu.matmul %4, %5, %cst {dimension_numbers = #tpu.dot_dimension_numbers<[1], [0], [0], [1], [0, 0, 1, 1], [], []>} : vector<2x4096xbf16>, vector<4096x10xbf16>, vector<2x10xf32> -> vector<2x10xf32>
    %7 = arith.addf %3, %6 : vector<2x10xf32>
    %c0_6 = arith.constant 0 : index
    %c0_7 = arith.constant 0 : index
    %8 = vector.load %arg4[%c0_6, %c0_7] : memref<2x10xf32, #tpu.memory_space<vmem>>, vector<2x10xf32>
    tpu.vector_store %arg4[%c0_6, %c0_7], %7 {strides = array<i32>} : memref<2x10xf32, #tpu.memory_space<vmem>>, vector<2x10xf32>,
    return
  }
  func.func @transform_0(%arg0: i32) -> (i32, i32) {
    %c0_i32 = arith.constant 0 : i32
    %c0_i32_0 = arith.constant 0 : i32
    return %c0_i32, %arg0 : i32, i32
  }
  func.func @transform_1(%arg0: i32) -> (i32, i32) {
    %c0_i32 = arith.constant 0 : i32
    %c0_i32_0 = arith.constant 0 : i32
    return %arg0, %c0_i32 : i32, i32
  }
  func.func @transform_2(%arg0: i32) -> (i32, i32) {
    %c0_i32 = arith.constant 0 : i32
    %c0_i32_0 = arith.constant 0 : i32
    %c0_i32_1 = arith.constant 0 : i32
    return %c0_i32, %c0_i32_0 : i32, i32
  }
  func.func @transform_3(%arg0: i32) -> (i32, i32) {
    %c0_i32 = arith.constant 0 : i32
    %c0_i32_0 = arith.constant 0 : i32
    %c0_i32_1 = arith.constant 0 : i32
    return %c0_i32, %c0_i32_0 : i32, i32
  }
}

</mosaic_0001>

<bundles_post_ra>
// kernel: resnet18_forward.6
= control target key start
LH: loop header
LB: loop body
LE: loop exit
PB: predicated region body
PF: predicated region fallthrough
CT: control target
= control target key end

     0   :  { %9 = vsyncpa [#allocation3], 0  ;;  %s1027_s15 = smov [#allocation2]   ;;  %s1529_s0 = inlined_call_operand.hbm [shape: bf16[16,9], index: 0, kind: input, shape index: {}]   ;;  %s1530_s1 = inlined_call_operand.vmem [shape: bf16[9,2048], index: 1, kind: input, shape index: {}]   ;;  %s1531_s2 = inlined_call_operand.vmem [shape: f32[16,1], index: 2, kind: input, shape index: {}]   ;;  %s1532_s3 = inlined_call_operand.vmem [shape: f32[16,1], index: 3, kind: input, shape index: {}]   ;;  %s1533_s4 = inlined_call_operand.vmem [shape: bf16[16,2048], index: 4, kind: output, shape index: {}]  }
   0x1   :  { %s15_s16 = sshll.u32 %s1027_s15, 4  ;;  %s1003_s19 = scalar_lea.hbm %s1529_s0, 128  ;;  %s16_s16 = int_to_ptr.vmem [resolvable:$true] %s15_s16 }
   0x2   :  { %p1004_p0 = scmp.ne.s32.totalorder %s1529_s0, %s1003_s19  ;;  %p1007_p1 = scmp.lt.u32.totalorder %s1003_s19, %s1529_s0 }
   0x4   :  { %p1009_p2 = pnand %p1007_p1, %p1004_p0 }
   0x6   :  { %1012 = shalt.err (!%p1009_p2)
}
   0x7   :  { %s1013_s24 = scalar_lea.vmem %s16_s16, 128  ;;  %p1018_p4 = scmp.lt.s32.totalorder %s16_s16, %s16_s16 }
   0x8   :  { %p1014_p3 = scmp.ne.s32.totalorder %s16_s16, %s1013_s24  ;;  %p1019_p5 = scmp.lt.s32.totalorder %s1013_s24, %s1013_s24 }
   0xa   :  { %p1020_p6 = por %p1019_p5, %p1018_p4 }
   0xc   :  { %p1021_p7 = pnand %p1020_p6, %p1014_p3 }
   0xe   :  { %1024 = shalt.err (!%p1021_p7)
}
   0xf   :  { %s1028_s25 = smov 64   ;;  %s1029_s26 = smov 4  }
  0x10   :  { %21 = dma.hbm_to_vmem [thread:$0]  %s1529_s0, 128, %s16_s16, [#allocation3], %s1028_s25, %s1028_s25, %s1029_s26  }
  0x11   :  { %1025 = dma.done.wait [#allocation3], 128  }
  0x12   :  { %1026 = vsyncadd [#allocation3], 4294967168  ;;  %vm123_vm0 = vcmask 1043456   ;;  %v1030_v0 = vmov 0   ;;  %vm124_vm1 = vcmask 1044480   ;;  %v1031_v1 = vmov 65535  }
  0x13   :  { %207 = vmatprep.mubr.bf16.mxu0 %v1030_v0  ;;  %250 = vmatprep.mubr.bf16.mxu1 %v1030_v0  ;;  %v125_v2 = vsel %vm123_vm0, 4294967295, %v1031_v1  ;;  %v34_v3 = vld [vmem:[%s1530_s1] sm:$0xff]  ;;  %v35_v6 = vld [vmem:[%s1530_s1 + $0x8] sm:$0xff]  ;;  %v36_v12 = vld [vmem:[%s1530_s1 + $0x10] sm:$0xff]  ;;  %vm119_vm2 = vcmask 72704  }
  0x14   :  { %997 = vset.pattern.permute.xlu1 %v1030_v0  ;;  %996 = vset.pattern.permute.xlu0 %v1030_v0  ;;  %v42_v4 = vld [vmem:[%s1530_s1 + $0x40] sm:$0x11]  ;;  %v1079_v5 = vsel %vm124_vm1, %v125_v2, 0  ;;  %v43_v9 = vld [vmem:[%s1530_s1 + $0x48] sm:$0x11]  ;;  %v37_v18 = vld [vmem:[%s1530_s1 + $0x18] sm:$0xff] }
  0x15   :  { %v936_v7 = vcombine.high %v34_v3, %v42_v4  ;;  %v935_v8 = vcombine.low %v34_v3, %v42_v4  ;;  %v938_v10 = vcombine.high %v35_v6, %v43_v9  ;;  %v937_v11 = vcombine.low %v35_v6, %v43_v9  ;;  %v44_v13 = vld [vmem:[%s1530_s1 + $0x50] sm:$0x11]  ;;  %v45_v19 = vld [vmem:[%s1530_s1 + $0x58] sm:$0x11]  ;;  %v38_v20 = vld [vmem:[%s1530_s1 + $0x20] sm:$0xff] }
  0x16   :  { %v939_v16 = vcombine.low %v36_v12, %v44_v13  ;;  %v940_v17 = vcombine.high %v36_v12, %v44_v13  ;;  %v941_v23 = vcombine.low %v37_v18, %v45_v19  ;;  %v942_v24 = vcombine.high %v37_v18, %v45_v19  ;;  %v46_v25 = vld [vmem:[%s1530_s1 + $0x60] sm:$0x11]  ;;  %v39_v26 = vld [vmem:[%s1530_s1 + $0x28] sm:$0xff]  ;;  %v40_v38 = vld [vmem:[%s1530_s1 + $0x30] sm:$0xff] }
  0x17   :  { %v131_v14 = vand.u32 %v936_v7, %v1079_v5  ;;  %v128_v15 = vand.u32 %v935_v8, %v1079_v5  ;;  %v137_v21 = vand.u32 %v938_v10, %v1079_v5  ;;  %v134_v22 = vand.u32 %v937_v11, %v1079_v5  ;;  %v47_v27 = vld [vmem:[%s1530_s1 + $0x68] sm:$0x11]  ;;  %v998_v28 = vld [vmem:[#allocation2] sm:$0xff]   ;;  %v48_v39 = vld [vmem:[%s1530_s1 + $0x70] sm:$0x11] }
  0x18   :  { %v143_v29 = vand.u32 %v940_v17, %v1079_v5  ;;  %v944_v30 = vcombine.high %v38_v20, %v46_v25  ;;  %v140_v31 = vand.u32 %v939_v16, %v1079_v5  ;;  %v149_v32 = vand.u32 %v942_v24, %v1079_v5  ;;  %v520_v33 = vld [vmem:[%s1531_s2 + $0x8] sm:$0xff]  ;;  %v41_v41 = vld [vmem:[%s1530_s1 + $0x38] sm:$0xff]  ;;  %v521_v43 = vld [vmem:[%s1532_s3] sm:$0xff] }
  0x19   :  { %175 = vmatprep.subr.bf16.mxu0 %v131_v14  ;;  %218 = vmatprep.subr.bf16.mxu1 %v137_v21  ;;  %v146_v34 = vand.u32 %v941_v23, %v1079_v5  ;;  %v946_v35 = vcombine.high %v39_v26, %v47_v27  ;;  %v943_v40 = vcombine.low %v38_v20, %v46_v25  ;;  %v49_v42 = vld [vmem:[%s1530_s1 + $0x78] sm:$0x11] }
  0x1a   :  { %176 = vmatpush1.bf16.msra.mxu0 %v128_v15  ;;  %219 = vmatpush1.bf16.msra.mxu1 %v134_v22  ;;  %v155_v36 = vand.u32 %v944_v30, %v1079_v5  ;;  %v945_v44 = vcombine.low %v39_v26, %v47_v27  ;;  %v948_v45 = vcombine.high %v40_v38, %v48_v39 }
  0x1b   :  { %261 = vmatprep.subr.bf16.mxu0 %v143_v29  ;;  %304 = vmatprep.subr.bf16.mxu1 %v149_v32  ;;  %v161_v37 = vand.u32 %v946_v35, %v1079_v5  ;;  %v950_v46 = vcombine.high %v41_v41, %v49_v42  ;;  %v152_v47 = vand.u32 %v943_v40, %v1079_v5 }
  0x1c   :  { %708 = vperm.xlu1 %997, %v520_v33   ;;  %v158_v48 = vand.u32 %v945_v44, %v1079_v5  ;;  %v167_v49 = vand.u32 %v948_v45, %v1079_v5  ;;  %v947_v51 = vcombine.low %v40_v38, %v48_v39  ;;  %v949_v52 = vcombine.low %v41_v41, %v49_v42 }
  0x1d   :  { %951 = vmatmul.mubr.msk.bf16.vlgmr.msra.gmra.mrb[0].mxu0 %vm119_vm2, %v998_v28  ;;  %952 = vmatmul.mubr.msk.bf16.vlgmr.msra.gmra.mrb[0].mxu1 %vm119_vm2, %v998_v28  ;;  %v173_v50 = vand.u32 %v950_v46, %v1079_v5 }
  0x1e   :  { %262 = vmatpush1.bf16.msra.mxu0 %v140_v31  ;;  %305 = vmatpush1.bf16.msra.mxu1 %v146_v34  ;;  %v164_v53 = vand.u32 %v947_v51, %v1079_v5  ;;  %v170_v54 = vand.u32 %v949_v52, %v1079_v5 }
  0x1f   :  { %293 = vmatprep.mubr.bf16.mxu0 %v1030_v0  ;;  %347 = vmatprep.subr.bf16.mxu0 %v155_v36 }
  0x20   :  { %336 = vmatprep.mubr.bf16.mxu1 %v1030_v0  ;;  %390 = vmatprep.subr.bf16.mxu1 %v161_v37 }
  0x21   :  { %745 = vperm.xlu1 %997, %v521_v43  }
  0x25   :  { %953 = vmatmul.mubr.msk.bf16.vlgmr.msra.gmra.mrb[4].mxu0 %vm119_vm2, %v998_v28  ;;  %954 = vmatmul.mubr.msk.bf16.vlgmr.msra.gmra.mrb[4].mxu1 %vm119_vm2, %v998_v28 }
  0x26   :  { %348 = vmatpush1.bf16.msra.mxu0 %v152_v47  ;;  %391 = vmatpush1.bf16.msra.mxu1 %v158_v48 }
  0x27   :  { %379 = vmatprep.mubr.bf16.mxu0 %v1030_v0  ;;  %433 = vmatprep.subr.bf16.mxu0 %v167_v49 }
  0x28   :  { %422 = vmatprep.mubr.bf16.mxu1 %v1030_v0  ;;  %476 = vmatprep.subr.bf16.mxu1 %v173_v50 }
  0x2d   :  { %955 = vmatmul.mubr.msk.bf16.vlgmr.msra.gmra.mrb[8].mxu0 %vm119_vm2, %v998_v28  ;;  %956 = vmatmul.mubr.msk.bf16.vlgmr.msra.gmra.mrb[8].mxu1 %vm119_vm2, %v998_v28 }
  0x2e   :  { %434 = vmatpush1.bf16.msra.mxu0 %v164_v53  ;;  %477 = vmatpush1.bf16.msra.mxu1 %v170_v54 }
  0x2f   :  { %465 = vmatprep.mubr.bf16.mxu0 %v1030_v0  ;;  %508 = vmatprep.mubr.bf16.mxu1 %v1030_v0 }
  0x35   :  { %957 = vmatmul.mubr.msk.bf16.vlgmr.msra.gmra.mrb[12].mxu0 %vm119_vm2, %v998_v28  ;;  %958 = vmatmul.mubr.msk.bf16.vlgmr.msra.gmra.mrb[12].mxu1 %vm119_vm2, %v998_v28 }
  0xf0   :  { %v1159_v55 = vpop.f32.mrb[0].mxu0  ;;  %v1165_v58 = vpop.f32.mrb[0].mxu1 }
  0xf1   :  { %v559_v56 = vmul.f32 %v1159_v55, %v1159_v55  ;;  %v1163_v57 = vpop.f32.mrb[1].mxu0  ;;  %v561_v62 = vmul.f32 %v1165_v58, %v1165_v58  ;;  %v1175_v63 = vpop.f32.mrb[1].mxu1 }
  0xf2   :  { %v523_v59 = vadd.f32 %v1163_v57, %v1159_v55  ;;  %v560_v60 = vmul.f32 %v1163_v57, %v1163_v57  ;;  %v1171_v61 = vpop.f32.mrb[2].mxu0  ;;  %v562_v2 = vmul.f32 %v1175_v63, %v1175_v63  ;;  %v1183_v3 = vpop.f32.mrb[2].mxu1 }
  0xf3   :  { %v575_v0 = vmul.f32 %v1171_v61, %v1171_v61  ;;  %v1179_v1 = vpop.f32.mrb[3].mxu0  ;;  %v1190_v8 = vpop.f32.mrb[3].mxu1  ;;  %v577_v9 = vmul.f32 %v1183_v3, %v1183_v3 }
  0xf4   :  { %v591_v4 = vadd.f32 %v560_v60, %v559_v56  ;;  %v524_v5 = vadd.f32 %v523_v59, %v1165_v58  ;;  %v540_v6 = vadd.f32 %v1179_v1, %v1171_v61  ;;  %v576_v7 = vmul.f32 %v1179_v1, %v1179_v1 }
  0xf5   :  { %v578_v17 = vmul.f32 %v1190_v8, %v1190_v8 }
  0xf6   :  { %v592_v10 = vadd.f32 %v591_v4, %v561_v62  ;;  %v608_v11 = vadd.f32 %v576_v7, %v575_v0  ;;  %v525_v12 = vadd.f32 %v524_v5, %v1175_v63  ;;  %v541_v13 = vadd.f32 %v540_v6, %v1183_v3 }
  0xf8   :  { %v593_v14 = vadd.f32 %v592_v10, %v562_v2  ;;  %v609_v15 = vadd.f32 %v608_v11, %v577_v9  ;;  %v542_v16 = vadd.f32 %v541_v13, %v1190_v8  ;;  %v1199_v18 = vpop.f32.mrb[4].mxu0  ;;  %v1206_v22 = vpop.f32.mrb[4].mxu1 }
  0xf9   :  { %v526_v19 = vadd.f32 %v525_v12, %v1199_v18  ;;  %v563_v20 = vmul.f32 %v1199_v18, %v1199_v18  ;;  %v1204_v21 = vpop.f32.mrb[5].mxu0  ;;  %v565_v26 = vmul.f32 %v1206_v22, %v1206_v22  ;;  %v1214_v27 = vpop.f32.mrb[5].mxu1 }
  0xfa   :  { %v610_v23 = vadd.f32 %v609_v15, %v578_v17  ;;  %v564_v24 = vmul.f32 %v1204_v21, %v1204_v21  ;;  %v1210_v25 = vpop.f32.mrb[6].mxu0  ;;  %v1222_v33 = vpop.f32.mrb[6].mxu1  ;;  %v566_v40 = vmul.f32 %v1214_v27, %v1214_v27 }
  0xfb   :  { %v594_v28 = vadd.f32 %v593_v14, %v563_v20  ;;  %v527_v29 = vadd.f32 %v526_v19, %v1204_v21  ;;  %v543_v30 = vadd.f32 %v542_v16, %v1210_v25  ;;  %v579_v31 = vmul.f32 %v1210_v25, %v1210_v25  ;;  %v1220_v32 = vpop.f32.mrb[7].mxu0  ;;  %v1226_v35 = vpop.f32.mrb[7].mxu1 }
  0xfc   :  { %v580_v34 = vmul.f32 %v1220_v32, %v1220_v32  ;;  %v581_v41 = vmul.f32 %v1222_v33, %v1222_v33  ;;  %v582_v46 = vmul.f32 %v1226_v35, %v1226_v35 }
  0xfd   :  { %v595_v36 = vadd.f32 %v594_v28, %v564_v24  ;;  %v611_v37 = vadd.f32 %v610_v23, %v579_v31  ;;  %v528_v38 = vadd.f32 %v527_v29, %v1206_v22  ;;  %v544_v39 = vadd.f32 %v543_v30, %v1220_v32 }
  0xff   :  { %v596_v42 = vadd.f32 %v595_v36, %v565_v26  ;;  %v612_v43 = vadd.f32 %v611_v37, %v580_v34  ;;  %v529_v44 = vadd.f32 %v528_v38, %v1214_v27  ;;  %v545_v45 = vadd.f32 %v544_v39, %v1222_v33 }
 0x100   :  { %v1238_v47 = vpop.f32.mrb[8].mxu0  ;;  %v1244_v53 = vpop.f32.mrb[8].mxu1 }
 0x101   :  { %v597_v48 = vadd.f32 %v596_v42, %v566_v40  ;;  %v613_v49 = vadd.f32 %v612_v43, %v581_v41  ;;  %v546_v50 = vadd.f32 %v545_v45, %v1226_v35  ;;  %v530_v51 = vadd.f32 %v529_v44, %v1238_v47  ;;  %v1242_v52 = vpop.f32.mrb[9].mxu0  ;;  %v1252_v60 = vpop.f32.mrb[9].mxu1 }
 0x102   :  { %v567_v54 = vmul.f32 %v1238_v47, %v1238_v47  ;;  %v568_v56 = vmul.f32 %v1242_v52, %v1242_v52  ;;  %v1250_v59 = vpop.f32.mrb[10].mxu0  ;;  %v1260_v6 = vpop.f32.mrb[10].mxu1  ;;  %v569_v9 = vmul.f32 %v1244_v53, %v1244_v53  ;;  %v570_v24 = vmul.f32 %v1252_v60, %v1252_v60 }
 0x103   :  { %v614_v62 = vadd.f32 %v613_v49, %v582_v46  ;;  %v531_v0 = vadd.f32 %v530_v51, %v1242_v52  ;;  %v547_v2 = vadd.f32 %v546_v50, %v1250_v59  ;;  %v583_v4 = vmul.f32 %v1250_v59, %v1250_v59  ;;  %v1258_v5 = vpop.f32.mrb[11].mxu0  ;;  %v1266_v11 = vpop.f32.mrb[11].mxu1 }
 0x104   :  { %v598_v7 = vadd.f32 %v597_v48, %v567_v54  ;;  %v584_v10 = vmul.f32 %v1258_v5, %v1258_v5  ;;  %v585_v20 = vmul.f32 %v1260_v6, %v1260_v6  ;;  %v586_v26 = vmul.f32 %v1266_v11, %v1266_v11 }
 0x105   :  { %v615_v12 = vadd.f32 %v614_v62, %v583_v4  ;;  %v532_v13 = vadd.f32 %v531_v0, %v1244_v53  ;;  %v548_v14 = vadd.f32 %v547_v2, %v1258_v5 }
 0x106   :  { %v599_v15 = vadd.f32 %v598_v7, %v568_v56 }
 0x107   :  { %v616_v16 = vadd.f32 %v615_v12, %v584_v10  ;;  %v533_v17 = vadd.f32 %v532_v13, %v1252_v60  ;;  %v549_v19 = vadd.f32 %v548_v14, %v1260_v6 }
 0x108   :  { %v600_v23 = vadd.f32 %v599_v15, %v569_v9  ;;  %v1278_v28 = vpop.f32.mrb[12].mxu0  ;;  %v1286_v37 = vpop.f32.mrb[12].mxu1 }
 0x109   :  { %v617_v29 = vadd.f32 %v616_v16, %v585_v20  ;;  %v550_v30 = vadd.f32 %v549_v19, %v1266_v11  ;;  %v534_v31 = vadd.f32 %v533_v17, %v1278_v28  ;;  %v571_v34 = vmul.f32 %v1278_v28, %v1278_v28  ;;  %v1284_v36 = vpop.f32.mrb[13].mxu0  ;;  %v1292_v41 = vpop.f32.mrb[13].mxu1  ;;  %v522_v20 = vld [vmem:[%s1532_s3 + $0x8] sm:$0xff] }
 0x10a   :  { %v601_v38 = vadd.f32 %v600_v23, %v570_v24  ;;  %v572_v39 = vmul.f32 %v1284_v36, %v1284_v36  ;;  %v1290_v40 = vpop.f32.mrb[14].mxu0  ;;  %v1300_v48 = vpop.f32.mrb[14].mxu1  ;;  %v573_v50 = vmul.f32 %v1286_v37, %v1286_v37  ;;  %v574_v12 = vmul.f32 %v1292_v41, %v1292_v41  ;;  %v519_v23 = vld [vmem:[%s1531_s2] sm:$0xff] }
 0x10b   :  { %v618_v42 = vadd.f32 %v617_v29, %v586_v26  ;;  %v535_v43 = vadd.f32 %v534_v31, %v1284_v36  ;;  %v551_v44 = vadd.f32 %v550_v30, %v1290_v40  ;;  %v587_v45 = vmul.f32 %v1290_v40, %v1290_v40  ;;  %v1298_v46 = vpop.f32.mrb[15].mxu0  ;;  %v1306_v54 = vpop.f32.mrb[15].mxu1 }
 0x10c   :  { %v602_v49 = vadd.f32 %v601_v38, %v571_v34  ;;  %v588_v51 = vmul.f32 %v1298_v46, %v1298_v46  ;;  %v589_v7 = vmul.f32 %v1300_v48, %v1300_v48  ;;  %v590_v14 = vmul.f32 %v1306_v54, %v1306_v54  ;;  %v1325_v24 = vpop.permute.xlu1 %708 }
 0x10d   :  { %v619_v56 = vadd.f32 %v618_v42, %v587_v45  ;;  %v552_v62 = vadd.f32 %v551_v44, %v1298_v46  ;;  %v536_v0 = vadd.f32 %v535_v43, %v1286_v37 }
 0x10e   :  { %v603_v2 = vadd.f32 %v602_v49, %v572_v39 }
 0x10f   :  { %v620_v4 = vadd.f32 %v619_v56, %v588_v51  ;;  %v537_v9 = vadd.f32 %v536_v0, %v1292_v41  ;;  %v553_v10 = vadd.f32 %v552_v62, %v1300_v48 }
 0x110   :  { %v604_v13 = vadd.f32 %v603_v2, %v573_v50  ;;  %v1327_v26 = vpop.permute.xlu1 %745 }
 0x111   :  { %538 = vadd.xlane.f32.xlu0 %v537_v9  ;;  %v554_v15 = vadd.f32 %v553_v10, %v1306_v54  ;;  %v621_v16 = vadd.f32 %v620_v4, %v589_v7 }
 0x112   :  { %v605_v17 = vadd.f32 %v604_v13, %v574_v12 }
 0x113   :  { %v622_v19 = vadd.f32 %v621_v16, %v590_v14 }
 0x114   :  { %606 = vadd.xlane.f32.xlu1 %v605_v17 }
 0x115   :  { %555 = vadd.xlane.f32.xlu0 %v554_v15 }
 0x118   :  { %623 = vadd.xlane.f32.xlu1 %v622_v19 }
 0x129   :  { %750 = vperm.xlu1 %997, %v522_v20  }
 0x12b   :  { %703 = vperm.xlu0 %996, %v519_v23  }
 0x19e   :  { %v539_v29 = vpop.xlane.xlu0 %538 }
 0x19f   :  { %v1329_v30 = vmul.f32 0.00048828125, %v539_v29 }
 0x1a1   :  { %v607_v31 = vpop.xlane.xlu1 %606  ;;  %v627_v34 = vmul.f32 %v1329_v30, %v1329_v30  ;;  %v633_v2 = vsub.f32 %v1159_v55, %v1329_v30  ;;  %v634_v4 = vsub.f32 %v1163_v57, %v1329_v30  ;;  %v635_v7 = vsub.f32 %v1165_v58, %v1329_v30 }
 0x1a2   :  { %v625_v38 = vmul.f32 0.00048828125, %v607_v31  ;;  %v556_v39 = vpop.xlane.xlu0 %555  ;;  %v636_v9 = vsub.f32 %v1175_v63, %v1329_v30  ;;  %v637_v10 = vsub.f32 %v1199_v18, %v1329_v30  ;;  %v638_v12 = vsub.f32 %v1204_v21, %v1329_v30 }
 0x1a3   :  { %v1333_v42 = vmul.f32 0.00048828125, %v556_v39  ;;  %v639_v13 = vsub.f32 %v1206_v22, %v1329_v30  ;;  %v640_v55 = vsub.f32 %v1214_v27, %v1329_v30  ;;  %v641_v57 = vsub.f32 %v1238_v47, %v1329_v30 }
 0x1a4   :  { %v629_v43 = vsub.f32 %v625_v38, %v627_v34  ;;  %v642_v58 = vsub.f32 %v1242_v52, %v1329_v30  ;;  %v643_v63 = vsub.f32 %v1244_v53, %v1329_v30  ;;  %v644_v18 = vsub.f32 %v1252_v60, %v1329_v30 }
 0x1a5   :  { %v624_v44 = vpop.xlane.xlu1 %623  ;;  %v628_v45 = vmul.f32 %v1333_v42, %v1333_v42  ;;  %v649_v21 = vsub.f32 %v1171_v61, %v1333_v42  ;;  %v650_v22 = vsub.f32 %v1179_v1, %v1333_v42  ;;  %v651_v27 = vsub.f32 %v1183_v3, %v1333_v42 }
 0x1a6   :  { %v631_v49 = vmax.f32 %v629_v43, 0.0  ;;  %v626_v50 = vmul.f32 0.00048828125, %v624_v44  ;;  %v652_v47 = vsub.f32 %v1190_v8, %v1333_v42  ;;  %v653_v52 = vsub.f32 %v1210_v25, %v1333_v42 }
 0x1a7   :  { %v654_v53 = vsub.f32 %v1220_v32, %v1333_v42  ;;  %v655_v60 = vsub.f32 %v1222_v33, %v1333_v42  ;;  %v656_v61 = vsub.f32 %v1226_v35, %v1333_v42  ;;  %v657_v1 = vsub.f32 %v1250_v59, %v1333_v42 }
 0x1a8   :  { %v665_v51 = vadd.f32 1e-05, %v631_v49  ;;  %v630_v56 = vsub.f32 %v626_v50, %v628_v45  ;;  %v658_v3 = vsub.f32 %v1258_v5, %v1333_v42  ;;  %v659_v8 = vsub.f32 %v1260_v6, %v1333_v42 }
 0x1a9   :  { %v660_v25 = vsub.f32 %v1266_v11, %v1333_v42  ;;  %v661_v32 = vsub.f32 %v1290_v40, %v1333_v42  ;;  %v662_v33 = vsub.f32 %v1298_v46, %v1333_v42  ;;  %v663_v35 = vsub.f32 %v1300_v48, %v1333_v42 }
 0x1aa   :  { %999 = vrsqrt.f32 %v665_v51  ;;  %v632_v62 = vmax.f32 %v630_v56, 0.0  ;;  %v664_v59 = vsub.f32 %v1306_v54, %v1333_v42  ;;  %v645_v5 = vsub.f32 %v1278_v28, %v1329_v30 }
 0x1ab   :  { %v646_v6 = vsub.f32 %v1284_v36, %v1329_v30  ;;  %v647_v11 = vsub.f32 %v1286_v37, %v1329_v30  ;;  %v648_v40 = vsub.f32 %v1292_v41, %v1329_v30 }
 0x1ac   :  { %v666_v0 = vadd.f32 1e-05, %v632_v62 }
 0x1ae   :  { %1001 = vrsqrt.f32 %v666_v0 }
 0x1b4   :  { %v1000_v14 = vpop.eup %999 }
 0x1b5   :  { %v1401_v46 = vmul.f32 %v1000_v14, %v633_v2  ;;  %v1403_v15 = vmul.f32 %v1000_v14, %v634_v4  ;;  %v1405_v48 = vmul.f32 %v1000_v14, %v635_v7  ;;  %v1407_v54 = vmul.f32 %v1000_v14, %v636_v9 }
 0x1b6   :  { %v1409_v16 = vmul.f32 %v1000_v14, %v637_v10  ;;  %v1411_v28 = vmul.f32 %v1000_v14, %v638_v12  ;;  %v1413_v17 = vmul.f32 %v1000_v14, %v639_v13  ;;  %v1415_v36 = vmul.f32 %v1000_v14, %v640_v55 }
 0x1b7   :  { %v1417_v37 = vmul.f32 %v1000_v14, %v641_v57  ;;  %v1419_v19 = vmul.f32 %v1000_v14, %v642_v58  ;;  %v1421_v41 = vmul.f32 %v1000_v14, %v643_v63  ;;  %v1423_v20 = vmul.f32 %v1000_v14, %v644_v18 }
 0x1b8   :  { %v1002_v23 = vpop.eup %1001  ;;  %v1425_v29 = vmul.f32 %v1000_v14, %v645_v5  ;;  %v1427_v30 = vmul.f32 %v1000_v14, %v646_v6  ;;  %v1429_v31 = vmul.f32 %v1000_v14, %v647_v11  ;;  %v1431_v34 = vmul.f32 %v1000_v14, %v648_v40 }
 0x1b9   :  { %v685_v38 = vmul.f32 %v1002_v23, %v649_v21  ;;  %v686_v39 = vmul.f32 %v1002_v23, %v650_v22  ;;  %v687_v42 = vmul.f32 %v1002_v23, %v651_v27  ;;  %v688_v43 = vmul.f32 %v1002_v23, %v652_v47 }
 0x1ba   :  { %v689_v44 = vmul.f32 %v1002_v23, %v653_v52  ;;  %v690_v45 = vmul.f32 %v1002_v23, %v654_v53  ;;  %v691_v49 = vmul.f32 %v1002_v23, %v655_v60  ;;  %v692_v50 = vmul.f32 %v1002_v23, %v656_v61  ;;  %v751_v52 = vpop.permute.xlu1 %750 }
 0x1bb   :  { %v693_v51 = vmul.f32 %v1002_v23, %v657_v1  ;;  %v694_v56 = vmul.f32 %v1002_v23, %v658_v3  ;;  %v695_v62 = vmul.f32 %v1002_v23, %v659_v8  ;;  %v696_v0 = vmul.f32 %v1002_v23, %v660_v25 }
 0x1bc   :  { %v697_v2 = vmul.f32 %v1002_v23, %v661_v32  ;;  %v698_v4 = vmul.f32 %v1002_v23, %v662_v33  ;;  %v699_v7 = vmul.f32 %v1002_v23, %v663_v35  ;;  %v700_v9 = vmul.f32 %v1002_v23, %v664_v59 }
 0x1bd   :  { %v727_v10 = vmul.f32 %v1325_v24, %v685_v38  ;;  %v728_v12 = vmul.f32 %v1325_v24, %v686_v39  ;;  %v729_v13 = vmul.f32 %v1325_v24, %v687_v42  ;;  %v730_v55 = vmul.f32 %v1325_v24, %v688_v43 }
 0x1be   :  { %v731_v57 = vmul.f32 %v1325_v24, %v689_v44  ;;  %v732_v58 = vmul.f32 %v1325_v24, %v690_v45  ;;  %v733_v63 = vmul.f32 %v1325_v24, %v691_v49  ;;  %v734_v18 = vmul.f32 %v1325_v24, %v692_v50 }
 0x1bf   :  { %v735_v21 = vmul.f32 %v1325_v24, %v693_v51  ;;  %v736_v22 = vmul.f32 %v1325_v24, %v694_v56  ;;  %v737_v27 = vmul.f32 %v1325_v24, %v695_v62  ;;  %v738_v47 = vmul.f32 %v1325_v24, %v696_v0 }
 0x1c0   :  { %v739_v53 = vmul.f32 %v1325_v24, %v697_v2  ;;  %v740_v60 = vmul.f32 %v1325_v24, %v698_v4  ;;  %v741_v61 = vmul.f32 %v1325_v24, %v699_v7  ;;  %v742_v1 = vmul.f32 %v1325_v24, %v700_v9 }
 0x1c1   :  { %v769_v3 = vadd.f32 %v751_v52, %v727_v10  ;;  %v770_v8 = vadd.f32 %v751_v52, %v728_v12  ;;  %v771_v25 = vadd.f32 %v751_v52, %v729_v13  ;;  %v772_v32 = vadd.f32 %v751_v52, %v730_v55  ;;  %v704_v13 = vpop.permute.xlu0 %703 }
 0x1c2   :  { %v773_v33 = vadd.f32 %v751_v52, %v731_v57  ;;  %v774_v35 = vadd.f32 %v751_v52, %v732_v58  ;;  %v775_v59 = vadd.f32 %v751_v52, %v733_v63  ;;  %v776_v14 = vadd.f32 %v751_v52, %v734_v18 }
 0x1c3   :  { %v777_v5 = vadd.f32 %v751_v52, %v735_v21  ;;  %v778_v6 = vadd.f32 %v751_v52, %v736_v22  ;;  %v779_v11 = vadd.f32 %v751_v52, %v737_v27  ;;  %v780_v40 = vadd.f32 %v751_v52, %v738_v47 }
 0x1c4   :  { %v781_v23 = vadd.f32 %v751_v52, %v739_v53  ;;  %v782_v38 = vadd.f32 %v751_v52, %v740_v60  ;;  %v783_v39 = vadd.f32 %v751_v52, %v741_v61  ;;  %v784_v42 = vadd.f32 %v751_v52, %v742_v1 }
 0x1c5   :  { %v801_v43 = vmax.f32 %v769_v3, 0.0  ;;  %v802_v44 = vmax.f32 %v770_v8, 0.0  ;;  %v803_v45 = vmax.f32 %v771_v25, 0.0  ;;  %v804_v24 = vmax.f32 %v772_v32, 0.0 }
 0x1c6   :  { %v805_v49 = vmax.f32 %v773_v33, 0.0  ;;  %v806_v50 = vmax.f32 %v774_v35, 0.0  ;;  %v807_v51 = vmax.f32 %v775_v59, 0.0  ;;  %v808_v56 = vmax.f32 %v776_v14, 0.0 }
 0x1c7   :  { %v809_v62 = vmax.f32 %v777_v5, 0.0  ;;  %v810_v0 = vmax.f32 %v778_v6, 0.0  ;;  %v811_v2 = vmax.f32 %v779_v11, 0.0  ;;  %v812_v4 = vmax.f32 %v780_v40, 0.0 }
 0x1c8   :  { %v813_v7 = vmax.f32 %v781_v23, 0.0  ;;  %v814_v9 = vmax.f32 %v782_v38, 0.0  ;;  %v815_v10 = vmax.f32 %v783_v39, 0.0  ;;  %v816_v12 = vmax.f32 %v784_v42, 0.0 }
 0x1c9   :  { %v983_v55 = vpack.c.bf16 %v802_v44, %v801_v43  ;;  %v984_v57 = vpack.c.bf16 %v804_v24, %v803_v45  ;;  %v985_v58 = vpack.c.bf16 %v806_v50, %v805_v49  ;;  %v986_v63 = vpack.c.bf16 %v808_v56, %v807_v51 }
 0x1ca   :  { %v987_v18 = vpack.c.bf16 %v810_v0, %v809_v62  ;;  %v988_v21 = vpack.c.bf16 %v812_v4, %v811_v2  ;;  %v989_v22 = vpack.c.bf16 %v814_v9, %v813_v7  ;;  %v990_v27 = vpack.c.bf16 %v816_v12, %v815_v10 }
 0x1cb   :  { %921 = vst [vmem:[%s1533_s4 + $0x40] sm:$0xff] %v983_v55  ;;  %922 = vst [vmem:[%s1533_s4 + $0x48] sm:$0xff] %v984_v57  ;;  %v711_v47 = vmul.f32 %v704_v13, %v1401_v46  ;;  %v712_v52 = vmul.f32 %v704_v13, %v1403_v15  ;;  %v713_v53 = vmul.f32 %v704_v13, %v1405_v48 }
 0x1cc   :  { %923 = vst [vmem:[%s1533_s4 + $0x50] sm:$0xff] %v985_v58  ;;  %924 = vst [vmem:[%s1533_s4 + $0x58] sm:$0xff] %v986_v63  ;;  %v714_v60 = vmul.f32 %v704_v13, %v1407_v54  ;;  %v715_v46 = vmul.f32 %v704_v13, %v1409_v16  ;;  %v716_v15 = vmul.f32 %v704_v13, %v1411_v28 }
 0x1cd   :  { %925 = vst [vmem:[%s1533_s4 + $0x60] sm:$0xff] %v987_v18  ;;  %926 = vst [vmem:[%s1533_s4 + $0x68] sm:$0xff] %v988_v21  ;;  %v717_v48 = vmul.f32 %v704_v13, %v1413_v17  ;;  %v718_v54 = vmul.f32 %v704_v13, %v1415_v36  ;;  %v719_v61 = vmul.f32 %v704_v13, %v1417_v37 }
 0x1ce   :  { %927 = vst [vmem:[%s1533_s4 + $0x70] sm:$0xff] %v989_v22  ;;  %928 = vst [vmem:[%s1533_s4 + $0x78] sm:$0xff] %v990_v27  ;;  %v720_v1 = vmul.f32 %v704_v13, %v1419_v19  ;;  %v721_v3 = vmul.f32 %v704_v13, %v1421_v41  ;;  %v722_v8 = vmul.f32 %v704_v13, %v1423_v20 }
 0x1cf   :  { %v723_v25 = vmul.f32 %v704_v13, %v1425_v29  ;;  %v724_v32 = vmul.f32 %v704_v13, %v1427_v30  ;;  %v725_v16 = vmul.f32 %v704_v13, %v1429_v31  ;;  %v726_v28 = vmul.f32 %v704_v13, %v1431_v34 }
 0x1d0   :  { %v753_v17 = vadd.f32 %v1327_v26, %v711_v47  ;;  %v754_v36 = vadd.f32 %v1327_v26, %v712_v52  ;;  %v755_v37 = vadd.f32 %v1327_v26, %v713_v53  ;;  %v756_v19 = vadd.f32 %v1327_v26, %v714_v60 }
 0x1d1   :  { %v757_v41 = vadd.f32 %v1327_v26, %v715_v46  ;;  %v758_v20 = vadd.f32 %v1327_v26, %v716_v15  ;;  %v759_v29 = vadd.f32 %v1327_v26, %v717_v48  ;;  %v760_v30 = vadd.f32 %v1327_v26, %v718_v54 }
 0x1d2   :  { %v761_v31 = vadd.f32 %v1327_v26, %v719_v61  ;;  %v762_v34 = vadd.f32 %v1327_v26, %v720_v1  ;;  %v763_v33 = vadd.f32 %v1327_v26, %v721_v3  ;;  %v764_v35 = vadd.f32 %v1327_v26, %v722_v8 }
 0x1d3   :  { %v765_v59 = vadd.f32 %v1327_v26, %v723_v25  ;;  %v766_v14 = vadd.f32 %v1327_v26, %v724_v32  ;;  %v767_v5 = vadd.f32 %v1327_v26, %v725_v16  ;;  %v768_v6 = vadd.f32 %v1327_v26, %v726_v28 }
 0x1d4   :  { %v785_v11 = vmax.f32 %v753_v17, 0.0  ;;  %v786_v40 = vmax.f32 %v754_v36, 0.0  ;;  %v787_v23 = vmax.f32 %v755_v37, 0.0  ;;  %v788_v38 = vmax.f32 %v756_v19, 0.0 }
 0x1d5   :  { %v789_v39 = vmax.f32 %v757_v41, 0.0  ;;  %v790_v42 = vmax.f32 %v758_v20, 0.0  ;;  %v791_v43 = vmax.f32 %v759_v29, 0.0  ;;  %v792_v44 = vmax.f32 %v760_v30, 0.0 }
 0x1d6   :  { %v793_v45 = vmax.f32 %v761_v31, 0.0  ;;  %v794_v24 = vmax.f32 %v762_v34, 0.0  ;;  %v795_v49 = vmax.f32 %v763_v33, 0.0  ;;  %v796_v50 = vmax.f32 %v764_v35, 0.0 }
 0x1d7   :  { %v797_v51 = vmax.f32 %v765_v59, 0.0  ;;  %v798_v56 = vmax.f32 %v766_v14, 0.0  ;;  %v799_v62 = vmax.f32 %v767_v5, 0.0  ;;  %v800_v0 = vmax.f32 %v768_v6, 0.0 }
 0x1d8   :  { %v975_v2 = vpack.c.bf16 %v786_v40, %v785_v11  ;;  %v976_v4 = vpack.c.bf16 %v788_v38, %v787_v23  ;;  %v977_v7 = vpack.c.bf16 %v790_v42, %v789_v39  ;;  %v978_v26 = vpack.c.bf16 %v792_v44, %v791_v43 }
 0x1d9   :  { %v979_v9 = vpack.c.bf16 %v794_v24, %v793_v45  ;;  %v980_v10 = vpack.c.bf16 %v796_v50, %v795_v49  ;;  %v981_v12 = vpack.c.bf16 %v798_v56, %v797_v51  ;;  %v982_v13 = vpack.c.bf16 %v800_v0, %v799_v62 }
 0x1da   :  { %913 = vst [vmem:[%s1533_s4] sm:$0xff] %v975_v2  ;;  %914 = vst [vmem:[%s1533_s4 + $0x8] sm:$0xff] %v976_v4 }
 0x1db   :  { %915 = vst [vmem:[%s1533_s4 + $0x10] sm:$0xff] %v977_v7  ;;  %916 = vst [vmem:[%s1533_s4 + $0x18] sm:$0xff] %v978_v26 }
 0x1dc   :  { %917 = vst [vmem:[%s1533_s4 + $0x20] sm:$0xff] %v979_v9  ;;  %918 = vst [vmem:[%s1533_s4 + $0x28] sm:$0xff] %v980_v10 }
 0x1dd   :  { %919 = vst [vmem:[%s1533_s4 + $0x30] sm:$0xff] %v981_v12  ;;  %920 = vst [vmem:[%s1533_s4 + $0x38] sm:$0xff] %v982_v13 }
 0x1de   :  { %933 = vsyncpa [#allocation3], 1 }

// kernel: resnet18_forward.7
= control target key start
LH: loop header
LB: loop body
LE: loop exit
PB: predicated region body
PF: predicated region fallthrough
CT: control target
= control target key end

     0   :  { %v1526_v1 = vmov 0   ;;  %vm833_vm0 = vcmask 130048   ;;  %vm1086_vm1 = vcmask 539648   ;;  %vm1168_vm2 = vcmask 535552   ;;  %s1988_s1 = inlined_call_operand.vmem [shape: bf16[400,578], index: 1, kind: input, shape index: {}]   ;;  %s1989_s0 = inlined_call_operand.vmem [shape: bf16[8,400], index: 0, kind: input, shape index: {}]   ;;  %s1990_s2 = inlined_call_operand.vmem [shape: f32[8,1], index: 2, kind: input, shape index: {}]   ;;  %s1991_s3 = inlined_call_operand.vmem [shape: f32[8,1], index: 3, kind: input, shape index: {}]   ;;  %s1992_s4 = inlined_call_operand.vmem [shape: bf16[8,578], index: 4, kind: output, shape index: {}]  }
   0x1   :  { %v1345_v0 = vld [vmem:[%s1988_s1 + $0x4] ss:$20 sps:$4 sm:$0xff]   ;;  %1343 = vset.pattern.permute.xlu1 %v1526_v1  ;;  %1344 = vset.pattern.permute.xlu0 %v1526_v1  ;;  %v1347_v2 = vld [vmem:[%s1988_s1 + $0xc] ss:$20 sps:$4 sm:$0xff]   ;;  %v1350_v4 = vld [vmem:[%s1988_s1 + $0x8] ss:$20 sps:$4 sm:$0xff]  }
   0x2   :  { %837 = vmatprep.subr.bf16.mxu0 %v1345_v0  ;;  %v1349_v3 = vld [vmem:[%s1988_s1] ss:$20 sps:$4 sm:$0xff]   ;;  %919 = vmatprep.subr.bf16.mxu1 %v1347_v2  ;;  %v1355_v7 = vld [vmem:[%s1988_s1 + $0x28] ss:$20 sps:$4 sm:$0xff]   ;;  %v1356_v8 = vld [vmem:[%s1988_s1 + $0x30] ss:$20 sps:$4 sm:$0xff]  }
   0x3   :  { %v1351_v5 = vld [vmem:[%s1988_s1 + $0x2c] ss:$20 sps:$4 sm:$0xff]   ;;  %838 = vmatpush1.bf16.msra.mxu0 %v1349_v3  ;;  %920 = vmatpush1.bf16.msra.mxu1 %v1350_v4  ;;  %v1353_v6 = vld [vmem:[%s1988_s1 + $0x34] ss:$20 sps:$4 sm:$0xff]   ;;  %v1359_v10 = vld [vmem:[%s1988_s1 + $0x5c] ss:$20 sps:$4 sm:$0xff]  }
   0x4   :  { %839 = vmatprep.subr.bf16.mxu0 %v1351_v5  ;;  %921 = vmatprep.subr.bf16.mxu1 %v1353_v6  ;;  %v1357_v9 = vld [vmem:[%s1988_s1 + $0x54] ss:$20 sps:$4 sm:$0xff]   ;;  %v1361_v11 = vld [vmem:[%s1988_s1 + $0x50] ss:$20 sps:$4 sm:$0xff]   ;;  %v1362_v12 = vld [vmem:[%s1988_s1 + $0x58] ss:$20 sps:$4 sm:$0xff]  }
   0x5   :  { %v1363_v13 = vld [vmem:[%s1988_s1 + $0x7c] ss:$20 sps:$4 sm:$0xff]   ;;  %v1365_v14 = vld [vmem:[%s1988_s1 + $0x84] ss:$20 sps:$4 sm:$0xff]   ;;  %v1368_v16 = vld [vmem:[%s1988_s1 + $0x80] ss:$20 sps:$4 sm:$0xff]  }
   0x6   :  { %v1367_v15 = vld [vmem:[%s1988_s1 + $0x78] ss:$20 sps:$4 sm:$0xff]   ;;  %v1373_v19 = vld [vmem:[%s1988_s1 + $0xa0] ss:$20 sps:$4 sm:$0xff]   ;;  %v1374_v20 = vld [vmem:[%s1988_s1 + $0xa8] ss:$20 sps:$4 sm:$0xff]  }
   0x7   :  { %840 = vmatpush1.bf16.msra.mxu0 %v1355_v7  ;;  %922 = vmatpush1.bf16.msra.mxu1 %v1356_v8  ;;  %v1369_v17 = vld [vmem:[%s1988_s1 + $0xa4] ss:$20 sps:$4 sm:$0xff]   ;;  %v1371_v18 = vld [vmem:[%s1988_s1 + $0xac] ss:$20 sps:$4 sm:$0xff]   ;;  %v1377_v22 = vld [vmem:[%s1988_s1 + $0xd4] ss:$20 sps:$4 sm:$0xff]  }
   0x8   :  { %841 = vmatprep.subr.bf16.mxu0 %v1357_v9  ;;  %923 = vmatprep.subr.bf16.mxu1 %v1359_v10  ;;  %v1375_v21 = vld [vmem:[%s1988_s1 + $0xcc] ss:$20 sps:$4 sm:$0xff]   ;;  %v1379_v23 = vld [vmem:[%s1988_s1 + $0xc8] ss:$20 sps:$4 sm:$0xff]   ;;  %v1380_v24 = vld [vmem:[%s1988_s1 + $0xd0] ss:$20 sps:$4 sm:$0xff]  }
   0x9   :  { %v1381_v25 = vld [vmem:[%s1988_s1 + $0xf4] ss:$20 sps:$4 sm:$0xff]   ;;  %v1383_v26 = vld [vmem:[%s1988_s1 + $0xfc] ss:$20 sps:$4 sm:$0xff]   ;;  %v1386_v28 = vld [vmem:[%s1988_s1 + $0xf8] ss:$20 sps:$4 sm:$0xff]  }
   0xa   :  { %v1385_v27 = vld [vmem:[%s1988_s1 + $0xf0] ss:$20 sps:$4 sm:$0xff]   ;;  %v1391_v31 = vld [vmem:[%s1988_s1 + $0x118] ss:$20 sps:$4 sm:$0xff]   ;;  %v1392_v32 = vld [vmem:[%s1988_s1 + $0x120] ss:$20 sps:$4 sm:$0xff]  }
   0xb   :  { %842 = vmatpush1.bf16.msra.mxu0 %v1361_v11  ;;  %924 = vmatpush1.bf16.msra.mxu1 %v1362_v12  ;;  %v1387_v29 = vld [vmem:[%s1988_s1 + $0x11c] ss:$20 sps:$4 sm:$0xff]   ;;  %v1389_v30 = vld [vmem:[%s1988_s1 + $0x124] ss:$20 sps:$4 sm:$0xff]   ;;  %v1395_v34 = vld [vmem:[%s1988_s1 + $0x14c] ss:$20 sps:$4 sm:$0xff]  }
   0xc   :  { %843 = vmatprep.subr.bf16.mxu0 %v1363_v13  ;;  %925 = vmatprep.subr.bf16.mxu1 %v1365_v14  ;;  %v1393_v33 = vld [vmem:[%s1988_s1 + $0x144] ss:$20 sps:$4 sm:$0xff]   ;;  %v1397_v35 = vld [vmem:[%s1988_s1 + $0x140] ss:$20 sps:$4 sm:$0xff]   ;;  %v1398_v36 = vld [vmem:[%s1988_s1 + $0x148] ss:$20 sps:$4 sm:$0xff]  }
   0xd   :  { %v1399_v37 = vld [vmem:[%s1988_s1 + $0x16c] ss:$20 sps:$4 sm:$0xff]   ;;  %v1401_v38 = vld [vmem:[%s1988_s1 + $0x174] ss:$20 sps:$4 sm:$0xff]   ;;  %v1404_v40 = vld [vmem:[%s1988_s1 + $0x170] ss:$20 sps:$4 sm:$0xff]  }
   0xe   :  { %v1403_v39 = vld [vmem:[%s1988_s1 + $0x168] ss:$20 sps:$4 sm:$0xff]   ;;  %v1409_v43 = vld [vmem:[%s1988_s1 + $0x190] ss:$20 sps:$4 sm:$0xff]   ;;  %v1410_v44 = vld [vmem:[%s1988_s1 + $0x198] ss:$20 sps:$4 sm:$0xff]  }
   0xf   :  { %844 = vmatpush1.bf16.msra.mxu0 %v1367_v15  ;;  %926 = vmatpush1.bf16.msra.mxu1 %v1368_v16  ;;  %v1405_v41 = vld [vmem:[%s1988_s1 + $0x194] ss:$20 sps:$4 sm:$0xff]   ;;  %v1407_v42 = vld [vmem:[%s1988_s1 + $0x19c] ss:$20 sps:$4 sm:$0xff]   ;;  %v1413_v46 = vld [vmem:[%s1988_s1 + $0x1c4] ss:$20 sps:$4 sm:$0xff]  }
  0x10   :  { %845 = vmatprep.subr.bf16.mxu0 %v1369_v17  ;;  %927 = vmatprep.subr.bf16.mxu1 %v1371_v18  ;;  %v1411_v45 = vld [vmem:[%s1988_s1 + $0x1bc] ss:$20 sps:$4 sm:$0xff]   ;;  %v18_v47 = vld [vmem:[%s1989_s0] sm:$0xff]  ;;  %v1415_v49 = vld [vmem:[%s1988_s1 + $0x1b8] ss:$20 sps:$4 sm:$0xff]  }
  0x11   :  { %v1695_v48 = vcombine.high %v18_v47, %v18_v47  ;;  %v1416_v50 = vld [vmem:[%s1988_s1 + $0x1c0] ss:$20 sps:$4 sm:$0xff]   ;;  %v1417_v51 = vld [vmem:[%s1988_s1 + $0x1e4] ss:$20 sps:$4 sm:$0xff]   ;;  %v1422_v54 = vld [vmem:[%s1988_s1 + $0x1e8] ss:$20 sps:$4 sm:$0xff]   ;;  %v1764_v7 = vcombine.low %v18_v47, %v18_v47 }
  0x12   :  { %v1419_v52 = vld [vmem:[%s1988_s1 + $0x1ec] ss:$20 sps:$4 sm:$0xff]   ;;  %v1425_v56 = vld [vmem:[%s1988_s1 + $0x214] ss:$20 sps:$4 sm:$0xff]   ;;  %v1428_v58 = vld [vmem:[%s1988_s1 + $0x210] ss:$20 sps:$4 sm:$0xff]  }
  0x13   :  { %846 = vmatpush1.bf16.msra.mxu0 %v1373_v19  ;;  %928 = vmatpush1.bf16.msra.mxu1 %v1374_v20  ;;  %v1421_v53 = vld [vmem:[%s1988_s1 + $0x1e0] ss:$20 sps:$4 sm:$0xff]   ;;  %v1427_v57 = vld [vmem:[%s1988_s1 + $0x208] ss:$20 sps:$4 sm:$0xff]   ;;  %v1433_v61 = vld [vmem:[%s1988_s1 + $0x230] ss:$20 sps:$4 sm:$0xff]  }
  0x14   :  { %847 = vmatprep.subr.bf16.mxu0 %v1375_v21  ;;  %929 = vmatprep.subr.bf16.mxu1 %v1377_v22  ;;  %v1423_v55 = vld [vmem:[%s1988_s1 + $0x20c] ss:$20 sps:$4 sm:$0xff]   ;;  %v1429_v59 = vld [vmem:[%s1988_s1 + $0x234] ss:$20 sps:$4 sm:$0xff]   ;;  %v1431_v60 = vld [vmem:[%s1988_s1 + $0x23c] ss:$20 sps:$4 sm:$0xff]  }
  0x15   :  { %869 = vmatprep.mubr.bf16.mxu0 %v1695_v48  ;;  %951 = vmatprep.mubr.bf16.mxu1 %v1695_v48  ;;  %v1434_v62 = vld [vmem:[%s1988_s1 + $0x238] ss:$20 sps:$4 sm:$0xff]   ;;  %v1435_v63 = vld [vmem:[%s1988_s1 + $0x25c] ss:$20 sps:$4 sm:$0xff]   ;;  %v1440_v3 = vld [vmem:[%s1988_s1 + $0x260] ss:$20 sps:$4 sm:$0xff]  }
  0x16   :  { %v1437_v0 = vld [vmem:[%s1988_s1 + $0x264] ss:$20 sps:$4 sm:$0xff]   ;;  %v1447_v5 = vld [vmem:[%s1988_s1 + $0x28c] ss:$20 sps:$4 sm:$0xff]   ;;  %v1445_v9 = vld [vmem:[%s1988_s1 + $0x288] ss:$20 sps:$4 sm:$0xff]  }
  0x17   :  { %848 = vmatpush1.bf16.msra.mxu0 %v1379_v23  ;;  %930 = vmatpush1.bf16.msra.mxu1 %v1380_v24  ;;  %v1439_v2 = vld [vmem:[%s1988_s1 + $0x258] ss:$20 sps:$4 sm:$0xff]   ;;  %v1442_v8 = vld [vmem:[%s1988_s1 + $0x280] ss:$20 sps:$4 sm:$0xff]   ;;  %v1449_v12 = vld [vmem:[%s1988_s1 + $0x2a8] ss:$20 sps:$4 sm:$0xff]  }
  0x18   :  { %849 = vmatprep.subr.bf16.mxu0 %v1381_v25  ;;  %931 = vmatprep.subr.bf16.mxu1 %v1383_v26  ;;  %v1444_v4 = vld [vmem:[%s1988_s1 + $0x284] ss:$20 sps:$4 sm:$0xff]   ;;  %v1762_v6 = vld [vmem:[%s1989_s0 + $0x8] sm:$0xff]  ;;  %v1460_v16 = vld [vmem:[%s1988_s1 + $0x2dc] ss:$20 sps:$4 sm:$0xff]  }
  0x19   :  { %v1451_v10 = vld [vmem:[%s1988_s1 + $0x2ac] ss:$20 sps:$4 sm:$0xff]   ;;  %v1454_v11 = vld [vmem:[%s1988_s1 + $0x2b4] ss:$20 sps:$4 sm:$0xff]   ;;  %v1783_v13 = vcombine.high %v1762_v6, %v1762_v6  ;;  %v1452_v14 = vld [vmem:[%s1988_s1 + $0x2b0] ss:$20 sps:$4 sm:$0xff]  }
  0x1a   :  { %v1457_v15 = vld [vmem:[%s1988_s1 + $0x2d4] ss:$20 sps:$4 sm:$0xff]   ;;  %v1455_v17 = vld [vmem:[%s1988_s1 + $0x2d0] ss:$20 sps:$4 sm:$0xff]   ;;  %v1458_v18 = vld [vmem:[%s1988_s1 + $0x2d8] ss:$20 sps:$4 sm:$0xff]  }
  0x1b   :  { %850 = vmatpush1.bf16.msra.mxu0 %v1385_v27  ;;  %932 = vmatpush1.bf16.msra.mxu1 %v1386_v28  ;;  %v1463_v19 = vld [vmem:[%s1988_s1 + $0x2fc] ss:$20 sps:$4 sm:$0xff]   ;;  %v1466_v20 = vld [vmem:[%s1988_s1 + $0x304] ss:$20 sps:$4 sm:$0xff]   ;;  %v1464_v22 = vld [vmem:[%s1988_s1 + $0x300] ss:$20 sps:$4 sm:$0xff]  }
  0x1c   :  { %851 = vmatprep.subr.bf16.mxu0 %v1387_v29  ;;  %933 = vmatprep.subr.bf16.mxu1 %v1389_v30  ;;  %v1461_v21 = vld [vmem:[%s1988_s1 + $0x2f8] ss:$20 sps:$4 sm:$0xff]   ;;  %v1467_v25 = vld [vmem:[%s1988_s1 + $0x320] ss:$20 sps:$4 sm:$0xff]   ;;  %v1470_v26 = vld [vmem:[%s1988_s1 + $0x328] ss:$20 sps:$4 sm:$0xff]  }
  0x1d   :  { %v1469_v23 = vld [vmem:[%s1988_s1 + $0x324] ss:$20 sps:$4 sm:$0xff]   ;;  %v1472_v24 = vld [vmem:[%s1988_s1 + $0x32c] ss:$20 sps:$4 sm:$0xff]   ;;  %v1478_v28 = vld [vmem:[%s1988_s1 + $0x354] ss:$20 sps:$4 sm:$0xff]  }
  0x1e   :  { %v1475_v27 = vld [vmem:[%s1988_s1 + $0x34c] ss:$20 sps:$4 sm:$0xff]   ;;  %v1473_v29 = vld [vmem:[%s1988_s1 + $0x348] ss:$20 sps:$4 sm:$0xff]   ;;  %v1476_v30 = vld [vmem:[%s1988_s1 + $0x350] ss:$20 sps:$4 sm:$0xff]  }
  0x1f   :  { %852 = vmatpush1.bf16.msra.mxu0 %v1391_v31  ;;  %934 = vmatpush1.bf16.msra.mxu1 %v1392_v32  ;;  %v1481_v31 = vld [vmem:[%s1988_s1 + $0x374] ss:$20 sps:$4 sm:$0xff]   ;;  %v1484_v32 = vld [vmem:[%s1988_s1 + $0x37c] ss:$20 sps:$4 sm:$0xff]   ;;  %v1502_v47 = vld [vmem:[%s1988_s1 + $0x178] ss:$20 sps:$4 sm:$0xff]  }
  0x20   :  { %853 = vmatprep.subr.bf16.mxu0 %v1393_v33  ;;  %935 = vmatprep.subr.bf16.mxu1 %v1395_v34  ;;  %v1479_v33 = vld [vmem:[%s1988_s1 + $0x370] ss:$20 sps:$4 sm:$0xff]   ;;  %v1482_v34 = vld [vmem:[%s1988_s1 + $0x378] ss:$20 sps:$4 sm:$0xff]  }
  0x23   :  { %854 = vmatpush1.bf16.msra.mxu0 %v1397_v35  ;;  %936 = vmatpush1.bf16.msra.mxu1 %v1398_v36  ;;  %v1487_v35 = vld [vmem:[%s1988_s1 + $0x39c] ss:$20 sps:$4 sm:$0xff]   ;;  %v1490_v36 = vld [vmem:[%s1988_s1 + $0x3a4] ss:$20 sps:$4 sm:$0xff]  }
  0x24   :  { %855 = vmatprep.subr.bf16.mxu0 %v1399_v37  ;;  %937 = vmatprep.subr.bf16.mxu1 %v1401_v38  ;;  %v1485_v37 = vld [vmem:[%s1988_s1 + $0x398] ss:$20 sps:$4 sm:$0xff]   ;;  %v1488_v38 = vld [vmem:[%s1988_s1 + $0x3a0] ss:$20 sps:$4 sm:$0xff]  }
  0x27   :  { %856 = vmatpush1.bf16.msra.mxu0 %v1403_v39  ;;  %938 = vmatpush1.bf16.msra.mxu1 %v1404_v40  ;;  %v1493_v39 = vld [vmem:[%s1988_s1 + $0x3c4] ss:$20 sps:$4 sm:$0xff]   ;;  %v1496_v40 = vld [vmem:[%s1988_s1 + $0x3cc] ss:$20 sps:$4 sm:$0xff]  }
  0x28   :  { %857 = vmatprep.subr.bf16.mxu0 %v1405_v41  ;;  %939 = vmatprep.subr.bf16.mxu1 %v1407_v42  ;;  %v1491_v41 = vld [vmem:[%s1988_s1 + $0x3c0] ss:$20 sps:$4 sm:$0xff]   ;;  %v1494_v42 = vld [vmem:[%s1988_s1 + $0x3c8] ss:$20 sps:$4 sm:$0xff]  }
  0x2b   :  { %858 = vmatpush1.bf16.msra.mxu0 %v1409_v43  ;;  %940 = vmatpush1.bf16.msra.mxu1 %v1410_v44  ;;  %v1499_v43 = vld [vmem:[%s1988_s1 + $0x150] ss:$20 sps:$4 sm:$0xff]   ;;  %v1883_v44 = vcombine.low %v1762_v6, %v1762_v6 }
  0x2c   :  { %859 = vmatprep.subr.bf16.mxu0 %v1411_v45  ;;  %941 = vmatprep.subr.bf16.mxu1 %v1413_v46  ;;  %v1500_v45 = vld [vmem:[%s1988_s1 + $0x10] ss:$20 sps:$4 sm:$0xff]  }
  0x2d   :  { %v1501_v46 = vld [vmem:[%s1988_s1 + $0x290] ss:$20 sps:$4 sm:$0xff]  }
  0x2e   :  { %v1081_v6 = vld [vmem:[%s1990_s2] sm:$0xff] }
  0x2f   :  { %860 = vmatpush1.bf16.msra.mxu0 %v1415_v49  ;;  %942 = vmatpush1.bf16.msra.mxu1 %v1416_v50  ;;  %v1503_v49 = vld [vmem:[%s1988_s1 + $0x38] ss:$20 sps:$4 sm:$0xff]  }
  0x30   :  { %861 = vmatprep.subr.bf16.mxu0 %v1417_v51  ;;  %943 = vmatprep.subr.bf16.mxu1 %v1419_v52  ;;  %v1504_v50 = vld [vmem:[%s1988_s1 + $0x2b8] ss:$20 sps:$4 sm:$0xff]   ;;  %v1505_v51 = vld [vmem:[%s1988_s1 + $0x1a0] ss:$20 sps:$4 sm:$0xff]  }
  0x31   :  { %v1506_v52 = vld [vmem:[%s1988_s1 + $0x60] ss:$20 sps:$4 sm:$0xff]   ;;  %1122 = vperm.xlu1 %1343, %v1081_v6  }
  0x33   :  { %862 = vmatpush1.bf16.msra.mxu0 %v1421_v53  ;;  %944 = vmatpush1.bf16.msra.mxu1 %v1422_v54  ;;  %v1507_v53 = vld [vmem:[%s1988_s1 + $0x2e0] ss:$20 sps:$4 sm:$0xff]   ;;  %v1509_v54 = vld [vmem:[%s1988_s1 + $0x88] ss:$20 sps:$4 sm:$0xff]  }
  0x34   :  { %863 = vmatprep.subr.bf16.mxu0 %v1423_v55  ;;  %945 = vmatprep.subr.bf16.mxu1 %v1425_v56  ;;  %v1510_v55 = vld [vmem:[%s1988_s1 + $0x308] ss:$20 sps:$4 sm:$0xff]   ;;  %v1511_v56 = vld [vmem:[%s1988_s1 + $0x1f0] ss:$20 sps:$4 sm:$0xff]  }
  0x37   :  { %864 = vmatpush1.bf16.msra.mxu0 %v1427_v57  ;;  %946 = vmatpush1.bf16.msra.mxu1 %v1428_v58  ;;  %v1512_v57 = vld [vmem:[%s1988_s1 + $0xb0] ss:$20 sps:$4 sm:$0xff]  }
  0x38   :  { %865 = vmatprep.subr.bf16.mxu0 %v1429_v59  ;;  %947 = vmatprep.subr.bf16.mxu1 %v1431_v60  ;;  %v1513_v58 = vld [vmem:[%s1988_s1 + $0x330] ss:$20 sps:$4 sm:$0xff]   ;;  %v1514_v59 = vld [vmem:[%s1988_s1 + $0x218] ss:$20 sps:$4 sm:$0xff]  }
  0x39   :  { %v1515_v60 = vld [vmem:[%s1988_s1 + $0xd8] ss:$20 sps:$4 sm:$0xff]  }
  0x3b   :  { %866 = vmatpush1.bf16.msra.mxu0 %v1433_v61  ;;  %948 = vmatpush1.bf16.msra.mxu1 %v1434_v62  ;;  %v1516_v61 = vld [vmem:[%s1988_s1 + $0x358] ss:$20 sps:$4 sm:$0xff]   ;;  %v1517_v62 = vld [vmem:[%s1988_s1 + $0x240] ss:$20 sps:$4 sm:$0xff]  }
  0x3c   :  { %867 = vmatprep.subr.bf16.mxu0 %v1435_v63  ;;  %949 = vmatprep.subr.bf16.mxu1 %v1437_v0  ;;  %v1518_v63 = vld [vmem:[%s1988_s1 + $0x100] ss:$20 sps:$4 sm:$0xff]  }
  0x3d   :  { %v1519_v0 = vld [vmem:[%s1988_s1 + $0x380] ss:$20 sps:$4 sm:$0xff]  }
  0x3f   :  { %868 = vmatpush1.bf16.msra.mxu0 %v1439_v2  ;;  %950 = vmatpush1.bf16.msra.mxu1 %v1440_v3  ;;  %v1520_v2 = vld [vmem:[%s1988_s1 + $0x268] ss:$20 sps:$4 sm:$0xff]  }
  0x40   :  { %878 = vmatprep.subr.bf16.mxu0 %v1444_v4  ;;  %960 = vmatprep.subr.bf16.mxu1 %v1447_v5  ;;  %v1521_v3 = vld [vmem:[%s1988_s1 + $0x128] ss:$20 sps:$4 sm:$0xff]   ;;  %v1523_v5 = vld [vmem:[%s1988_s1 + $0x3d0] ss:$20 sps:$4 sm:$0xff]  }
  0x41   :  { %v1522_v4 = vld [vmem:[%s1988_s1 + $0x3a8] ss:$20 sps:$4 sm:$0xff]  }
  0x42   :  { %870 = vmatmul.mubr.bf16.vlgmr.msra.gmra.mrb[0].mxu0 %v1764_v7  ;;  %952 = vmatmul.mubr.bf16.vlgmr.msra.gmra.mrb[0].mxu1 %v1764_v7 }
  0x43   :  { %879 = vmatpush1.bf16.msra.mxu0 %v1442_v8  ;;  %961 = vmatpush1.bf16.msra.mxu1 %v1445_v9  ;;  %v1082_v8 = vld [vmem:[%s1991_s3] sm:$0xff] }
  0x44   :  { %880 = vmatprep.subr.bf16.mxu0 %v1451_v10  ;;  %962 = vmatprep.subr.bf16.mxu1 %v1454_v11 }
  0x45   :  { %1303 = vmatprep.mubr.msk.bf16.mxu0 %vm833_vm0, %v1783_v13  ;;  %1304 = vmatprep.mubr.msk.bf16.mxu1 %vm833_vm0, %v1783_v13 }
  0x46   :  { %1132 = vperm.xlu1 %1343, %v1082_v8  }
  0x47   :  { %881 = vmatpush1.bf16.msra.mxu0 %v1449_v12  ;;  %963 = vmatpush1.bf16.msra.mxu1 %v1452_v14 }
  0x48   :  { %882 = vmatprep.subr.bf16.mxu0 %v1457_v15  ;;  %964 = vmatprep.subr.bf16.mxu1 %v1460_v16 }
  0x4b   :  { %883 = vmatpush1.bf16.msra.mxu0 %v1455_v17  ;;  %965 = vmatpush1.bf16.msra.mxu1 %v1458_v18 }
  0x4c   :  { %884 = vmatprep.subr.bf16.mxu0 %v1463_v19  ;;  %966 = vmatprep.subr.bf16.mxu1 %v1466_v20 }
  0x4f   :  { %885 = vmatpush1.bf16.msra.mxu0 %v1461_v21  ;;  %967 = vmatpush1.bf16.msra.mxu1 %v1464_v22 }
  0x50   :  { %886 = vmatprep.subr.bf16.mxu0 %v1469_v23  ;;  %968 = vmatprep.subr.bf16.mxu1 %v1472_v24 }
  0x53   :  { %887 = vmatpush1.bf16.msra.mxu0 %v1467_v25  ;;  %969 = vmatpush1.bf16.msra.mxu1 %v1470_v26 }
  0x54   :  { %888 = vmatprep.subr.bf16.mxu0 %v1475_v27  ;;  %970 = vmatprep.subr.bf16.mxu1 %v1478_v28 }
  0x57   :  { %889 = vmatpush1.bf16.msra.mxu0 %v1473_v29  ;;  %971 = vmatpush1.bf16.msra.mxu1 %v1476_v30 }
  0x58   :  { %890 = vmatprep.subr.bf16.mxu0 %v1481_v31  ;;  %972 = vmatprep.subr.bf16.mxu1 %v1484_v32 }
  0x5b   :  { %891 = vmatpush1.bf16.msra.mxu0 %v1479_v33  ;;  %973 = vmatpush1.bf16.msra.mxu1 %v1482_v34 }
  0x5c   :  { %892 = vmatprep.subr.bf16.mxu0 %v1487_v35  ;;  %974 = vmatprep.subr.bf16.mxu1 %v1490_v36 }
  0x5f   :  { %893 = vmatpush1.bf16.msra.mxu0 %v1485_v37  ;;  %975 = vmatpush1.bf16.msra.mxu1 %v1488_v38 }
  0x60   :  { %894 = vmatprep.subr.bf16.mxu0 %v1493_v39  ;;  %976 = vmatprep.subr.bf16.mxu1 %v1496_v40 }
  0x63   :  { %895 = vmatpush1.bf16.msra.mxu0 %v1491_v41  ;;  %977 = vmatpush1.bf16.msra.mxu1 %v1494_v42 }
  0x64   :  { %1312 = vmatprep.subr.bf16.mxu0 %v1499_v43  ;;  %1041 = vmatprep.subr.bf16.mxu1 %v1526_v1 }
  0x66   :  { %911 = vmatmul.mubr.bf16.vlgmr.msra.gmra.mrb[0].mxu0 %v1883_v44  ;;  %993 = vmatmul.mubr.bf16.vlgmr.msra.gmra.mrb[0].mxu1 %v1883_v44 }
  0x67   :  { %1313 = vmatpush3.bf16.msra.mxu0 %v1500_v45  ;;  %1042 = vmatpush1.bf16.msra.mxu1 %v1501_v46 }
  0x68   :  { %1314 = vmatprep.subr.bf16.mxu0 %v1502_v47  ;;  %1043 = vmatprep.subr.bf16.mxu1 %v1526_v1 }
  0x69   :  { %1033 = vmatprep.mubr.bf16.mxu0 %v1695_v48  ;;  %1305 = vmatprep.mubr.msk.bf16.mxu1 %vm833_vm0, %v1783_v13  ;;  %v1508_v48 = vld [vmem:[%s1988_s1 + $0x1c8] ss:$20 sps:$4 sm:$0xff]  }
  0x6b   :  { %1315 = vmatpush3.bf16.msra.mxu0 %v1503_v49  ;;  %1044 = vmatpush1.bf16.msra.mxu1 %v1504_v50 }
  0x6c   :  { %1316 = vmatprep.subr.bf16.mxu0 %v1505_v51  ;;  %1045 = vmatprep.subr.bf16.mxu1 %v1526_v1 }
  0x6f   :  { %1317 = vmatpush3.bf16.msra.mxu0 %v1506_v52  ;;  %1046 = vmatpush1.bf16.msra.mxu1 %v1507_v53 }
  0x70   :  { %1318 = vmatprep.subr.bf16.mxu0 %v1508_v48  ;;  %1047 = vmatprep.subr.bf16.mxu1 %v1526_v1 }
  0x73   :  { %1319 = vmatpush3.bf16.msra.mxu0 %v1509_v54  ;;  %1048 = vmatpush1.bf16.msra.mxu1 %v1510_v55 }
  0x74   :  { %1320 = vmatprep.subr.bf16.mxu0 %v1511_v56  ;;  %1049 = vmatprep.subr.bf16.mxu1 %v1526_v1 }
  0x77   :  { %1321 = vmatpush3.bf16.msra.mxu0 %v1512_v57  ;;  %1050 = vmatpush1.bf16.msra.mxu1 %v1513_v58 }
  0x78   :  { %1322 = vmatprep.subr.bf16.mxu0 %v1514_v59  ;;  %1051 = vmatprep.subr.bf16.mxu1 %v1526_v1 }
  0x7b   :  { %1323 = vmatpush3.bf16.msra.mxu0 %v1515_v60  ;;  %1052 = vmatpush1.bf16.msra.mxu1 %v1516_v61 }
  0x7c   :  { %1324 = vmatprep.subr.bf16.mxu0 %v1517_v62  ;;  %1053 = vmatprep.subr.bf16.mxu1 %v1526_v1 }
  0x7f   :  { %1325 = vmatpush3.bf16.msra.mxu0 %v1518_v63  ;;  %1054 = vmatpush1.bf16.msra.mxu1 %v1519_v0 }
  0x80   :  { %1326 = vmatprep.subr.bf16.mxu0 %v1520_v2  ;;  %1055 = vmatprep.subr.bf16.mxu1 %v1526_v1 }
  0x83   :  { %1327 = vmatpush3.bf16.msra.mxu0 %v1521_v3  ;;  %1056 = vmatpush1.bf16.msra.mxu1 %v1522_v4 }
  0x84   :  { %1057 = vmatprep.subr.bf16.mxu1 %v1526_v1 }
  0x86   :  { %1034 = vmatmul.mubr.bf16.vlgmr.msra.gmra.mrb[4].mxu0 %v1764_v7 }
  0x87   :  { %1058 = vmatpush1.bf16.msra.mxu1 %v1523_v5 }
  0x8a   :  { %1074 = vmatmul.mubr.bf16.vlgmr.msra.gmra.mrb[4].mxu1 %v1883_v44 }
  0xb0   :  { %v1123_v49 = vpop.permute.xlu1 %1122 }
  0xc5   :  { %v1133_v0 = vpop.permute.xlu1 %1132 }
 0x139   :  { %v912_v9 = vpop.f32.mrb[0].mxu0  ;;  %v994_v10 = vpop.f32.mrb[0].mxu1 }
 0x13a   :  { %v1092_v11 = vmul.f32 %v912_v9, %v912_v9  ;;  %v914_v12 = vpop.f32.mrb[1].mxu0  ;;  %v996_v1 = vpop.f32.mrb[1].mxu1  ;;  %v1094_v18 = vmul.f32 %v994_v10, %v994_v10 }
 0x13b   :  { %v1083_v13 = vadd.f32 %v914_v12, %v912_v9  ;;  %v1093_v7 = vmul.f32 %v914_v12, %v914_v12  ;;  %v916_v14 = vpop.f32.mrb[2].mxu0  ;;  %v998_v15 = vpop.f32.mrb[2].mxu1  ;;  %v1095_v21 = vmul.f32 %v996_v1, %v996_v1 }
 0x13c   :  { %v917_v16 = vpop.f32.mrb[3].mxu0  ;;  %v999_v17 = vpop.f32.mrb[3].mxu1 }
 0x13d   :  { %v1097_v19 = vadd.f32 %v1093_v7, %v1092_v11  ;;  %v1084_v20 = vadd.f32 %v1083_v13, %v994_v10 }
 0x13f   :  { %v1085_v22 = vadd.f32 %v1084_v20, %v996_v1  ;;  %v1098_v23 = vadd.f32 %v1097_v19, %v1094_v18 }
 0x141   :  { %v1099_v24 = vadd.f32 %v1098_v23, %v1095_v21 }
 0x159   :  { %v1328_v25 = vpop.f32.mrb[4].mxu0 }
 0x15a   :  { %v1329_v26 = vpop.f32.mrb[5].mxu0 }
 0x15b   :  { %v1330_v27 = vadd.f32 %v1329_v26, %v1328_v25  ;;  %v1331_v28 = vpop.f32.mrb[6].mxu0 }
 0x15c   :  { %v1332_v29 = vpop.f32.mrb[7].mxu0 }
 0x15d   :  { %v1075_v30 = vpop.f32.mrb[4].mxu1 }
 0x15e   :  { %v1076_v31 = vadd.f32 %v1330_v27, %v1075_v30  ;;  %v1077_v32 = vpop.f32.mrb[5].mxu1 }
 0x15f   :  { %v1078_v33 = vpop.f32.mrb[6].mxu1 }
 0x160   :  { %v1079_v34 = vpop.f32.mrb[7].mxu1  ;;  %v1087_v35 = vsel %vm1086_vm1, %v1076_v31, 0.0  ;;  %v1096_v36 = vmul.f32 %v1076_v31, %v1076_v31 }
 0x161   :  { %v1088_v37 = vadd.f32 %v1087_v35, %v1085_v22 }
 0x162   :  { %v1100_v38 = vsel %vm1086_vm1, %v1096_v36, 0.0 }
 0x163   :  { %1089 = vadd.xlane.f32.xlu0 %v1088_v37  ;;  %v1101_v39 = vadd.f32 %v1100_v38, %v1099_v24 }
 0x167   :  { %1102 = vadd.xlane.f32.xlu0 %v1101_v39 }
 0x1f0   :  { %v1090_v40 = vpop.xlane.xlu0 %1089 }
 0x1f1   :  { %v1091_v41 = vmul.f32 0.0017301039, %v1090_v40 }
 0x1f3   :  { %v1105_v43 = vmul.f32 %v1091_v41, %v1091_v41  ;;  %v1108_v50 = vsub.f32 %v912_v9, %v1091_v41  ;;  %v1109_v51 = vsub.f32 %v914_v12, %v1091_v41  ;;  %v1110_v52 = vsub.f32 %v994_v10, %v1091_v41 }
 0x1f4   :  { %v1103_v42 = vpop.xlane.xlu0 %1102  ;;  %v1111_v53 = vsub.f32 %v996_v1, %v1091_v41  ;;  %v1112_v54 = vsub.f32 %v1076_v31, %v1091_v41 }
 0x1f5   :  { %v1104_v44 = vmul.f32 0.0017301039, %v1103_v42 }
 0x1f7   :  { %v1106_v45 = vsub.f32 %v1104_v44, %v1105_v43 }
 0x1f9   :  { %v1107_v46 = vmax.f32 %v1106_v45, 0.0 }
 0x1fb   :  { %v1113_v47 = vadd.f32 1e-05, %v1107_v46 }
 0x1fd   :  { %1524 = vrsqrt.f32 %v1113_v47 }
 0x207   :  { %v1525_v48 = vpop.eup %1524 }
 0x208   :  { %v1115_v55 = vmul.f32 %v1525_v48, %v1108_v50  ;;  %v1116_v56 = vmul.f32 %v1525_v48, %v1109_v51  ;;  %v1117_v57 = vmul.f32 %v1525_v48, %v1110_v52  ;;  %v1118_v58 = vmul.f32 %v1525_v48, %v1111_v53 }
 0x209   :  { %v1119_v59 = vmul.f32 %v1525_v48, %v1112_v54 }
 0x20a   :  { %v1125_v60 = vmul.f32 %v1123_v49, %v1115_v55  ;;  %v1126_v61 = vmul.f32 %v1123_v49, %v1116_v56  ;;  %v1127_v62 = vmul.f32 %v1123_v49, %v1117_v57  ;;  %v1128_v63 = vmul.f32 %v1123_v49, %v1118_v58 }
 0x20b   :  { %v1129_v2 = vmul.f32 %v1123_v49, %v1119_v59 }
 0x20c   :  { %v1135_v3 = vadd.f32 %v1133_v0, %v1125_v60  ;;  %v1136_v4 = vadd.f32 %v1133_v0, %v1126_v61  ;;  %v1137_v5 = vadd.f32 %v1133_v0, %v1127_v62  ;;  %v1138_v6 = vadd.f32 %v1133_v0, %v1128_v63 }
 0x20d   :  { %v1139_v8 = vadd.f32 %v1133_v0, %v1129_v2 }
 0x20e   :  { %v1140_v9 = vmax.f32 %v1135_v3, 0.0  ;;  %v1141_v10 = vmax.f32 %v1136_v4, 0.0  ;;  %v1142_v11 = vmax.f32 %v1137_v5, 0.0  ;;  %v1143_v12 = vmax.f32 %v1138_v6, 0.0 }
 0x20f   :  { %v1144_v1 = vmax.f32 %v1139_v8, 0.0 }
 0x210   :  { %v1309_v13 = vpack.c.bf16 %v1141_v10, %v1140_v9  ;;  %v1310_v7 = vpack.c.bf16 %v1143_v12, %v1142_v11 }
 0x211   :  { %v1311_v14 = vpack.c.bf16 %v1144_v1, %v1144_v1 }
 0x212   :  { %1166 = vst [vmem:[%s1992_s4] sm:$0xff] %v1309_v13  ;;  %1167 = vst [vmem:[%s1992_s4 + $0x8] sm:$0xff] %v1310_v7 }
 0x213   :  { %1169 = vst.msk [vmem:[%s1992_s4 + $0x10] sm:$0xf] %vm1168_vm2, %v1311_v14 }

// kernel: resnet18_forward.8
= control target key start
LH: loop header
LB: loop body
LE: loop exit
PB: predicated region body
PF: predicated region fallthrough
CT: control target
= control target key end

     0   :  { %v905_v3 = vmov 0   ;;  %vm129_vm0 = vcmask 130048   ;;  %vm725_vm1 = vcmask 1043456   ;;  %vm721_vm2 = vcmask 588800   ;;  %s1223_s1 = inlined_call_operand.vmem [shape: bf16[16,2048], index: 1, kind: input, shape index: {}]   ;;  %s1224_s0 = inlined_call_operand.vmem [shape: bf16[8,16], index: 0, kind: input, shape index: {}]   ;;  %s1225_s3 = inlined_call_operand.vmem [shape: bf16[72,242], index: 3, kind: input, shape index: {}]   ;;  %s1226_s2 = inlined_call_operand.vmem [shape: bf16[8,72], index: 2, kind: input, shape index: {}]   ;;  %s1227_s6 = inlined_call_operand.vmem [shape: f32[8,1], index: 6, kind: input, shape index: {}]   ;;  %s1228_s5 = inlined_call_operand.vmem [shape: f32[8,1], index: 5, kind: input, shape index: {}]   ;;  %s1229_s4 = inlined_call_operand.vmem [shape: f32[8,1], index: 4, kind: input, shape index: {}]   ;;  %s1230_s7 = inlined_call_operand.vmem [shape: f32[8,1], index: 7, kind: input, shape index: {}]   ;;  %s1231_s8 = inlined_call_operand.vmem [shape: bf16[8,2048], index: 8, kind: output, shape index: {0}]   ;;  %s1232_s9 = inlined_call_operand.vmem [shape: bf16[8,242], index: 9, kind: output, shape index: {1}]  }
   0x1   :  { %v33_v0 = vld [vmem:[%s1223_s1] sm:$0xff]  ;;  %v35_v2 = vld [vmem:[%s1223_s1 + $0x10] sm:$0xff]  ;;  %165 = vmatprep.mubr.bf16.mxu1 %v905_v3  ;;  %247 = vmatprep.mubr.bf16.mxu0 %v905_v3  ;;  %v34_v7 = vld [vmem:[%s1223_s1 + $0x8] sm:$0xff]  ;;  %vm775_vm3 = vcmask 932864   ;;  %vm819_vm4 = vcmask 932868  }
   0x2   :  { %v41_v1 = vld [vmem:[%s1223_s1 + $0x40] sm:$0xff]  ;;  %v43_v6 = vld [vmem:[%s1223_s1 + $0x50] sm:$0xff]  ;;  %886 = vset.pattern.permute.xlu1 %v905_v3  ;;  %885 = vset.pattern.permute.xlu0 %v905_v3  ;;  %v42_v10 = vld [vmem:[%s1223_s1 + $0x48] sm:$0xff] }
   0x3   :  { %v831_v4 = vcombine.high %v33_v0, %v41_v1  ;;  %v830_v5 = vcombine.low %v33_v0, %v41_v1  ;;  %v835_v8 = vcombine.high %v35_v2, %v43_v6  ;;  %v834_v9 = vcombine.low %v35_v2, %v43_v6  ;;  %v37_v11 = vld [vmem:[%s1223_s1 + $0x20] sm:$0xff]  ;;  %v36_v15 = vld [vmem:[%s1223_s1 + $0x18] sm:$0xff]  ;;  %v39_v19 = vld [vmem:[%s1223_s1 + $0x30] sm:$0xff] }
   0x4   :  { %v45_v12 = vld [vmem:[%s1223_s1 + $0x60] sm:$0xff]  ;;  %v833_v13 = vcombine.high %v34_v7, %v42_v10  ;;  %v44_v16 = vld [vmem:[%s1223_s1 + $0x58] sm:$0xff]  ;;  %v832_v18 = vcombine.low %v34_v7, %v42_v10  ;;  %v47_v20 = vld [vmem:[%s1223_s1 + $0x70] sm:$0xff] }
   0x5   :  { %133 = vmatprep.subr.bf16.mxu1 %v831_v4  ;;  %v839_v14 = vcombine.high %v37_v11, %v45_v12  ;;  %215 = vmatprep.subr.bf16.mxu0 %v835_v8  ;;  %v993_v17 = vld [vmem:[%s1224_s0] sm:$0xf]  ;;  %v838_v21 = vcombine.low %v37_v11, %v45_v12  ;;  %v837_v22 = vcombine.high %v36_v15, %v44_v16  ;;  %v38_v24 = vld [vmem:[%s1223_s1 + $0x28] sm:$0xff]  ;;  %v40_v30 = vld [vmem:[%s1223_s1 + $0x38] sm:$0xff] }
   0x6   :  { %134 = vmatpush1.bf16.msra.mxu1 %v830_v5  ;;  %216 = vmatpush1.bf16.msra.mxu0 %v834_v9  ;;  %v843_v23 = vcombine.high %v39_v19, %v47_v20  ;;  %v46_v25 = vld [vmem:[%s1223_s1 + $0x68] sm:$0xff]  ;;  %v836_v26 = vcombine.low %v36_v15, %v44_v16  ;;  %v842_v27 = vcombine.low %v39_v19, %v47_v20  ;;  %v48_v31 = vld [vmem:[%s1223_s1 + $0x78] sm:$0xff]  ;;  %v675_v41 = vld [vmem:[%s1225_s3 + $0x40] sm:$0xff] }
   0x7   :  { %174 = vmatprep.subr.bf16.mxu1 %v833_v13  ;;  %297 = vmatprep.subr.bf16.mxu0 %v839_v14  ;;  %v841_v28 = vcombine.high %v38_v24, %v46_v25  ;;  %v889_v29 = vld [vmem:[%s1225_s3 + $0x4] ss:$8 sps:$4 sm:$0xff]   ;;  %v840_v32 = vcombine.low %v38_v24, %v46_v25  ;;  %v887_v33 = vld [vmem:[%s1225_s3] ss:$8 sps:$4 sm:$0xff]   ;;  %v892_v34 = vld [vmem:[%s1225_s3 + $0x14] ss:$8 sps:$4 sm:$0xff]   ;;  %v845_v35 = vcombine.high %v40_v30, %v48_v31 }
   0x8   :  { %v890_v36 = vld [vmem:[%s1225_s3 + $0x10] ss:$8 sps:$4 sm:$0xff]   ;;  %v895_v37 = vld [vmem:[%s1225_s3 + $0x24] ss:$8 sps:$4 sm:$0xff]   ;;  %v844_v38 = vcombine.low %v40_v30, %v48_v31  ;;  %v893_v39 = vld [vmem:[%s1225_s3 + $0x20] ss:$8 sps:$4 sm:$0xff]   ;;  %v871_v43 = vcombine.high %v675_v41, %v675_v41  ;;  %v870_v44 = vcombine.low %v675_v41, %v675_v41 }
   0x9   :  { %846 = vmatmul.mubr.msk.bf16.vlgmr.msra.gmra.mrb[0].mxu1 %vm129_vm0, %v993_v17  ;;  %848 = vmatmul.mubr.msk.bf16.vlgmr.msra.gmra.mrb[0].mxu0 %vm129_vm0, %v993_v17  ;;  %v898_v40 = vld [vmem:[%s1225_s3 + $0x34] ss:$8 sps:$4 sm:$0xff]   ;;  %v896_v42 = vld [vmem:[%s1225_s3 + $0x30] ss:$8 sps:$4 sm:$0xff]   ;;  %v666_v46 = vld [vmem:[%s1226_s2] sm:$0xf] }
   0xa   :  { %175 = vmatpush1.bf16.msra.mxu1 %v832_v18  ;;  %298 = vmatpush1.bf16.msra.mxu0 %v838_v21  ;;  %v727_v45 = vsel %vm725_vm1, %v870_v44, 0  ;;  %vm820_vm5 = vmor %vm819_vm4, %vm725_vm1 }
   0xb   :  { %206 = vmatprep.mubr.bf16.mxu1 %v905_v3  ;;  %256 = vmatprep.subr.bf16.mxu1 %v837_v22 }
   0xc   :  { %329 = vmatprep.mubr.bf16.mxu0 %v905_v3  ;;  %379 = vmatprep.subr.bf16.mxu0 %v843_v23 }
  0x11   :  { %847 = vmatmul.mubr.msk.bf16.vlgmr.msra.gmra.mrb[4].mxu1 %vm129_vm0, %v993_v17  ;;  %850 = vmatmul.mubr.msk.bf16.vlgmr.msra.gmra.mrb[4].mxu0 %vm129_vm0, %v993_v17 }
  0x12   :  { %257 = vmatpush1.bf16.msra.mxu1 %v836_v26  ;;  %380 = vmatpush1.bf16.msra.mxu0 %v842_v27 }
  0x13   :  { %288 = vmatprep.mubr.bf16.mxu1 %v905_v3  ;;  %338 = vmatprep.subr.bf16.mxu1 %v841_v28 }
  0x14   :  { %411 = vmatprep.mubr.bf16.mxu0 %v905_v3  ;;  %732 = vmatprep.subr.bf16.mxu0 %v889_v29 }
  0x19   :  { %849 = vmatmul.mubr.msk.bf16.vlgmr.msra.gmra.mrb[8].mxu1 %vm129_vm0, %v993_v17  ;;  %852 = vmatmul.mubr.msk.bf16.vlgmr.msra.gmra.mrb[8].mxu0 %vm129_vm0, %v993_v17 }
  0x1a   :  { %339 = vmatpush1.bf16.msra.mxu1 %v840_v32  ;;  %733 = vmatpush1.bf16.msra.mxu0 %v887_v33 }
  0x1b   :  { %370 = vmatprep.mubr.bf16.mxu1 %v905_v3  ;;  %734 = vmatprep.subr.bf16.mxu0 %v892_v34 }
  0x1c   :  { %420 = vmatprep.subr.bf16.mxu1 %v845_v35  ;;  %764 = vmatprep.mubr.bf16.mxu0 %v905_v3 }
  0x1e   :  { %735 = vmatpush1.bf16.msra.mxu0 %v890_v36 }
  0x1f   :  { %736 = vmatprep.subr.bf16.mxu0 %v895_v37 }
  0x21   :  { %851 = vmatmul.mubr.msk.bf16.vlgmr.msra.gmra.mrb[12].mxu1 %vm129_vm0, %v993_v17 }
  0x22   :  { %421 = vmatpush1.bf16.msra.mxu1 %v844_v38  ;;  %452 = vmatprep.mubr.bf16.mxu1 %v905_v3 }
  0x23   :  { %737 = vmatpush1.bf16.msra.mxu0 %v893_v39 }
  0x24   :  { %738 = vmatprep.subr.bf16.mxu0 %v898_v40 }
  0x27   :  { %739 = vmatpush1.bf16.msra.mxu0 %v896_v42 }
  0x28   :  { %872 = vmatprep.subr.msk.bf16.mxu0 %vm725_vm1, %v871_v43 }
  0x29   :  { %853 = vmatmul.mubr.msk.bf16.vlgmr.msra.gmra.mrb[16].mxu1 %vm129_vm0, %v993_v17 }
  0x2b   :  { %741 = vmatpush1.bf16.msra.mxu0 %v727_v45 }
  0x2e   :  { %873 = vmatmul.mubr.msk.bf16.vlgmr.msra.gmra.mrb[12].mxu0 %vm721_vm2, %v666_v46 }
  0xdc   :  { %v1068_v47 = vpop.f32.mrb[0].mxu1  ;;  %v1074_v50 = vpop.f32.mrb[0].mxu0 }
  0xdd   :  { %v481_v48 = vmul.f32 %v1068_v47, %v1068_v47  ;;  %v1072_v49 = vpop.f32.mrb[1].mxu1  ;;  %v1080_v54 = vpop.f32.mrb[1].mxu0  ;;  %v485_v5 = vmul.f32 %v1074_v50, %v1074_v50 }
  0xde   :  { %v463_v51 = vadd.f32 %v1072_v49, %v1068_v47  ;;  %v482_v52 = vmul.f32 %v1072_v49, %v1072_v49  ;;  %v171_v53 = vpop.f32.mrb[2].mxu1  ;;  %v253_v56 = vpop.f32.mrb[2].mxu0  ;;  %v486_v13 = vmul.f32 %v1080_v54, %v1080_v54 }
  0xdf   :  { %v172_v55 = vpop.f32.mrb[3].mxu1  ;;  %v254_v58 = vpop.f32.mrb[3].mxu0 }
  0xe0   :  { %v497_v57 = vadd.f32 %v482_v52, %v481_v48 }
  0xe4   :  { %v1082_v59 = vpop.f32.mrb[4].mxu1  ;;  %v1089_v63 = vpop.f32.mrb[4].mxu0 }
  0xe5   :  { %v464_v60 = vadd.f32 %v463_v51, %v1082_v59  ;;  %v483_v61 = vmul.f32 %v1082_v59, %v1082_v59  ;;  %v1087_v62 = vpop.f32.mrb[5].mxu1  ;;  %v1093_v2 = vpop.f32.mrb[5].mxu0  ;;  %v489_v25 = vmul.f32 %v1089_v63, %v1089_v63 }
  0xe6   :  { %v484_v0 = vmul.f32 %v1087_v62, %v1087_v62  ;;  %v212_v1 = vpop.f32.mrb[6].mxu1  ;;  %v335_v7 = vpop.f32.mrb[6].mxu0  ;;  %v490_v33 = vmul.f32 %v1093_v2, %v1093_v2 }
  0xe7   :  { %v498_v3 = vadd.f32 %v497_v57, %v483_v61  ;;  %v465_v4 = vadd.f32 %v464_v60, %v1087_v62  ;;  %v213_v6 = vpop.f32.mrb[7].mxu1  ;;  %v336_v8 = vpop.f32.mrb[7].mxu0 }
  0xe9   :  { %v499_v9 = vadd.f32 %v498_v3, %v484_v0  ;;  %v466_v10 = vadd.f32 %v465_v4, %v1074_v50 }
  0xeb   :  { %v500_v11 = vadd.f32 %v499_v9, %v485_v5  ;;  %v467_v12 = vadd.f32 %v466_v10, %v1080_v54 }
  0xec   :  { %v1102_v14 = vpop.f32.mrb[8].mxu1  ;;  %v1109_v19 = vpop.f32.mrb[8].mxu0 }
  0xed   :  { %v501_v15 = vadd.f32 %v500_v11, %v486_v13  ;;  %v468_v16 = vadd.f32 %v467_v12, %v1102_v14  ;;  %v487_v17 = vmul.f32 %v1102_v14, %v1102_v14  ;;  %v1107_v18 = vpop.f32.mrb[9].mxu1  ;;  %v1113_v22 = vpop.f32.mrb[9].mxu0  ;;  %v493_v43 = vmul.f32 %v1109_v19, %v1109_v19 }
  0xee   :  { %v488_v20 = vmul.f32 %v1107_v18, %v1107_v18  ;;  %v294_v21 = vpop.f32.mrb[10].mxu1  ;;  %v417_v27 = vpop.f32.mrb[10].mxu0  ;;  %v494_v52 = vmul.f32 %v1113_v22, %v1113_v22 }
  0xef   :  { %v502_v23 = vadd.f32 %v501_v15, %v487_v17  ;;  %v469_v24 = vadd.f32 %v468_v16, %v1107_v18  ;;  %v295_v26 = vpop.f32.mrb[11].mxu1  ;;  %v418_v28 = vpop.f32.mrb[11].mxu0  ;;  %v773_v16 = vld [vmem:[%s1227_s6] sm:$0xff] }
  0xf0   :  { %v462_v17 = vld [vmem:[%s1228_s5] sm:$0xff] }
  0xf1   :  { %v503_v29 = vadd.f32 %v502_v23, %v488_v20  ;;  %v470_v30 = vadd.f32 %v469_v24, %v1089_v63  ;;  %v461_v20 = vld [vmem:[%s1229_s4] sm:$0xff] }
  0xf2   :  { %v774_v21 = vld [vmem:[%s1230_s7] sm:$0xff] }
  0xf3   :  { %v504_v31 = vadd.f32 %v503_v29, %v489_v25  ;;  %v471_v32 = vadd.f32 %v470_v30, %v1093_v2 }
  0xf4   :  { %v1122_v34 = vpop.f32.mrb[12].mxu1 }
  0xf5   :  { %v505_v35 = vadd.f32 %v504_v31, %v490_v33  ;;  %v472_v36 = vadd.f32 %v471_v32, %v1122_v34  ;;  %v491_v37 = vmul.f32 %v1122_v34, %v1122_v34  ;;  %v1127_v38 = vpop.f32.mrb[13].mxu1 }
  0xf6   :  { %v492_v39 = vmul.f32 %v1127_v38, %v1127_v38  ;;  %v376_v40 = vpop.f32.mrb[14].mxu1 }
  0xf7   :  { %v506_v41 = vadd.f32 %v505_v35, %v491_v37  ;;  %v473_v42 = vadd.f32 %v472_v36, %v1127_v38  ;;  %v377_v44 = vpop.f32.mrb[15].mxu1 }
  0xf9   :  { %v507_v45 = vadd.f32 %v506_v41, %v492_v39  ;;  %v474_v46 = vadd.f32 %v473_v42, %v1109_v19 }
  0xfb   :  { %v508_v48 = vadd.f32 %v507_v45, %v493_v43  ;;  %v475_v51 = vadd.f32 %v474_v46, %v1113_v22 }
  0xfc   :  { %v1138_v53 = vpop.f32.mrb[16].mxu1 }
  0xfd   :  { %v495_v55 = vmul.f32 %v1138_v53, %v1138_v53  ;;  %v1142_v56 = vpop.f32.mrb[17].mxu1  ;;  %v476_v57 = vadd.f32 %v475_v51, %v1138_v53  ;;  %v509_v58 = vadd.f32 %v508_v48, %v494_v52 }
  0xfe   :  { %v458_v60 = vpop.f32.mrb[18].mxu1  ;;  %v496_v61 = vmul.f32 %v1142_v56, %v1142_v56 }
  0xff   :  { %v459_v0 = vpop.f32.mrb[19].mxu1  ;;  %v477_v1 = vadd.f32 %v476_v57, %v1142_v56  ;;  %v510_v3 = vadd.f32 %v509_v58, %v495_v55 }
 0x101   :  { %v1148_v4 = vpop.f32.mrb[12].mxu0  ;;  %478 = vadd.xlane.f32.xlu0 %v477_v1  ;;  %v511_v5 = vadd.f32 %v510_v3, %v496_v61 }
 0x102   :  { %v1150_v6 = vpop.f32.mrb[13].mxu0  ;;  %v781_v7 = vmul.f32 %v1148_v4, %v1148_v4 }
 0x103   :  { %v782_v8 = vmul.f32 %v1150_v6, %v1150_v6  ;;  %512 = vadd.xlane.f32.xlu1 %v511_v5  ;;  %v776_v9 = vsel %vm775_vm3, %v1150_v6, 0.0  ;;  %v770_v10 = vpop.f32.mrb[14].mxu0 }
 0x104   :  { %v777_v11 = vadd.f32 %v776_v9, %v1148_v4  ;;  %v771_v12 = vpop.f32.mrb[15].mxu0 }
 0x105   :  { %v783_v13 = vsel %vm775_vm3, %v782_v8, 0.0 }
 0x106   :  { %778 = vadd.xlane.f32.xlu0 %v777_v11  ;;  %v784_v15 = vadd.f32 %v783_v13, %v781_v7 }
 0x114   :  { %799 = vperm.xlu1 %886, %v773_v16  }
 0x118   :  { %575 = vperm.xlu1 %886, %v462_v17  }
 0x11c   :  { %554 = vperm.xlu0 %885, %v461_v20  }
 0x13c   :  { %785 = vadd.xlane.f32.xlu1 %v784_v15 }
 0x14d   :  { %806 = vperm.xlu1 %886, %v774_v21  }
 0x18e   :  { %v479_v23 = vpop.xlane.xlu0 %478 }
 0x18f   :  { %v480_v24 = vmul.f32 0.00048828125, %v479_v23 }
 0x190   :  { %v513_v25 = vpop.xlane.xlu1 %512 }
 0x191   :  { %v514_v26 = vmul.f32 0.00048828125, %v513_v25  ;;  %v515_v27 = vmul.f32 %v480_v24, %v480_v24  ;;  %v518_v31 = vsub.f32 %v1068_v47, %v480_v24  ;;  %v519_v32 = vsub.f32 %v1072_v49, %v480_v24 }
 0x192   :  { %v520_v33 = vsub.f32 %v1082_v59, %v480_v24  ;;  %v521_v35 = vsub.f32 %v1087_v62, %v480_v24  ;;  %v522_v37 = vsub.f32 %v1074_v50, %v480_v24  ;;  %v523_v39 = vsub.f32 %v1080_v54, %v480_v24 }
 0x193   :  { %v516_v28 = vsub.f32 %v514_v26, %v515_v27  ;;  %v1174_v36 = vpop.xlane.xlu0 %778  ;;  %v524_v40 = vsub.f32 %v1102_v14, %v480_v24  ;;  %v525_v41 = vsub.f32 %v1107_v18, %v480_v24  ;;  %v526_v42 = vsub.f32 %v1089_v63, %v480_v24 }
 0x194   :  { %v527_v47 = vsub.f32 %v1093_v2, %v480_v24  ;;  %v528_v49 = vsub.f32 %v1122_v34, %v480_v24  ;;  %v529_v59 = vsub.f32 %v1127_v38, %v480_v24  ;;  %v530_v62 = vsub.f32 %v1109_v19, %v480_v24  ;;  %v1188_v63 = vpop.permute.xlu1 %799 }
 0x195   :  { %v517_v29 = vmax.f32 %v516_v28, 0.0  ;;  %v531_v44 = vsub.f32 %v1113_v22, %v480_v24  ;;  %v532_v50 = vsub.f32 %v1138_v53, %v480_v24  ;;  %v533_v54 = vsub.f32 %v1142_v56, %v480_v24 }
 0x197   :  { %v534_v30 = vadd.f32 1e-05, %v517_v29 }
 0x198   :  { %v576_v13 = vpop.permute.xlu1 %575 }
 0x199   :  { %901 = vrsqrt.f32 %v534_v30 }
 0x19b   :  { %v555_v38 = vpop.permute.xlu0 %554 }
 0x1a3   :  { %v902_v43 = vpop.eup %901 }
 0x1a4   :  { %v536_v14 = vmul.f32 %v902_v43, %v518_v31  ;;  %v537_v45 = vmul.f32 %v902_v43, %v519_v32  ;;  %v538_v18 = vmul.f32 %v902_v43, %v520_v33  ;;  %v539_v46 = vmul.f32 %v902_v43, %v521_v35 }
 0x1a5   :  { %v540_v2 = vmul.f32 %v902_v43, %v522_v37  ;;  %v541_v48 = vmul.f32 %v902_v43, %v523_v39  ;;  %v542_v34 = vmul.f32 %v902_v43, %v524_v40  ;;  %v543_v51 = vmul.f32 %v902_v43, %v525_v41 }
 0x1a6   :  { %v544_v52 = vmul.f32 %v902_v43, %v526_v42  ;;  %v545_v55 = vmul.f32 %v902_v43, %v527_v47  ;;  %v546_v19 = vmul.f32 %v902_v43, %v528_v49  ;;  %v547_v57 = vmul.f32 %v902_v43, %v529_v59 }
 0x1a7   :  { %v548_v22 = vmul.f32 %v902_v43, %v530_v62  ;;  %v549_v58 = vmul.f32 %v902_v43, %v531_v44  ;;  %v550_v53 = vmul.f32 %v902_v43, %v532_v50  ;;  %v551_v60 = vmul.f32 %v902_v43, %v533_v54 }
 0x1a8   :  { %v557_v56 = vmul.f32 %v555_v38, %v536_v14  ;;  %v558_v61 = vmul.f32 %v555_v38, %v537_v45  ;;  %v559_v0 = vmul.f32 %v555_v38, %v538_v18  ;;  %v560_v1 = vmul.f32 %v555_v38, %v539_v46 }
 0x1a9   :  { %v561_v3 = vmul.f32 %v555_v38, %v540_v2  ;;  %v562_v5 = vmul.f32 %v555_v38, %v541_v48  ;;  %v563_v7 = vmul.f32 %v555_v38, %v542_v34  ;;  %v564_v8 = vmul.f32 %v555_v38, %v543_v51 }
 0x1aa   :  { %v565_v9 = vmul.f32 %v555_v38, %v544_v52  ;;  %v566_v10 = vmul.f32 %v555_v38, %v545_v55  ;;  %v567_v11 = vmul.f32 %v555_v38, %v546_v19  ;;  %v568_v12 = vmul.f32 %v555_v38, %v547_v57 }
 0x1ab   :  { %v569_v15 = vmul.f32 %v555_v38, %v548_v22  ;;  %v570_v16 = vmul.f32 %v555_v38, %v549_v58  ;;  %v571_v17 = vmul.f32 %v555_v38, %v550_v53  ;;  %v572_v20 = vmul.f32 %v555_v38, %v551_v60 }
 0x1ac   :  { %v578_v21 = vadd.f32 %v576_v13, %v557_v56  ;;  %v579_v23 = vadd.f32 %v576_v13, %v558_v61  ;;  %v580_v24 = vadd.f32 %v576_v13, %v559_v0  ;;  %v581_v25 = vadd.f32 %v576_v13, %v560_v1 }
 0x1ad   :  { %v582_v26 = vadd.f32 %v576_v13, %v561_v3  ;;  %v583_v27 = vadd.f32 %v576_v13, %v562_v5  ;;  %v584_v28 = vadd.f32 %v576_v13, %v563_v7  ;;  %v585_v29 = vadd.f32 %v576_v13, %v564_v8 }
 0x1ae   :  { %v586_v30 = vadd.f32 %v576_v13, %v565_v9  ;;  %v587_v31 = vadd.f32 %v576_v13, %v566_v10  ;;  %v588_v32 = vadd.f32 %v576_v13, %v567_v11  ;;  %v589_v33 = vadd.f32 %v576_v13, %v568_v12 }
 0x1af   :  { %v590_v35 = vadd.f32 %v576_v13, %v569_v15  ;;  %v591_v37 = vadd.f32 %v576_v13, %v570_v16  ;;  %v592_v39 = vadd.f32 %v576_v13, %v571_v17  ;;  %v593_v40 = vadd.f32 %v576_v13, %v572_v20 }
 0x1b0   :  { %v875_v41 = vpack.c.bf16 %v579_v23, %v578_v21  ;;  %v876_v42 = vpack.c.bf16 %v581_v25, %v580_v24  ;;  %v877_v47 = vpack.c.bf16 %v583_v27, %v582_v26  ;;  %v878_v49 = vpack.c.bf16 %v585_v29, %v584_v28 }
 0x1b1   :  { %v879_v59 = vpack.c.bf16 %v587_v31, %v586_v30  ;;  %v880_v43 = vpack.c.bf16 %v589_v33, %v588_v32  ;;  %v881_v62 = vpack.c.bf16 %v591_v37, %v590_v35  ;;  %v882_v44 = vpack.c.bf16 %v593_v40, %v592_v39 }
 0x1b2   :  { %658 = vst [vmem:[%s1231_s8] sm:$0xff] %v875_v41  ;;  %659 = vst [vmem:[%s1231_s8 + $0x8] sm:$0xff] %v876_v42  ;;  %v780_v50 = vmul.f32 0.004132231, %v1174_v36 }
 0x1b3   :  { %660 = vst [vmem:[%s1231_s8 + $0x10] sm:$0xff] %v877_v47  ;;  %661 = vst [vmem:[%s1231_s8 + $0x18] sm:$0xff] %v878_v49 }
 0x1b4   :  { %662 = vst [vmem:[%s1231_s8 + $0x20] sm:$0xff] %v879_v59  ;;  %663 = vst [vmem:[%s1231_s8 + $0x28] sm:$0xff] %v880_v43  ;;  %v788_v45 = vmul.f32 %v780_v50, %v780_v50  ;;  %v791_v48 = vsub.f32 %v1148_v4, %v780_v50  ;;  %v792_v34 = vsub.f32 %v1150_v6, %v780_v50 }
 0x1b5   :  { %664 = vst [vmem:[%s1231_s8 + $0x30] sm:$0xff] %v881_v62  ;;  %665 = vst [vmem:[%s1231_s8 + $0x38] sm:$0xff] %v882_v44 }
 0x1c9   :  { %v786_v54 = vpop.xlane.xlu1 %785 }
 0x1ca   :  { %v787_v14 = vmul.f32 0.004132231, %v786_v54 }
 0x1cc   :  { %v789_v18 = vsub.f32 %v787_v14, %v788_v45 }
 0x1cd   :  { %v807_v36 = vpop.permute.xlu1 %806 }
 0x1ce   :  { %v790_v46 = vmax.f32 %v789_v18, 0.0 }
 0x1d0   :  { %v793_v2 = vadd.f32 1e-05, %v790_v46 }
 0x1d2   :  { %903 = vrsqrt.f32 %v793_v2 }
 0x1dc   :  { %v904_v51 = vpop.eup %903 }
 0x1dd   :  { %v795_v38 = vmul.f32 %v904_v51, %v791_v48  ;;  %v796_v52 = vmul.f32 %v904_v51, %v792_v34 }
 0x1df   :  { %v802_v55 = vmul.f32 %v1188_v63, %v795_v38  ;;  %v803_v19 = vmul.f32 %v1188_v63, %v796_v52 }
 0x1e1   :  { %v809_v57 = vadd.f32 %v807_v36, %v802_v55  ;;  %v810_v22 = vadd.f32 %v807_v36, %v803_v19 }
 0x1e3   :  { %v883_v58 = vpack.c.bf16 %v810_v22, %v809_v57 }
 0x1e5   :  { %821 = vst.msk [vmem:[%s1232_s9] sm:$0xff] %vm820_vm5, %v883_v58 }

// kernel: resnet18_forward.9
= control target key start
LH: loop header
LB: loop body
LE: loop exit
PB: predicated region body
PF: predicated region fallthrough
CT: control target
= control target key end

     0   :  { %v1920_v1 = vmov 0   ;;  %vm864_vm0 = vcmask 130048   ;;  %vm1192_vm1 = vcmask 539648   ;;  %vm1500_vm2 = vcmask 535552   ;;  %s2638_s1 = inlined_call_operand.vmem [shape: bf16[400,578], index: 1, kind: input, shape index: {}]   ;;  %s2639_s0 = inlined_call_operand.vmem [shape: bf16[32,400], index: 0, kind: input, shape index: {}]   ;;  %s2640_s2 = inlined_call_operand.vmem [shape: f32[32,1], index: 2, kind: input, shape index: {}]   ;;  %s2641_s3 = inlined_call_operand.vmem [shape: f32[32,1], index: 3, kind: input, shape index: {}]   ;;  %s2642_s4 = inlined_call_operand.vmem [shape: bf16[32,578], index: 4, kind: output, shape index: {}]  }
   0x1   :  { %v1725_v0 = vld [vmem:[%s2638_s1 + $0x4] ss:$20 sps:$4 sm:$0xff]   ;;  %1724 = vset.pattern.permute.xlu1 %v1920_v1  ;;  %1723 = vset.pattern.permute.xlu0 %v1920_v1  ;;  %v1727_v2 = vld [vmem:[%s2638_s1 + $0xc] ss:$20 sps:$4 sm:$0xff]   ;;  %v1730_v4 = vld [vmem:[%s2638_s1 + $0x8] ss:$20 sps:$4 sm:$0xff]  }
   0x2   :  { %871 = vmatprep.subr.bf16.mxu0 %v1725_v0  ;;  %v1729_v3 = vld [vmem:[%s2638_s1] ss:$20 sps:$4 sm:$0xff]   ;;  %977 = vmatprep.subr.bf16.mxu1 %v1727_v2  ;;  %v1735_v7 = vld [vmem:[%s2638_s1 + $0x28] ss:$20 sps:$4 sm:$0xff]   ;;  %v1736_v8 = vld [vmem:[%s2638_s1 + $0x30] ss:$20 sps:$4 sm:$0xff]  }
   0x3   :  { %v1731_v5 = vld [vmem:[%s2638_s1 + $0x2c] ss:$20 sps:$4 sm:$0xff]   ;;  %872 = vmatpush1.bf16.msra.mxu0 %v1729_v3  ;;  %978 = vmatpush1.bf16.msra.mxu1 %v1730_v4  ;;  %v1733_v6 = vld [vmem:[%s2638_s1 + $0x34] ss:$20 sps:$4 sm:$0xff]   ;;  %v1739_v10 = vld [vmem:[%s2638_s1 + $0x5c] ss:$20 sps:$4 sm:$0xff]  }
   0x4   :  { %873 = vmatprep.subr.bf16.mxu0 %v1731_v5  ;;  %979 = vmatprep.subr.bf16.mxu1 %v1733_v6  ;;  %v1737_v9 = vld [vmem:[%s2638_s1 + $0x54] ss:$20 sps:$4 sm:$0xff]   ;;  %v1741_v11 = vld [vmem:[%s2638_s1 + $0x50] ss:$20 sps:$4 sm:$0xff]   ;;  %v1742_v12 = vld [vmem:[%s2638_s1 + $0x58] ss:$20 sps:$4 sm:$0xff]  }
   0x5   :  { %v1743_v13 = vld [vmem:[%s2638_s1 + $0x7c] ss:$20 sps:$4 sm:$0xff]   ;;  %v1745_v14 = vld [vmem:[%s2638_s1 + $0x84] ss:$20 sps:$4 sm:$0xff]   ;;  %v1748_v16 = vld [vmem:[%s2638_s1 + $0x80] ss:$20 sps:$4 sm:$0xff]  }
   0x6   :  { %v1747_v15 = vld [vmem:[%s2638_s1 + $0x78] ss:$20 sps:$4 sm:$0xff]   ;;  %v1753_v19 = vld [vmem:[%s2638_s1 + $0xa0] ss:$20 sps:$4 sm:$0xff]   ;;  %v1754_v20 = vld [vmem:[%s2638_s1 + $0xa8] ss:$20 sps:$4 sm:$0xff]  }
   0x7   :  { %874 = vmatpush1.bf16.msra.mxu0 %v1735_v7  ;;  %980 = vmatpush1.bf16.msra.mxu1 %v1736_v8  ;;  %v1749_v17 = vld [vmem:[%s2638_s1 + $0xa4] ss:$20 sps:$4 sm:$0xff]   ;;  %v1751_v18 = vld [vmem:[%s2638_s1 + $0xac] ss:$20 sps:$4 sm:$0xff]   ;;  %v1757_v22 = vld [vmem:[%s2638_s1 + $0xd4] ss:$20 sps:$4 sm:$0xff]  }
   0x8   :  { %875 = vmatprep.subr.bf16.mxu0 %v1737_v9  ;;  %981 = vmatprep.subr.bf16.mxu1 %v1739_v10  ;;  %v1755_v21 = vld [vmem:[%s2638_s1 + $0xcc] ss:$20 sps:$4 sm:$0xff]   ;;  %v1759_v23 = vld [vmem:[%s2638_s1 + $0xc8] ss:$20 sps:$4 sm:$0xff]   ;;  %v1760_v24 = vld [vmem:[%s2638_s1 + $0xd0] ss:$20 sps:$4 sm:$0xff]  }
   0x9   :  { %v1761_v25 = vld [vmem:[%s2638_s1 + $0xf4] ss:$20 sps:$4 sm:$0xff]   ;;  %v1763_v26 = vld [vmem:[%s2638_s1 + $0xfc] ss:$20 sps:$4 sm:$0xff]   ;;  %v1766_v28 = vld [vmem:[%s2638_s1 + $0xf8] ss:$20 sps:$4 sm:$0xff]  }
   0xa   :  { %v1765_v27 = vld [vmem:[%s2638_s1 + $0xf0] ss:$20 sps:$4 sm:$0xff]   ;;  %v1771_v31 = vld [vmem:[%s2638_s1 + $0x118] ss:$20 sps:$4 sm:$0xff]   ;;  %v1772_v32 = vld [vmem:[%s2638_s1 + $0x120] ss:$20 sps:$4 sm:$0xff]  }
   0xb   :  { %876 = vmatpush1.bf16.msra.mxu0 %v1741_v11  ;;  %982 = vmatpush1.bf16.msra.mxu1 %v1742_v12  ;;  %v1767_v29 = vld [vmem:[%s2638_s1 + $0x11c] ss:$20 sps:$4 sm:$0xff]   ;;  %v1769_v30 = vld [vmem:[%s2638_s1 + $0x124] ss:$20 sps:$4 sm:$0xff]   ;;  %v1775_v34 = vld [vmem:[%s2638_s1 + $0x14c] ss:$20 sps:$4 sm:$0xff]  }
   0xc   :  { %877 = vmatprep.subr.bf16.mxu0 %v1743_v13  ;;  %983 = vmatprep.subr.bf16.mxu1 %v1745_v14  ;;  %v1773_v33 = vld [vmem:[%s2638_s1 + $0x144] ss:$20 sps:$4 sm:$0xff]   ;;  %v1777_v35 = vld [vmem:[%s2638_s1 + $0x140] ss:$20 sps:$4 sm:$0xff]   ;;  %v1778_v36 = vld [vmem:[%s2638_s1 + $0x148] ss:$20 sps:$4 sm:$0xff]  }
   0xd   :  { %v1779_v37 = vld [vmem:[%s2638_s1 + $0x16c] ss:$20 sps:$4 sm:$0xff]   ;;  %v1781_v38 = vld [vmem:[%s2638_s1 + $0x174] ss:$20 sps:$4 sm:$0xff]   ;;  %v1784_v40 = vld [vmem:[%s2638_s1 + $0x170] ss:$20 sps:$4 sm:$0xff]  }
   0xe   :  { %v1783_v39 = vld [vmem:[%s2638_s1 + $0x168] ss:$20 sps:$4 sm:$0xff]   ;;  %v1789_v43 = vld [vmem:[%s2638_s1 + $0x190] ss:$20 sps:$4 sm:$0xff]   ;;  %v1790_v44 = vld [vmem:[%s2638_s1 + $0x198] ss:$20 sps:$4 sm:$0xff]  }
   0xf   :  { %878 = vmatpush1.bf16.msra.mxu0 %v1747_v15  ;;  %984 = vmatpush1.bf16.msra.mxu1 %v1748_v16  ;;  %v1785_v41 = vld [vmem:[%s2638_s1 + $0x194] ss:$20 sps:$4 sm:$0xff]   ;;  %v1787_v42 = vld [vmem:[%s2638_s1 + $0x19c] ss:$20 sps:$4 sm:$0xff]   ;;  %v1793_v46 = vld [vmem:[%s2638_s1 + $0x1c4] ss:$20 sps:$4 sm:$0xff]  }
  0x10   :  { %879 = vmatprep.subr.bf16.mxu0 %v1749_v17  ;;  %985 = vmatprep.subr.bf16.mxu1 %v1751_v18  ;;  %v1791_v45 = vld [vmem:[%s2638_s1 + $0x1bc] ss:$20 sps:$4 sm:$0xff]   ;;  %v1795_v47 = vld [vmem:[%s2638_s1 + $0x1b8] ss:$20 sps:$4 sm:$0xff]   ;;  %v2092_v48 = vld [vmem:[%s2639_s0 + $0x4] ss:$16 sps:$4 sm:$0xff]  }
  0x11   :  { %v1796_v49 = vld [vmem:[%s2638_s1 + $0x1c0] ss:$20 sps:$4 sm:$0xff]   ;;  %v1797_v50 = vld [vmem:[%s2638_s1 + $0x1e4] ss:$20 sps:$4 sm:$0xff]   ;;  %903 = vmatprep.mubr.bf16.mxu0 %v2092_v48  ;;  %1009 = vmatprep.mubr.bf16.mxu1 %v2092_v48  ;;  %v1802_v53 = vld [vmem:[%s2638_s1 + $0x1e8] ss:$20 sps:$4 sm:$0xff]  }
  0x12   :  { %v1799_v51 = vld [vmem:[%s2638_s1 + $0x1ec] ss:$20 sps:$4 sm:$0xff]   ;;  %v1805_v55 = vld [vmem:[%s2638_s1 + $0x214] ss:$20 sps:$4 sm:$0xff]   ;;  %v1808_v57 = vld [vmem:[%s2638_s1 + $0x210] ss:$20 sps:$4 sm:$0xff]  }
  0x13   :  { %880 = vmatpush1.bf16.msra.mxu0 %v1753_v19  ;;  %986 = vmatpush1.bf16.msra.mxu1 %v1754_v20  ;;  %v1801_v52 = vld [vmem:[%s2638_s1 + $0x1e0] ss:$20 sps:$4 sm:$0xff]   ;;  %v1807_v56 = vld [vmem:[%s2638_s1 + $0x208] ss:$20 sps:$4 sm:$0xff]   ;;  %v1813_v60 = vld [vmem:[%s2638_s1 + $0x230] ss:$20 sps:$4 sm:$0xff]  }
  0x14   :  { %881 = vmatprep.subr.bf16.mxu0 %v1755_v21  ;;  %987 = vmatprep.subr.bf16.mxu1 %v1757_v22  ;;  %v1803_v54 = vld [vmem:[%s2638_s1 + $0x20c] ss:$20 sps:$4 sm:$0xff]   ;;  %v1809_v58 = vld [vmem:[%s2638_s1 + $0x234] ss:$20 sps:$4 sm:$0xff]   ;;  %v1811_v59 = vld [vmem:[%s2638_s1 + $0x23c] ss:$20 sps:$4 sm:$0xff]  }
  0x15   :  { %v1814_v61 = vld [vmem:[%s2638_s1 + $0x238] ss:$20 sps:$4 sm:$0xff]   ;;  %v1815_v62 = vld [vmem:[%s2638_s1 + $0x25c] ss:$20 sps:$4 sm:$0xff]   ;;  %v1820_v2 = vld [vmem:[%s2638_s1 + $0x260] ss:$20 sps:$4 sm:$0xff]  }
  0x16   :  { %v1817_v63 = vld [vmem:[%s2638_s1 + $0x264] ss:$20 sps:$4 sm:$0xff]   ;;  %v1828_v4 = vld [vmem:[%s2638_s1 + $0x28c] ss:$20 sps:$4 sm:$0xff]   ;;  %v1826_v6 = vld [vmem:[%s2638_s1 + $0x288] ss:$20 sps:$4 sm:$0xff]  }
  0x17   :  { %882 = vmatpush1.bf16.msra.mxu0 %v1759_v23  ;;  %988 = vmatpush1.bf16.msra.mxu1 %v1760_v24  ;;  %v1819_v0 = vld [vmem:[%s2638_s1 + $0x258] ss:$20 sps:$4 sm:$0xff]   ;;  %v1823_v5 = vld [vmem:[%s2638_s1 + $0x280] ss:$20 sps:$4 sm:$0xff]   ;;  %v1830_v11 = vld [vmem:[%s2638_s1 + $0x2a8] ss:$20 sps:$4 sm:$0xff]  }
  0x18   :  { %883 = vmatprep.subr.bf16.mxu0 %v1761_v25  ;;  %989 = vmatprep.subr.bf16.mxu1 %v1763_v26  ;;  %v1825_v3 = vld [vmem:[%s2638_s1 + $0x284] ss:$20 sps:$4 sm:$0xff]   ;;  %v2162_v7 = vld [vmem:[%s2639_s0] ss:$16 sps:$4 sm:$0xff]   ;;  %v1835_v9 = vld [vmem:[%s2638_s1 + $0x2b4] ss:$20 sps:$4 sm:$0xff]  }
  0x19   :  { %v1832_v8 = vld [vmem:[%s2638_s1 + $0x2ac] ss:$20 sps:$4 sm:$0xff]   ;;  %v2173_v10 = vld [vmem:[%s2639_s0 + $0x24] ss:$16 sps:$4 sm:$0xff]   ;;  %v1841_v14 = vld [vmem:[%s2638_s1 + $0x2dc] ss:$20 sps:$4 sm:$0xff]  }
  0x1a   :  { %v1833_v12 = vld [vmem:[%s2638_s1 + $0x2b0] ss:$20 sps:$4 sm:$0xff]   ;;  %v1838_v13 = vld [vmem:[%s2638_s1 + $0x2d4] ss:$20 sps:$4 sm:$0xff]   ;;  %v1839_v16 = vld [vmem:[%s2638_s1 + $0x2d8] ss:$20 sps:$4 sm:$0xff]  }
  0x1b   :  { %884 = vmatpush1.bf16.msra.mxu0 %v1765_v27  ;;  %990 = vmatpush1.bf16.msra.mxu1 %v1766_v28  ;;  %v1836_v15 = vld [vmem:[%s2638_s1 + $0x2d0] ss:$20 sps:$4 sm:$0xff]   ;;  %v2211_v20 = vld [vmem:[%s2639_s0 + $0xc] ss:$16 sps:$4 sm:$0xff]   ;;  %v1845_v22 = vld [vmem:[%s2638_s1 + $0x300] ss:$20 sps:$4 sm:$0xff]  }
  0x1c   :  { %885 = vmatprep.subr.bf16.mxu0 %v1767_v29  ;;  %991 = vmatprep.subr.bf16.mxu1 %v1769_v30  ;;  %v2200_v17 = vld [vmem:[%s2639_s0 + $0x20] ss:$16 sps:$4 sm:$0xff]   ;;  %v1847_v19 = vld [vmem:[%s2638_s1 + $0x304] ss:$20 sps:$4 sm:$0xff]   ;;  %v1851_v26 = vld [vmem:[%s2638_s1 + $0x328] ss:$20 sps:$4 sm:$0xff]  }
  0x1d   :  { %v1844_v18 = vld [vmem:[%s2638_s1 + $0x2fc] ss:$20 sps:$4 sm:$0xff]   ;;  %v1842_v21 = vld [vmem:[%s2638_s1 + $0x2f8] ss:$20 sps:$4 sm:$0xff]   ;;  %v1848_v25 = vld [vmem:[%s2638_s1 + $0x320] ss:$20 sps:$4 sm:$0xff]  }
  0x1e   :  { %v1850_v23 = vld [vmem:[%s2638_s1 + $0x324] ss:$20 sps:$4 sm:$0xff]   ;;  %v1853_v24 = vld [vmem:[%s2638_s1 + $0x32c] ss:$20 sps:$4 sm:$0xff]   ;;  %v1859_v28 = vld [vmem:[%s2638_s1 + $0x354] ss:$20 sps:$4 sm:$0xff]  }
  0x1f   :  { %886 = vmatpush1.bf16.msra.mxu0 %v1771_v31  ;;  %992 = vmatpush1.bf16.msra.mxu1 %v1772_v32  ;;  %v1856_v27 = vld [vmem:[%s2638_s1 + $0x34c] ss:$20 sps:$4 sm:$0xff]   ;;  %v1854_v29 = vld [vmem:[%s2638_s1 + $0x348] ss:$20 sps:$4 sm:$0xff]   ;;  %v1857_v30 = vld [vmem:[%s2638_s1 + $0x350] ss:$20 sps:$4 sm:$0xff]  }
  0x20   :  { %887 = vmatprep.subr.bf16.mxu0 %v1773_v33  ;;  %993 = vmatprep.subr.bf16.mxu1 %v1775_v34  ;;  %v1862_v31 = vld [vmem:[%s2638_s1 + $0x374] ss:$20 sps:$4 sm:$0xff]   ;;  %v1865_v32 = vld [vmem:[%s2638_s1 + $0x37c] ss:$20 sps:$4 sm:$0xff]   ;;  %v1863_v34 = vld [vmem:[%s2638_s1 + $0x378] ss:$20 sps:$4 sm:$0xff]  }
  0x21   :  { %v1860_v33 = vld [vmem:[%s2638_s1 + $0x370] ss:$20 sps:$4 sm:$0xff]  }
  0x23   :  { %888 = vmatpush1.bf16.msra.mxu0 %v1777_v35  ;;  %994 = vmatpush1.bf16.msra.mxu1 %v1778_v36  ;;  %v1871_v35 = vld [vmem:[%s2638_s1 + $0x39c] ss:$20 sps:$4 sm:$0xff]   ;;  %v1874_v36 = vld [vmem:[%s2638_s1 + $0x3a4] ss:$20 sps:$4 sm:$0xff]  }
  0x24   :  { %889 = vmatprep.subr.bf16.mxu0 %v1779_v37  ;;  %995 = vmatprep.subr.bf16.mxu1 %v1781_v38  ;;  %v1869_v37 = vld [vmem:[%s2638_s1 + $0x398] ss:$20 sps:$4 sm:$0xff]   ;;  %v1872_v38 = vld [vmem:[%s2638_s1 + $0x3a0] ss:$20 sps:$4 sm:$0xff]  }
  0x27   :  { %890 = vmatpush1.bf16.msra.mxu0 %v1783_v39  ;;  %996 = vmatpush1.bf16.msra.mxu1 %v1784_v40  ;;  %v1877_v39 = vld [vmem:[%s2638_s1 + $0x3c4] ss:$20 sps:$4 sm:$0xff]   ;;  %v1880_v40 = vld [vmem:[%s2638_s1 + $0x3cc] ss:$20 sps:$4 sm:$0xff]  }
  0x28   :  { %891 = vmatprep.subr.bf16.mxu0 %v1785_v41  ;;  %997 = vmatprep.subr.bf16.mxu1 %v1787_v42  ;;  %v1875_v41 = vld [vmem:[%s2638_s1 + $0x3c0] ss:$20 sps:$4 sm:$0xff]   ;;  %v1878_v42 = vld [vmem:[%s2638_s1 + $0x3c8] ss:$20 sps:$4 sm:$0xff]  }
  0x2b   :  { %892 = vmatpush1.bf16.msra.mxu0 %v1789_v43  ;;  %998 = vmatpush1.bf16.msra.mxu1 %v1790_v44  ;;  %v1884_v43 = vld [vmem:[%s2638_s1 + $0x150] ss:$20 sps:$4 sm:$0xff]   ;;  %v2291_v44 = vld [vmem:[%s2639_s0 + $0x8] ss:$16 sps:$4 sm:$0xff]  }
  0x2c   :  { %893 = vmatprep.subr.bf16.mxu0 %v1791_v45  ;;  %999 = vmatprep.subr.bf16.mxu1 %v1793_v46  ;;  %v1885_v45 = vld [vmem:[%s2638_s1 + $0x10] ss:$20 sps:$4 sm:$0xff]  }
  0x2d   :  { %v1886_v46 = vld [vmem:[%s2638_s1 + $0x290] ss:$20 sps:$4 sm:$0xff]  }
  0x2f   :  { %894 = vmatpush1.bf16.msra.mxu0 %v1795_v47  ;;  %1000 = vmatpush1.bf16.msra.mxu1 %v1796_v49  ;;  %v1887_v47 = vld [vmem:[%s2638_s1 + $0x178] ss:$20 sps:$4 sm:$0xff]  }
  0x30   :  { %895 = vmatprep.subr.bf16.mxu0 %v1797_v50  ;;  %1001 = vmatprep.subr.bf16.mxu1 %v1799_v51  ;;  %v2306_v49 = vld [vmem:[%s2639_s0 + $0x2c] ss:$16 sps:$4 sm:$0xff]  }
  0x31   :  { %v1888_v50 = vld [vmem:[%s2638_s1 + $0x38] ss:$20 sps:$4 sm:$0xff]  }
  0x32   :  { %v1889_v51 = vld [vmem:[%s2638_s1 + $0x2b8] ss:$20 sps:$4 sm:$0xff]  }
  0x33   :  { %896 = vmatpush1.bf16.msra.mxu0 %v1801_v52  ;;  %1002 = vmatpush1.bf16.msra.mxu1 %v1802_v53  ;;  %v1893_v52 = vld [vmem:[%s2638_s1 + $0x1a0] ss:$20 sps:$4 sm:$0xff]   ;;  %v1892_v53 = vld [vmem:[%s2639_s0 + $0x28] ss:$16 sps:$4 sm:$0xff]  }
  0x34   :  { %897 = vmatprep.subr.bf16.mxu0 %v1803_v54  ;;  %1003 = vmatprep.subr.bf16.mxu1 %v1805_v55  ;;  %v1894_v54 = vld [vmem:[%s2638_s1 + $0x60] ss:$20 sps:$4 sm:$0xff]  }
  0x35   :  { %v1895_v55 = vld [vmem:[%s2638_s1 + $0x2e0] ss:$20 sps:$4 sm:$0xff]  }
  0x37   :  { %898 = vmatpush1.bf16.msra.mxu0 %v1807_v56  ;;  %1004 = vmatpush1.bf16.msra.mxu1 %v1808_v57  ;;  %v1896_v56 = vld [vmem:[%s2638_s1 + $0x1c8] ss:$20 sps:$4 sm:$0xff]  }
  0x38   :  { %899 = vmatprep.subr.bf16.mxu0 %v1809_v58  ;;  %1005 = vmatprep.subr.bf16.mxu1 %v1811_v59  ;;  %v1897_v57 = vld [vmem:[%s2638_s1 + $0x88] ss:$20 sps:$4 sm:$0xff]   ;;  %v1899_v59 = vld [vmem:[%s2638_s1 + $0x1f0] ss:$20 sps:$4 sm:$0xff]  }
  0x39   :  { %v1898_v58 = vld [vmem:[%s2638_s1 + $0x308] ss:$20 sps:$4 sm:$0xff]  }
  0x3b   :  { %900 = vmatpush1.bf16.msra.mxu0 %v1813_v60  ;;  %1006 = vmatpush1.bf16.msra.mxu1 %v1814_v61  ;;  %v1900_v60 = vld [vmem:[%s2638_s1 + $0xb0] ss:$20 sps:$4 sm:$0xff]  }
  0x3c   :  { %901 = vmatprep.subr.bf16.mxu0 %v1815_v62  ;;  %1007 = vmatprep.subr.bf16.mxu1 %v1817_v63  ;;  %v1901_v61 = vld [vmem:[%s2638_s1 + $0x330] ss:$20 sps:$4 sm:$0xff]   ;;  %v1903_v62 = vld [vmem:[%s2638_s1 + $0xd8] ss:$20 sps:$4 sm:$0xff]  }
  0x3d   :  { %v1904_v63 = vld [vmem:[%s2638_s1 + $0x358] ss:$20 sps:$4 sm:$0xff]  }
  0x3f   :  { %902 = vmatpush1.bf16.msra.mxu0 %v1819_v0  ;;  %1008 = vmatpush1.bf16.msra.mxu1 %v1820_v2  ;;  %v1905_v0 = vld [vmem:[%s2638_s1 + $0x240] ss:$20 sps:$4 sm:$0xff]  }
  0x40   :  { %924 = vmatprep.subr.bf16.mxu0 %v1825_v3  ;;  %1030 = vmatprep.subr.bf16.mxu1 %v1828_v4  ;;  %v1906_v2 = vld [vmem:[%s2638_s1 + $0x100] ss:$20 sps:$4 sm:$0xff]   ;;  %v1908_v4 = vld [vmem:[%s2638_s1 + $0x268] ss:$20 sps:$4 sm:$0xff]  }
  0x41   :  { %v1907_v3 = vld [vmem:[%s2638_s1 + $0x380] ss:$20 sps:$4 sm:$0xff]  }
  0x42   :  { %904 = vmatmul.mubr.bf16.vlgmr.msra.gmra.mrb[0].mxu0 %v2162_v7  ;;  %1010 = vmatmul.mubr.bf16.vlgmr.msra.gmra.mrb[0].mxu1 %v2162_v7 }
  0x43   :  { %925 = vmatpush1.bf16.msra.mxu0 %v1823_v5  ;;  %1031 = vmatpush1.bf16.msra.mxu1 %v1826_v6  ;;  %v1909_v5 = vld [vmem:[%s2638_s1 + $0x128] ss:$20 sps:$4 sm:$0xff]  }
  0x44   :  { %926 = vmatprep.subr.bf16.mxu0 %v1832_v8  ;;  %1032 = vmatprep.subr.bf16.mxu1 %v1835_v9  ;;  %v1910_v6 = vld [vmem:[%s2638_s1 + $0x3a8] ss:$20 sps:$4 sm:$0xff]   ;;  %v1911_v8 = vld [vmem:[%s2638_s1 + $0x3d0] ss:$20 sps:$4 sm:$0xff]  }
  0x45   :  { %913 = vmatprep.mubr.bf16.mxu0 %v2173_v10  ;;  %1019 = vmatprep.mubr.bf16.mxu1 %v2173_v10 }
  0x47   :  { %927 = vmatpush1.bf16.msra.mxu0 %v1830_v11  ;;  %1033 = vmatpush1.bf16.msra.mxu1 %v1833_v12 }
  0x48   :  { %928 = vmatprep.subr.bf16.mxu0 %v1838_v13  ;;  %1034 = vmatprep.subr.bf16.mxu1 %v1841_v14 }
  0x4a   :  { %914 = vmatmul.mubr.bf16.gmra.mrb[4].mxu0 %v2200_v17  ;;  %1020 = vmatmul.mubr.bf16.gmra.mrb[4].mxu1 %v2200_v17 }
  0x4b   :  { %929 = vmatpush1.bf16.msra.mxu0 %v1836_v15  ;;  %1035 = vmatpush1.bf16.msra.mxu1 %v1839_v16 }
  0x4c   :  { %930 = vmatprep.subr.bf16.mxu0 %v1844_v18  ;;  %1036 = vmatprep.subr.bf16.mxu1 %v1847_v19 }
  0x4d   :  { %1648 = vmatprep.mubr.msk.bf16.mxu0 %vm864_vm0, %v2211_v20  ;;  %1650 = vmatprep.mubr.msk.bf16.mxu1 %vm864_vm0, %v2211_v20 }
  0x4f   :  { %931 = vmatpush1.bf16.msra.mxu0 %v1842_v21  ;;  %1037 = vmatpush1.bf16.msra.mxu1 %v1845_v22 }
  0x50   :  { %932 = vmatprep.subr.bf16.mxu0 %v1850_v23  ;;  %1038 = vmatprep.subr.bf16.mxu1 %v1853_v24 }
  0x53   :  { %933 = vmatpush1.bf16.msra.mxu0 %v1848_v25  ;;  %1039 = vmatpush1.bf16.msra.mxu1 %v1851_v26 }
  0x54   :  { %934 = vmatprep.subr.bf16.mxu0 %v1856_v27  ;;  %1040 = vmatprep.subr.bf16.mxu1 %v1859_v28 }
  0x57   :  { %935 = vmatpush1.bf16.msra.mxu0 %v1854_v29  ;;  %1041 = vmatpush1.bf16.msra.mxu1 %v1857_v30 }
  0x58   :  { %936 = vmatprep.subr.bf16.mxu0 %v1862_v31  ;;  %1042 = vmatprep.subr.bf16.mxu1 %v1865_v32 }
  0x5b   :  { %937 = vmatpush1.bf16.msra.mxu0 %v1860_v33  ;;  %1043 = vmatpush1.bf16.msra.mxu1 %v1863_v34 }
  0x5c   :  { %938 = vmatprep.subr.bf16.mxu0 %v1871_v35  ;;  %1044 = vmatprep.subr.bf16.mxu1 %v1874_v36 }
  0x5f   :  { %939 = vmatpush1.bf16.msra.mxu0 %v1869_v37  ;;  %1045 = vmatpush1.bf16.msra.mxu1 %v1872_v38 }
  0x60   :  { %940 = vmatprep.subr.bf16.mxu0 %v1877_v39  ;;  %1046 = vmatprep.subr.bf16.mxu1 %v1880_v40 }
  0x63   :  { %941 = vmatpush1.bf16.msra.mxu0 %v1875_v41  ;;  %1047 = vmatpush1.bf16.msra.mxu1 %v1878_v42 }
  0x64   :  { %1678 = vmatprep.subr.bf16.mxu0 %v1884_v43  ;;  %1132 = vmatprep.subr.bf16.mxu1 %v1920_v1 }
  0x66   :  { %957 = vmatmul.mubr.bf16.vlgmr.msra.gmra.mrb[0].mxu0 %v2291_v44  ;;  %1063 = vmatmul.mubr.bf16.vlgmr.msra.gmra.mrb[0].mxu1 %v2291_v44 }
  0x67   :  { %1679 = vmatpush3.bf16.msra.mxu0 %v1885_v45  ;;  %1133 = vmatpush1.bf16.msra.mxu1 %v1886_v46 }
  0x68   :  { %1680 = vmatprep.subr.bf16.mxu0 %v1887_v47  ;;  %1134 = vmatprep.subr.bf16.mxu1 %v1920_v1 }
  0x69   :  { %1649 = vmatprep.mubr.msk.bf16.mxu0 %vm864_vm0, %v2306_v49  ;;  %1651 = vmatprep.mubr.msk.bf16.mxu1 %vm864_vm0, %v2306_v49 }
  0x6b   :  { %1681 = vmatpush3.bf16.msra.mxu0 %v1888_v50  ;;  %1135 = vmatpush1.bf16.msra.mxu1 %v1889_v51 }
  0x6c   :  { %1682 = vmatprep.subr.bf16.mxu0 %v1893_v52  ;;  %1136 = vmatprep.subr.bf16.mxu1 %v1920_v1 }
  0x6e   :  { %967 = vmatmul.mubr.bf16.gmra.mrb[4].mxu0 %v1892_v53  ;;  %1073 = vmatmul.mubr.bf16.gmra.mrb[4].mxu1 %v1892_v53 }
  0x6f   :  { %1683 = vmatpush3.bf16.msra.mxu0 %v1894_v54  ;;  %1137 = vmatpush1.bf16.msra.mxu1 %v1895_v55 }
  0x70   :  { %1684 = vmatprep.subr.bf16.mxu0 %v1896_v56  ;;  %1138 = vmatprep.subr.bf16.mxu1 %v1920_v1 }
  0x71   :  { %1115 = vmatprep.mubr.bf16.mxu0 %v2092_v48  ;;  %1652 = vmatprep.mubr.msk.bf16.mxu1 %vm864_vm0, %v2211_v20  ;;  %v1902_v48 = vld [vmem:[%s2638_s1 + $0x218] ss:$20 sps:$4 sm:$0xff]  }
  0x73   :  { %1685 = vmatpush3.bf16.msra.mxu0 %v1897_v57  ;;  %1139 = vmatpush1.bf16.msra.mxu1 %v1898_v58 }
  0x74   :  { %1686 = vmatprep.subr.bf16.mxu0 %v1899_v59  ;;  %1140 = vmatprep.subr.bf16.mxu1 %v1920_v1 }
  0x77   :  { %1687 = vmatpush3.bf16.msra.mxu0 %v1900_v60  ;;  %1141 = vmatpush1.bf16.msra.mxu1 %v1901_v61 }
  0x78   :  { %1688 = vmatprep.subr.bf16.mxu0 %v1902_v48  ;;  %1142 = vmatprep.subr.bf16.mxu1 %v1920_v1 }
  0x7b   :  { %1689 = vmatpush3.bf16.msra.mxu0 %v1903_v62  ;;  %1143 = vmatpush1.bf16.msra.mxu1 %v1904_v63 }
  0x7c   :  { %1690 = vmatprep.subr.bf16.mxu0 %v1905_v0  ;;  %1144 = vmatprep.subr.bf16.mxu1 %v1920_v1 }
  0x7f   :  { %1691 = vmatpush3.bf16.msra.mxu0 %v1906_v2  ;;  %1145 = vmatpush1.bf16.msra.mxu1 %v1907_v3 }
  0x80   :  { %1692 = vmatprep.subr.bf16.mxu0 %v1908_v4  ;;  %1146 = vmatprep.subr.bf16.mxu1 %v1920_v1 }
  0x83   :  { %1693 = vmatpush3.bf16.msra.mxu0 %v1909_v5  ;;  %1147 = vmatpush1.bf16.msra.mxu1 %v1910_v6 }
  0x84   :  { %1148 = vmatprep.subr.bf16.mxu1 %v1920_v1 }
  0x86   :  { %1116 = vmatmul.mubr.bf16.vlgmr.msra.gmra.mrb[8].mxu0 %v2162_v7 }
  0x87   :  { %1149 = vmatpush1.bf16.msra.mxu1 %v1911_v8  ;;  %1123 = vmatprep.mubr.bf16.mxu0 %v2173_v10 }
  0x8a   :  { %1165 = vmatmul.mubr.bf16.vlgmr.msra.gmra.mrb[8].mxu1 %v2291_v44 }
  0x8b   :  { %1653 = vmatprep.mubr.msk.bf16.mxu1 %vm864_vm0, %v2306_v49 }
  0x8e   :  { %1124 = vmatmul.mubr.bf16.gmra.mrb[12].mxu0 %v2200_v17 }
  0x92   :  { %1173 = vmatmul.mubr.bf16.gmra.mrb[12].mxu1 %v1892_v53 }
 0x139   :  { %v2397_v9 = vpop.f32.mrb[0].mxu0  ;;  %v2399_v11 = vpop.f32.mrb[0].mxu1 }
 0x13a   :  { %v1222_v1 = vmul.f32 %v2397_v9, %v2397_v9  ;;  %v2403_v12 = vpop.f32.mrb[1].mxu0  ;;  %v2405_v7 = vpop.f32.mrb[1].mxu1  ;;  %v1224_v19 = vmul.f32 %v2399_v11, %v2399_v11 }
 0x13b   :  { %v1189_v10 = vadd.f32 %v2403_v12, %v2397_v9  ;;  %v1223_v13 = vmul.f32 %v2403_v12, %v2403_v12  ;;  %v2411_v14 = vpop.f32.mrb[2].mxu0  ;;  %v2413_v15 = vpop.f32.mrb[2].mxu1  ;;  %v1225_v23 = vmul.f32 %v2405_v7, %v2405_v7 }
 0x13c   :  { %v1227_v16 = vmul.f32 %v2411_v14, %v2411_v14  ;;  %v2417_v17 = vpop.f32.mrb[3].mxu0  ;;  %v2419_v18 = vpop.f32.mrb[3].mxu1  ;;  %v1229_v25 = vmul.f32 %v2413_v15, %v2413_v15 }
 0x13d   :  { %v1242_v20 = vadd.f32 %v1223_v13, %v1222_v1  ;;  %v1197_v21 = vadd.f32 %v2417_v17, %v2411_v14  ;;  %v1228_v22 = vmul.f32 %v2417_v17, %v2417_v17  ;;  %v1190_v24 = vadd.f32 %v1189_v10, %v2399_v11 }
 0x13e   :  { %v1230_v30 = vmul.f32 %v2419_v18, %v2419_v18 }
 0x13f   :  { %v1249_v26 = vadd.f32 %v1228_v22, %v1227_v16  ;;  %v1198_v27 = vadd.f32 %v1197_v21, %v2413_v15  ;;  %v1243_v28 = vadd.f32 %v1242_v20, %v1224_v19  ;;  %v1191_v29 = vadd.f32 %v1190_v24, %v2405_v7 }
 0x141   :  { %v2436_v31 = vpop.f32.mrb[4].mxu0  ;;  %v2438_v32 = vpop.f32.mrb[4].mxu1  ;;  %v1250_v33 = vadd.f32 %v1249_v26, %v1229_v25  ;;  %v1199_v34 = vadd.f32 %v1198_v27, %v2419_v18  ;;  %v2441_v35 = vadd.f32 %v1243_v28, %v1225_v23 }
 0x142   :  { %v1232_v36 = vmul.f32 %v2436_v31, %v2436_v31  ;;  %v2445_v37 = vpop.f32.mrb[5].mxu0  ;;  %v2447_v38 = vpop.f32.mrb[5].mxu1  ;;  %v1234_v47 = vmul.f32 %v2438_v32, %v2438_v32 }
 0x143   :  { %v1204_v39 = vadd.f32 %v2445_v37, %v2436_v31  ;;  %v1233_v40 = vmul.f32 %v2445_v37, %v2445_v37  ;;  %v2453_v41 = vpop.f32.mrb[6].mxu0  ;;  %v2455_v42 = vpop.f32.mrb[6].mxu1  ;;  %v1251_v43 = vadd.f32 %v1250_v33, %v1230_v30  ;;  %v1235_v52 = vmul.f32 %v2447_v38, %v2447_v38 }
 0x144   :  { %v1237_v44 = vmul.f32 %v2453_v41, %v2453_v41  ;;  %v2459_v45 = vpop.f32.mrb[7].mxu0  ;;  %v2461_v46 = vpop.f32.mrb[7].mxu1  ;;  %v1239_v54 = vmul.f32 %v2455_v42, %v2455_v42 }
 0x145   :  { %v1256_v49 = vadd.f32 %v1233_v40, %v1232_v36  ;;  %v1211_v50 = vadd.f32 %v2459_v45, %v2453_v41  ;;  %v1238_v51 = vmul.f32 %v2459_v45, %v2459_v45  ;;  %v1205_v53 = vadd.f32 %v1204_v39, %v2438_v32 }
 0x146   :  { %v1240_v59 = vmul.f32 %v2461_v46, %v2461_v46 }
 0x147   :  { %v1263_v55 = vadd.f32 %v1238_v51, %v1237_v44  ;;  %v1212_v56 = vadd.f32 %v1211_v50, %v2455_v42  ;;  %v1257_v57 = vadd.f32 %v1256_v49, %v1234_v47  ;;  %v1206_v58 = vadd.f32 %v1205_v53, %v2447_v38 }
 0x149   :  { %v1213_v60 = vadd.f32 %v1212_v56, %v2461_v46  ;;  %v1258_v61 = vadd.f32 %v1257_v57, %v1235_v52  ;;  %v1264_v48 = vadd.f32 %v1263_v55, %v1239_v54 }
 0x14b   :  { %v1265_v62 = vadd.f32 %v1264_v48, %v1240_v59 }
 0x159   :  { %v1694_v63 = vpop.f32.mrb[8].mxu0 }
 0x15a   :  { %v1695_v0 = vpop.f32.mrb[9].mxu0 }
 0x15b   :  { %v1696_v2 = vadd.f32 %v1695_v0, %v1694_v63  ;;  %v1697_v3 = vpop.f32.mrb[10].mxu0  ;;  %v1181_v0 = vld [vmem:[%s2640_s2] sm:$0xff] }
 0x15c   :  { %v1698_v4 = vpop.f32.mrb[11].mxu0 }
 0x15d   :  { %v1699_v5 = vadd.f32 %v1698_v4, %v1697_v3  ;;  %v1166_v6 = vpop.f32.mrb[8].mxu1  ;;  %v1188_v3 = vld [vmem:[%s2641_s3 + $0x18] sm:$0xff] }
 0x15e   :  { %v2479_v8 = vadd.f32 %v1696_v2, %v1166_v6  ;;  %v1168_v1 = vpop.f32.mrb[9].mxu1  ;;  %v1187_v2 = vld [vmem:[%s2641_s3 + $0x10] sm:$0xff] }
 0x15f   :  { %v1169_v10 = vpop.f32.mrb[10].mxu1 }
 0x160   :  { %v2481_v13 = vadd.f32 %v1699_v5, %v1169_v10  ;;  %v1171_v16 = vpop.f32.mrb[11].mxu1  ;;  %v1193_v19 = vsel %vm1192_vm1, %v2479_v8, 0.0  ;;  %v1226_v25 = vmul.f32 %v2479_v8, %v2479_v8 }
 0x161   :  { %v1700_v20 = vpop.f32.mrb[12].mxu0  ;;  %v1194_v21 = vadd.f32 %v1193_v19, %v1191_v29 }
 0x162   :  { %v1701_v22 = vpop.f32.mrb[13].mxu0  ;;  %v1231_v23 = vmul.f32 %v2481_v13, %v2481_v13  ;;  %v1200_v24 = vsel %vm1192_vm1, %v2481_v13, 0.0  ;;  %v1245_v47 = vsel %vm1192_vm1, %v1226_v25, 0.0 }
 0x163   :  { %v1702_v26 = vadd.f32 %v1701_v22, %v1700_v20  ;;  %v1703_v27 = vpop.f32.mrb[14].mxu0  ;;  %1195 = vadd.xlane.f32.xlu0 %v1194_v21  ;;  %v1201_v29 = vadd.f32 %v1200_v24, %v1199_v34  ;;  %v1246_v34 = vadd.f32 %v1245_v47, %v2441_v35  ;;  %v1182_v35 = vld [vmem:[%s2640_s2 + $0x8] sm:$0xff] }
 0x164   :  { %v1704_v28 = vpop.f32.mrb[15].mxu0  ;;  %v1252_v30 = vsel %vm1192_vm1, %v1231_v23, 0.0 }
 0x165   :  { %v1705_v33 = vadd.f32 %v1704_v28, %v1703_v27  ;;  %v1174_v36 = vpop.f32.mrb[12].mxu1  ;;  %v1253_v39 = vadd.f32 %v1252_v30, %v1251_v43 }
 0x166   :  { %v2492_v40 = vadd.f32 %v1702_v26, %v1174_v36  ;;  %v1176_v44 = vpop.f32.mrb[13].mxu1 }
 0x167   :  { %v1177_v49 = vpop.f32.mrb[14].mxu1  ;;  %1254 = vadd.xlane.f32.xlu1 %v1253_v39  ;;  %1202 = vadd.xlane.f32.xlu0 %v1201_v29 }
 0x168   :  { %v2495_v50 = vadd.f32 %v1705_v33, %v1177_v49  ;;  %v1179_v51 = vpop.f32.mrb[15].mxu1  ;;  %v1207_v52 = vsel %vm1192_vm1, %v2492_v40, 0.0  ;;  %v1236_v53 = vmul.f32 %v2492_v40, %v2492_v40 }
 0x169   :  { %v1208_v54 = vadd.f32 %v1207_v52, %v1206_v58  ;;  %v1183_v58 = vld [vmem:[%s2640_s2 + $0x10] sm:$0xff] }
 0x16a   :  { %v1214_v43 = vsel %vm1192_vm1, %v2495_v50, 0.0  ;;  %v1259_v55 = vsel %vm1192_vm1, %v1236_v53, 0.0  ;;  %v1241_v56 = vmul.f32 %v2495_v50, %v2495_v50 }
 0x16b   :  { %1209 = vadd.xlane.f32.xlu1 %v1208_v54  ;;  %1247 = vadd.xlane.f32.xlu0 %v1246_v34  ;;  %v1215_v59 = vadd.f32 %v1214_v43, %v1213_v60  ;;  %v1260_v48 = vadd.f32 %v1259_v55, %v1258_v61  ;;  %v1184_v60 = vld [vmem:[%s2640_s2 + $0x18] sm:$0xff]  ;;  %v1185_v61 = vld [vmem:[%s2641_s3] sm:$0xff] }
 0x16c   :  { %v1266_v57 = vsel %vm1192_vm1, %v1241_v56, 0.0 }
 0x16d   :  { %v1267_v63 = vadd.f32 %v1266_v57, %v1265_v62  ;;  %v1186_v62 = vld [vmem:[%s2641_s3 + $0x8] sm:$0xff] }
 0x16f   :  { %1216 = vadd.xlane.f32.xlu1 %v1215_v59  ;;  %1261 = vadd.xlane.f32.xlu0 %v1260_v48 }
 0x180   :  { %1341 = vperm.xlu1 %1724, %v1182_v35  }
 0x184   :  { %1346 = vperm.xlu1 %1724, %v1183_v58  }
 0x185   :  { %1336 = vperm.xlu0 %1723, %v1181_v0  }
 0x188   :  { %1351 = vperm.xlu1 %1724, %v1184_v60  }
 0x18c   :  { %1376 = vperm.xlu1 %1724, %v1185_v61  }
 0x190   :  { %1381 = vperm.xlu1 %1724, %v1186_v62  }
 0x194   :  { %1386 = vperm.xlu1 %1724, %v1187_v2  }
 0x1b8   :  { %1268 = vadd.xlane.f32.xlu1 %v1267_v63 }
 0x1c9   :  { %1391 = vperm.xlu1 %1724, %v1188_v3  }
 0x1f0   :  { %v1196_v4 = vpop.xlane.xlu0 %1195 }
 0x1f1   :  { %v2532_v1 = vmul.f32 0.0017301039, %v1196_v4 }
 0x1f3   :  { %v1274_v23 = vmul.f32 %v2532_v1, %v2532_v1  ;;  %v1286_v63 = vsub.f32 %v2397_v9, %v2532_v1  ;;  %v1287_v0 = vsub.f32 %v2403_v12, %v2532_v1  ;;  %v1288_v60 = vsub.f32 %v2399_v11, %v2532_v1 }
 0x1f4   :  { %v1255_v5 = vpop.xlane.xlu1 %1254  ;;  %v1203_v6 = vpop.xlane.xlu0 %1202  ;;  %v1289_v61 = vsub.f32 %v2405_v7, %v2532_v1  ;;  %v1290_v11 = vsub.f32 %v2479_v8, %v2532_v1 }
 0x1f5   :  { %v1219_v10 = vmul.f32 0.0017301039, %v1203_v6  ;;  %v1271_v16 = vmul.f32 0.0017301039, %v1255_v5 }
 0x1f7   :  { %v1275_v19 = vmul.f32 %v1219_v10, %v1219_v10  ;;  %v1291_v57 = vsub.f32 %v2411_v14, %v1219_v10  ;;  %v1292_v59 = vsub.f32 %v2417_v17, %v1219_v10  ;;  %v1293_v58 = vsub.f32 %v2413_v15, %v1219_v10 }
 0x1f8   :  { %v1210_v20 = vpop.xlane.xlu1 %1209  ;;  %v1248_v21 = vpop.xlane.xlu0 %1247  ;;  %v1294_v14 = vsub.f32 %v2419_v18, %v1219_v10  ;;  %v1295_v17 = vsub.f32 %v2481_v13, %v1219_v10 }
 0x1f9   :  { %v1279_v22 = vsub.f32 %v1271_v16, %v1275_v19  ;;  %v1270_v24 = vmul.f32 0.0017301039, %v1248_v21  ;;  %v2536_v25 = vmul.f32 0.0017301039, %v1210_v20 }
 0x1fb   :  { %v1283_v26 = vmax.f32 %v1279_v22, 0.0  ;;  %v1278_v27 = vsub.f32 %v1270_v24, %v1274_v23  ;;  %v1276_v29 = vmul.f32 %v2536_v25, %v2536_v25  ;;  %v1296_v15 = vsub.f32 %v2436_v31, %v2536_v25 }
 0x1fc   :  { %v1217_v28 = vpop.xlane.xlu1 %1216  ;;  %v1262_v30 = vpop.xlane.xlu0 %1261  ;;  %v1297_v12 = vsub.f32 %v2445_v37, %v2536_v25  ;;  %v1298_v7 = vsub.f32 %v2438_v32, %v2536_v25  ;;  %v1299_v18 = vsub.f32 %v2447_v38, %v2536_v25  ;;  %v1300_v10 = vsub.f32 %v2492_v40, %v2536_v25 }
 0x1fd   :  { %v1307_v33 = vadd.f32 1e-05, %v1283_v26  ;;  %v1282_v36 = vmax.f32 %v1278_v27, 0.0  ;;  %v2538_v39 = vmul.f32 0.0017301039, %v1217_v28 }
 0x1fe   :  { %v1272_v44 = vmul.f32 0.0017301039, %v1262_v30 }
 0x1ff   :  { %1912 = vrsqrt.f32 %v1307_v33  ;;  %v1306_v47 = vadd.f32 1e-05, %v1282_v36  ;;  %v1301_v49 = vsub.f32 %v2453_v41, %v2538_v39  ;;  %v1302_v53 = vsub.f32 %v2459_v45, %v2538_v39 }
 0x200   :  { %v1280_v51 = vsub.f32 %v1272_v44, %v1276_v29  ;;  %v1342_v52 = vpop.permute.xlu1 %1341  ;;  %v1303_v54 = vsub.f32 %v2455_v42, %v2538_v39  ;;  %v1304_v34 = vsub.f32 %v2461_v46, %v2538_v39 }
 0x201   :  { %1914 = vrsqrt.f32 %v1306_v47 }
 0x202   :  { %v1284_v43 = vmax.f32 %v1280_v51, 0.0 }
 0x204   :  { %v1308_v55 = vadd.f32 1e-05, %v1284_v43  ;;  %v1347_v56 = vpop.permute.xlu1 %1346  ;;  %v1337_v6 = vpop.permute.xlu0 %1336 }
 0x206   :  { %1916 = vrsqrt.f32 %v1308_v55 }
 0x208   :  { %v2552_v48 = vpop.permute.xlu1 %1351 }
 0x209   :  { %v1913_v35 = vpop.eup %1912 }
 0x20a   :  { %v1319_v62 = vmul.f32 %v1913_v35, %v1291_v57  ;;  %v1320_v2 = vmul.f32 %v1913_v35, %v1292_v59  ;;  %v1321_v9 = vmul.f32 %v1913_v35, %v1293_v58  ;;  %v1322_v4 = vmul.f32 %v1913_v35, %v1294_v14 }
 0x20b   :  { %v1915_v3 = vpop.eup %1914  ;;  %v1323_v5 = vmul.f32 %v1913_v35, %v1295_v17 }
 0x20c   :  { %v1377_v13 = vpop.permute.xlu1 %1376  ;;  %v1314_v31 = vmul.f32 %v1915_v3, %v1286_v63  ;;  %v1315_v16 = vmul.f32 %v1915_v3, %v1287_v0  ;;  %v1316_v19 = vmul.f32 %v1915_v3, %v1288_v60  ;;  %v1359_v37 = vmul.f32 %v1342_v52, %v1319_v62 }
 0x20d   :  { %v1360_v20 = vmul.f32 %v1342_v52, %v1320_v2  ;;  %v1317_v21 = vmul.f32 %v1915_v3, %v1289_v61  ;;  %v1318_v8 = vmul.f32 %v1915_v3, %v1290_v11  ;;  %v1361_v1 = vmul.f32 %v1342_v52, %v1321_v9 }
 0x20e   :  { %v1354_v22 = vmul.f32 %v1337_v6, %v1314_v31  ;;  %v1355_v23 = vmul.f32 %v1337_v6, %v1315_v16  ;;  %v1356_v32 = vmul.f32 %v1337_v6, %v1316_v19  ;;  %v1362_v26 = vmul.f32 %v1342_v52, %v1322_v4 }
 0x20f   :  { %v1363_v38 = vmul.f32 %v1342_v52, %v1323_v5  ;;  %v1357_v27 = vmul.f32 %v1337_v6, %v1317_v21  ;;  %v1358_v28 = vmul.f32 %v1337_v6, %v1318_v8 }
 0x210   :  { %v1917_v24 = vpop.eup %1916  ;;  %v1382_v30 = vpop.permute.xlu1 %1381  ;;  %v1394_v44 = vadd.f32 %v1377_v13, %v1354_v22  ;;  %v1395_v47 = vadd.f32 %v1377_v13, %v1355_v23  ;;  %v1396_v51 = vadd.f32 %v1377_v13, %v1356_v32 }
 0x211   :  { %v1324_v33 = vmul.f32 %v1917_v24, %v1296_v15  ;;  %v1325_v40 = vmul.f32 %v1917_v24, %v1297_v12  ;;  %v1326_v25 = vmul.f32 %v1917_v24, %v1298_v7  ;;  %v1327_v36 = vmul.f32 %v1917_v24, %v1299_v18 }
 0x212   :  { %v1328_v29 = vmul.f32 %v1917_v24, %v1300_v10  ;;  %v1397_v35 = vadd.f32 %v1377_v13, %v1357_v27  ;;  %v1398_v58 = vadd.f32 %v1377_v13, %v1358_v28  ;;  %v1414_v0 = vmax.f32 %v1394_v44, 0.0 }
 0x213   :  { %v1364_v43 = vmul.f32 %v1347_v56, %v1324_v33  ;;  %v1365_v55 = vmul.f32 %v1347_v56, %v1325_v40  ;;  %v1366_v57 = vmul.f32 %v1347_v56, %v1326_v25  ;;  %v1367_v59 = vmul.f32 %v1347_v56, %v1327_v36 }
 0x214   :  { %v1368_v63 = vmul.f32 %v1347_v56, %v1328_v29  ;;  %v1415_v52 = vmax.f32 %v1395_v47, 0.0  ;;  %v1416_v60 = vmax.f32 %v1396_v51, 0.0  ;;  %v1399_v61 = vadd.f32 %v1382_v30, %v1359_v37  ;;  %v1387_v9 = vpop.permute.xlu1 %1386 }
 0x215   :  { %v1400_v14 = vadd.f32 %v1382_v30, %v1360_v20  ;;  %v1417_v17 = vmax.f32 %v1397_v35, 0.0  ;;  %v1418_v62 = vmax.f32 %v1398_v58, 0.0  ;;  %v1401_v2 = vadd.f32 %v1382_v30, %v1361_v1 }
 0x216   :  { %v1402_v3 = vadd.f32 %v1382_v30, %v1362_v26  ;;  %v1666_v15 = vpack.c.bf16 %v1415_v52, %v1414_v0  ;;  %v1403_v12 = vadd.f32 %v1382_v30, %v1363_v38  ;;  %v1419_v11 = vmax.f32 %v1399_v61, 0.0 }
 0x217   :  { %v1420_v4 = vmax.f32 %v1400_v14, 0.0  ;;  %v1667_v5 = vpack.c.bf16 %v1417_v17, %v1416_v60  ;;  %v1668_v7 = vpack.c.bf16 %v1418_v62, %v1418_v62  ;;  %v1421_v18 = vmax.f32 %v1401_v2, 0.0 }
 0x218   :  { %v1422_v56 = vmax.f32 %v1402_v3, 0.0  ;;  %1498 = vst [vmem:[%s2642_s4] sm:$0xff] %v1666_v15  ;;  %v1423_v13 = vmax.f32 %v1403_v12, 0.0  ;;  %v1404_v10 = vadd.f32 %v1387_v9, %v1364_v43  ;;  %v1405_v31 = vadd.f32 %v1387_v9, %v1365_v55 }
 0x219   :  { %v1669_v6 = vpack.c.bf16 %v1420_v4, %v1419_v11  ;;  %1499 = vst [vmem:[%s2642_s4 + $0x8] sm:$0xff] %v1667_v5  ;;  %1501 = vst.msk [vmem:[%s2642_s4 + $0x10] sm:$0xf] %vm1500_vm2, %v1668_v7  ;;  %v1406_v19 = vadd.f32 %v1387_v9, %v1366_v57  ;;  %v1407_v37 = vadd.f32 %v1387_v9, %v1367_v59 }
 0x21a   :  { %v1670_v16 = vpack.c.bf16 %v1422_v56, %v1421_v18  ;;  %v1408_v20 = vadd.f32 %v1387_v9, %v1368_v63  ;;  %v1671_v21 = vpack.c.bf16 %v1423_v13, %v1423_v13  ;;  %v1424_v8 = vmax.f32 %v1404_v10, 0.0 }
 0x21b   :  { %1502 = vst [vmem:[%s2642_s4 + $0x14] sm:$0xff] %v1669_v6  ;;  %v1425_v1 = vmax.f32 %v1405_v31, 0.0  ;;  %v1426_v22 = vmax.f32 %v1406_v19, 0.0  ;;  %v1427_v23 = vmax.f32 %v1407_v37, 0.0  ;;  %v1277_v28 = vmul.f32 %v2538_v39, %v2538_v39 }
 0x21c   :  { %1503 = vst [vmem:[%s2642_s4 + $0x1c] sm:$0xff] %v1670_v16  ;;  %v1428_v32 = vmax.f32 %v1408_v20, 0.0  ;;  %1504 = vst.msk [vmem:[%s2642_s4 + $0x24] sm:$0xf] %vm1500_vm2, %v1671_v21  ;;  %v1305_v29 = vsub.f32 %v2495_v50, %v2538_v39 }
 0x21d   :  { %v1672_v24 = vpack.c.bf16 %v1425_v1, %v1424_v8  ;;  %v1673_v26 = vpack.c.bf16 %v1427_v23, %v1426_v22 }
 0x21e   :  { %v1674_v38 = vpack.c.bf16 %v1428_v32, %v1428_v32 }
 0x21f   :  { %1505 = vst [vmem:[%s2642_s4 + $0x28] sm:$0xff] %v1672_v24  ;;  %1506 = vst [vmem:[%s2642_s4 + $0x30] sm:$0xff] %v1673_v26 }
 0x220   :  { %1507 = vst.msk [vmem:[%s2642_s4 + $0x38] sm:$0xf] %vm1500_vm2, %v1674_v38 }
 0x245   :  { %v1269_v27 = vpop.xlane.xlu1 %1268 }
 0x246   :  { %v1273_v30 = vmul.f32 0.0017301039, %v1269_v27 }
 0x248   :  { %v1281_v33 = vsub.f32 %v1273_v30, %v1277_v28 }
 0x24a   :  { %v1285_v40 = vmax.f32 %v1281_v33, 0.0 }
 0x24c   :  { %v1309_v25 = vadd.f32 1e-05, %v1285_v40 }
 0x24e   :  { %1918 = vrsqrt.f32 %v1309_v25 }
 0x258   :  { %v1919_v36 = vpop.eup %1918 }
 0x259   :  { %v1329_v44 = vmul.f32 %v1919_v36, %v1301_v49  ;;  %v1330_v47 = vmul.f32 %v1919_v36, %v1302_v53  ;;  %v1331_v51 = vmul.f32 %v1919_v36, %v1303_v54  ;;  %v1332_v43 = vmul.f32 %v1919_v36, %v1304_v34  ;;  %v1392_v53 = vpop.permute.xlu1 %1391 }
 0x25a   :  { %v1333_v55 = vmul.f32 %v1919_v36, %v1305_v29 }
 0x25b   :  { %v1369_v57 = vmul.f32 %v2552_v48, %v1329_v44  ;;  %v1370_v50 = vmul.f32 %v2552_v48, %v1330_v47  ;;  %v1371_v41 = vmul.f32 %v2552_v48, %v1331_v51  ;;  %v1372_v49 = vmul.f32 %v2552_v48, %v1332_v43 }
 0x25c   :  { %v1373_v45 = vmul.f32 %v2552_v48, %v1333_v55 }
 0x25d   :  { %v1409_v59 = vadd.f32 %v1392_v53, %v1369_v57  ;;  %v1410_v63 = vadd.f32 %v1392_v53, %v1370_v50  ;;  %v1411_v42 = vadd.f32 %v1392_v53, %v1371_v41  ;;  %v1412_v54 = vadd.f32 %v1392_v53, %v1372_v49 }
 0x25e   :  { %v1413_v35 = vadd.f32 %v1392_v53, %v1373_v45 }
 0x25f   :  { %v1429_v58 = vmax.f32 %v1409_v59, 0.0  ;;  %v1430_v46 = vmax.f32 %v1410_v63, 0.0  ;;  %v1431_v39 = vmax.f32 %v1411_v42, 0.0  ;;  %v1432_v34 = vmax.f32 %v1412_v54, 0.0 }
 0x260   :  { %v1433_v0 = vmax.f32 %v1413_v35, 0.0 }
 0x261   :  { %v1675_v52 = vpack.c.bf16 %v1430_v46, %v1429_v58  ;;  %v1676_v60 = vpack.c.bf16 %v1432_v34, %v1431_v39 }
 0x262   :  { %v1677_v61 = vpack.c.bf16 %v1433_v0, %v1433_v0 }
 0x263   :  { %1508 = vst [vmem:[%s2642_s4 + $0x3c] sm:$0xff] %v1675_v52  ;;  %1509 = vst [vmem:[%s2642_s4 + $0x44] sm:$0xff] %v1676_v60 }
 0x264   :  { %1510 = vst.msk [vmem:[%s2642_s4 + $0x4c] sm:$0xf] %vm1500_vm2, %v1677_v61 }

// kernel: resnet18_forward.10
= control target key start
LH: loop header
LB: loop body
LE: loop exit
PB: predicated region body
PF: predicated region fallthrough
CT: control target
= control target key end

     0   :  { %v2127_v3 = vmov 0   ;;  %vm142_vm0 = vcmask 130048   ;;  %vm1583_vm1 = vcmask 261120   ;;  %vm1704_vm2 = vcmask 932864   ;;  %s3496_s1 = inlined_call_operand.vmem [shape: bf16[16,2048], index: 1, kind: input, shape index: {}]   ;;  %s3497_s0 = inlined_call_operand.vmem [shape: bf16[32,16], index: 0, kind: input, shape index: {}]   ;;  %s3498_s3 = inlined_call_operand.vmem [shape: bf16[288,242], index: 3, kind: input, shape index: {}]   ;;  %s3499_s2 = inlined_call_operand.vmem [shape: bf16[32,288], index: 2, kind: input, shape index: {}]   ;;  %s3500_s4 = inlined_call_operand.vmem [shape: f32[32,1], index: 4, kind: input, shape index: {}]   ;;  %s3501_s6 = inlined_call_operand.vmem [shape: f32[32,1], index: 6, kind: input, shape index: {}]   ;;  %s3502_s5 = inlined_call_operand.vmem [shape: f32[32,1], index: 5, kind: input, shape index: {}]   ;;  %s3503_s7 = inlined_call_operand.vmem [shape: f32[32,1], index: 7, kind: input, shape index: {}]   ;;  %s3504_s9 = inlined_call_operand.vmem [shape: bf16[32,242], index: 9, kind: output, shape index: {1}]   ;;  %s3505_s8 = inlined_call_operand.vmem [shape: bf16[32,2048], index: 8, kind: output, shape index: {0}]  }
   0x1   :  { %v36_v0 = vld [vmem:[%s3496_s1] sm:$0xff]  ;;  %181 = vmatprep.mubr.bf16.mxu1 %v2127_v3  ;;  %393 = vmatprep.mubr.bf16.mxu0 %v2127_v3  ;;  %v42_v10 = vld [vmem:[%s3496_s1 + $0x30] sm:$0xff]  ;;  %v37_v13 = vld [vmem:[%s3496_s1 + $0x8] sm:$0xff]  ;;  %vm1869_vm3 = vcmask 1043456   ;;  %vm1870_vm4 = vcmask 932868  }
   0x2   :  { %v44_v1 = vld [vmem:[%s3496_s1 + $0x40] sm:$0xff]  ;;  %2046 = vset.pattern.permute.xlu1 %v2127_v3  ;;  %2045 = vset.pattern.permute.xlu0 %v2127_v3  ;;  %v50_v11 = vld [vmem:[%s3496_s1 + $0x70] sm:$0xff]  ;;  %v45_v14 = vld [vmem:[%s3496_s1 + $0x48] sm:$0xff] }
   0x3   :  { %v40_v2 = vld [vmem:[%s3496_s1 + $0x20] sm:$0xff]  ;;  %v1887_v4 = vcombine.high %v36_v0, %v44_v1  ;;  %v1886_v6 = vcombine.low %v36_v0, %v44_v1  ;;  %v1899_v12 = vcombine.high %v42_v10, %v50_v11  ;;  %v1889_v15 = vcombine.high %v37_v13, %v45_v14  ;;  %v38_v19 = vld [vmem:[%s3496_s1 + $0x10] sm:$0xff]  ;;  %v2235_v21 = vld [vmem:[%s3497_s0 + $0x8] sm:$0xff]  }
   0x4   :  { %v48_v5 = vld [vmem:[%s3496_s1 + $0x60] sm:$0xff]  ;;  %v1898_v16 = vcombine.low %v42_v10, %v50_v11  ;;  %v1888_v17 = vcombine.low %v37_v13, %v45_v14  ;;  %v46_v20 = vld [vmem:[%s3496_s1 + $0x50] sm:$0xff]  ;;  %v39_v27 = vld [vmem:[%s3496_s1 + $0x18] sm:$0xff] }
   0x5   :  { %v2194_v7 = vcombine.high %v40_v2, %v48_v5  ;;  %v2196_v8 = vcombine.low %v40_v2, %v48_v5  ;;  %v2201_v9 = vld [vmem:[%s3497_s0] sm:$0xff]   ;;  %149 = vmatprep.subr.bf16.mxu1 %v1887_v4  ;;  %v1891_v22 = vcombine.high %v38_v19, %v46_v20  ;;  %v2054_v24 = vld [vmem:[%s3498_s3 + $0x14] ss:$8 sps:$4 sm:$0xff]   ;;  %v2052_v25 = vld [vmem:[%s3498_s3 + $0x10] ss:$8 sps:$4 sm:$0xff]   ;;  %v1890_v29 = vcombine.low %v38_v19, %v46_v20 }
   0x6   :  { %150 = vmatpush1.bf16.msra.mxu1 %v1886_v6  ;;  %v2050_v18 = vld [vmem:[%s3498_s3 + $0x4] ss:$8 sps:$4 sm:$0xff]   ;;  %v2048_v23 = vld [vmem:[%s3498_s3] ss:$8 sps:$4 sm:$0xff]   ;;  %v47_v28 = vld [vmem:[%s3496_s1 + $0x58] sm:$0xff] }
   0x7   :  { %361 = vmatprep.subr.bf16.mxu0 %v2194_v7  ;;  %202 = vmatprep.subr.bf16.mxu1 %v1889_v15  ;;  %v2057_v26 = vld [vmem:[%s3498_s3 + $0x24] ss:$8 sps:$4 sm:$0xff]   ;;  %v2055_v30 = vld [vmem:[%s3498_s3 + $0x20] ss:$8 sps:$4 sm:$0xff]   ;;  %v1893_v31 = vcombine.high %v39_v27, %v47_v28  ;;  %v2060_v32 = vld [vmem:[%s3498_s3 + $0x34] ss:$8 sps:$4 sm:$0xff]   ;;  %v1892_v40 = vcombine.low %v39_v27, %v47_v28 }
   0x8   :  { %362 = vmatpush1.bf16.msra.mxu0 %v2196_v8  ;;  %v2058_v33 = vld [vmem:[%s3498_s3 + $0x30] ss:$8 sps:$4 sm:$0xff]   ;;  %v2063_v34 = vld [vmem:[%s3498_s3 + $0x44] ss:$8 sps:$4 sm:$0xff]   ;;  %v2061_v35 = vld [vmem:[%s3498_s3 + $0x40] ss:$8 sps:$4 sm:$0xff]  }
   0x9   :  { %467 = vmatprep.subr.bf16.mxu0 %v1899_v12  ;;  %1902 = vmatmul.mubr.msk.bf16.vlgmr.msra.gmra.mrb[0].mxu1 %vm142_vm0, %v2201_v9  ;;  %v2099_v36 = vld [vmem:[%s3499_s2 + $0x4] ss:$12 sps:$4 sm:$0xff]   ;;  %v2066_v37 = vld [vmem:[%s3498_s3 + $0x54] ss:$8 sps:$4 sm:$0xff]   ;;  %v2067_v41 = vld [vmem:[%s3498_s3 + $0x60] ss:$8 sps:$4 sm:$0xff]  }
   0xa   :  { %191 = vmatprep.mubr.bf16.mxu1 %v2127_v3  ;;  %203 = vmatpush1.bf16.msra.mxu1 %v1888_v17  ;;  %v2064_v38 = vld [vmem:[%s3498_s3 + $0x50] ss:$8 sps:$4 sm:$0xff]   ;;  %v2069_v39 = vld [vmem:[%s3498_s3 + $0x64] ss:$8 sps:$4 sm:$0xff]   ;;  %v2072_v42 = vld [vmem:[%s3498_s3 + $0x74] ss:$8 sps:$4 sm:$0xff]  }
   0xb   :  { %1910 = vmatmul.mubr.msk.bf16.vlgmr.msra.gmra.mrb[0].mxu0 %vm142_vm0, %v2201_v9  ;;  %255 = vmatprep.subr.bf16.mxu1 %v1891_v22  ;;  %v2070_v43 = vld [vmem:[%s3498_s3 + $0x70] ss:$8 sps:$4 sm:$0xff]   ;;  %v2075_v44 = vld [vmem:[%s3498_s3 + $0x84] ss:$8 sps:$4 sm:$0xff]   ;;  %v2073_v45 = vld [vmem:[%s3498_s3 + $0x80] ss:$8 sps:$4 sm:$0xff]  }
   0xc   :  { %468 = vmatpush1.bf16.msra.mxu0 %v1898_v16  ;;  %499 = vmatprep.mubr.bf16.mxu0 %v2127_v3  ;;  %v2078_v46 = vld [vmem:[%s3498_s3 + $0x94] ss:$8 sps:$4 sm:$0xff]   ;;  %v2076_v47 = vld [vmem:[%s3498_s3 + $0x90] ss:$8 sps:$4 sm:$0xff]   ;;  %v2081_v48 = vld [vmem:[%s3498_s3 + $0xa4] ss:$8 sps:$4 sm:$0xff]  }
   0xd   :  { %1590 = vmatprep.subr.bf16.mxu0 %v2050_v18  ;;  %v41_v49 = vld [vmem:[%s3496_s1 + $0x28] sm:$0xff]  ;;  %v2084_v53 = vld [vmem:[%s3498_s3 + $0xb4] ss:$8 sps:$4 sm:$0xff]   ;;  %v2082_v54 = vld [vmem:[%s3498_s3 + $0xb0] ss:$8 sps:$4 sm:$0xff]  }
   0xe   :  { %v49_v50 = vld [vmem:[%s3496_s1 + $0x68] sm:$0xff]  ;;  %v2090_v57 = vld [vmem:[%s3498_s3 + $0xd4] ss:$8 sps:$4 sm:$0xff]   ;;  %v2088_v58 = vld [vmem:[%s3498_s3 + $0xd0] ss:$8 sps:$4 sm:$0xff]  }
   0xf   :  { %v2079_v51 = vld [vmem:[%s3498_s3 + $0xa0] ss:$8 sps:$4 sm:$0xff]   ;;  %v1897_v52 = vcombine.high %v41_v49, %v49_v50  ;;  %v2087_v55 = vld [vmem:[%s3498_s3 + $0xc4] ss:$8 sps:$4 sm:$0xff]   ;;  %v43_v60 = vld [vmem:[%s3496_s1 + $0x38] sm:$0xff]  ;;  %v1896_v62 = vcombine.low %v41_v49, %v49_v50 }
  0x10   :  { %v2085_v56 = vld [vmem:[%s3498_s3 + $0xc0] ss:$8 sps:$4 sm:$0xff]   ;;  %v2093_v59 = vld [vmem:[%s3498_s3 + $0xe4] ss:$8 sps:$4 sm:$0xff]   ;;  %v51_v61 = vld [vmem:[%s3496_s1 + $0x78] sm:$0xff] }
  0x11   :  { %1903 = vmatmul.mubr.msk.bf16.gmra.mrb[4].mxu1 %vm142_vm0, %v2235_v21  ;;  %v2091_v63 = vld [vmem:[%s3498_s3 + $0xe0] ss:$8 sps:$4 sm:$0xff]   ;;  %v1901_v0 = vcombine.high %v43_v60, %v51_v61  ;;  %v2096_v1 = vld [vmem:[%s3498_s3 + $0xf4] ss:$8 sps:$4 sm:$0xff]   ;;  %v2094_v2 = vld [vmem:[%s3498_s3 + $0xf0] ss:$8 sps:$4 sm:$0xff]  }
  0x12   :  { %234 = vmatprep.mubr.bf16.mxu1 %v2127_v3  ;;  %v2102_v4 = vld [vmem:[%s3498_s3 + $0x104] ss:$8 sps:$4 sm:$0xff]   ;;  %v2100_v6 = vld [vmem:[%s3498_s3 + $0x100] ss:$8 sps:$4 sm:$0xff]   ;;  %v2108_v10 = vld [vmem:[%s3498_s3 + $0x114] ss:$8 sps:$4 sm:$0xff]  }
  0x13   :  { %1914 = vmatmul.mubr.msk.bf16.vlgmr.msra.gmra.mrb[4].mxu0 %vm142_vm0, %v2201_v9  ;;  %v2097_v5 = vld [vmem:[%s3499_s2] ss:$12 sps:$4 sm:$0xff]   ;;  %v2106_v11 = vld [vmem:[%s3498_s3 + $0x110] ss:$8 sps:$4 sm:$0xff]   ;;  %v2109_v14 = vld [vmem:[%s3499_s2 + $0x8] ss:$12 sps:$4 sm:$0xff]  }
  0x14   :  { %1591 = vmatpush1.bf16.msra.mxu0 %v2048_v23  ;;  %509 = vmatprep.mubr.bf16.mxu0 %v2127_v3  ;;  %v2105_v12 = vld [vmem:[%s3499_s2 + $0x18] ss:$12 sps:$4 sm:$0xff]   ;;  %v574_v13 = vld [vmem:[%s3500_s4 + $0x8] sm:$0xff]  ;;  %v575_v15 = vld [vmem:[%s3500_s4 + $0x10] sm:$0xff] }
  0x15   :  { %1592 = vmatprep.subr.bf16.mxu0 %v2054_v24  ;;  %944 = vperm.xlu1 %2046, %v574_v13   ;;  %v576_v16 = vld [vmem:[%s3500_s4 + $0x18] sm:$0xff]  ;;  %v2110_v17 = vld [vmem:[%s3499_s2 + $0x20] ss:$12 sps:$4 sm:$0xff]   ;;  %v579_v19 = vld [vmem:[%s3502_s5 + $0x10] sm:$0xff] }
  0x16   :  { %v577_v18 = vld [vmem:[%s3502_s5] sm:$0xff]  ;;  %v1699_v23 = vld [vmem:[%s3501_s6 + $0x18] sm:$0xff]  ;;  %v578_v24 = vld [vmem:[%s3502_s5 + $0x8] sm:$0xff] }
  0x17   :  { %v1700_v20 = vld [vmem:[%s3503_s7] sm:$0xff]  ;;  %vm3007_vm5 = vmor %vm1870_vm4, %vm1869_vm3 }
  0x18   :  { %1593 = vmatpush1.bf16.msra.mxu0 %v2052_v25  ;;  %v1696_v22 = vld [vmem:[%s3501_s6] sm:$0xff]  ;;  %v580_v25 = vld [vmem:[%s3502_s5 + $0x18] sm:$0xff] }
  0x19   :  { %1594 = vmatprep.subr.bf16.mxu0 %v2057_v26  ;;  %1904 = vmatmul.mubr.msk.bf16.vlgmr.msra.gmra.mrb[8].mxu1 %vm142_vm0, %v2201_v9  ;;  %v1701_v26 = vld [vmem:[%s3503_s7 + $0x8] sm:$0xff] }
  0x1a   :  { %244 = vmatprep.mubr.bf16.mxu1 %v2127_v3  ;;  %256 = vmatpush1.bf16.msra.mxu1 %v1890_v29 }
  0x1b   :  { %308 = vmatprep.subr.bf16.mxu1 %v1893_v31  ;;  %1915 = vmatmul.mubr.msk.bf16.gmra.mrb[8].mxu0 %vm142_vm0, %v2235_v21 }
  0x1c   :  { %1595 = vmatpush1.bf16.msra.mxu0 %v2055_v30  ;;  %1622 = vmatprep.mubr.bf16.mxu0 %v2099_v36 }
  0x1d   :  { %1596 = vmatprep.subr.bf16.mxu0 %v2060_v32  ;;  %949 = vperm.xlu1 %2046, %v575_v15  }
  0x20   :  { %1597 = vmatpush1.bf16.msra.mxu0 %v2058_v33 }
  0x21   :  { %1598 = vmatprep.subr.bf16.mxu0 %v2063_v34  ;;  %1905 = vmatmul.mubr.msk.bf16.gmra.mrb[12].mxu1 %vm142_vm0, %v2235_v21 }
  0x22   :  { %287 = vmatprep.mubr.bf16.mxu1 %v2127_v3  ;;  %954 = vperm.xlu1 %2046, %v576_v16  }
  0x24   :  { %1599 = vmatpush1.bf16.msra.mxu0 %v2061_v35 }
  0x25   :  { %1600 = vmatprep.subr.bf16.mxu0 %v2066_v37 }
  0x28   :  { %1601 = vmatpush1.bf16.msra.mxu0 %v2064_v38 }
  0x29   :  { %1602 = vmatprep.subr.bf16.mxu0 %v2069_v39  ;;  %1906 = vmatmul.mubr.msk.bf16.vlgmr.msra.gmra.mrb[16].mxu1 %vm142_vm0, %v2201_v9 }
  0x2a   :  { %297 = vmatprep.mubr.bf16.mxu1 %v2127_v3  ;;  %309 = vmatpush1.bf16.msra.mxu1 %v1892_v40 }
  0x2b   :  { %2034 = vmatprep.subr.bf16.mxu1 %v2194_v7  ;;  %v2103_v7 = vld [vmem:[%s3499_s2 + $0x1c] ss:$12 sps:$4 sm:$0xff]  }
  0x2c   :  { %1603 = vmatpush1.bf16.msra.mxu0 %v2067_v41 }
  0x2d   :  { %1604 = vmatprep.subr.bf16.mxu0 %v2072_v42 }
  0x30   :  { %1605 = vmatpush1.bf16.msra.mxu0 %v2070_v43 }
  0x31   :  { %1606 = vmatprep.subr.bf16.mxu0 %v2075_v44  ;;  %1907 = vmatmul.mubr.msk.bf16.gmra.mrb[20].mxu1 %vm142_vm0, %v2235_v21 }
  0x32   :  { %340 = vmatprep.mubr.bf16.mxu1 %v2127_v3 }
  0x34   :  { %1607 = vmatpush1.bf16.msra.mxu0 %v2073_v45 }
  0x35   :  { %1608 = vmatprep.subr.bf16.mxu0 %v2078_v46 }
  0x38   :  { %1609 = vmatpush1.bf16.msra.mxu0 %v2076_v47 }
  0x39   :  { %1610 = vmatprep.subr.bf16.mxu0 %v2081_v48  ;;  %1908 = vmatmul.mubr.msk.bf16.vlgmr.msra.gmra.mrb[24].mxu1 %vm142_vm0, %v2201_v9 }
  0x3a   :  { %350 = vmatprep.mubr.bf16.mxu1 %v2127_v3  ;;  %2035 = vmatpush1.bf16.msra.mxu1 %v2196_v8  ;;  %v1900_v8 = vcombine.low %v43_v60, %v51_v61 }
  0x3b   :  { %414 = vmatprep.subr.bf16.mxu1 %v1897_v52 }
  0x3c   :  { %1611 = vmatpush1.bf16.msra.mxu0 %v2079_v51 }
  0x3d   :  { %1612 = vmatprep.subr.bf16.mxu0 %v2084_v53 }
  0x40   :  { %1613 = vmatpush1.bf16.msra.mxu0 %v2082_v54 }
  0x41   :  { %1614 = vmatprep.subr.bf16.mxu0 %v2087_v55  ;;  %1909 = vmatmul.mubr.msk.bf16.gmra.mrb[28].mxu1 %vm142_vm0, %v2235_v21 }
  0x42   :  { %403 = vmatprep.mubr.bf16.mxu1 %v2127_v3 }
  0x44   :  { %1615 = vmatpush1.bf16.msra.mxu0 %v2085_v56 }
  0x45   :  { %1616 = vmatprep.subr.bf16.mxu0 %v2090_v57 }
  0x48   :  { %1617 = vmatpush1.bf16.msra.mxu0 %v2088_v58 }
  0x49   :  { %1618 = vmatprep.subr.bf16.mxu0 %v2093_v59  ;;  %1911 = vmatmul.mubr.msk.bf16.vlgmr.msra.gmra.mrb[32].mxu1 %vm142_vm0, %v2235_v21 }
  0x4a   :  { %415 = vmatpush1.bf16.msra.mxu1 %v1896_v62  ;;  %446 = vmatprep.mubr.bf16.mxu1 %v2127_v3 }
  0x4b   :  { %520 = vmatprep.subr.bf16.mxu1 %v1901_v0 }
  0x4c   :  { %1619 = vmatpush1.bf16.msra.mxu0 %v2091_v63 }
  0x4d   :  { %1620 = vmatprep.subr.bf16.mxu0 %v2096_v1 }
  0x50   :  { %1621 = vmatpush1.bf16.msra.mxu0 %v2094_v2 }
  0x51   :  { %1643 = vmatprep.subr.bf16.mxu0 %v2102_v4  ;;  %1912 = vmatmul.mubr.msk.bf16.vlgmr.msra.gmra.mrb[36].mxu1 %vm142_vm0, %v2201_v9 }
  0x52   :  { %456 = vmatprep.mubr.bf16.mxu1 %v2127_v3  ;;  %521 = vmatpush1.bf16.msra.mxu1 %v1900_v8 }
  0x53   :  { %1623 = vmatmul.mubr.bf16.vlgmr.msra.gmra.mrb[12].mxu0 %v2097_v5 }
  0x54   :  { %1644 = vmatpush1.bf16.msra.mxu0 %v2100_v6  ;;  %1632 = vmatprep.mubr.bf16.mxu0 %v2103_v7 }
  0x55   :  { %1645 = vmatprep.subr.bf16.mxu0 %v2108_v10 }
  0x58   :  { %1646 = vmatpush1.bf16.msra.mxu0 %v2106_v11 }
  0x59   :  { %1913 = vmatmul.mubr.msk.bf16.gmra.mrb[40].mxu1 %vm142_vm0, %v2235_v21 }
  0x5a   :  { %552 = vmatprep.mubr.bf16.mxu1 %v2127_v3 }
  0x5b   :  { %1633 = vmatmul.mubr.bf16.gmra.mrb[16].mxu0 %v2105_v12 }
  0x5c   :  { %1675 = vmatprep.mubr.bf16.mxu0 %v2127_v3 }
  0x61   :  { %1916 = vmatmul.mubr.msk.bf16.vlgmr.msra.gmra.mrb[44].mxu1 %vm142_vm0, %v2201_v9  ;;  %v1697_v9 = vld [vmem:[%s3501_s6 + $0x8] sm:$0xff] }
  0x62   :  { %562 = vmatprep.mubr.bf16.mxu1 %v2127_v3  ;;  %1796 = vperm.xlu1 %2046, %v1697_v9  }
  0x63   :  { %1992 = vmatmul.mubr.msk.bf16.vlgmr.msra.gmra.mrb[12].mxu0 %vm1583_vm1, %v2109_v14 }
  0x64   :  { %1685 = vmatprep.mubr.bf16.mxu0 %v2127_v3  ;;  %v1698_v3 = vld [vmem:[%s3501_s6 + $0x10] sm:$0xff] }
  0x66   :  { %1801 = vperm.xlu1 %2046, %v1698_v3  }
  0x69   :  { %1917 = vmatmul.mubr.msk.bf16.gmra.mrb[48].mxu1 %vm142_vm0, %v2235_v21  ;;  %v573_v21 = vld [vmem:[%s3500_s4] sm:$0xff] }
  0x6a   :  { %1023 = vperm.xlu1 %2046, %v577_v18   ;;  %939 = vperm.xlu0 %2045, %v573_v21  }
  0x6b   :  { %1993 = vmatmul.mubr.msk.bf16.gmra.mrb[16].mxu0 %vm1583_vm1, %v2110_v17 }
  0x6e   :  { %1033 = vperm.xlu1 %2046, %v579_v19   ;;  %1791 = vperm.xlu0 %2045, %v1696_v22  }
  0x72   :  { %1819 = vperm.xlu1 %2046, %v1700_v20   ;;  %1806 = vperm.xlu0 %2045, %v1699_v23  }
  0x76   :  { %1028 = vperm.xlu0 %2045, %v578_v24  }
  0x7a   :  { %1038 = vperm.xlu0 %2045, %v580_v25  }
  0x7e   :  { %1824 = vperm.xlu0 %2045, %v1701_v26  }
  0xdc   :  { %v2464_v27 = vpop.f32.mrb[0].mxu1 }
  0xdd   :  { %v653_v29 = vmul.f32 %v2464_v27, %v2464_v27  ;;  %v2470_v30 = vpop.f32.mrb[1].mxu1 }
  0xde   :  { %v2466_v28 = vpop.f32.mrb[0].mxu0  ;;  %v581_v32 = vadd.f32 %v2470_v30, %v2464_v27  ;;  %v654_v33 = vmul.f32 %v2470_v30, %v2470_v30  ;;  %v2478_v34 = vpop.f32.mrb[2].mxu1 }
  0xdf   :  { %v2472_v31 = vpop.f32.mrb[1].mxu0  ;;  %v669_v36 = vmul.f32 %v2478_v34, %v2478_v34  ;;  %v2484_v37 = vpop.f32.mrb[3].mxu1 }
  0xe0   :  { %v2480_v35 = vpop.f32.mrb[2].mxu0  ;;  %v717_v39 = vadd.f32 %v654_v33, %v653_v29  ;;  %v598_v40 = vadd.f32 %v2484_v37, %v2478_v34  ;;  %v670_v41 = vmul.f32 %v2484_v37, %v2484_v37 }
  0xe1   :  { %v2486_v38 = vpop.f32.mrb[3].mxu0 }
  0xe2   :  { %v734_v42 = vadd.f32 %v670_v41, %v669_v36 }
  0xe4   :  { %v2492_v43 = vpop.f32.mrb[4].mxu1 }
  0xe5   :  { %3579 = vst [vmem:[#allocation2_spill] sm:$0xff] %v2492_v43  ;;  %v685_v45 = vmul.f32 %v2492_v43, %v2492_v43  ;;  %v2498_v46 = vpop.f32.mrb[5].mxu1 }
  0xe6   :  { %v2494_v44 = vpop.f32.mrb[4].mxu0  ;;  %3580 = vst [vmem:[#allocation3_spill] sm:$0xff] %v2498_v46  ;;  %v615_v48 = vadd.f32 %v2498_v46, %v2492_v43  ;;  %v686_v49 = vmul.f32 %v2498_v46, %v2498_v46  ;;  %v2506_v50 = vpop.f32.mrb[6].mxu1 }
  0xe7   :  { %v2500_v47 = vpop.f32.mrb[5].mxu0  ;;  %3581 = vst [vmem:[#allocation4_spill] sm:$0xff] %v2506_v50  ;;  %v701_v52 = vmul.f32 %v2506_v50, %v2506_v50  ;;  %v2512_v53 = vpop.f32.mrb[7].mxu1 }
  0xe8   :  { %v2508_v51 = vpop.f32.mrb[6].mxu0  ;;  %3582 = vst [vmem:[#allocation5_spill] sm:$0xff] %v2512_v53  ;;  %v751_v55 = vadd.f32 %v686_v49, %v685_v45  ;;  %v632_v56 = vadd.f32 %v2512_v53, %v2506_v50  ;;  %v702_v57 = vmul.f32 %v2512_v53, %v2512_v53  ;;  %v666_v50 = vmul.f32 %v2500_v47, %v2500_v47 }
  0xe9   :  { %v2514_v54 = vpop.f32.mrb[7].mxu0 }
  0xea   :  { %3583 = vst [vmem:[#allocation6_spill] sm:$0xff] %v2514_v54  ;;  %v768_v58 = vadd.f32 %v702_v57, %v701_v52 }
  0xec   :  { %v2520_v59 = vpop.f32.mrb[8].mxu1 }
  0xed   :  { %v582_v60 = vadd.f32 %v581_v32, %v2520_v59  ;;  %v655_v61 = vmul.f32 %v2520_v59, %v2520_v59  ;;  %v2525_v62 = vpop.f32.mrb[9].mxu1 }
  0xee   :  { %v656_v63 = vmul.f32 %v2525_v62, %v2525_v62  ;;  %v2529_v0 = vpop.f32.mrb[10].mxu1  ;;  %v2537_v7 = vpop.f32.mrb[8].mxu0 }
  0xef   :  { %v718_v1 = vadd.f32 %v717_v39, %v655_v61  ;;  %v583_v2 = vadd.f32 %v582_v60, %v2525_v62  ;;  %v599_v4 = vadd.f32 %v598_v40, %v2529_v0  ;;  %v671_v5 = vmul.f32 %v2529_v0, %v2529_v0  ;;  %v2535_v6 = vpop.f32.mrb[11].mxu1  ;;  %3584 = vst [vmem:[#allocation7_spill] sm:$0xff] %v2537_v7  ;;  %v2541_v10 = vpop.f32.mrb[9].mxu0 }
  0xf0   :  { %v672_v8 = vmul.f32 %v2535_v6, %v2535_v6  ;;  %3585 = vst [vmem:[#allocation8_spill] sm:$0xff] %v2541_v10  ;;  %v2544_v14 = vpop.f32.mrb[10].mxu0 }
  0xf1   :  { %v719_v11 = vadd.f32 %v718_v1, %v656_v63  ;;  %v735_v12 = vadd.f32 %v734_v42, %v671_v5  ;;  %v600_v13 = vadd.f32 %v599_v4, %v2535_v6  ;;  %3586 = vst [vmem:[#allocation9_spill] sm:$0xff] %v2544_v14  ;;  %v2546_v15 = vpop.f32.mrb[11].mxu0 }
  0xf2   :  { %3587 = vst [vmem:[#allocation10_spill] sm:$0xff] %v2546_v15 }
  0xf3   :  { %v736_v16 = vadd.f32 %v735_v12, %v672_v8 }
  0xf4   :  { %v2548_v17 = vpop.f32.mrb[12].mxu1 }
  0xf5   :  { %3588 = vst [vmem:[#allocation11_spill] sm:$0xff] %v2548_v17  ;;  %v616_v9 = vadd.f32 %v615_v48, %v2548_v17  ;;  %v687_v3 = vmul.f32 %v2548_v17, %v2548_v17  ;;  %v2553_v18 = vpop.f32.mrb[13].mxu1 }
  0xf6   :  { %3589 = vst [vmem:[#allocation12_spill] sm:$0xff] %v2553_v18  ;;  %v688_v19 = vmul.f32 %v2553_v18, %v2553_v18  ;;  %v2557_v20 = vpop.f32.mrb[14].mxu1 }
  0xf7   :  { %3590 = vst [vmem:[#allocation13_spill] sm:$0xff] %v2557_v20  ;;  %v752_v21 = vadd.f32 %v751_v55, %v687_v3  ;;  %v617_v22 = vadd.f32 %v616_v9, %v2553_v18  ;;  %v633_v23 = vadd.f32 %v632_v56, %v2557_v20  ;;  %v703_v24 = vmul.f32 %v2557_v20, %v2557_v20  ;;  %v2563_v25 = vpop.f32.mrb[15].mxu1 }
  0xf8   :  { %3591 = vst [vmem:[#allocation14_spill] sm:$0xff] %v2563_v25  ;;  %v704_v26 = vmul.f32 %v2563_v25, %v2563_v25 }
  0xf9   :  { %v753_v29 = vadd.f32 %v752_v21, %v688_v19  ;;  %v769_v32 = vadd.f32 %v768_v58, %v703_v24  ;;  %v634_v33 = vadd.f32 %v633_v23, %v2563_v25 }
  0xfb   :  { %v770_v36 = vadd.f32 %v769_v32, %v704_v26 }
  0xfc   :  { %v2568_v39 = vpop.f32.mrb[16].mxu1 }
  0xfd   :  { %v584_v40 = vadd.f32 %v583_v2, %v2568_v39  ;;  %v657_v41 = vmul.f32 %v2568_v39, %v2568_v39  ;;  %v2573_v42 = vpop.f32.mrb[17].mxu1 }
  0xfe   :  { %v658_v45 = vmul.f32 %v2573_v42, %v2573_v42  ;;  %v2577_v48 = vpop.f32.mrb[18].mxu1 }
  0xff   :  { %v720_v49 = vadd.f32 %v719_v11, %v657_v41  ;;  %v585_v52 = vadd.f32 %v584_v40, %v2573_v42  ;;  %v601_v55 = vadd.f32 %v600_v13, %v2577_v48  ;;  %v673_v56 = vmul.f32 %v2577_v48, %v2577_v48  ;;  %v2583_v57 = vpop.f32.mrb[19].mxu1 }
 0x100   :  { %v674_v58 = vmul.f32 %v2583_v57, %v2583_v57 }
 0x101   :  { %v721_v60 = vadd.f32 %v720_v49, %v658_v45  ;;  %v737_v61 = vadd.f32 %v736_v16, %v673_v56  ;;  %v602_v63 = vadd.f32 %v601_v55, %v2583_v57 }
 0x103   :  { %v738_v1 = vadd.f32 %v737_v61, %v674_v58 }
 0x104   :  { %v2588_v2 = vpop.f32.mrb[20].mxu1 }
 0x105   :  { %3592 = vst [vmem:[#allocation15_spill] sm:$0xff] %v2588_v2  ;;  %v618_v4 = vadd.f32 %v617_v22, %v2588_v2  ;;  %v689_v5 = vmul.f32 %v2588_v2, %v2588_v2  ;;  %v2593_v8 = vpop.f32.mrb[21].mxu1 }
 0x106   :  { %3593 = vst [vmem:[#allocation16_spill] sm:$0xff] %v2593_v8  ;;  %v690_v11 = vmul.f32 %v2593_v8, %v2593_v8  ;;  %v2597_v12 = vpop.f32.mrb[22].mxu1 }
 0x107   :  { %3594 = vst [vmem:[#allocation17_spill] sm:$0xff] %v2597_v12  ;;  %v754_v13 = vadd.f32 %v753_v29, %v689_v5  ;;  %v619_v16 = vadd.f32 %v618_v4, %v2593_v8  ;;  %v635_v9 = vadd.f32 %v634_v33, %v2597_v12  ;;  %v705_v3 = vmul.f32 %v2597_v12, %v2597_v12  ;;  %v2603_v19 = vpop.f32.mrb[23].mxu1 }
 0x108   :  { %3595 = vst [vmem:[#allocation18_spill] sm:$0xff] %v2603_v19  ;;  %v706_v21 = vmul.f32 %v2603_v19, %v2603_v19 }
 0x109   :  { %v755_v22 = vadd.f32 %v754_v13, %v690_v11  ;;  %v771_v23 = vadd.f32 %v770_v36, %v705_v3  ;;  %v636_v24 = vadd.f32 %v635_v9, %v2603_v19  ;;  %v677_v13 = vmul.f32 %v2480_v35, %v2480_v35 }
 0x10b   :  { %v772_v26 = vadd.f32 %v771_v23, %v706_v21 }
 0x10c   :  { %v2608_v32 = vpop.f32.mrb[24].mxu1 }
 0x10d   :  { %v586_v29 = vadd.f32 %v585_v52, %v2608_v32  ;;  %v659_v33 = vmul.f32 %v2608_v32, %v2608_v32  ;;  %v2613_v40 = vpop.f32.mrb[25].mxu1  ;;  %v661_v52 = vmul.f32 %v2466_v28, %v2466_v28 }
 0x10e   :  { %v660_v41 = vmul.f32 %v2613_v40, %v2613_v40  ;;  %v2617_v45 = vpop.f32.mrb[26].mxu1 }
 0x10f   :  { %v722_v49 = vadd.f32 %v721_v60, %v659_v33  ;;  %v587_v36 = vadd.f32 %v586_v29, %v2613_v40  ;;  %v603_v55 = vadd.f32 %v602_v63, %v2617_v45  ;;  %v675_v56 = vmul.f32 %v2617_v45, %v2617_v45  ;;  %v2623_v58 = vpop.f32.mrb[27].mxu1 }
 0x110   :  { %v676_v61 = vmul.f32 %v2623_v58, %v2623_v58  ;;  %v662_v63 = vmul.f32 %v2472_v31, %v2472_v31 }
 0x111   :  { %v588_v4 = vadd.f32 %v587_v36, %v2466_v28  ;;  %v723_v5 = vadd.f32 %v722_v49, %v660_v41  ;;  %v739_v11 = vadd.f32 %v738_v1, %v675_v56  ;;  %v604_v60 = vadd.f32 %v603_v55, %v2623_v58 }
 0x112   :  { %v678_v55 = vmul.f32 %v2486_v38, %v2486_v38 }
 0x113   :  { %v724_v9 = vadd.f32 %v723_v5, %v661_v52  ;;  %v605_v3 = vadd.f32 %v604_v60, %v2480_v35  ;;  %v740_v21 = vadd.f32 %v739_v11, %v676_v61  ;;  %v589_v23 = vadd.f32 %v588_v4, %v2472_v31 }
 0x114   :  { %v2637_v29 = vpop.f32.mrb[28].mxu1 }
 0x115   :  { %3596 = vst [vmem:[#allocation19_spill] sm:$0xff] %v2637_v29  ;;  %v741_v33 = vadd.f32 %v740_v21, %v677_v13  ;;  %v620_v41 = vadd.f32 %v619_v16, %v2637_v29  ;;  %v691_v1 = vmul.f32 %v2637_v29, %v2637_v29  ;;  %v2642_v49 = vpop.f32.mrb[29].mxu1  ;;  %v725_v36 = vadd.f32 %v724_v9, %v662_v63 }
 0x116   :  { %3597 = vst [vmem:[#allocation20_spill] sm:$0xff] %v2642_v49  ;;  %v692_v56 = vmul.f32 %v2642_v49, %v2642_v49  ;;  %v2648_v52 = vpop.f32.mrb[30].mxu1  ;;  %v606_v61 = vadd.f32 %v605_v3, %v2486_v38 }
 0x117   :  { %3598 = vst [vmem:[#allocation21_spill] sm:$0xff] %v2648_v52  ;;  %v756_v4 = vadd.f32 %v755_v22, %v691_v1  ;;  %v621_v5 = vadd.f32 %v620_v41, %v2642_v49  ;;  %v637_v16 = vadd.f32 %v636_v24, %v2648_v52  ;;  %v707_v11 = vmul.f32 %v2648_v52, %v2648_v52  ;;  %v2655_v60 = vpop.f32.mrb[31].mxu1 }
 0x118   :  { %3599 = vst [vmem:[#allocation22_spill] sm:$0xff] %v2655_v60  ;;  %v708_v63 = vmul.f32 %v2655_v60, %v2655_v60  ;;  %v742_v13 = vadd.f32 %v741_v33, %v678_v55  ;;  %v713_v49 = vmul.f32 %v2544_v14, %v2544_v14 }
 0x119   :  { %v757_v9 = vadd.f32 %v756_v4, %v692_v56  ;;  %v773_v21 = vadd.f32 %v772_v26, %v707_v11  ;;  %v638_v19 = vadd.f32 %v637_v16, %v2655_v60 }
 0x11b   :  { %v774_v12 = vadd.f32 %v773_v21, %v708_v63 }
 0x11c   :  { %v2660_v3 = vpop.f32.mrb[32].mxu1 }
 0x11d   :  { %3600 = vst [vmem:[#allocation23_spill] sm:$0xff] %v2660_v3  ;;  %v622_v22 = vadd.f32 %v621_v5, %v2660_v3  ;;  %v693_v24 = vmul.f32 %v2660_v3, %v2660_v3  ;;  %v2665_v41 = vpop.f32.mrb[33].mxu1 }
 0x11e   :  { %3601 = vst [vmem:[#allocation24_spill] sm:$0xff] %v2665_v41  ;;  %v694_v1 = vmul.f32 %v2665_v41, %v2665_v41  ;;  %v2669_v52 = vpop.f32.mrb[34].mxu1 }
 0x11f   :  { %3602 = vst [vmem:[#allocation25_spill] sm:$0xff] %v2669_v52  ;;  %v758_v33 = vadd.f32 %v757_v9, %v693_v24  ;;  %v623_v26 = vadd.f32 %v622_v22, %v2665_v41  ;;  %v639_v55 = vadd.f32 %v638_v19, %v2669_v52  ;;  %v709_v56 = vmul.f32 %v2669_v52, %v2669_v52  ;;  %v2675_v4 = vpop.f32.mrb[35].mxu1 }
 0x120   :  { %3603 = vst [vmem:[#allocation26_spill] sm:$0xff] %v2675_v4  ;;  %v710_v5 = vmul.f32 %v2675_v4, %v2675_v4 }
 0x121   :  { %v759_v16 = vadd.f32 %v758_v33, %v694_v1  ;;  %v775_v11 = vadd.f32 %v774_v12, %v709_v56  ;;  %v640_v63 = vadd.f32 %v639_v55, %v2675_v4 }
 0x123   :  { %v776_v21 = vadd.f32 %v775_v11, %v710_v5 }
 0x124   :  { %v2680_v60 = vpop.f32.mrb[36].mxu1 }
 0x125   :  { %v590_v9 = vadd.f32 %v589_v23, %v2680_v60  ;;  %v663_v19 = vmul.f32 %v2680_v60, %v2680_v60  ;;  %v2685_v22 = vpop.f32.mrb[37].mxu1  ;;  %v665_v23 = vmul.f32 %v2494_v44, %v2494_v44 }
 0x126   :  { %v664_v24 = vmul.f32 %v2685_v22, %v2685_v22  ;;  %v2689_v52 = vpop.f32.mrb[38].mxu1 }
 0x127   :  { %v726_v25 = vadd.f32 %v725_v36, %v663_v19  ;;  %v591_v12 = vadd.f32 %v590_v9, %v2685_v22  ;;  %v607_v1 = vadd.f32 %v606_v61, %v2689_v52  ;;  %v679_v33 = vmul.f32 %v2689_v52, %v2689_v52  ;;  %v2695_v55 = vpop.f32.mrb[39].mxu1 }
 0x128   :  { %v680_v56 = vmul.f32 %v2695_v55, %v2695_v55  ;;  %v681_v61 = vmul.f32 %v2508_v51, %v2508_v51 }
 0x129   :  { %v592_v5 = vadd.f32 %v591_v12, %v2494_v44  ;;  %v727_v11 = vadd.f32 %v726_v25, %v664_v24  ;;  %v743_v4 = vadd.f32 %v742_v13, %v679_v33  ;;  %v608_v36 = vadd.f32 %v607_v1, %v2695_v55 }
 0x12b   :  { %v609_v9 = vadd.f32 %v608_v36, %v2508_v51  ;;  %v744_v19 = vadd.f32 %v743_v4, %v680_v56  ;;  %v593_v20 = vadd.f32 %v592_v5, %v2500_v47  ;;  %v728_v53 = vadd.f32 %v727_v11, %v665_v23 }
 0x12c   :  { %v2709_v41 = vpop.f32.mrb[40].mxu1  ;;  %v682_v4 = vmul.f32 %v2514_v54, %v2514_v54 }
 0x12d   :  { %3604 = vst [vmem:[#allocation27_spill] sm:$0xff] %v2709_v41  ;;  %v624_v12 = vadd.f32 %v623_v26, %v2709_v41  ;;  %v695_v25 = vmul.f32 %v2709_v41, %v2709_v41  ;;  %v2714_v13 = vpop.f32.mrb[41].mxu1  ;;  %v610_v24 = vadd.f32 %v609_v9, %v2514_v54  ;;  %v745_v1 = vadd.f32 %v744_v19, %v681_v61 }
 0x12e   :  { %3605 = vst [vmem:[#allocation28_spill] sm:$0xff] %v2714_v13  ;;  %v696_v33 = vmul.f32 %v2714_v13, %v2714_v13  ;;  %v2721_v23 = vpop.f32.mrb[42].mxu1  ;;  %v729_v56 = vadd.f32 %v728_v53, %v666_v50  ;;  %v697_v61 = vmul.f32 %v2537_v7, %v2537_v7 }
 0x12f   :  { %3606 = vst [vmem:[#allocation29_spill] sm:$0xff] %v2721_v23  ;;  %v760_v5 = vadd.f32 %v759_v16, %v695_v25  ;;  %v625_v26 = vadd.f32 %v624_v12, %v2714_v13  ;;  %v641_v11 = vadd.f32 %v640_v63, %v2721_v23  ;;  %v711_v36 = vmul.f32 %v2721_v23, %v2721_v23  ;;  %v2727_v41 = vpop.f32.mrb[43].mxu1 }
 0x130   :  { %3607 = vst [vmem:[#allocation30_spill] sm:$0xff] %v2727_v41  ;;  %v712_v9 = vmul.f32 %v2727_v41, %v2727_v41  ;;  %v746_v19 = vadd.f32 %v745_v1, %v682_v4  ;;  %v698_v63 = vmul.f32 %v2541_v10, %v2541_v10 }
 0x131   :  { %v626_v3 = vadd.f32 %v625_v26, %v2537_v7  ;;  %v761_v50 = vadd.f32 %v760_v5, %v696_v33  ;;  %v777_v53 = vadd.f32 %v776_v21, %v711_v36  ;;  %v642_v16 = vadd.f32 %v641_v11, %v2727_v41 }
 0x132   :  { %v714_v21 = vmul.f32 %v2546_v15, %v2546_v15 }
 0x133   :  { %v643_v12 = vadd.f32 %v642_v16, %v2544_v14  ;;  %v778_v25 = vadd.f32 %v777_v53, %v712_v9  ;;  %v762_v23 = vadd.f32 %v761_v50, %v697_v61  ;;  %v627_v13 = vadd.f32 %v626_v3, %v2541_v10 }
 0x134   :  { %v2741_v29 = vpop.f32.mrb[44].mxu1 }
 0x135   :  { %v2747_v4 = vpop.f32.mrb[45].mxu1  ;;  %v594_v33 = vadd.f32 %v593_v20, %v2741_v29  ;;  %v763_v5 = vadd.f32 %v762_v23, %v698_v63  ;;  %v2751_v26 = vadd.f32 %v643_v12, %v2546_v15  ;;  %v667_v3 = vmul.f32 %v2741_v29, %v2741_v29 }
 0x136   :  { %v2745_v1 = vpop.f32.mrb[12].mxu0  ;;  %v2757_v36 = vpop.f32.mrb[46].mxu1  ;;  %v668_v9 = vmul.f32 %v2747_v4, %v2747_v4  ;;  %v779_v50 = vadd.f32 %v778_v25, %v713_v49 }
 0x137   :  { %v2755_v11 = vpop.f32.mrb[13].mxu0  ;;  %3608 = vst [vmem:[#allocation31_spill] sm:$0xff] %v2757_v36  ;;  %v1725_v61 = vmul.f32 %v2745_v1, %v2745_v1  ;;  %v683_v53 = vmul.f32 %v2757_v36, %v2757_v36  ;;  %v2771_v63 = vpop.f32.mrb[47].mxu1  ;;  %v595_v12 = vadd.f32 %v594_v33, %v2747_v4  ;;  %v611_v25 = vadd.f32 %v610_v24, %v2757_v36 }
 0x138   :  { %v1726_v20 = vmul.f32 %v2755_v11, %v2755_v11  ;;  %v2765_v23 = vpop.f32.mrb[14].mxu0  ;;  %v1705_v16 = vsel %vm1704_vm2, %v2755_v11, 0.0  ;;  %3609 = vst [vmem:[#allocation32_spill] sm:$0xff] %v2771_v63  ;;  %v684_v41 = vmul.f32 %v2771_v63, %v2771_v63  ;;  %v730_v24 = vadd.f32 %v729_v56, %v667_v3 }
 0x139   :  { %v2774_v15 = vpop.f32.mrb[15].mxu0  ;;  %v1706_v14 = vadd.f32 %v1705_v16, %v2745_v1  ;;  %v1727_v49 = vmul.f32 %v2765_v23, %v2765_v23  ;;  %596 = vadd.xlane.f32.xlu0 %v595_v12  ;;  %v747_v8 = vadd.f32 %v746_v19, %v683_v53  ;;  %v612_v18 = vadd.f32 %v611_v25, %v2771_v63 }
 0x13a   :  { %v1728_v10 = vmul.f32 %v2774_v15, %v2774_v15  ;;  %v1733_v7 = vsel %vm1704_vm2, %v1726_v20, 0.0  ;;  %v1709_v33 = vsel %vm1704_vm2, %v2774_v15, 0.0  ;;  %v780_v43 = vadd.f32 %v779_v50, %v714_v21 }
 0x13b   :  { %1707 = vadd.xlane.f32.xlu1 %v1706_v14  ;;  %v1734_v16 = vadd.f32 %v1733_v7, %v1725_v61  ;;  %v1710_v2 = vadd.f32 %v1709_v33, %v2765_v23  ;;  %v748_v46 = vadd.f32 %v747_v8, %v684_v41  ;;  %v731_v54 = vadd.f32 %v730_v24, %v668_v9 }
 0x13c   :  { %v1737_v17 = vsel %vm1704_vm2, %v1728_v10, 0.0  ;;  %v2790_v36 = vpop.f32.mrb[48].mxu1 }
 0x13d   :  { %3610 = vst [vmem:[#allocation33_spill] sm:$0xff] %v2790_v36  ;;  %v1738_v12 = vadd.f32 %v1737_v17, %v1727_v49  ;;  %v699_v19 = vmul.f32 %v2790_v36, %v2790_v36  ;;  %1711 = vadd.xlane.f32.xlu0 %v1710_v2  ;;  %v2796_v7 = vpop.f32.mrb[49].mxu1  ;;  %v628_v14 = vadd.f32 %v627_v13, %v2790_v36 }
 0x13e   :  { %v2792_v20 = vpop.f32.mrb[16].mxu0  ;;  %3612 = vst [vmem:[#allocation35_spill] sm:$0xff] %v2796_v7  ;;  %v2801_v10 = vpop.f32.mrb[50].mxu1  ;;  %v700_v8 = vmul.f32 %v2796_v7, %v2796_v7 }
 0x13f   :  { %3611 = vst [vmem:[#allocation34_spill] sm:$0xff] %v2792_v20  ;;  %1735 = vadd.xlane.f32.xlu1 %v1734_v16  ;;  %v2799_v56 = vpop.f32.mrb[17].mxu0  ;;  %3614 = vst [vmem:[#allocation37_spill] sm:$0xff] %v2801_v10  ;;  %v1729_v17 = vmul.f32 %v2792_v20, %v2792_v20  ;;  %v715_v2 = vmul.f32 %v2801_v10, %v2801_v10  ;;  %v2813_v13 = vpop.f32.mrb[51].mxu1  ;;  %v764_v61 = vadd.f32 %v763_v5, %v699_v19 }
 0x140   :  { %3613 = vst [vmem:[#allocation36_spill] sm:$0xff] %v2799_v56  ;;  %v1730_v41 = vmul.f32 %v2799_v56, %v2799_v56  ;;  %v2809_v21 = vpop.f32.mrb[18].mxu0  ;;  %3616 = vst [vmem:[#allocation39_spill] sm:$0xff] %v2813_v13  ;;  %v1713_v3 = vsel %vm1704_vm2, %v2799_v56, 0.0  ;;  %v716_v50 = vmul.f32 %v2813_v13, %v2813_v13  ;;  %v629_v49 = vadd.f32 %v628_v14, %v2796_v7 }
 0x141   :  { %3615 = vst [vmem:[#allocation38_spill] sm:$0xff] %v2809_v21  ;;  %v2817_v9 = vpop.f32.mrb[19].mxu0  ;;  %v1714_v53 = vadd.f32 %v1713_v3, %v2792_v20  ;;  %v1731_v25 = vmul.f32 %v2809_v21, %v2809_v21  ;;  %613 = vadd.xlane.f32.xlu0 %v612_v18  ;;  %v765_v5 = vadd.f32 %v764_v61, %v700_v8  ;;  %v1702_v18 = vld [vmem:[%s3503_s7 + $0x10] sm:$0xff] }
 0x142   :  { %3617 = vst [vmem:[#allocation40_spill] sm:$0xff] %v2817_v9  ;;  %v1717_v33 = vsel %vm1704_vm2, %v2817_v9, 0.0  ;;  %v1732_v16 = vmul.f32 %v2817_v9, %v2817_v9  ;;  %v1741_v24 = vsel %vm1704_vm2, %v1730_v41, 0.0  ;;  %v645_v14 = vadd.f32 %v2751_v26, %v2801_v10  ;;  %v2845_v26 = vpop.permute.xlu0 %939  ;;  %v3630_v9 = vld [vmem:[#allocation32_spill] sm:$0xff] }
 0x143   :  { %1739 = vadd.xlane.f32.xlu1 %v1738_v12  ;;  %v1718_v19 = vadd.f32 %v1717_v33, %v2809_v21  ;;  %v1742_v56 = vadd.f32 %v1741_v24, %v1729_v17  ;;  %v781_v3 = vadd.f32 %v780_v43, %v715_v2  ;;  %v1703_v43 = vld [vmem:[%s3503_s7 + $0x18] sm:$0xff] }
 0x144   :  { %v1745_v20 = vsel %vm1704_vm2, %v1732_v16, 0.0  ;;  %v646_v36 = vadd.f32 %v645_v14, %v2813_v13 }
 0x145   :  { %v1746_v7 = vadd.f32 %v1745_v20, %v1731_v25  ;;  %v782_v63 = vadd.f32 %v781_v3, %v716_v50  ;;  %732 = vadd.xlane.f32.xlu0 %v731_v54  ;;  %v2841_v54 = vpop.permute.xlu1 %944 }
 0x146   :  { %3618 = vst [vmem:[#allocation41_spill] sm:$0xff] %v2841_v54 }
 0x147   :  { %749 = vadd.xlane.f32.xlu1 %v748_v46 }
 0x149   :  { %766 = vadd.xlane.f32.xlu0 %v765_v5  ;;  %v2843_v46 = vpop.permute.xlu1 %949 }
 0x14a   :  { %3619 = vst [vmem:[#allocation42_spill] sm:$0xff] %v2843_v46 }
 0x14b   :  { %1715 = vadd.xlane.f32.xlu1 %v1714_v53 }
 0x14d   :  { %1747 = vadd.xlane.f32.xlu0 %v1746_v7  ;;  %v2847_v12 = vpop.permute.xlu1 %954 }
 0x14e   :  { %3620 = vst [vmem:[#allocation43_spill] sm:$0xff] %v2847_v12 }
 0x14f   :  { %630 = vadd.xlane.f32.xlu1 %v629_v49 }
 0x153   :  { %1719 = vadd.xlane.f32.xlu1 %v1718_v19 }
 0x157   :  { %1743 = vadd.xlane.f32.xlu1 %v1742_v56 }
 0x15b   :  { %647 = vadd.xlane.f32.xlu1 %v646_v36  ;;  %v2849_v36 = vpop.permute.xlu0 %1791 }
 0x15f   :  { %783 = vadd.xlane.f32.xlu1 %v782_v63  ;;  %v2851_v63 = vpop.permute.xlu1 %1796  ;;  %v2853_v20 = vpop.permute.xlu0 %1806 }
 0x160   :  { %3621 = vst [vmem:[#allocation44_spill] sm:$0xff] %v2853_v20 }
 0x163   :  { %1834 = vperm.xlu0 %2045, %v1703_v43   ;;  %v2855_v7 = vpop.permute.xlu1 %1801  ;;  %v2857_v56 = vpop.permute.xlu0 %1028 }
 0x164   :  { %3622 = vst [vmem:[#allocation45_spill] sm:$0xff] %v2855_v7  ;;  %3623 = vst [vmem:[#allocation46_spill] sm:$0xff] %v2857_v56  ;;  %v3641_v56 = vld [vmem:[#allocation20_spill] sm:$0xff] }
 0x167   :  { %v2859_v8 = vpop.permute.xlu1 %1023  ;;  %v2861_v17 = vpop.permute.xlu0 %1038 }
 0x168   :  { %3624 = vst [vmem:[#allocation47_spill] sm:$0xff] %v2859_v8  ;;  %3625 = vst [vmem:[#allocation48_spill] sm:$0xff] %v2861_v17 }
 0x16b   :  { %v2863_v41 = vpop.permute.xlu1 %1033  ;;  %v2865_v2 = vpop.permute.xlu0 %1824 }
 0x16c   :  { %3626 = vst [vmem:[#allocation49_spill] sm:$0xff] %v2863_v41 }
 0x16f   :  { %v2867_v61 = vpop.permute.xlu1 %1819 }
 0x170   :  { %1829 = vperm.xlu1 %2046, %v1702_v18  }
 0x1c6   :  { %v597_v50 = vpop.xlane.xlu0 %596 }
 0x1c7   :  { %v2871_v33 = vmul.f32 0.00048828125, %v597_v50 }
 0x1c8   :  { %v1708_v53 = vpop.xlane.xlu1 %1707 }
 0x1c9   :  { %v2869_v49 = vmul.f32 0.004132231, %v1708_v53 }
 0x1ca   :  { %v1712_v25 = vpop.xlane.xlu0 %1711 }
 0x1cb   :  { %v1753_v5 = vmul.f32 %v2869_v49, %v2869_v49  ;;  %v2875_v19 = vmul.f32 0.004132231, %v1712_v25 }
 0x1cc   :  { %v1736_v16 = vpop.xlane.xlu1 %1735 }
 0x1cd   :  { %v1749_v24 = vmul.f32 0.004132231, %v1736_v16  ;;  %v1754_v12 = vmul.f32 %v2875_v19, %v2875_v19  ;;  %v1768_v25 = vsub.f32 %v2774_v15, %v2875_v19  ;;  %v789_v16 = vmul.f32 %v2871_v33, %v2871_v33 }
 0x1ce   :  { %v614_v14 = vpop.xlane.xlu0 %613 }
 0x1cf   :  { %v1757_v43 = vsub.f32 %v1749_v24, %v1753_v5  ;;  %v2895_v3 = vmul.f32 0.00048828125, %v614_v14 }
 0x1d0   :  { %v1740_v18 = vpop.xlane.xlu1 %1739 }
 0x1d1   :  { %v1750_v17 = vmul.f32 0.004132231, %v1740_v18  ;;  %v1761_v24 = vmax.f32 %v1757_v43, 0.0 }
 0x1d2   :  { %v733_v13 = vpop.xlane.xlu0 %732 }
 0x1d3   :  { %v1758_v18 = vsub.f32 %v1750_v17, %v1754_v12  ;;  %v1773_v43 = vadd.f32 1e-05, %v1761_v24  ;;  %v790_v12 = vmul.f32 %v2895_v3, %v2895_v3  ;;  %v785_v24 = vmul.f32 0.00048828125, %v733_v13 }
 0x1d4   :  { %v750_v10 = vpop.xlane.xlu1 %749 }
 0x1d5   :  { %v1762_v14 = vmax.f32 %v1758_v18, 0.0  ;;  %2111 = vrsqrt.f32 %v1773_v43  ;;  %v786_v50 = vmul.f32 0.00048828125, %v750_v10  ;;  %v1767_v18 = vsub.f32 %v2765_v23, %v2875_v19 }
 0x1d6   :  { %v767_v17 = vpop.xlane.xlu0 %766  ;;  %v793_v19 = vsub.f32 %v785_v24, %v789_v16 }
 0x1d7   :  { %v1774_v5 = vadd.f32 1e-05, %v1762_v14  ;;  %v794_v53 = vsub.f32 %v786_v50, %v790_v12  ;;  %v3628_v14 = vld [vmem:[#allocation6_spill] sm:$0xff]  ;;  %v787_v21 = vmul.f32 0.00048828125, %v767_v17  ;;  %v3634_v17 = vsub.f32 %v2755_v11, %v2869_v49 }
 0x1d8   :  { %v1716_v43 = vpop.xlane.xlu1 %1715  ;;  %v797_v15 = vmax.f32 %v793_v19, 0.0 }
 0x1d9   :  { %2113 = vrsqrt.f32 %v1774_v5  ;;  %v798_v50 = vmax.f32 %v794_v53, 0.0  ;;  %v2945_v16 = vmul.f32 0.004132231, %v1716_v43  ;;  %v3629_v43 = vld [vmem:[#allocation31_spill] sm:$0xff]  ;;  %v3652_v5 = vld [vmem:[#allocation33_spill] sm:$0xff] }
 0x1da   :  { %v1748_v20 = vpop.xlane.xlu0 %1747  ;;  %v865_v7 = vadd.f32 1e-05, %v797_v15  ;;  %v3633_v15 = vsub.f32 %v2745_v1, %v2869_v49 }
 0x1db   :  { %3627 = vst [vmem:[#allocation50_spill] sm:$0xff] %v2945_v16  ;;  %v866_v10 = vadd.f32 1e-05, %v798_v50  ;;  %v2965_v41 = vmul.f32 0.004132231, %v1748_v20  ;;  %v2969_v19 = vmul.f32 %v2945_v16, %v2945_v16  ;;  %v3636_v20 = vld [vmem:[#allocation11_spill] sm:$0xff] }
 0x1dc   :  { %v631_v24 = vpop.xlane.xlu1 %630 }
 0x1dd   :  { %v2951_v53 = vmul.f32 0.00048828125, %v631_v24  ;;  %2115 = vrsqrt.f32 %v866_v10  ;;  %3632 = vst [vmem:[#allocation6_spill] sm:$0xff] %v2965_v41  ;;  %v3642_v41 = vld [vmem:[#allocation23_spill] sm:$0xff] }
 0x1de   :  { %2117 = vrsqrt.f32 %v865_v7  ;;  %v3635_v7 = vld [vmem:[#allocation3_spill] sm:$0xff] }
 0x1df   :  { %v791_v50 = vmul.f32 %v2951_v53, %v2951_v53  ;;  %v2112_v24 = vpop.eup %2111 }
 0x1e0   :  { %v1720_v23 = vpop.xlane.xlu1 %1719  ;;  %v1781_v10 = vmul.f32 %v2112_v24, %v3633_v15  ;;  %v1782_v13 = vmul.f32 %v2112_v24, %v3634_v17 }
 0x1e1   :  { %v795_v46 = vsub.f32 %v787_v21, %v791_v50  ;;  %v3640_v50 = vld [vmem:[#allocation19_spill] sm:$0xff] }
 0x1e2   :  { %v1809_v11 = vmul.f32 %v2849_v36, %v1781_v10  ;;  %v1810_v21 = vmul.f32 %v2849_v36, %v1782_v13  ;;  %v3013_v36 = vmul.f32 0.004132231, %v1720_v23 }
 0x1e3   :  { %v2114_v54 = vpop.eup %2113  ;;  %v799_v49 = vmax.f32 %v795_v46, 0.0 }
 0x1e4   :  { %v1783_v17 = vmul.f32 %v2114_v54, %v1767_v18  ;;  %v1784_v12 = vmul.f32 %v2114_v54, %v1768_v25  ;;  %v1744_v16 = vpop.xlane.xlu1 %1743  ;;  %v1837_v15 = vadd.f32 %v2867_v61, %v1809_v11  ;;  %v1838_v1 = vadd.f32 %v2867_v61, %v1810_v21  ;;  %v3649_v61 = vld [vmem:[#allocation7_spill] sm:$0xff]  ;;  %3650 = vst [vmem:[#allocation32_spill] sm:$0xff] %v3013_v36 }
 0x1e5   :  { %v867_v24 = vadd.f32 1e-05, %v799_v49  ;;  %v3646_v11 = vmov 0  ;;  %v3015_v13 = vmul.f32 0.004132231, %v1744_v16  ;;  %v3653_v25 = vld [vmem:[#allocation35_spill] sm:$0xff]  ;;  %v3031_v23 = vmul.f32 %v3013_v36, %v3013_v36 }
 0x1e6   :  { %v1811_v18 = vmul.f32 %v2851_v63, %v1783_v17  ;;  %v1812_v54 = vmul.f32 %v2851_v63, %v1784_v12  ;;  %v3647_v11 = vsel %vm3007_vm5, 4294967295, %v3646_v11  ;;  %v2030_v17 = vpack.c.bf16 %v1838_v1, %v1837_v15  ;;  %v3651_v12 = vld [vmem:[#allocation8_spill] sm:$0xff] }
 0x1e7   :  { %3648 = vst [vmem:[#allocation31_spill] sm:$0xff] %v3647_v11  ;;  %v2116_v10 = vpop.eup %2115  ;;  %2119 = vrsqrt.f32 %v867_v24  ;;  %v3655_v15 = vsub.f32 %v2478_v34, %v2895_v3  ;;  %v3656_v24 = vsub.f32 %v2484_v37, %v2895_v3  ;;  %v3658_v16 = vsub.f32 %v2535_v6, %v2895_v3 }
 0x1e8   :  { %v3018_v63 = vadd.f32 %v2865_v2, %v1811_v18  ;;  %v3027_v21 = vadd.f32 %v2865_v2, %v1812_v54  ;;  %1872 = vst.msk [vmem:[%s3504_s9] sm:$0xff] %vm3007_vm5, %v2030_v17  ;;  %v2118_v1 = vpop.eup %2117  ;;  %v3657_v54 = vsub.f32 %v2529_v0, %v2895_v3  ;;  %v3659_v17 = vsub.f32 %v2464_v27, %v2871_v33 }
 0x1e9   :  { %v889_v2 = vmul.f32 %v2116_v10, %v3655_v15  ;;  %v890_v18 = vmul.f32 %v2116_v10, %v3656_v24  ;;  %v892_v8 = vmul.f32 %v2116_v10, %v3658_v16  ;;  %v3660_v34 = vsub.f32 %v2470_v30, %v2871_v33 }
 0x1ea   :  { %3654 = vst [vmem:[#allocation3_spill] sm:$0xff] %v3027_v21  ;;  %v891_v46 = vmul.f32 %v2116_v10, %v3657_v54  ;;  %v873_v49 = vmul.f32 %v2118_v1, %v3659_v17  ;;  %v3661_v37 = vsub.f32 %v2520_v59, %v2871_v33  ;;  %v3662_v0 = vsub.f32 %v2525_v62, %v2871_v33 }
 0x1eb   :  { %v874_v15 = vmul.f32 %v2118_v1, %v3660_v34  ;;  %v3663_v6 = vsub.f32 %v2568_v39, %v2871_v33  ;;  %v3664_v27 = vsub.f32 %v2573_v42, %v2871_v33  ;;  %v3665_v30 = vsub.f32 %v2608_v32, %v2871_v33 }
 0x1ec   :  { %v875_v24 = vmul.f32 %v2118_v1, %v3661_v37  ;;  %v876_v54 = vmul.f32 %v2118_v1, %v3662_v0  ;;  %v3666_v59 = vsub.f32 %v2613_v40, %v2871_v33  ;;  %v3667_v62 = vsub.f32 %v2466_v28, %v2871_v33 }
 0x1ed   :  { %v877_v16 = vmul.f32 %v2118_v1, %v3663_v6  ;;  %v878_v17 = vmul.f32 %v2118_v1, %v3664_v27  ;;  %v879_v34 = vmul.f32 %v2118_v1, %v3665_v30  ;;  %v3668_v39 = vsub.f32 %v2472_v31, %v2871_v33 }
 0x1ee   :  { %v880_v37 = vmul.f32 %v2118_v1, %v3666_v59  ;;  %v881_v0 = vmul.f32 %v2118_v1, %v3667_v62  ;;  %v3669_v42 = vsub.f32 %v2680_v60, %v2871_v33  ;;  %v3670_v32 = vsub.f32 %v2685_v22, %v2871_v33 }
 0x1ef   :  { %v882_v6 = vmul.f32 %v2118_v1, %v3668_v39  ;;  %v3671_v40 = vsub.f32 %v2494_v44, %v2871_v33  ;;  %v3672_v28 = vsub.f32 %v2500_v47, %v2871_v33  ;;  %v3673_v31 = vsub.f32 %v2741_v29, %v2871_v33 }
 0x1f0   :  { %v883_v27 = vmul.f32 %v2118_v1, %v3669_v42  ;;  %v884_v30 = vmul.f32 %v2118_v1, %v3670_v32  ;;  %v3674_v60 = vsub.f32 %v2747_v4, %v2871_v33  ;;  %v3675_v22 = vsub.f32 %v2577_v48, %v2895_v3 }
 0x1f1   :  { %v885_v59 = vmul.f32 %v2118_v1, %v3671_v40  ;;  %v886_v62 = vmul.f32 %v2118_v1, %v3672_v28  ;;  %v887_v39 = vmul.f32 %v2118_v1, %v3673_v31  ;;  %v3676_v44 = vsub.f32 %v2583_v57, %v2895_v3 }
 0x1f2   :  { %v888_v42 = vmul.f32 %v2118_v1, %v3674_v60  ;;  %v893_v32 = vmul.f32 %v2116_v10, %v3675_v22  ;;  %v3677_v47 = vsub.f32 %v2617_v45, %v2895_v3  ;;  %v3678_v29 = vsub.f32 %v2623_v58, %v2895_v3 }
 0x1f3   :  { %v894_v40 = vmul.f32 %v2116_v10, %v3676_v44  ;;  %v3679_v4 = vsub.f32 %v2480_v35, %v2895_v3  ;;  %v3680_v48 = vsub.f32 %v2486_v38, %v2895_v3  ;;  %v3681_v57 = vsub.f32 %v2689_v52, %v2895_v3 }
 0x1f4   :  { %v895_v28 = vmul.f32 %v2116_v10, %v3677_v47  ;;  %v896_v31 = vmul.f32 %v2116_v10, %v3678_v29  ;;  %v3682_v45 = vsub.f32 %v2695_v55, %v2895_v3  ;;  %v3683_v58 = vsub.f32 %v2508_v51, %v2895_v3 }
 0x1f5   :  { %v897_v33 = vmul.f32 %v2116_v10, %v3679_v4  ;;  %v898_v1 = vmul.f32 %v2116_v10, %v3680_v48  ;;  %v899_v60 = vmul.f32 %v2116_v10, %v3681_v57  ;;  %v3684_v35 = vsub.f32 %v3628_v14, %v2895_v3 }
 0x1f6   :  { %v900_v22 = vmul.f32 %v2116_v10, %v3682_v45  ;;  %v901_v44 = vmul.f32 %v2116_v10, %v3683_v58  ;;  %v3685_v38 = vsub.f32 %v3629_v43, %v2895_v3  ;;  %v3686_v52 = vsub.f32 %v3630_v9, %v2895_v3  ;;  %v3140_v45 = vpop.eup %2119 }
 0x1f7   :  { %v902_v47 = vmul.f32 %v2116_v10, %v3684_v35  ;;  %v957_v48 = vmul.f32 %v2845_v26, %v873_v49  ;;  %v958_v55 = vmul.f32 %v2845_v26, %v874_v15  ;;  %v959_v57 = vmul.f32 %v2845_v26, %v875_v24 }
 0x1f8   :  { %v903_v29 = vmul.f32 %v2116_v10, %v3685_v38  ;;  %v904_v4 = vmul.f32 %v2116_v10, %v3686_v52  ;;  %v960_v51 = vmul.f32 %v2845_v26, %v876_v54  ;;  %v961_v14 = vmul.f32 %v2845_v26, %v877_v16 }
 0x1f9   :  { %v962_v58 = vmul.f32 %v2845_v26, %v878_v17  ;;  %v963_v43 = vmul.f32 %v2845_v26, %v879_v34  ;;  %v964_v35 = vmul.f32 %v2845_v26, %v880_v37  ;;  %v965_v9 = vmul.f32 %v2845_v26, %v881_v0  ;;  %v3687_v17 = vld [vmem:[#allocation41_spill] sm:$0xff] }
 0x1fa   :  { %v966_v3 = vmul.f32 %v2845_v26, %v882_v6  ;;  %v967_v10 = vmul.f32 %v2845_v26, %v883_v27  ;;  %v968_v49 = vmul.f32 %v2845_v26, %v884_v30  ;;  %v969_v15 = vmul.f32 %v2845_v26, %v885_v59 }
 0x1fb   :  { %v970_v24 = vmul.f32 %v2845_v26, %v886_v62  ;;  %v971_v54 = vmul.f32 %v2845_v26, %v887_v39  ;;  %v972_v16 = vmul.f32 %v2845_v26, %v888_v42  ;;  %v973_v34 = vmul.f32 %v3687_v17, %v889_v2 }
 0x1fc   :  { %v974_v37 = vmul.f32 %v3687_v17, %v890_v18  ;;  %v975_v0 = vmul.f32 %v3687_v17, %v891_v46  ;;  %v976_v6 = vmul.f32 %v3687_v17, %v892_v8  ;;  %v977_v27 = vmul.f32 %v3687_v17, %v893_v32 }
 0x1fd   :  { %v978_v30 = vmul.f32 %v3687_v17, %v894_v40  ;;  %v979_v59 = vmul.f32 %v3687_v17, %v895_v28  ;;  %v980_v62 = vmul.f32 %v3687_v17, %v896_v31  ;;  %v981_v39 = vmul.f32 %v3687_v17, %v897_v33  ;;  %v3688_v40 = vld [vmem:[#allocation47_spill] sm:$0xff] }
 0x1fe   :  { %v982_v26 = vmul.f32 %v3687_v17, %v898_v1  ;;  %v983_v2 = vmul.f32 %v3687_v17, %v899_v60  ;;  %v984_v18 = vmul.f32 %v3687_v17, %v900_v22  ;;  %v985_v46 = vmul.f32 %v3687_v17, %v901_v44 }
 0x1ff   :  { %v986_v8 = vmul.f32 %v3687_v17, %v902_v47  ;;  %v987_v42 = vmul.f32 %v3687_v17, %v903_v29  ;;  %v988_v32 = vmul.f32 %v3687_v17, %v904_v4  ;;  %v1041_v28 = vadd.f32 %v3688_v40, %v957_v48 }
 0x200   :  { %v1042_v31 = vadd.f32 %v3688_v40, %v958_v55  ;;  %v1043_v33 = vadd.f32 %v3688_v40, %v959_v57  ;;  %v1044_v1 = vadd.f32 %v3688_v40, %v960_v51  ;;  %v1045_v60 = vadd.f32 %v3688_v40, %v961_v14  ;;  %v3689_v14 = vld [vmem:[#allocation46_spill] sm:$0xff] }
 0x201   :  { %v1046_v22 = vadd.f32 %v3688_v40, %v962_v58  ;;  %v1047_v44 = vadd.f32 %v3688_v40, %v963_v43  ;;  %v1048_v47 = vadd.f32 %v3688_v40, %v964_v35  ;;  %v1049_v38 = vadd.f32 %v3688_v40, %v965_v9 }
 0x202   :  { %v1050_v29 = vadd.f32 %v3688_v40, %v966_v3  ;;  %v1051_v52 = vadd.f32 %v3688_v40, %v967_v10  ;;  %v1052_v4 = vadd.f32 %v3688_v40, %v968_v49  ;;  %v1053_v48 = vadd.f32 %v3688_v40, %v969_v15 }
 0x203   :  { %v1054_v55 = vadd.f32 %v3688_v40, %v970_v24  ;;  %v1055_v57 = vadd.f32 %v3688_v40, %v971_v54  ;;  %v1056_v51 = vadd.f32 %v3688_v40, %v972_v16  ;;  %v1057_v58 = vadd.f32 %v3689_v14, %v973_v34 }
 0x204   :  { %v1058_v43 = vadd.f32 %v3689_v14, %v974_v37  ;;  %v1059_v35 = vadd.f32 %v3689_v14, %v975_v0  ;;  %v1060_v9 = vadd.f32 %v3689_v14, %v976_v6  ;;  %v1061_v3 = vadd.f32 %v3689_v14, %v977_v27 }
 0x205   :  { %v1062_v10 = vadd.f32 %v3689_v14, %v978_v30  ;;  %v1063_v49 = vadd.f32 %v3689_v14, %v979_v59  ;;  %v1064_v15 = vadd.f32 %v3689_v14, %v980_v62  ;;  %v1065_v24 = vadd.f32 %v3689_v14, %v981_v39 }
 0x206   :  { %v1066_v54 = vadd.f32 %v3689_v14, %v982_v26  ;;  %v1067_v16 = vadd.f32 %v3689_v14, %v983_v2  ;;  %v1068_v17 = vadd.f32 %v3689_v14, %v984_v18  ;;  %v1069_v34 = vadd.f32 %v3689_v14, %v985_v46 }
 0x207   :  { %v1070_v37 = vadd.f32 %v3689_v14, %v986_v8  ;;  %v1071_v0 = vadd.f32 %v3689_v14, %v987_v42  ;;  %v1072_v6 = vadd.f32 %v3689_v14, %v988_v32  ;;  %v1998_v27 = vpack.c.bf16 %v1042_v31, %v1041_v28 }
 0x208   :  { %v1999_v30 = vpack.c.bf16 %v1044_v1, %v1043_v33  ;;  %v2000_v59 = vpack.c.bf16 %v1046_v22, %v1045_v60  ;;  %v2001_v62 = vpack.c.bf16 %v1048_v47, %v1047_v44  ;;  %v2002_v40 = vpack.c.bf16 %v1050_v29, %v1049_v38  ;;  %v3698_v38 = vld [vmem:[#allocation16_spill] sm:$0xff] }
 0x209   :  { %v2003_v39 = vpack.c.bf16 %v1052_v4, %v1051_v52  ;;  %v2004_v36 = vpack.c.bf16 %v1054_v55, %v1053_v48  ;;  %v2005_v26 = vpack.c.bf16 %v1056_v51, %v1055_v57  ;;  %v2006_v11 = vpack.c.bf16 %v1058_v43, %v1057_v58  ;;  %1297 = vst [vmem:[%s3505_s8] sm:$0xff] %v1998_v27  ;;  %v3703_v58 = vld [vmem:[#allocation24_spill] sm:$0xff] }
 0x20a   :  { %v2007_v2 = vpack.c.bf16 %v1060_v9, %v1059_v35  ;;  %v2008_v21 = vpack.c.bf16 %v1062_v10, %v1061_v3  ;;  %v2009_v18 = vpack.c.bf16 %v1064_v15, %v1063_v49  ;;  %1298 = vst [vmem:[%s3505_s8 + $0x8] sm:$0xff] %v1999_v30  ;;  %1299 = vst [vmem:[%s3505_s8 + $0x10] sm:$0xff] %v2000_v59  ;;  %v3705_v9 = vld [vmem:[#allocation27_spill] sm:$0xff]  ;;  %v3707_v10 = vld [vmem:[#allocation28_spill] sm:$0xff] }
 0x20b   :  { %1300 = vst [vmem:[%s3505_s8 + $0x18] sm:$0xff] %v2001_v62  ;;  %v2010_v46 = vpack.c.bf16 %v1066_v54, %v1065_v24  ;;  %v2011_v8 = vpack.c.bf16 %v1068_v17, %v1067_v16  ;;  %v2012_v42 = vpack.c.bf16 %v1070_v37, %v1069_v34  ;;  %v2013_v32 = vpack.c.bf16 %v1072_v6, %v1071_v0  ;;  %v3713_v0 = vld [vmem:[#allocation42_spill] sm:$0xff] }
 0x20c   :  { %1301 = vst [vmem:[%s3505_s8 + $0x20] sm:$0xff] %v2002_v40  ;;  %1302 = vst [vmem:[%s3505_s8 + $0x28] sm:$0xff] %v2003_v39  ;;  %v3693_v1 = vsub.f32 %v3636_v20, %v2951_v53  ;;  %v3699_v29 = vsub.f32 %v3698_v38, %v2951_v53  ;;  %v3700_v4 = vsub.f32 %v3640_v50, %v2951_v53 }
 0x20d   :  { %1303 = vst [vmem:[%s3505_s8 + $0x30] sm:$0xff] %v2004_v36  ;;  %1304 = vst [vmem:[%s3505_s8 + $0x38] sm:$0xff] %v2005_v26  ;;  %v3690_v36 = vld [vmem:[#allocation2_spill] sm:$0xff]  ;;  %v3701_v55 = vsub.f32 %v3641_v56, %v2951_v53  ;;  %v3702_v51 = vsub.f32 %v3642_v41, %v2951_v53  ;;  %v3704_v43 = vsub.f32 %v3703_v58, %v2951_v53 }
 0x20e   :  { %1305 = vst [vmem:[%s3505_s8 + $0x40] sm:$0xff] %v2006_v11  ;;  %1306 = vst [vmem:[%s3505_s8 + $0x48] sm:$0xff] %v2007_v2  ;;  %v3691_v28 = vsub.f32 %v3690_v36, %v2951_v53  ;;  %v3692_v11 = vsub.f32 %v3635_v7, %v2951_v53  ;;  %v907_v60 = vmul.f32 %v3140_v45, %v3693_v1  ;;  %v3696_v7 = vld [vmem:[#allocation15_spill] sm:$0xff]  ;;  %v3715_v58 = vld [vmem:[#allocation6_spill] sm:$0xff] }
 0x20f   :  { %1307 = vst [vmem:[%s3505_s8 + $0x50] sm:$0xff] %v2008_v21  ;;  %1308 = vst [vmem:[%s3505_s8 + $0x58] sm:$0xff] %v2009_v18  ;;  %v3694_v21 = vld [vmem:[#allocation12_spill] sm:$0xff]  ;;  %v3697_v20 = vsub.f32 %v3696_v7, %v2951_v53  ;;  %v910_v52 = vmul.f32 %v3140_v45, %v3699_v29  ;;  %v911_v48 = vmul.f32 %v3140_v45, %v3700_v4 }
 0x210   :  { %v905_v31 = vmul.f32 %v3140_v45, %v3691_v28  ;;  %v906_v33 = vmul.f32 %v3140_v45, %v3692_v11  ;;  %v3695_v22 = vsub.f32 %v3694_v21, %v2951_v53  ;;  %1309 = vst [vmem:[%s3505_s8 + $0x60] sm:$0xff] %v2010_v46  ;;  %1310 = vst [vmem:[%s3505_s8 + $0x68] sm:$0xff] %v2011_v8  ;;  %v3714_v46 = vld [vmem:[#allocation49_spill] sm:$0xff] }
 0x211   :  { %1311 = vst [vmem:[%s3505_s8 + $0x70] sm:$0xff] %v2012_v42  ;;  %1312 = vst [vmem:[%s3505_s8 + $0x78] sm:$0xff] %v2013_v32  ;;  %v909_v47 = vmul.f32 %v3140_v45, %v3697_v20  ;;  %v912_v57 = vmul.f32 %v3140_v45, %v3701_v55  ;;  %v913_v14 = vmul.f32 %v3140_v45, %v3702_v51 }
 0x212   :  { %v908_v44 = vmul.f32 %v3140_v45, %v3695_v22  ;;  %v914_v35 = vmul.f32 %v3140_v45, %v3704_v43  ;;  %v3706_v50 = vsub.f32 %v3705_v9, %v2951_v53  ;;  %v3708_v56 = vsub.f32 %v3707_v10, %v2951_v53 }
 0x213   :  { %v3709_v41 = vsub.f32 %v3649_v61, %v2951_v53  ;;  %v3710_v24 = vsub.f32 %v3651_v12, %v2951_v53  ;;  %v3711_v16 = vsub.f32 %v3652_v5, %v2951_v53  ;;  %v3712_v34 = vsub.f32 %v3653_v25, %v2951_v53 }
 0x214   :  { %v915_v3 = vmul.f32 %v3140_v45, %v3706_v50  ;;  %v916_v49 = vmul.f32 %v3140_v45, %v3708_v56  ;;  %v989_v6 = vmul.f32 %v3713_v0, %v905_v31  ;;  %v990_v61 = vmul.f32 %v3713_v0, %v906_v33  ;;  %v3717_v50 = vld [vmem:[#allocation3_spill] sm:$0xff] }
 0x215   :  { %v917_v15 = vmul.f32 %v3140_v45, %v3709_v41  ;;  %v918_v54 = vmul.f32 %v3140_v45, %v3710_v24  ;;  %v919_v17 = vmul.f32 %v3140_v45, %v3711_v16  ;;  %v920_v37 = vmul.f32 %v3140_v45, %v3712_v34  ;;  %v3720_v16 = vld [vmem:[#allocation34_spill] sm:$0xff]  ;;  %v3721_v34 = vld [vmem:[#allocation36_spill] sm:$0xff] }
 0x216   :  { %v991_v27 = vmul.f32 %v3713_v0, %v907_v60  ;;  %v992_v12 = vmul.f32 %v3713_v0, %v908_v44  ;;  %v993_v30 = vmul.f32 %v3713_v0, %v909_v47  ;;  %v994_v59 = vmul.f32 %v3713_v0, %v910_v52  ;;  %v648_v44 = vpop.xlane.xlu1 %647 }
 0x217   :  { %v995_v5 = vmul.f32 %v3713_v0, %v911_v48  ;;  %v996_v62 = vmul.f32 %v3713_v0, %v912_v57  ;;  %v997_v53 = vmul.f32 %v3713_v0, %v913_v14  ;;  %v998_v25 = vmul.f32 %v3713_v0, %v914_v35 }
 0x218   :  { %v999_v45 = vmul.f32 %v3713_v0, %v915_v3  ;;  %v1000_v40 = vmul.f32 %v3713_v0, %v916_v49  ;;  %v1001_v39 = vmul.f32 %v3713_v0, %v917_v15  ;;  %v1002_v26 = vmul.f32 %v3713_v0, %v918_v54  ;;  %v3719_v54 = vld [vmem:[#allocation50_spill] sm:$0xff] }
 0x219   :  { %v1003_v2 = vmul.f32 %v3713_v0, %v919_v17  ;;  %v1004_v18 = vmul.f32 %v3713_v0, %v920_v37  ;;  %v1073_v8 = vadd.f32 %v3714_v46, %v989_v6  ;;  %v1074_v42 = vadd.f32 %v3714_v46, %v990_v61  ;;  %v3722_v61 = vld [vmem:[#allocation32_spill] sm:$0xff] }
 0x21a   :  { %v1075_v32 = vadd.f32 %v3714_v46, %v991_v27  ;;  %v1076_v36 = vadd.f32 %v3714_v46, %v992_v12  ;;  %v1077_v28 = vadd.f32 %v3714_v46, %v993_v30  ;;  %v1078_v31 = vadd.f32 %v3714_v46, %v994_v59  ;;  %v3723_v27 = vld [vmem:[#allocation38_spill] sm:$0xff]  ;;  %v3724_v30 = vld [vmem:[#allocation40_spill] sm:$0xff] }
 0x21b   :  { %v1079_v11 = vadd.f32 %v3714_v46, %v995_v5  ;;  %v1080_v33 = vadd.f32 %v3714_v46, %v996_v62  ;;  %v1081_v1 = vadd.f32 %v3714_v46, %v997_v53  ;;  %v1082_v60 = vadd.f32 %v3714_v46, %v998_v25 }
 0x21c   :  { %v1083_v21 = vadd.f32 %v3714_v46, %v999_v45  ;;  %v1084_v22 = vadd.f32 %v3714_v46, %v1000_v40  ;;  %v1085_v7 = vadd.f32 %v3714_v46, %v1001_v39  ;;  %v1086_v20 = vadd.f32 %v3714_v46, %v1002_v26  ;;  %v3725_v40 = vld [vmem:[#allocation45_spill] sm:$0xff] }
 0x21d   :  { %v1087_v47 = vadd.f32 %v3714_v46, %v1003_v2  ;;  %v1088_v38 = vadd.f32 %v3714_v46, %v1004_v18  ;;  %v2014_v29 = vpack.c.bf16 %v1074_v42, %v1073_v8  ;;  %v2015_v52 = vpack.c.bf16 %v1076_v36, %v1075_v32  ;;  %v3726_v18 = vld [vmem:[#allocation44_spill] sm:$0xff]  ;;  %v1835_v36 = vpop.permute.xlu0 %1834 }
 0x21e   :  { %v2016_v4 = vpack.c.bf16 %v1078_v31, %v1077_v28  ;;  %v2017_v48 = vpack.c.bf16 %v1080_v33, %v1079_v11  ;;  %v2018_v55 = vpack.c.bf16 %v1082_v60, %v1081_v1  ;;  %v2019_v57 = vpack.c.bf16 %v1084_v22, %v1083_v21  ;;  %v3727_v11 = vld [vmem:[#allocation4_spill] sm:$0xff]  ;;  %v3728_v60 = vld [vmem:[#allocation5_spill] sm:$0xff] }
 0x21f   :  { %v2020_v51 = vpack.c.bf16 %v1086_v20, %v1085_v7  ;;  %v2021_v14 = vpack.c.bf16 %v1088_v38, %v1087_v47  ;;  %1313 = vst [vmem:[%s3505_s8 + $0x80] sm:$0xff] %v2014_v29  ;;  %1314 = vst [vmem:[%s3505_s8 + $0x88] sm:$0xff] %v2015_v52  ;;  %v1760_v43 = vsub.f32 %v3715_v58, %v3031_v23  ;;  %v3382_v10 = vmul.f32 0.00048828125, %v648_v44  ;;  %v3729_v22 = vld [vmem:[#allocation13_spill] sm:$0xff]  ;;  %v3730_v7 = vld [vmem:[#allocation14_spill] sm:$0xff] }
 0x220   :  { %1315 = vst [vmem:[%s3505_s8 + $0x90] sm:$0xff] %v2016_v4  ;;  %1316 = vst [vmem:[%s3505_s8 + $0x98] sm:$0xff] %v2017_v48  ;;  %v3716_v35 = vsub.f32 %v3015_v13, %v2969_v19  ;;  %v2031_v3 = vpack.c.bf16 %v3717_v50, %v3018_v63  ;;  %v784_v63 = vpop.xlane.xlu1 %783  ;;  %v1769_v17 = vsub.f32 %v3720_v16, %v3719_v54  ;;  %v3731_v47 = vld [vmem:[#allocation17_spill] sm:$0xff]  ;;  %v3732_v52 = vld [vmem:[#allocation18_spill] sm:$0xff] }
 0x221   :  { %1317 = vst [vmem:[%s3505_s8 + $0xa0] sm:$0xff] %v2018_v55  ;;  %1318 = vst [vmem:[%s3505_s8 + $0xa8] sm:$0xff] %v2019_v57  ;;  %v1764_v19 = vmax.f32 %v1760_v43, 0.0  ;;  %v788_v49 = vmul.f32 0.00048828125, %v784_v63  ;;  %v792_v41 = vmul.f32 %v3382_v10, %v3382_v10  ;;  %v1770_v37 = vsub.f32 %v3721_v34, %v3719_v54  ;;  %v3733_v48 = vld [vmem:[#allocation21_spill] sm:$0xff]  ;;  %v3734_v57 = vld [vmem:[#allocation22_spill] sm:$0xff] }
 0x222   :  { %v1763_v9 = vmax.f32 %v3716_v35, 0.0  ;;  %1319 = vst [vmem:[%s3505_s8 + $0xb0] sm:$0xff] %v2020_v51  ;;  %1320 = vst [vmem:[%s3505_s8 + $0xb8] sm:$0xff] %v2021_v14  ;;  %v1771_v12 = vsub.f32 %v3723_v27, %v3722_v61  ;;  %v1772_v59 = vsub.f32 %v3724_v30, %v3722_v61  ;;  %v849_v33 = vsub.f32 %v3727_v11, %v3382_v10  ;;  %v3735_v14 = vld [vmem:[#allocation25_spill] sm:$0xff]  ;;  %v3736_v43 = vld [vmem:[#allocation26_spill] sm:$0xff] }
 0x223   :  { %1873 = vst.msk [vmem:[%s3504_s9 + $0x8] sm:$0xff] %vm3007_vm5, %v2031_v3  ;;  %v1776_v56 = vadd.f32 1e-05, %v1764_v19  ;;  %v796_v15 = vsub.f32 %v788_v49, %v792_v41  ;;  %v850_v21 = vsub.f32 %v3728_v60, %v3382_v10  ;;  %v851_v44 = vsub.f32 %v3729_v22, %v3382_v10  ;;  %v3738_v3 = vld [vmem:[#allocation30_spill] sm:$0xff]  ;;  %v3739_v63 = vld [vmem:[#allocation9_spill] sm:$0xff]  ;;  %v3742_v54 = vld [vmem:[#allocation39_spill] sm:$0xff] }
 0x224   :  { %v1775_v13 = vadd.f32 1e-05, %v1763_v9  ;;  %v1830_v2 = vpop.permute.xlu1 %1829  ;;  %v852_v20 = vsub.f32 %v3730_v7, %v3382_v10  ;;  %v853_v38 = vsub.f32 %v3731_v47, %v3382_v10  ;;  %v854_v4 = vsub.f32 %v3732_v52, %v3382_v10  ;;  %v3737_v9 = vld [vmem:[#allocation29_spill] sm:$0xff]  ;;  %v3740_v49 = vld [vmem:[#allocation10_spill] sm:$0xff] }
 0x225   :  { %v800_v24 = vmax.f32 %v796_v15, 0.0  ;;  %v855_v55 = vsub.f32 %v3733_v48, %v3382_v10  ;;  %v856_v51 = vsub.f32 %v3734_v57, %v3382_v10  ;;  %v857_v58 = vsub.f32 %v3735_v14, %v3382_v10  ;;  %v3741_v15 = vld [vmem:[#allocation37_spill] sm:$0xff] }
 0x226   :  { %2121 = vrsqrt.f32 %v1775_v13  ;;  %v858_v35 = vsub.f32 %v3736_v43, %v3382_v10  ;;  %v859_v50 = vsub.f32 %v3737_v9, %v3382_v10  ;;  %v860_v19 = vsub.f32 %v3738_v3, %v3382_v10 }
 0x227   :  { %2123 = vrsqrt.f32 %v1776_v56  ;;  %v868_v0 = vadd.f32 1e-05, %v800_v24  ;;  %v861_v56 = vsub.f32 %v3739_v63, %v3382_v10  ;;  %v862_v41 = vsub.f32 %v3740_v49, %v3382_v10 }
 0x228   :  { %v863_v24 = vsub.f32 %v3741_v15, %v3382_v10  ;;  %v864_v16 = vsub.f32 %v3742_v54, %v3382_v10 }
 0x229   :  { %2125 = vrsqrt.f32 %v868_v0 }
 0x230   :  { %v2122_v6 = vpop.eup %2121 }
 0x231   :  { %v1785_v5 = vmul.f32 %v2122_v6, %v1769_v17  ;;  %v1786_v62 = vmul.f32 %v2122_v6, %v1770_v37  ;;  %v2124_v53 = vpop.eup %2123 }
 0x232   :  { %v1787_v25 = vmul.f32 %v2124_v53, %v1771_v12  ;;  %v1788_v45 = vmul.f32 %v2124_v53, %v1772_v59 }
 0x233   :  { %v1813_v39 = vmul.f32 %v3725_v40, %v1785_v5  ;;  %v1814_v26 = vmul.f32 %v3725_v40, %v1786_v62  ;;  %v2126_v13 = vpop.eup %2125  ;;  %v3743_v40 = vld [vmem:[#allocation43_spill] sm:$0xff] }
 0x234   :  { %v1815_v46 = vmul.f32 %v3726_v18, %v1787_v25  ;;  %v1816_v8 = vmul.f32 %v3726_v18, %v1788_v45  ;;  %v921_v17 = vmul.f32 %v2126_v13, %v849_v33  ;;  %v922_v34 = vmul.f32 %v2126_v13, %v850_v21  ;;  %v3744_v21 = vld [vmem:[#allocation48_spill] sm:$0xff] }
 0x235   :  { %v1841_v42 = vadd.f32 %v1830_v2, %v1813_v39  ;;  %v1842_v32 = vadd.f32 %v1830_v2, %v1814_v26  ;;  %v923_v37 = vmul.f32 %v2126_v13, %v851_v44  ;;  %v924_v23 = vmul.f32 %v2126_v13, %v852_v20 }
 0x236   :  { %v1843_v28 = vadd.f32 %v1835_v36, %v1815_v46  ;;  %v1844_v31 = vadd.f32 %v1835_v36, %v1816_v8  ;;  %v925_v0 = vmul.f32 %v2126_v13, %v853_v38  ;;  %v926_v6 = vmul.f32 %v2126_v13, %v854_v4 }
 0x237   :  { %v2032_v1 = vpack.c.bf16 %v1842_v32, %v1841_v42  ;;  %v927_v61 = vmul.f32 %v2126_v13, %v855_v55  ;;  %v928_v27 = vmul.f32 %v2126_v13, %v856_v51  ;;  %v929_v12 = vmul.f32 %v2126_v13, %v857_v58 }
 0x238   :  { %v2033_v29 = vpack.c.bf16 %v1844_v31, %v1843_v28  ;;  %v930_v30 = vmul.f32 %v2126_v13, %v858_v35  ;;  %v931_v59 = vmul.f32 %v2126_v13, %v859_v50  ;;  %v932_v5 = vmul.f32 %v2126_v13, %v860_v19 }
 0x239   :  { %1874 = vst.msk [vmem:[%s3504_s9 + $0x10] sm:$0xff] %vm3007_vm5, %v2032_v1  ;;  %v933_v62 = vmul.f32 %v2126_v13, %v861_v56  ;;  %v934_v53 = vmul.f32 %v2126_v13, %v862_v41  ;;  %v935_v25 = vmul.f32 %v2126_v13, %v863_v24  ;;  %v936_v45 = vmul.f32 %v2126_v13, %v864_v16 }
 0x23a   :  { %1875 = vst.msk [vmem:[%s3504_s9 + $0x18] sm:$0xff] %vm3007_vm5, %v2033_v29  ;;  %v1005_v39 = vmul.f32 %v3743_v40, %v921_v17  ;;  %v1006_v10 = vmul.f32 %v3743_v40, %v922_v34  ;;  %v1007_v26 = vmul.f32 %v3743_v40, %v923_v37  ;;  %v1008_v2 = vmul.f32 %v3743_v40, %v924_v23 }
 0x23b   :  { %v1009_v18 = vmul.f32 %v3743_v40, %v925_v0  ;;  %v1010_v46 = vmul.f32 %v3743_v40, %v926_v6  ;;  %v1011_v8 = vmul.f32 %v3743_v40, %v927_v61  ;;  %v1012_v42 = vmul.f32 %v3743_v40, %v928_v27 }
 0x23c   :  { %v1013_v32 = vmul.f32 %v3743_v40, %v929_v12  ;;  %v1014_v36 = vmul.f32 %v3743_v40, %v930_v30  ;;  %v1015_v28 = vmul.f32 %v3743_v40, %v931_v59  ;;  %v1016_v31 = vmul.f32 %v3743_v40, %v932_v5 }
 0x23d   :  { %v1017_v11 = vmul.f32 %v3743_v40, %v933_v62  ;;  %v1018_v33 = vmul.f32 %v3743_v40, %v934_v53  ;;  %v1019_v1 = vmul.f32 %v3743_v40, %v935_v25  ;;  %v1020_v60 = vmul.f32 %v3743_v40, %v936_v45 }
 0x23e   :  { %v1089_v22 = vadd.f32 %v3744_v21, %v1005_v39  ;;  %v1090_v44 = vadd.f32 %v3744_v21, %v1006_v10  ;;  %v1091_v7 = vadd.f32 %v3744_v21, %v1007_v26  ;;  %v1092_v20 = vadd.f32 %v3744_v21, %v1008_v2 }
 0x23f   :  { %v1093_v47 = vadd.f32 %v3744_v21, %v1009_v18  ;;  %v1094_v38 = vadd.f32 %v3744_v21, %v1010_v46  ;;  %v1095_v29 = vadd.f32 %v3744_v21, %v1011_v8  ;;  %v1096_v52 = vadd.f32 %v3744_v21, %v1012_v42 }
 0x240   :  { %v1097_v4 = vadd.f32 %v3744_v21, %v1013_v32  ;;  %v1098_v48 = vadd.f32 %v3744_v21, %v1014_v36  ;;  %v1099_v55 = vadd.f32 %v3744_v21, %v1015_v28  ;;  %v1100_v57 = vadd.f32 %v3744_v21, %v1016_v31 }
 0x241   :  { %v1101_v51 = vadd.f32 %v3744_v21, %v1017_v11  ;;  %v1102_v14 = vadd.f32 %v3744_v21, %v1018_v33  ;;  %v1103_v58 = vadd.f32 %v3744_v21, %v1019_v1  ;;  %v1104_v43 = vadd.f32 %v3744_v21, %v1020_v60 }
 0x242   :  { %v2022_v35 = vpack.c.bf16 %v1090_v44, %v1089_v22  ;;  %v2023_v9 = vpack.c.bf16 %v1092_v20, %v1091_v7  ;;  %v2024_v50 = vpack.c.bf16 %v1094_v38, %v1093_v47  ;;  %v2025_v3 = vpack.c.bf16 %v1096_v52, %v1095_v29 }
 0x243   :  { %v2026_v19 = vpack.c.bf16 %v1098_v48, %v1097_v4  ;;  %v2027_v13 = vpack.c.bf16 %v1100_v57, %v1099_v55  ;;  %v2028_v63 = vpack.c.bf16 %v1102_v14, %v1101_v51  ;;  %v2029_v56 = vpack.c.bf16 %v1104_v43, %v1103_v58 }
 0x244   :  { %1321 = vst [vmem:[%s3505_s8 + $0xc0] sm:$0xff] %v2022_v35  ;;  %1322 = vst [vmem:[%s3505_s8 + $0xc8] sm:$0xff] %v2023_v9 }
 0x245   :  { %1323 = vst [vmem:[%s3505_s8 + $0xd0] sm:$0xff] %v2024_v50  ;;  %1324 = vst [vmem:[%s3505_s8 + $0xd8] sm:$0xff] %v2025_v3 }
 0x246   :  { %1325 = vst [vmem:[%s3505_s8 + $0xe0] sm:$0xff] %v2026_v19  ;;  %1326 = vst [vmem:[%s3505_s8 + $0xe8] sm:$0xff] %v2027_v13 }
 0x247   :  { %1327 = vst [vmem:[%s3505_s8 + $0xf0] sm:$0xff] %v2028_v63  ;;  %1328 = vst [vmem:[%s3505_s8 + $0xf8] sm:$0xff] %v2029_v56 }

// kernel: resnet18_forward.11
= control target key start
LH: loop header
LB: loop body
LE: loop exit
PB: predicated region body
PF: predicated region fallthrough
CT: control target
= control target key end

     0   :  { %8 = vsyncpa [#allocation3], 0  ;;  %s4132_s12 = smov 0   ;;  %s4490_s0 = inlined_call_operand.vmem [shape: bf16[2,32768], index: 0, kind: input, shape index: {}]   ;;  %s4491_s1 = inlined_call_operand.vmem [shape: bf16[32768,10], index: 1, kind: input, shape index: {}]   ;;  %s4492_s2 = inlined_call_operand.vmem [shape: f32[1,10], index: 2, kind: input, shape index: {}]   ;;  %s4493_s3 = inlined_call_operand.hbm [shape: f32[2,10], index: 3, kind: output, shape index: {}]  }
   0x1 LB: > { %s4138_s13 = sadd.s32 4294967295, %s4108_s12   ;;  %p3178_p0 = scmp.ge.s32.totalorder %s4108_s12, 1  ;;  %s4108_s12 = sphi %s4132_s12, %s14_s12  }
   0x2   : > { %p144_p1 = scmp.lt.s32.totalorder %s4108_s12, 9 }
   0x4   : > { %p145_p2 = pnand %p3178_p0, %p144_p1 }
   0x5   : > { %s3179_s14 = sshll.u32 (!%p145_p2), %s4138_s13, 5  ;;  %s3180_s15 = sshll.u32 (!%p145_p2), %s4138_s13, 9 }
   0x6   : > { %148 = sbr.rel (%p145_p2) target bundleno = 516 (0x204), region = 32  ;;  %p168_p3 = scmp.lt.s32.totalorder (!%p145_p2), %s3179_s14, 255 }
   0x7   : > { %p173_p4 = scmp.lt.s32.totalorder (!%p145_p2), %s3180_s15, 4095  ;;  %p3182_p5 = scmp.ne.s32.totalorder (!%p145_p2), %s4138_s13, 0 }
   0xd   : > { %s4495_s14 = smov (!%p168_p3, %s3179_s14), 255  ;;  %s4497_s15 = smov (!%p173_p4, %s3180_s15), 4095 }
   0xe   : > { %s4147_s18 = scalar_lea.vmem %s4490_s0, %s4495_s14  ;;  %s3181_s19 = sshll.u32 %s4497_s15, 2  ;;  %v3183_v0 = vld [vmem:[%s4492_s2] ss:$0 sm:$0xff] (!%p3182_p5)  ;;  %vm190_vm0 = vcmask (!%p3182_p5), 74752  }
   0xf   : > { %s4152_s22 = scalar_lea.vmem %s4491_s1, %s3181_s19  ;;  %182 = sbr.rel (%p3182_p5) target bundleno = 22 (0x16), region = 36  ;;  %191 = vst.msk [vmem:[#allocation2] sm:$0x3] (!%p3182_p5), %vm190_vm0, %v3183_v0 }
  0x16 PF: > { %v3812_v1 = vld [vmem:[%s4152_s22 + $0x40] sm:$0xff]   ;;  %v3816_v5 = vld [vmem:[%s4152_s22 + $0x48] sm:$0xff]   ;;  %v3820_v9 = vld [vmem:[%s4152_s22 + $0x50] sm:$0xff]   ;;  %v717_v29 = vlaneseq  ;;  %v4110_v37 = vmov 1966171168   ;;  %s4111_s25 = smov [#allocation2]  }
  0x17   : > { %v3813_v2 = vld [vmem:[%s4152_s22 + $0xc0] sm:$0xff]   ;;  %3444 = vmatprep.subr.bf16.mxu0 %v3812_v1  ;;  %v3817_v6 = vld [vmem:[%s4152_s22 + $0xc8] sm:$0xff]   ;;  %v3821_v10 = vld [vmem:[%s4152_s22 + $0xd0] sm:$0xff]   ;;  %v715_v38 = vunpack.c.l.s4 %v4110_v37  ;;  %s3127_s26 = sshll.u32 %s4111_s25, 4  ;;  %vm3118_vm1 = vcmask 74752   ;;  %p3800_p6 = scmp.eq.s32.totalorder %s4138_s13, 7  ;;  %s3128_s26 = int_to_ptr.vmem [resolvable:$true] %s3127_s26 }
  0x18   : > { %v3814_v3 = vld [vmem:[%s4152_s22] sm:$0xff]   ;;  %3466 = vmatprep.subr.bf16.mxu1 %v3813_v2  ;;  %v3818_v7 = vld [vmem:[%s4152_s22 + $0x8] sm:$0xff]   ;;  %v3822_v11 = vld [vmem:[%s4152_s22 + $0x10] sm:$0xff]   ;;  %v718_v34 = vshrl.u32 %v717_v29, 7  ;;  %s4072_s27 = scalar_lea.vmem %s3128_s26, 32  ;;  %p4079_p10 = scmp.lt.s32.totalorder %s3128_s26, %s3128_s26 }
  0x19   : > { %v3815_v4 = vld [vmem:[%s4152_s22 + $0x80] sm:$0xff]   ;;  %3445 = vmatpush3.bf16.msra.mxu0 %v3814_v3  ;;  %v3819_v8 = vld [vmem:[%s4152_s22 + $0x88] sm:$0xff]   ;;  %v3823_v12 = vld [vmem:[%s4152_s22 + $0x90] sm:$0xff]   ;;  %v716_v41 = vunpack.c.0.s8 %v715_v38  ;;  %p4073_p7 = scmp.ne.s32.totalorder %s3128_s26, %s4072_s27  ;;  %p4080_p11 = scmp.lt.s32.totalorder %s4072_s27, %s4072_s27 }
  0x1a   : > { %3467 = vmatpush3.bf16.msra.mxu1 %v3815_v4  ;;  %3446 = vmatprep.subr.bf16.mxu0 %v3816_v5  ;;  %v3824_v13 = vld [vmem:[%s4152_s22 + $0x58] sm:$0xff]   ;;  %v3828_v17 = vld [vmem:[%s4152_s22 + $0x60] sm:$0xff]   ;;  %v3832_v21 = vld [vmem:[%s4152_s22 + $0x68] sm:$0xff]  }
  0x1b   : > { %3468 = vmatprep.subr.bf16.mxu1 %v3817_v6  ;;  %v3825_v14 = vld [vmem:[%s4152_s22 + $0xd8] sm:$0xff]   ;;  %v3829_v18 = vld [vmem:[%s4152_s22 + $0xe0] sm:$0xff]   ;;  %v3833_v22 = vld [vmem:[%s4152_s22 + $0xe8] sm:$0xff]   ;;  %v4193_v42 = vsub.s32 %v716_v41, %v718_v34  ;;  %p4074_p8 = pnand %p4073_p7, %p3800_p6  ;;  %p4081_p12 = por %p4080_p11, %p4079_p10 }
  0x1c   : > { %v3826_v15 = vld [vmem:[%s4152_s22 + $0x18] sm:$0xff]   ;;  %v3830_v19 = vld [vmem:[%s4152_s22 + $0x20] sm:$0xff]   ;;  %v3834_v23 = vld [vmem:[%s4152_s22 + $0x28] sm:$0xff]  }
  0x1d   : > { %3447 = vmatpush3.bf16.msra.mxu0 %v3818_v7  ;;  %v3827_v16 = vld [vmem:[%s4152_s22 + $0x98] sm:$0xff]   ;;  %v3831_v20 = vld [vmem:[%s4152_s22 + $0xa0] sm:$0xff]   ;;  %v3835_v24 = vld [vmem:[%s4152_s22 + $0xa8] sm:$0xff]   ;;  %p4075_p9 = pneg %p4074_p8 }
  0x1e   : > { %3469 = vmatpush3.bf16.msra.mxu1 %v3819_v8  ;;  %3448 = vmatprep.subr.bf16.mxu0 %v3820_v9  ;;  %v3836_v25 = vld [vmem:[%s4152_s22 + $0x70] sm:$0xff]   ;;  %v3840_v30 = vld [vmem:[%s4152_s22 + $0x78] sm:$0xff]   ;;  %v193_v35 = vld [vmem:[%s4147_s18] sm:$0xff] }
  0x1f   : > { %3470 = vmatprep.subr.bf16.mxu1 %v3821_v10  ;;  %v3837_v26 = vld [vmem:[%s4152_s22 + $0xf0] sm:$0xff]   ;;  %v3841_v31 = vld [vmem:[%s4152_s22 + $0xf8] sm:$0xff]   ;;  %v3845_v36 = vld [vmem:[%s4152_s22 + $0x140] sm:$0xff]   ;;  %v713_v40 = vcombine.high %v193_v35, %v193_v35  ;;  %v720_v43 = vrot.slane %v193_v35, %v4193_v42  ;;  %p4082_p13 = pnand %p4081_p12, %p4075_p9 }
  0x20   : > { %v3838_v27 = vld [vmem:[%s4152_s22 + $0x30] sm:$0xff]   ;;  %v3842_v32 = vld [vmem:[%s4152_s22 + $0x38] sm:$0xff]   ;;  %v3846_v39 = vld [vmem:[%s4152_s22 + $0x1c0] sm:$0xff]  }
  0x21   : > { %3449 = vmatpush3.bf16.msra.mxu0 %v3822_v11  ;;  %v3839_v28 = vld [vmem:[%s4152_s22 + $0xb0] sm:$0xff]   ;;  %v3843_v33 = vld [vmem:[%s4152_s22 + $0xb8] sm:$0xff]   ;;  %v4197_v44 = vrot.slane %v713_v40, %v4193_v42  ;;  %v728_v45 = vcombine.high %v720_v43, %v720_v43  ;;  %v736_v46 = vrot.slane %v720_v43, %v4193_v42  ;;  %v3847_v48 = vld [vmem:[%s4152_s22 + $0x100] sm:$0xff]  }
  0x22   : > { %3471 = vmatpush3.bf16.msra.mxu1 %v3823_v12  ;;  %3450 = vmatprep.subr.bf16.mxu0 %v3824_v13  ;;  %v3848_v50 = vld [vmem:[%s4152_s22 + $0x180] sm:$0xff]   ;;  %v3849_v53 = vld [vmem:[%s4152_s22 + $0x148] sm:$0xff]   ;;  %v3853_v59 = vld [vmem:[%s4152_s22 + $0x150] sm:$0xff]  }
  0x23   : > { %3472 = vmatprep.subr.bf16.mxu1 %v3825_v14  ;;  %v729_v47 = vcombine.high %v4197_v44, %v4197_v44  ;;  %v750_v49 = vrot.slane %v728_v45, %v4193_v42  ;;  %v758_v52 = vcombine.high %v736_v46, %v736_v46  ;;  %v3850_v55 = vld [vmem:[%s4152_s22 + $0x1c8] sm:$0xff]   ;;  %v3854_v60 = vld [vmem:[%s4152_s22 + $0x1d0] sm:$0xff]   ;;  %v3857_v63 = vld [vmem:[%s4152_s22 + $0x158] sm:$0xff]  }
  0x24   : > { %v3851_v56 = vld [vmem:[%s4152_s22 + $0x108] sm:$0xff]   ;;  %v3855_v61 = vld [vmem:[%s4152_s22 + $0x110] sm:$0xff]   ;;  %v3858_v0 = vld [vmem:[%s4152_s22 + $0x1d8] sm:$0xff]  }
  0x25   : > { %3451 = vmatpush3.bf16.msra.mxu0 %v3826_v15  ;;  %v757_v51 = vrot.slane %v729_v47, %v4193_v42  ;;  %2509 = vmatprep.mubr.bf16.mxu0 %v750_v49  ;;  %v760_v54 = vcombine.high %v750_v49, %v750_v49  ;;  %v3852_v58 = vld [vmem:[%s4152_s22 + $0x188] sm:$0xff]   ;;  %v3856_v62 = vld [vmem:[%s4152_s22 + $0x190] sm:$0xff]   ;;  %v3859_v1 = vld [vmem:[%s4152_s22 + $0x118] sm:$0xff]  }
  0x26   : > { %3473 = vmatpush3.bf16.msra.mxu1 %v3827_v16  ;;  %3452 = vmatprep.subr.bf16.mxu0 %v3828_v17  ;;  %v3860_v2 = vld [vmem:[%s4152_s22 + $0x198] sm:$0xff]   ;;  %v3861_v3 = vld [vmem:[%s4152_s22 + $0x160] sm:$0xff]   ;;  %v3865_v7 = vld [vmem:[%s4152_s22 + $0x168] sm:$0xff]  }
  0x27   : > { %3474 = vmatprep.subr.bf16.mxu1 %v3829_v18  ;;  %v761_v57 = vcombine.high %v757_v51, %v757_v51  ;;  %2549 = vmatprep.mubr.bf16.mxu1 %v760_v54  ;;  %v3862_v4 = vld [vmem:[%s4152_s22 + $0x1e0] sm:$0xff]   ;;  %v3866_v8 = vld [vmem:[%s4152_s22 + $0x1e8] sm:$0xff]   ;;  %v3869_v11 = vld [vmem:[%s4152_s22 + $0x170] sm:$0xff]  }
  0x28   : > { %v3863_v5 = vld [vmem:[%s4152_s22 + $0x120] sm:$0xff]   ;;  %v3867_v9 = vld [vmem:[%s4152_s22 + $0x128] sm:$0xff]   ;;  %v3870_v12 = vld [vmem:[%s4152_s22 + $0x1f0] sm:$0xff]  }
  0x29   : > { %3453 = vmatpush3.bf16.msra.mxu0 %v3830_v19  ;;  %v3864_v6 = vld [vmem:[%s4152_s22 + $0x1a0] sm:$0xff]   ;;  %v3868_v10 = vld [vmem:[%s4152_s22 + $0x1a8] sm:$0xff]   ;;  %v3871_v13 = vld [vmem:[%s4152_s22 + $0x130] sm:$0xff]   ;;  %v743_v19 = vrot.slane %v4197_v44, %v4193_v42 }
  0x2a   : > { %3475 = vmatpush3.bf16.msra.mxu1 %v3831_v20  ;;  %3454 = vmatprep.subr.bf16.mxu0 %v3832_v21  ;;  %v3872_v14 = vld [vmem:[%s4152_s22 + $0x1b0] sm:$0xff]   ;;  %v3873_v15 = vld [vmem:[%s4152_s22 + $0x178] sm:$0xff]   ;;  %v3877_v20 = vld [vmem:[%s4152_s22 + $0x240] sm:$0xff]  }
  0x2b   : > { %3476 = vmatprep.subr.bf16.mxu1 %v3833_v22  ;;  %v3874_v16 = vld [vmem:[%s4152_s22 + $0x1f8] sm:$0xff]   ;;  %v3878_v21 = vld [vmem:[%s4152_s22 + $0x2c0] sm:$0xff]   ;;  %v3885_v29 = vld [vmem:[%s4152_s22 + $0x250] sm:$0xff]  }
  0x2c   : > { %v3875_v17 = vld [vmem:[%s4152_s22 + $0x138] sm:$0xff]   ;;  %v3879_v22 = vld [vmem:[%s4152_s22 + $0x200] sm:$0xff]   ;;  %v3897_v41 = vld [vmem:[%s4152_s22 + $0x268] sm:$0xff]  }
  0x2d   : > { %3455 = vmatpush3.bf16.msra.mxu0 %v3834_v23  ;;  %v3876_v18 = vld [vmem:[%s4152_s22 + $0x1b8] sm:$0xff]   ;;  %v3880_v23 = vld [vmem:[%s4152_s22 + $0x280] sm:$0xff]   ;;  %v3898_v43 = vld [vmem:[%s4152_s22 + $0x2e8] sm:$0xff]  }
  0x2e   : > { %3477 = vmatpush3.bf16.msra.mxu1 %v3835_v24  ;;  %3456 = vmatprep.subr.bf16.mxu0 %v3836_v25  ;;  %v759_v24 = vcombine.high %v743_v19, %v743_v19  ;;  %v3881_v25 = vld [vmem:[%s4152_s22 + $0x248] sm:$0xff]   ;;  %v3890_v34 = vld [vmem:[%s4152_s22 + $0x2d8] sm:$0xff]   ;;  %v3893_v37 = vld [vmem:[%s4152_s22 + $0x260] sm:$0xff]  }
  0x2f   : > { %3478 = vmatprep.subr.bf16.mxu1 %v3837_v26  ;;  %v3882_v26 = vld [vmem:[%s4152_s22 + $0x2c8] sm:$0xff]   ;;  %v3891_v35 = vld [vmem:[%s4152_s22 + $0x218] sm:$0xff]   ;;  %v3894_v38 = vld [vmem:[%s4152_s22 + $0x2e0] sm:$0xff]  }
  0x30   : > { %v3896_v40 = vld [vmem:[%s4152_s22 + $0x2a0] sm:$0xff]   ;;  %v3899_v44 = vld [vmem:[%s4152_s22 + $0x228] sm:$0xff]  }
  0x31   : > { %3457 = vmatpush3.bf16.msra.mxu0 %v3838_v27  ;;  %v3883_v27 = vld [vmem:[%s4152_s22 + $0x208] sm:$0xff]  }
  0x32   : > { %3479 = vmatpush3.bf16.msra.mxu1 %v3839_v28  ;;  %3458 = vmatprep.subr.bf16.mxu0 %v3840_v30  ;;  %v3884_v28 = vld [vmem:[%s4152_s22 + $0x288] sm:$0xff]   ;;  %v3886_v30 = vld [vmem:[%s4152_s22 + $0x2d0] sm:$0xff]  }
  0x33   : > { %3480 = vmatprep.subr.bf16.mxu1 %v3841_v31  ;;  %v3887_v31 = vld [vmem:[%s4152_s22 + $0x210] sm:$0xff]   ;;  %v3900_v45 = vld [vmem:[%s4152_s22 + $0x2a8] sm:$0xff]  }
  0x34   : > { %v194_v47 = vld [vmem:[%s4147_s18 + $0x8] sm:$0xff] }
  0x35   : > { %3459 = vmatpush3.bf16.msra.mxu0 %v3842_v32  ;;  %v3888_v32 = vld [vmem:[%s4152_s22 + $0x290] sm:$0xff]   ;;  %v769_v49 = vrot.slane %v194_v47, %v4193_v42 }
  0x36   : > { %3481 = vmatpush3.bf16.msra.mxu1 %v3843_v33  ;;  %3488 = vmatprep.subr.bf16.mxu0 %v3845_v36  ;;  %v3889_v33 = vld [vmem:[%s4152_s22 + $0x258] sm:$0xff]  }
  0x37   : > { %3510 = vmatprep.subr.bf16.mxu1 %v3846_v39  ;;  %v3892_v36 = vld [vmem:[%s4152_s22 + $0x298] sm:$0xff]   ;;  %v3895_v39 = vld [vmem:[%s4152_s22 + $0x220] sm:$0xff]  }
  0x38   : > { %2510 = vmatmul.mubr.bf16.vlgmr.msra.gmra.mrb[0].mxu0 %v736_v46  ;;  %v3901_v46 = vld [vmem:[%s4152_s22 + $0x270] sm:$0xff]  }
  0x39   : > { %3489 = vmatpush3.bf16.msra.mxu0 %v3847_v48  ;;  %2550 = vmatmul.mubr.bf16.vlgmr.msra.gmra.mrb[0].mxu1 %v758_v52  ;;  %v3902_v48 = vld [vmem:[%s4152_s22 + $0x2f0] sm:$0xff]  }
  0x3a   : > { %3490 = vmatprep.subr.bf16.mxu0 %v3849_v53  ;;  %3511 = vmatpush3.bf16.msra.mxu1 %v3848_v50  ;;  %v762_v50 = vcombine.high %v194_v47, %v194_v47  ;;  %v3904_v52 = vld [vmem:[%s4152_s22 + $0x2b0] sm:$0xff]   ;;  %v777_v53 = vcombine.high %v769_v49, %v769_v49 }
  0x3b   : > { %2589 = vmatprep.mubr.bf16.mxu0 %v757_v51  ;;  %3512 = vmatprep.subr.bf16.mxu1 %v3850_v55  ;;  %v3903_v51 = vld [vmem:[%s4152_s22 + $0x230] sm:$0xff]   ;;  %v3905_v55 = vld [vmem:[%s4152_s22 + $0x278] sm:$0xff]  }
  0x3c   : > { %2629 = vmatprep.mubr.bf16.mxu1 %v761_v57  ;;  %v4267_v54 = vrot.slane %v762_v50, %v4193_v42  ;;  %v799_v57 = vrot.slane %v777_v53, %v4193_v42  ;;  %v3952_v47 = vld [vmem:[%s4152_s22 + $0x410] sm:$0xff]   ;;  %v3955_v50 = vld [vmem:[%s4152_s22 + $0x4d8] sm:$0xff]   ;;  %v3958_v53 = vld [vmem:[%s4152_s22 + $0x460] sm:$0xff]  }
  0x3d   : > { %3491 = vmatpush3.bf16.msra.mxu0 %v3851_v56  ;;  %v3906_v56 = vld [vmem:[%s4152_s22 + $0x2f8] sm:$0xff]  }
  0x3e   : > { %3492 = vmatprep.subr.bf16.mxu0 %v3853_v59  ;;  %3513 = vmatpush3.bf16.msra.mxu1 %v3852_v58  ;;  %v778_v58 = vcombine.high %v4267_v54, %v4267_v54  ;;  %v3907_v59 = vld [vmem:[%s4152_s22 + $0x238] sm:$0xff]  }
  0x3f   : > { %3514 = vmatprep.subr.bf16.mxu1 %v3854_v60  ;;  %v3908_v60 = vld [vmem:[%s4152_s22 + $0x2b8] sm:$0xff]  }
  0x41   : > { %3493 = vmatpush3.bf16.msra.mxu0 %v3855_v61  ;;  %v809_v61 = vcombine.high %v799_v57, %v799_v57 }
  0x42   : > { %3494 = vmatprep.subr.bf16.mxu0 %v3857_v63  ;;  %3515 = vmatpush3.bf16.msra.mxu1 %v3856_v62  ;;  %v785_v62 = vrot.slane %v769_v49, %v4193_v42  ;;  %v3909_v63 = vld [vmem:[%s4152_s22 + $0x340] sm:$0xff]   ;;  %v3954_v49 = vld [vmem:[%s4152_s22 + $0x458] sm:$0xff]  }
  0x43   : > { %3516 = vmatprep.subr.bf16.mxu1 %v3858_v0  ;;  %v3910_v0 = vld [vmem:[%s4152_s22 + $0x3c0] sm:$0xff]  }
  0x45   : > { %3495 = vmatpush3.bf16.msra.mxu0 %v3859_v1  ;;  %v806_v1 = vrot.slane %v778_v58, %v4193_v42  ;;  %v3963_v58 = vld [vmem:[%s4152_s22 + $0x4e8] sm:$0xff]  }
  0x46   : > { %3496 = vmatprep.subr.bf16.mxu0 %v3861_v3  ;;  %3517 = vmatpush3.bf16.msra.mxu1 %v3860_v2  ;;  %v3911_v2 = vld [vmem:[%s4152_s22 + $0x300] sm:$0xff]  }
  0x47   : > { %3518 = vmatprep.subr.bf16.mxu1 %v3862_v4  ;;  %v3912_v3 = vld [vmem:[%s4152_s22 + $0x380] sm:$0xff]   ;;  %v807_v4 = vcombine.high %v785_v62, %v785_v62 }
  0x49   : > { %3497 = vmatpush3.bf16.msra.mxu0 %v3863_v5  ;;  %v3913_v5 = vld [vmem:[%s4152_s22 + $0x348] sm:$0xff]  }
  0x4a   : > { %3498 = vmatprep.subr.bf16.mxu0 %v3865_v7  ;;  %3519 = vmatpush3.bf16.msra.mxu1 %v3864_v6  ;;  %v3914_v6 = vld [vmem:[%s4152_s22 + $0x3c8] sm:$0xff]   ;;  %v810_v7 = vcombine.high %v806_v1, %v806_v1 }
  0x4b   : > { %3520 = vmatprep.subr.bf16.mxu1 %v3866_v8  ;;  %v3915_v8 = vld [vmem:[%s4152_s22 + $0x308] sm:$0xff]  }
  0x4d   : > { %3499 = vmatpush3.bf16.msra.mxu0 %v3867_v9  ;;  %v3916_v9 = vld [vmem:[%s4152_s22 + $0x388] sm:$0xff]  }
  0x4e   : > { %3500 = vmatprep.subr.bf16.mxu0 %v3869_v11  ;;  %3521 = vmatpush3.bf16.msra.mxu1 %v3868_v10  ;;  %v3917_v10 = vld [vmem:[%s4152_s22 + $0x350] sm:$0xff]  }
  0x4f   : > { %3522 = vmatprep.subr.bf16.mxu1 %v3870_v12  ;;  %v3918_v11 = vld [vmem:[%s4152_s22 + $0x3d0] sm:$0xff]  }
  0x50   : > { %v3919_v12 = vld [vmem:[%s4152_s22 + $0x310] sm:$0xff]  }
  0x51   : > { %3501 = vmatpush3.bf16.msra.mxu0 %v3871_v13  ;;  %v3920_v13 = vld [vmem:[%s4152_s22 + $0x390] sm:$0xff]  }
  0x52   : > { %3502 = vmatprep.subr.bf16.mxu0 %v3873_v15  ;;  %3523 = vmatpush3.bf16.msra.mxu1 %v3872_v14  ;;  %v3921_v14 = vld [vmem:[%s4152_s22 + $0x358] sm:$0xff]  }
  0x53   : > { %3524 = vmatprep.subr.bf16.mxu1 %v3874_v16  ;;  %v3922_v15 = vld [vmem:[%s4152_s22 + $0x3d8] sm:$0xff]  }
  0x54   : > { %v3923_v16 = vld [vmem:[%s4152_s22 + $0x318] sm:$0xff]  }
  0x55   : > { %3503 = vmatpush3.bf16.msra.mxu0 %v3875_v17  ;;  %v3924_v17 = vld [vmem:[%s4152_s22 + $0x398] sm:$0xff]  }
  0x56   : > { %3532 = vmatprep.subr.bf16.mxu0 %v3877_v20  ;;  %3525 = vmatpush3.bf16.msra.mxu1 %v3876_v18  ;;  %v3925_v18 = vld [vmem:[%s4152_s22 + $0x360] sm:$0xff]  }
  0x57   : > { %3554 = vmatprep.subr.bf16.mxu1 %v3878_v21  ;;  %v3927_v20 = vld [vmem:[%s4152_s22 + $0x320] sm:$0xff]  }
  0x58   : > { %2590 = vmatmul.mubr.bf16.vlgmr.msra.gmra.mrb[4].mxu0 %v743_v19  ;;  %v3926_v19 = vld [vmem:[%s4152_s22 + $0x3e0] sm:$0xff]  }
  0x59   : > { %3533 = vmatpush3.bf16.msra.mxu0 %v3879_v22  ;;  %2630 = vmatmul.mubr.bf16.vlgmr.msra.gmra.mrb[4].mxu1 %v759_v24  ;;  %v3928_v21 = vld [vmem:[%s4152_s22 + $0x3a0] sm:$0xff]   ;;  %v3929_v22 = vld [vmem:[%s4152_s22 + $0x368] sm:$0xff]  }
  0x5a   : > { %3534 = vmatprep.subr.bf16.mxu0 %v3881_v25  ;;  %3555 = vmatpush3.bf16.msra.mxu1 %v3880_v23  ;;  %v3930_v23 = vld [vmem:[%s4152_s22 + $0x3e8] sm:$0xff]  }
  0x5b   : > { %3556 = vmatprep.subr.bf16.mxu1 %v3882_v26  ;;  %2669 = vmatprep.mubr.bf16.mxu0 %v799_v57  ;;  %v3931_v24 = vld [vmem:[%s4152_s22 + $0x328] sm:$0xff]   ;;  %v3933_v26 = vld [vmem:[%s4152_s22 + $0x370] sm:$0xff]  }
  0x5c   : > { %2709 = vmatprep.mubr.bf16.mxu1 %v809_v61  ;;  %v3932_v25 = vld [vmem:[%s4152_s22 + $0x3a8] sm:$0xff]   ;;  %v3966_v61 = vld [vmem:[%s4152_s22 + $0x470] sm:$0xff]  }
  0x5d   : > { %3535 = vmatpush3.bf16.msra.mxu0 %v3883_v27  ;;  %v3934_v27 = vld [vmem:[%s4152_s22 + $0x3f0] sm:$0xff]   ;;  %v3962_v57 = vld [vmem:[%s4152_s22 + $0x468] sm:$0xff]  }
  0x5e   : > { %3536 = vmatprep.subr.bf16.mxu0 %v3885_v29  ;;  %3557 = vmatpush3.bf16.msra.mxu1 %v3884_v28  ;;  %v3935_v28 = vld [vmem:[%s4152_s22 + $0x330] sm:$0xff]  }
  0x5f   : > { %3558 = vmatprep.subr.bf16.mxu1 %v3886_v30  ;;  %v3936_v29 = vld [vmem:[%s4152_s22 + $0x3b0] sm:$0xff]   ;;  %v3937_v30 = vld [vmem:[%s4152_s22 + $0x378] sm:$0xff]  }
  0x61   : > { %3537 = vmatpush3.bf16.msra.mxu0 %v3887_v31  ;;  %v3938_v31 = vld [vmem:[%s4152_s22 + $0x3f8] sm:$0xff]  }
  0x62   : > { %3538 = vmatprep.subr.bf16.mxu0 %v3889_v33  ;;  %3559 = vmatpush3.bf16.msra.mxu1 %v3888_v32  ;;  %v3939_v32 = vld [vmem:[%s4152_s22 + $0x338] sm:$0xff]  }
  0x63   : > { %3560 = vmatprep.subr.bf16.mxu1 %v3890_v34  ;;  %v3940_v33 = vld [vmem:[%s4152_s22 + $0x3b8] sm:$0xff]   ;;  %v792_v34 = vrot.slane %v4267_v54, %v4193_v42  ;;  %v3959_v54 = vld [vmem:[%s4152_s22 + $0x4e0] sm:$0xff]  }
  0x65   : > { %3539 = vmatpush3.bf16.msra.mxu0 %v3891_v35  ;;  %v3942_v35 = vld [vmem:[%s4152_s22 + $0x440] sm:$0xff]  }
  0x66   : > { %3540 = vmatprep.subr.bf16.mxu0 %v3893_v37  ;;  %3561 = vmatpush3.bf16.msra.mxu1 %v3892_v36  ;;  %v3943_v36 = vld [vmem:[%s4152_s22 + $0x4c0] sm:$0xff]  }
  0x67   : > { %3562 = vmatprep.subr.bf16.mxu1 %v3894_v38  ;;  %v3944_v37 = vld [vmem:[%s4152_s22 + $0x400] sm:$0xff]  }
  0x68   : > { %v3945_v38 = vld [vmem:[%s4152_s22 + $0x480] sm:$0xff]  }
  0x69   : > { %3541 = vmatpush3.bf16.msra.mxu0 %v3895_v39  ;;  %v808_v39 = vcombine.high %v792_v34, %v792_v34 }
  0x6a   : > { %3542 = vmatprep.subr.bf16.mxu0 %v3897_v41  ;;  %3563 = vmatpush3.bf16.msra.mxu1 %v3896_v40  ;;  %v3946_v40 = vld [vmem:[%s4152_s22 + $0x448] sm:$0xff]  }
  0x6b   : > { %3564 = vmatprep.subr.bf16.mxu1 %v3898_v43  ;;  %v3947_v41 = vld [vmem:[%s4152_s22 + $0x4c8] sm:$0xff]  }
  0x6c   : > { %v3948_v43 = vld [vmem:[%s4152_s22 + $0x408] sm:$0xff]  }
  0x6d   : > { %3543 = vmatpush3.bf16.msra.mxu0 %v3899_v44  ;;  %v3949_v44 = vld [vmem:[%s4152_s22 + $0x488] sm:$0xff]  }
  0x6e   : > { %3544 = vmatprep.subr.bf16.mxu0 %v3901_v46  ;;  %3565 = vmatpush3.bf16.msra.mxu1 %v3900_v45  ;;  %v3950_v45 = vld [vmem:[%s4152_s22 + $0x450] sm:$0xff]  }
  0x6f   : > { %3566 = vmatprep.subr.bf16.mxu1 %v3902_v48  ;;  %v3951_v46 = vld [vmem:[%s4152_s22 + $0x4d0] sm:$0xff]  }
  0x70   : > { %v3953_v48 = vld [vmem:[%s4152_s22 + $0x490] sm:$0xff]  }
  0x71   : > { %3545 = vmatpush3.bf16.msra.mxu0 %v3903_v51  ;;  %v3956_v51 = vld [vmem:[%s4152_s22 + $0x418] sm:$0xff]  }
  0x72   : > { %3546 = vmatprep.subr.bf16.mxu0 %v3905_v55  ;;  %3567 = vmatpush3.bf16.msra.mxu1 %v3904_v52  ;;  %v3957_v52 = vld [vmem:[%s4152_s22 + $0x498] sm:$0xff]   ;;  %v3960_v55 = vld [vmem:[%s4152_s22 + $0x420] sm:$0xff]  }
  0x73   : > { %3568 = vmatprep.subr.bf16.mxu1 %v3906_v56  ;;  %v3961_v56 = vld [vmem:[%s4152_s22 + $0x4a0] sm:$0xff]  }
  0x75   : > { %3547 = vmatpush3.bf16.msra.mxu0 %v3907_v59  ;;  %v3964_v59 = vld [vmem:[%s4152_s22 + $0x428] sm:$0xff]  }
  0x76   : > { %3576 = vmatprep.subr.bf16.mxu0 %v3909_v63  ;;  %3569 = vmatpush3.bf16.msra.mxu1 %v3908_v60  ;;  %v3965_v60 = vld [vmem:[%s4152_s22 + $0x4a8] sm:$0xff]   ;;  %v3967_v63 = vld [vmem:[%s4152_s22 + $0x4f0] sm:$0xff]  }
  0x77   : > { %3598 = vmatprep.subr.bf16.mxu1 %v3910_v0 }
  0x78   : > { %2670 = vmatmul.mubr.bf16.vlgmr.msra.gmra.mrb[8].mxu0 %v785_v62  ;;  %v195_v62 = vld [vmem:[%s4147_s18 + $0x10] sm:$0xff] }
  0x79   : > { %3577 = vmatpush3.bf16.msra.mxu0 %v3911_v2  ;;  %2749 = vmatprep.mubr.bf16.mxu0 %v806_v1  ;;  %v818_v0 = vrot.slane %v195_v62, %v4193_v42  ;;  %v811_v1 = vcombine.high %v195_v62, %v195_v62  ;;  %v3968_v2 = vld [vmem:[%s4152_s22 + $0x430] sm:$0xff]  }
  0x7a   : > { %2710 = vmatmul.mubr.bf16.vlgmr.msra.gmra.mrb[8].mxu1 %v807_v4  ;;  %3578 = vmatprep.subr.bf16.mxu0 %v3913_v5  ;;  %v4017_v62 = vld [vmem:[%s4152_s22 + $0x610] sm:$0xff]  }
  0x7b   : > { %3599 = vmatpush3.bf16.msra.mxu1 %v3912_v3  ;;  %2789 = vmatprep.mubr.bf16.mxu1 %v810_v7  ;;  %v3969_v3 = vld [vmem:[%s4152_s22 + $0x4b0] sm:$0xff]   ;;  %v826_v4 = vcombine.high %v818_v0, %v818_v0  ;;  %v4343_v5 = vrot.slane %v811_v1, %v4193_v42  ;;  %v3971_v7 = vld [vmem:[%s4152_s22 + $0x4f8] sm:$0xff]  }
  0x7c   : > { %3600 = vmatprep.subr.bf16.mxu1 %v3914_v6  ;;  %v3970_v6 = vld [vmem:[%s4152_s22 + $0x478] sm:$0xff]  }
  0x7d   : > { %3579 = vmatpush3.bf16.msra.mxu0 %v3915_v8  ;;  %v848_v8 = vrot.slane %v826_v4, %v4193_v42  ;;  %v4020_v1 = vld [vmem:[%s4152_s22 + $0x6d8] sm:$0xff]   ;;  %v4023_v4 = vld [vmem:[%s4152_s22 + $0x660] sm:$0xff]  }
  0x7e   : > { %3580 = vmatprep.subr.bf16.mxu0 %v3917_v10  ;;  %v3972_v10 = vld [vmem:[%s4152_s22 + $0x438] sm:$0xff]  }
  0x7f   : > { %3601 = vmatpush3.bf16.msra.mxu1 %v3916_v9  ;;  %v827_v9 = vcombine.high %v4343_v5, %v4343_v5 }
  0x80   : > { %3602 = vmatprep.subr.bf16.mxu1 %v3918_v11  ;;  %v3973_v11 = vld [vmem:[%s4152_s22 + $0x4b8] sm:$0xff]  }
  0x81   : > { %3581 = vmatpush3.bf16.msra.mxu0 %v3919_v12  ;;  %v858_v12 = vcombine.high %v848_v8, %v848_v8 }
  0x82   : > { %3582 = vmatprep.subr.bf16.mxu0 %v3921_v14  ;;  %v3974_v14 = vld [vmem:[%s4152_s22 + $0x540] sm:$0xff]  }
  0x83   : > { %3603 = vmatpush3.bf16.msra.mxu1 %v3920_v13  ;;  %v834_v13 = vrot.slane %v818_v0, %v4193_v42  ;;  %v4019_v0 = vld [vmem:[%s4152_s22 + $0x658] sm:$0xff]  }
  0x84   : > { %3604 = vmatprep.subr.bf16.mxu1 %v3922_v15  ;;  %v3975_v15 = vld [vmem:[%s4152_s22 + $0x5c0] sm:$0xff]  }
  0x85   : > { %3583 = vmatpush3.bf16.msra.mxu0 %v3923_v16  ;;  %v855_v16 = vrot.slane %v827_v9, %v4193_v42  ;;  %v4028_v9 = vld [vmem:[%s4152_s22 + $0x6e8] sm:$0xff]  }
  0x86   : > { %3584 = vmatprep.subr.bf16.mxu0 %v3925_v18  ;;  %v3977_v18 = vld [vmem:[%s4152_s22 + $0x580] sm:$0xff]  }
  0x87   : > { %3605 = vmatpush3.bf16.msra.mxu1 %v3924_v17  ;;  %v3976_v17 = vld [vmem:[%s4152_s22 + $0x500] sm:$0xff]  }
  0x88   : > { %3606 = vmatprep.subr.bf16.mxu1 %v3926_v19  ;;  %v856_v19 = vcombine.high %v834_v13, %v834_v13 }
  0x89   : > { %3585 = vmatpush3.bf16.msra.mxu0 %v3927_v20  ;;  %v3978_v20 = vld [vmem:[%s4152_s22 + $0x548] sm:$0xff]  }
  0x8a   : > { %3586 = vmatprep.subr.bf16.mxu0 %v3929_v22  ;;  %v859_v22 = vcombine.high %v855_v16, %v855_v16 }
  0x8b   : > { %3607 = vmatpush3.bf16.msra.mxu1 %v3928_v21  ;;  %v3979_v21 = vld [vmem:[%s4152_s22 + $0x5c8] sm:$0xff]  }
  0x8c   : > { %3608 = vmatprep.subr.bf16.mxu1 %v3930_v23  ;;  %v3980_v23 = vld [vmem:[%s4152_s22 + $0x508] sm:$0xff]  }
  0x8d   : > { %3587 = vmatpush3.bf16.msra.mxu0 %v3931_v24  ;;  %v3981_v24 = vld [vmem:[%s4152_s22 + $0x588] sm:$0xff]  }
  0x8e   : > { %3588 = vmatprep.subr.bf16.mxu0 %v3933_v26  ;;  %v3983_v26 = vld [vmem:[%s4152_s22 + $0x5d0] sm:$0xff]  }
  0x8f   : > { %3609 = vmatpush3.bf16.msra.mxu1 %v3932_v25  ;;  %v3982_v25 = vld [vmem:[%s4152_s22 + $0x550] sm:$0xff]  }
  0x90   : > { %3610 = vmatprep.subr.bf16.mxu1 %v3934_v27  ;;  %v3984_v27 = vld [vmem:[%s4152_s22 + $0x510] sm:$0xff]  }
  0x91   : > { %3589 = vmatpush3.bf16.msra.mxu0 %v3935_v28  ;;  %v3985_v28 = vld [vmem:[%s4152_s22 + $0x590] sm:$0xff]  }
  0x92   : > { %3590 = vmatprep.subr.bf16.mxu0 %v3937_v30  ;;  %v3987_v30 = vld [vmem:[%s4152_s22 + $0x5d8] sm:$0xff]  }
  0x93   : > { %3611 = vmatpush3.bf16.msra.mxu1 %v3936_v29  ;;  %v3986_v29 = vld [vmem:[%s4152_s22 + $0x558] sm:$0xff]  }
  0x94   : > { %3612 = vmatprep.subr.bf16.mxu1 %v3938_v31  ;;  %v3988_v31 = vld [vmem:[%s4152_s22 + $0x518] sm:$0xff]  }
  0x95   : > { %3591 = vmatpush3.bf16.msra.mxu0 %v3939_v32  ;;  %v3989_v32 = vld [vmem:[%s4152_s22 + $0x598] sm:$0xff]  }
  0x96   : > { %3620 = vmatprep.subr.bf16.mxu0 %v3942_v35  ;;  %v3992_v35 = vld [vmem:[%s4152_s22 + $0x520] sm:$0xff]  }
  0x97   : > { %3613 = vmatpush3.bf16.msra.mxu1 %v3940_v33  ;;  %v3990_v33 = vld [vmem:[%s4152_s22 + $0x560] sm:$0xff]  }
  0x98   : > { %2750 = vmatmul.mubr.bf16.vlgmr.msra.gmra.mrb[12].mxu0 %v792_v34  ;;  %3642 = vmatprep.subr.bf16.mxu1 %v3943_v36  ;;  %v3991_v34 = vld [vmem:[%s4152_s22 + $0x5e0] sm:$0xff]  }
  0x99   : > { %3621 = vmatpush3.bf16.msra.mxu0 %v3944_v37  ;;  %2829 = vmatprep.mubr.bf16.mxu0 %v848_v8  ;;  %v3993_v36 = vld [vmem:[%s4152_s22 + $0x5a0] sm:$0xff]   ;;  %v3994_v37 = vld [vmem:[%s4152_s22 + $0x568] sm:$0xff]  }
  0x9a   : > { %2790 = vmatmul.mubr.bf16.vlgmr.msra.gmra.mrb[12].mxu1 %v808_v39  ;;  %3622 = vmatprep.subr.bf16.mxu0 %v3946_v40  ;;  %v3996_v39 = vld [vmem:[%s4152_s22 + $0x528] sm:$0xff]  }
  0x9b   : > { %3643 = vmatpush3.bf16.msra.mxu1 %v3945_v38  ;;  %2869 = vmatprep.mubr.bf16.mxu1 %v858_v12  ;;  %v3995_v38 = vld [vmem:[%s4152_s22 + $0x5e8] sm:$0xff]   ;;  %v4031_v12 = vld [vmem:[%s4152_s22 + $0x670] sm:$0xff]  }
  0x9c   : > { %3644 = vmatprep.subr.bf16.mxu1 %v3947_v41  ;;  %v3997_v40 = vld [vmem:[%s4152_s22 + $0x5a8] sm:$0xff]   ;;  %v3998_v41 = vld [vmem:[%s4152_s22 + $0x570] sm:$0xff]  }
  0x9d   : > { %3623 = vmatpush3.bf16.msra.mxu0 %v3948_v43  ;;  %v3999_v43 = vld [vmem:[%s4152_s22 + $0x5f0] sm:$0xff]   ;;  %v4027_v8 = vld [vmem:[%s4152_s22 + $0x668] sm:$0xff]  }
  0x9e   : > { %3624 = vmatprep.subr.bf16.mxu0 %v3950_v45  ;;  %v4001_v45 = vld [vmem:[%s4152_s22 + $0x5b0] sm:$0xff]  }
  0x9f   : > { %3645 = vmatpush3.bf16.msra.mxu1 %v3949_v44  ;;  %v4000_v44 = vld [vmem:[%s4152_s22 + $0x530] sm:$0xff]  }
  0xa0   : > { %3646 = vmatprep.subr.bf16.mxu1 %v3951_v46  ;;  %v4002_v46 = vld [vmem:[%s4152_s22 + $0x578] sm:$0xff]  }
  0xa1   : > { %3625 = vmatpush3.bf16.msra.mxu0 %v3952_v47  ;;  %v4003_v47 = vld [vmem:[%s4152_s22 + $0x5f8] sm:$0xff]  }
  0xa2   : > { %3626 = vmatprep.subr.bf16.mxu0 %v3954_v49  ;;  %v4005_v49 = vld [vmem:[%s4152_s22 + $0x5b8] sm:$0xff]  }
  0xa3   : > { %3647 = vmatpush3.bf16.msra.mxu1 %v3953_v48  ;;  %v4004_v48 = vld [vmem:[%s4152_s22 + $0x538] sm:$0xff]  }
  0xa4   : > { %3648 = vmatprep.subr.bf16.mxu1 %v3955_v50  ;;  %v841_v50 = vrot.slane %v4343_v5, %v4193_v42  ;;  %v4024_v5 = vld [vmem:[%s4152_s22 + $0x6e0] sm:$0xff]  }
  0xa5   : > { %3627 = vmatpush3.bf16.msra.mxu0 %v3956_v51  ;;  %v4007_v51 = vld [vmem:[%s4152_s22 + $0x640] sm:$0xff]  }
  0xa6   : > { %3628 = vmatprep.subr.bf16.mxu0 %v3958_v53  ;;  %v4009_v53 = vld [vmem:[%s4152_s22 + $0x600] sm:$0xff]  }
  0xa7   : > { %3649 = vmatpush3.bf16.msra.mxu1 %v3957_v52  ;;  %v4008_v52 = vld [vmem:[%s4152_s22 + $0x6c0] sm:$0xff]  }
  0xa8   : > { %3650 = vmatprep.subr.bf16.mxu1 %v3959_v54  ;;  %v4010_v54 = vld [vmem:[%s4152_s22 + $0x680] sm:$0xff]  }
  0xa9   : > { %3629 = vmatpush3.bf16.msra.mxu0 %v3960_v55  ;;  %v857_v55 = vcombine.high %v841_v50, %v841_v50 }
  0xaa   : > { %3630 = vmatprep.subr.bf16.mxu0 %v3962_v57  ;;  %v4012_v57 = vld [vmem:[%s4152_s22 + $0x6c8] sm:$0xff]  }
  0xab   : > { %3651 = vmatpush3.bf16.msra.mxu1 %v3961_v56  ;;  %v4011_v56 = vld [vmem:[%s4152_s22 + $0x648] sm:$0xff]  }
  0xac   : > { %3652 = vmatprep.subr.bf16.mxu1 %v3963_v58  ;;  %v4013_v58 = vld [vmem:[%s4152_s22 + $0x608] sm:$0xff]  }
  0xad   : > { %3631 = vmatpush3.bf16.msra.mxu0 %v3964_v59  ;;  %v4014_v59 = vld [vmem:[%s4152_s22 + $0x688] sm:$0xff]  }
  0xae   : > { %3632 = vmatprep.subr.bf16.mxu0 %v3966_v61  ;;  %v4016_v61 = vld [vmem:[%s4152_s22 + $0x6d0] sm:$0xff]  }
  0xaf   : > { %3653 = vmatpush3.bf16.msra.mxu1 %v3965_v60  ;;  %v4015_v60 = vld [vmem:[%s4152_s22 + $0x650] sm:$0xff]  }
  0xb0   : > { %3654 = vmatprep.subr.bf16.mxu1 %v3967_v63  ;;  %v4018_v63 = vld [vmem:[%s4152_s22 + $0x690] sm:$0xff]  }
  0xb1   : > { %3633 = vmatpush3.bf16.msra.mxu0 %v3968_v2  ;;  %v4021_v2 = vld [vmem:[%s4152_s22 + $0x618] sm:$0xff]  }
  0xb2   : > { %3634 = vmatprep.subr.bf16.mxu0 %v3970_v6  ;;  %v4025_v6 = vld [vmem:[%s4152_s22 + $0x620] sm:$0xff]  }
  0xb3   : > { %3655 = vmatpush3.bf16.msra.mxu1 %v3969_v3  ;;  %v4022_v3 = vld [vmem:[%s4152_s22 + $0x698] sm:$0xff]  }
  0xb4   : > { %3656 = vmatprep.subr.bf16.mxu1 %v3971_v7  ;;  %v4026_v7 = vld [vmem:[%s4152_s22 + $0x6a0] sm:$0xff]  }
  0xb5   : > { %3635 = vmatpush3.bf16.msra.mxu0 %v3972_v10  ;;  %v4029_v10 = vld [vmem:[%s4152_s22 + $0x628] sm:$0xff]  }
  0xb6   : > { %3664 = vmatprep.subr.bf16.mxu0 %v3974_v14  ;;  %v4032_v14 = vld [vmem:[%s4152_s22 + $0x6f0] sm:$0xff]  }
  0xb7   : > { %3657 = vmatpush3.bf16.msra.mxu1 %v3973_v11  ;;  %v4030_v11 = vld [vmem:[%s4152_s22 + $0x6a8] sm:$0xff]  }
  0xb8   : > { %2830 = vmatmul.mubr.bf16.vlgmr.msra.gmra.mrb[16].mxu0 %v834_v13  ;;  %3686 = vmatprep.subr.bf16.mxu1 %v3975_v15  ;;  %v196_v13 = vld [vmem:[%s4147_s18 + $0x18] sm:$0xff] }
  0xb9   : > { %3665 = vmatpush3.bf16.msra.mxu0 %v3976_v17  ;;  %2909 = vmatprep.mubr.bf16.mxu0 %v855_v16  ;;  %v867_v15 = vrot.slane %v196_v13, %v4193_v42  ;;  %v860_v16 = vcombine.high %v196_v13, %v196_v13  ;;  %v4033_v17 = vld [vmem:[%s4152_s22 + $0x630] sm:$0xff]  }
  0xba   : > { %2870 = vmatmul.mubr.bf16.vlgmr.msra.gmra.mrb[16].mxu1 %v856_v19  ;;  %3666 = vmatprep.subr.bf16.mxu0 %v3978_v20 }
  0xbb   : > { %3687 = vmatpush3.bf16.msra.mxu1 %v3977_v18  ;;  %2949 = vmatprep.mubr.bf16.mxu1 %v859_v22  ;;  %v4035_v18 = vld [vmem:[%s4152_s22 + $0x678] sm:$0xff]   ;;  %v875_v19 = vcombine.high %v867_v15, %v867_v15  ;;  %v4419_v20 = vrot.slane %v860_v16, %v4193_v42 }
  0xbc   : > { %3688 = vmatprep.subr.bf16.mxu1 %v3979_v21  ;;  %v4034_v21 = vld [vmem:[%s4152_s22 + $0x6b0] sm:$0xff]   ;;  %v4036_v22 = vld [vmem:[%s4152_s22 + $0x6f8] sm:$0xff]  }
  0xbd   : > { %3667 = vmatpush3.bf16.msra.mxu0 %v3980_v23  ;;  %v897_v23 = vrot.slane %v875_v19, %v4193_v42 }
  0xbe   : > { %3668 = vmatprep.subr.bf16.mxu0 %v3982_v25  ;;  %v4037_v25 = vld [vmem:[%s4152_s22 + $0x638] sm:$0xff]  }
  0xbf   : > { %3689 = vmatpush3.bf16.msra.mxu1 %v3981_v24  ;;  %v876_v24 = vcombine.high %v4419_v20, %v4419_v20 }
  0xc0   : > { %3690 = vmatprep.subr.bf16.mxu1 %v3983_v26  ;;  %v907_v26 = vcombine.high %v897_v23, %v897_v23 }
  0xc1   : > { %3669 = vmatpush3.bf16.msra.mxu0 %v3984_v27  ;;  %v883_v27 = vrot.slane %v867_v15, %v4193_v42 }
  0xc2   : > { %3670 = vmatprep.subr.bf16.mxu0 %v3986_v29  ;;  %v4038_v29 = vld [vmem:[%s4152_s22 + $0x6b8] sm:$0xff]  }
  0xc3   : > { %3691 = vmatpush3.bf16.msra.mxu1 %v3985_v28  ;;  %v4039_v28 = vld [vmem:[%s4152_s22 + $0x740] sm:$0xff]  }
  0xc4   : > { %3692 = vmatprep.subr.bf16.mxu1 %v3987_v30  ;;  %v904_v30 = vrot.slane %v876_v24, %v4193_v42 }
  0xc5   : > { %3671 = vmatpush3.bf16.msra.mxu0 %v3988_v31  ;;  %v4040_v31 = vld [vmem:[%s4152_s22 + $0x7c0] sm:$0xff]  }
  0xc6   : > { %3672 = vmatprep.subr.bf16.mxu0 %v3990_v33  ;;  %v905_v33 = vcombine.high %v883_v27, %v883_v27 }
  0xc7   : > { %3693 = vmatpush3.bf16.msra.mxu1 %v3989_v32  ;;  %v4041_v32 = vld [vmem:[%s4152_s22 + $0x700] sm:$0xff]  }
  0xc8   : > { %3694 = vmatprep.subr.bf16.mxu1 %v3991_v34  ;;  %v4043_v34 = vld [vmem:[%s4152_s22 + $0x748] sm:$0xff]  }
  0xc9   : > { %3673 = vmatpush3.bf16.msra.mxu0 %v3992_v35  ;;  %v4042_v35 = vld [vmem:[%s4152_s22 + $0x780] sm:$0xff]  }
  0xca   : > { %3674 = vmatprep.subr.bf16.mxu0 %v3994_v37  ;;  %v4044_v37 = vld [vmem:[%s4152_s22 + $0x7c8] sm:$0xff]  }
  0xcb   : > { %3695 = vmatpush3.bf16.msra.mxu1 %v3993_v36  ;;  %v908_v36 = vcombine.high %v904_v30, %v904_v30 }
  0xcc   : > { %3696 = vmatprep.subr.bf16.mxu1 %v3995_v38  ;;  %v4045_v38 = vld [vmem:[%s4152_s22 + $0x708] sm:$0xff]  }
  0xcd   : > { %3675 = vmatpush3.bf16.msra.mxu0 %v3996_v39  ;;  %v4047_v39 = vld [vmem:[%s4152_s22 + $0x750] sm:$0xff]  }
  0xce   : > { %3676 = vmatprep.subr.bf16.mxu0 %v3998_v41  ;;  %v4048_v41 = vld [vmem:[%s4152_s22 + $0x7d0] sm:$0xff]  }
  0xcf   : > { %3697 = vmatpush3.bf16.msra.mxu1 %v3997_v40  ;;  %v4046_v40 = vld [vmem:[%s4152_s22 + $0x788] sm:$0xff]  }
  0xd0   : > { %3698 = vmatprep.subr.bf16.mxu1 %v3999_v43  ;;  %v4049_v43 = vld [vmem:[%s4152_s22 + $0x710] sm:$0xff]  }
  0xd1   : > { %3677 = vmatpush3.bf16.msra.mxu0 %v4000_v44  ;;  %v4051_v44 = vld [vmem:[%s4152_s22 + $0x758] sm:$0xff]  }
  0xd2   : > { %3678 = vmatprep.subr.bf16.mxu0 %v4002_v46  ;;  %v4052_v46 = vld [vmem:[%s4152_s22 + $0x7d8] sm:$0xff]  }
  0xd3   : > { %3699 = vmatpush3.bf16.msra.mxu1 %v4001_v45  ;;  %v4050_v45 = vld [vmem:[%s4152_s22 + $0x790] sm:$0xff]  }
  0xd4   : > { %3700 = vmatprep.subr.bf16.mxu1 %v4003_v47  ;;  %v4053_v47 = vld [vmem:[%s4152_s22 + $0x718] sm:$0xff]  }
  0xd5   : > { %3679 = vmatpush3.bf16.msra.mxu0 %v4004_v48  ;;  %v4055_v48 = vld [vmem:[%s4152_s22 + $0x760] sm:$0xff]  }
  0xd6   : > { %3708 = vmatprep.subr.bf16.mxu0 %v4007_v51  ;;  %v4057_v51 = vld [vmem:[%s4152_s22 + $0x720] sm:$0xff]  }
  0xd7   : > { %3701 = vmatpush3.bf16.msra.mxu1 %v4005_v49  ;;  %v4054_v49 = vld [vmem:[%s4152_s22 + $0x798] sm:$0xff]  }
  0xd8   : > { %2910 = vmatmul.mubr.bf16.vlgmr.msra.gmra.mrb[20].mxu0 %v841_v50  ;;  %3730 = vmatprep.subr.bf16.mxu1 %v4008_v52  ;;  %v4056_v50 = vld [vmem:[%s4152_s22 + $0x7e0] sm:$0xff]   ;;  %v4059_v52 = vld [vmem:[%s4152_s22 + $0x768] sm:$0xff]  }
  0xd9   : > { %3709 = vmatpush3.bf16.msra.mxu0 %v4009_v53  ;;  %2989 = vmatprep.mubr.bf16.mxu0 %v897_v23  ;;  %v4058_v53 = vld [vmem:[%s4152_s22 + $0x7a0] sm:$0xff]  }
  0xda   : > { %2950 = vmatmul.mubr.bf16.vlgmr.msra.gmra.mrb[20].mxu1 %v857_v55  ;;  %3710 = vmatprep.subr.bf16.mxu0 %v4011_v56  ;;  %v4061_v55 = vld [vmem:[%s4152_s22 + $0x728] sm:$0xff]   ;;  %v4063_v56 = vld [vmem:[%s4152_s22 + $0x770] sm:$0xff]  }
  0xdb   : > { %3731 = vmatpush3.bf16.msra.mxu1 %v4010_v54  ;;  %3029 = vmatprep.mubr.bf16.mxu1 %v907_v26  ;;  %v4060_v54 = vld [vmem:[%s4152_s22 + $0x7e8] sm:$0xff]  }
  0xdc   : > { %3732 = vmatprep.subr.bf16.mxu1 %v4012_v57 }
  0xdd   : > { %3711 = vmatpush3.bf16.msra.mxu0 %v4013_v58  ;;  %v4062_v58 = vld [vmem:[%s4152_s22 + $0x7a8] sm:$0xff]  }
  0xde   : > { %3712 = vmatprep.subr.bf16.mxu0 %v4015_v60  ;;  %v4064_v60 = vld [vmem:[%s4152_s22 + $0x7f0] sm:$0xff]  }
  0xdf   : > { %3733 = vmatpush3.bf16.msra.mxu1 %v4014_v59 }
  0xe0   : > { %3734 = vmatprep.subr.bf16.mxu1 %v4016_v61 }
  0xe1   : > { %3713 = vmatpush3.bf16.msra.mxu0 %v4017_v62 }
  0xe2   : > { %3714 = vmatprep.subr.bf16.mxu0 %v4019_v0  ;;  %v4065_v0 = vld [vmem:[%s4152_s22 + $0x730] sm:$0xff]  }
  0xe3   : > { %3735 = vmatpush3.bf16.msra.mxu1 %v4018_v63 }
  0xe4   : > { %3736 = vmatprep.subr.bf16.mxu1 %v4020_v1 }
  0xe5   : > { %3715 = vmatpush3.bf16.msra.mxu0 %v4021_v2 }
  0xe6   : > { %3716 = vmatprep.subr.bf16.mxu0 %v4023_v4 }
  0xe7   : > { %3737 = vmatpush3.bf16.msra.mxu1 %v4022_v3  ;;  %v4067_v3 = vld [vmem:[%s4152_s22 + $0x778] sm:$0xff]  }
  0xe8   : > { %3738 = vmatprep.subr.bf16.mxu1 %v4024_v5 }
  0xe9   : > { %3717 = vmatpush3.bf16.msra.mxu0 %v4025_v6  ;;  %v4066_v6 = vld [vmem:[%s4152_s22 + $0x7b0] sm:$0xff]  }
  0xea   : > { %3718 = vmatprep.subr.bf16.mxu0 %v4027_v8  ;;  %v4068_v8 = vld [vmem:[%s4152_s22 + $0x7f8] sm:$0xff]  }
  0xeb   : > { %3739 = vmatpush3.bf16.msra.mxu1 %v4026_v7 }
  0xec   : > { %3740 = vmatprep.subr.bf16.mxu1 %v4028_v9 }
  0xed   : > { %3719 = vmatpush3.bf16.msra.mxu0 %v4029_v10  ;;  %v4069_v10 = vld [vmem:[%s4152_s22 + $0x738] sm:$0xff]  }
  0xee   : > { %3720 = vmatprep.subr.bf16.mxu0 %v4031_v12  ;;  %v4070_v12 = vld [vmem:[%s4152_s22 + $0x7b8] sm:$0xff]  }
  0xef   : > { %3741 = vmatpush3.bf16.msra.mxu1 %v4030_v11  ;;  %v890_v11 = vrot.slane %v4419_v20, %v4193_v42 }
  0xf0   : > { %3742 = vmatprep.subr.bf16.mxu1 %v4032_v14 }
  0xf1   : > { %3721 = vmatpush3.bf16.msra.mxu0 %v4033_v17  ;;  %v906_v13 = vcombine.high %v890_v11, %v890_v11 }
  0xf2   : > { %3722 = vmatprep.subr.bf16.mxu0 %v4035_v18 }
  0xf3   : > { %3743 = vmatpush3.bf16.msra.mxu1 %v4034_v21 }
  0xf4   : > { %3744 = vmatprep.subr.bf16.mxu1 %v4036_v22 }
  0xf5   : > { %3723 = vmatpush3.bf16.msra.mxu0 %v4037_v25 }
  0xf6   : > { %3752 = vmatprep.subr.bf16.mxu0 %v4039_v28 }
  0xf7   : > { %3745 = vmatpush3.bf16.msra.mxu1 %v4038_v29 }
  0xf8   : > { %2990 = vmatmul.mubr.bf16.vlgmr.msra.gmra.mrb[24].mxu0 %v883_v27  ;;  %3774 = vmatprep.subr.bf16.mxu1 %v4040_v31 }
  0xf9   : > { %3753 = vmatpush3.bf16.msra.mxu0 %v4041_v32  ;;  %3069 = vmatprep.mubr.bf16.mxu0 %v904_v30 }
  0xfa   : > { %3030 = vmatmul.mubr.bf16.vlgmr.msra.gmra.mrb[24].mxu1 %v905_v33  ;;  %3754 = vmatprep.subr.bf16.mxu0 %v4043_v34 }
  0xfb   : > { %3775 = vmatpush3.bf16.msra.mxu1 %v4042_v35  ;;  %3109 = vmatprep.mubr.bf16.mxu1 %v908_v36 }
  0xfc   : > { %3776 = vmatprep.subr.bf16.mxu1 %v4044_v37 }
  0xfd   : > { %3755 = vmatpush3.bf16.msra.mxu0 %v4045_v38 }
  0xfe   : > { %3756 = vmatprep.subr.bf16.mxu0 %v4047_v39 }
  0xff   : > { %3777 = vmatpush3.bf16.msra.mxu1 %v4046_v40 }
 0x100   : > { %3778 = vmatprep.subr.bf16.mxu1 %v4048_v41 }
 0x101   : > { %3757 = vmatpush3.bf16.msra.mxu0 %v4049_v43 }
 0x102   : > { %3758 = vmatprep.subr.bf16.mxu0 %v4051_v44 }
 0x103   : > { %3779 = vmatpush3.bf16.msra.mxu1 %v4050_v45 }
 0x104   : > { %3780 = vmatprep.subr.bf16.mxu1 %v4052_v46 }
 0x105   : > { %3759 = vmatpush3.bf16.msra.mxu0 %v4053_v47 }
 0x106   : > { %3760 = vmatprep.subr.bf16.mxu0 %v4055_v48 }
 0x107   : > { %3781 = vmatpush3.bf16.msra.mxu1 %v4054_v49 }
 0x108   : > { %3782 = vmatprep.subr.bf16.mxu1 %v4056_v50 }
 0x109   : > { %3761 = vmatpush3.bf16.msra.mxu0 %v4057_v51 }
 0x10a   : > { %3762 = vmatprep.subr.bf16.mxu0 %v4059_v52 }
 0x10b   : > { %3783 = vmatpush3.bf16.msra.mxu1 %v4058_v53  ;;  %v3460_v57 = vpop.f32.mrb[0].mxu0 }
 0x10c   : > { %v3461_v59 = vpop.f32.mrb[1].mxu0  ;;  %3784 = vmatprep.subr.bf16.mxu1 %v4060_v54  ;;  %v3482_v61 = vpop.f32.mrb[0].mxu1 }
 0x10d   : > { %v3462_v62 = vadd.f32 %v3461_v59, %v3460_v57  ;;  %v3463_v63 = vpop.f32.mrb[2].mxu0  ;;  %3763 = vmatpush3.bf16.msra.mxu0 %v4061_v55  ;;  %v3483_v1 = vpop.f32.mrb[1].mxu1 }
 0x10e   : > { %v3464_v2 = vpop.f32.mrb[3].mxu0  ;;  %3764 = vmatprep.subr.bf16.mxu0 %v4063_v56  ;;  %v3484_v4 = vadd.f32 %v3483_v1, %v3482_v61  ;;  %v3485_v5 = vpop.f32.mrb[2].mxu1 }
 0x10f   : > { %3785 = vmatpush3.bf16.msra.mxu1 %v4062_v58  ;;  %v3486_v7 = vpop.f32.mrb[3].mxu1 }
 0x110   : > { %3786 = vmatprep.subr.bf16.mxu1 %v4064_v60  ;;  %v2552_v9 = vadd.f32 %v3484_v4, %v3462_v62 }
 0x111   : > { %3765 = vmatpush3.bf16.msra.mxu0 %v4065_v0 }
 0x112   : > { %3766 = vmatprep.subr.bf16.mxu0 %v4067_v3 }
 0x113   : > { %3787 = vmatpush3.bf16.msra.mxu1 %v4066_v6 }
 0x114   : > { %3788 = vmatprep.subr.bf16.mxu1 %v4068_v8 }
 0x115   : > { %3767 = vmatpush3.bf16.msra.mxu0 %v4069_v10 }
 0x117   : > { %3789 = vmatpush3.bf16.msra.mxu1 %v4070_v12 }
 0x118   : > { %3070 = vmatmul.mubr.bf16.vlgmr.msra.gmra.mrb[28].mxu0 %v890_v11 }
 0x11a   : > { %3110 = vmatmul.mubr.bf16.vlgmr.msra.gmra.mrb[28].mxu1 %v906_v13 }
 0x12b   : > { %v3504_v14 = vpop.f32.mrb[4].mxu0 }
 0x12c   : > { %v3505_v15 = vpop.f32.mrb[5].mxu0  ;;  %v3526_v16 = vpop.f32.mrb[4].mxu1 }
 0x12d   : > { %v3506_v17 = vadd.f32 %v3505_v15, %v3504_v14  ;;  %v3507_v18 = vpop.f32.mrb[6].mxu0  ;;  %v3527_v19 = vpop.f32.mrb[5].mxu1 }
 0x12e   : > { %v3508_v21 = vpop.f32.mrb[7].mxu0  ;;  %v3528_v23 = vadd.f32 %v3527_v19, %v3526_v16  ;;  %v3529_v24 = vpop.f32.mrb[6].mxu1 }
 0x12f   : > { %v2592_v22 = vadd.f32 %v3506_v17, %v2552_v9  ;;  %v3530_v25 = vpop.f32.mrb[7].mxu1 }
 0x131   : > { %v2632_v42 = vadd.f32 %v3528_v23, %v2592_v22 }
 0x14b   : > { %v3548_v20 = vpop.f32.mrb[8].mxu0 }
 0x14c   : > { %v3549_v26 = vpop.f32.mrb[9].mxu0 }
 0x14d   : > { %v3570_v27 = vpop.f32.mrb[8].mxu1  ;;  %v3550_v28 = vadd.f32 %v3549_v26, %v3548_v20  ;;  %v3551_v29 = vpop.f32.mrb[10].mxu0 }
 0x14e   : > { %v3571_v30 = vpop.f32.mrb[9].mxu1  ;;  %v3552_v31 = vpop.f32.mrb[11].mxu0 }
 0x14f   : > { %v2672_v32 = vadd.f32 %v3550_v28, %v2632_v42  ;;  %v3572_v33 = vadd.f32 %v3571_v30, %v3570_v27  ;;  %v3573_v34 = vpop.f32.mrb[10].mxu1 }
 0x150   : > { %v3574_v35 = vpop.f32.mrb[11].mxu1 }
 0x151   : > { %v2712_v36 = vadd.f32 %v3572_v33, %v2672_v32  ;;  %v192_v32 = vld [vmem:[#allocation2] sm:$0x3] }
 0x16b   : > { %v3592_v37 = vpop.f32.mrb[12].mxu0 }
 0x16c   : > { %v3593_v38 = vpop.f32.mrb[13].mxu0 }
 0x16d   : > { %v3614_v39 = vpop.f32.mrb[12].mxu1  ;;  %v3594_v40 = vadd.f32 %v3593_v38, %v3592_v37  ;;  %v3595_v41 = vpop.f32.mrb[14].mxu0 }
 0x16e   : > { %v3615_v43 = vpop.f32.mrb[13].mxu1  ;;  %v3596_v44 = vpop.f32.mrb[15].mxu0 }
 0x16f   : > { %v2752_v45 = vadd.f32 %v3594_v40, %v2712_v36  ;;  %v3616_v46 = vadd.f32 %v3615_v43, %v3614_v39  ;;  %v3617_v47 = vpop.f32.mrb[14].mxu1 }
 0x170   : > { %v3618_v48 = vpop.f32.mrb[15].mxu1 }
 0x171   : > { %v2792_v49 = vadd.f32 %v3616_v46, %v2752_v45 }
 0x18b   : > { %v3636_v50 = vpop.f32.mrb[16].mxu0 }
 0x18c   : > { %v3637_v51 = vpop.f32.mrb[17].mxu0 }
 0x18d   : > { %v3658_v52 = vpop.f32.mrb[16].mxu1  ;;  %v3638_v53 = vadd.f32 %v3637_v51, %v3636_v50  ;;  %v3639_v54 = vpop.f32.mrb[18].mxu0 }
 0x18e   : > { %v3659_v55 = vpop.f32.mrb[17].mxu1  ;;  %v3640_v56 = vpop.f32.mrb[19].mxu0 }
 0x18f   : > { %v2832_v57 = vadd.f32 %v3638_v53, %v2792_v49  ;;  %v3660_v58 = vadd.f32 %v3659_v55, %v3658_v52  ;;  %v3661_v59 = vpop.f32.mrb[18].mxu1 }
 0x190   : > { %v3662_v60 = vpop.f32.mrb[19].mxu1 }
 0x191   : > { %v2872_v61 = vadd.f32 %v3660_v58, %v2832_v57 }
 0x1ab   : > { %v3680_v62 = vpop.f32.mrb[20].mxu0 }
 0x1ac   : > { %v3681_v63 = vpop.f32.mrb[21].mxu0 }
 0x1ad   : > { %v3702_v0 = vpop.f32.mrb[20].mxu1  ;;  %v3682_v1 = vadd.f32 %v3681_v63, %v3680_v62  ;;  %v3683_v2 = vpop.f32.mrb[22].mxu0 }
 0x1ae   : > { %v3703_v3 = vpop.f32.mrb[21].mxu1  ;;  %v3684_v4 = vpop.f32.mrb[23].mxu0 }
 0x1af   : > { %v2912_v5 = vadd.f32 %v3682_v1, %v2872_v61  ;;  %v3704_v6 = vadd.f32 %v3703_v3, %v3702_v0  ;;  %v3705_v7 = vpop.f32.mrb[22].mxu1 }
 0x1b0   : > { %v3706_v8 = vpop.f32.mrb[23].mxu1 }
 0x1b1   : > { %v2952_v9 = vadd.f32 %v3704_v6, %v2912_v5 }
 0x1cb   : > { %v3724_v10 = vpop.f32.mrb[24].mxu0 }
 0x1cc   : > { %v3725_v11 = vpop.f32.mrb[25].mxu0 }
 0x1cd   : > { %v3746_v12 = vpop.f32.mrb[24].mxu1  ;;  %v3726_v13 = vadd.f32 %v3725_v11, %v3724_v10  ;;  %v3727_v14 = vpop.f32.mrb[26].mxu0 }
 0x1ce   : > { %v3747_v15 = vpop.f32.mrb[25].mxu1  ;;  %v3728_v16 = vpop.f32.mrb[27].mxu0 }
 0x1cf   : > { %v2992_v17 = vadd.f32 %v3726_v13, %v2952_v9  ;;  %v3748_v18 = vadd.f32 %v3747_v15, %v3746_v12  ;;  %v3749_v19 = vpop.f32.mrb[26].mxu1 }
 0x1d0   : > { %v3750_v21 = vpop.f32.mrb[27].mxu1 }
 0x1d1   : > { %v3032_v22 = vadd.f32 %v3748_v18, %v2992_v17 }
 0x1eb   : > { %v3768_v23 = vpop.f32.mrb[28].mxu0 }
 0x1ec   : > { %v3769_v24 = vpop.f32.mrb[29].mxu0 }
 0x1ed   : > { %v3790_v25 = vpop.f32.mrb[28].mxu1  ;;  %v3770_v42 = vadd.f32 %v3769_v24, %v3768_v23  ;;  %v3771_v20 = vpop.f32.mrb[30].mxu0 }
 0x1ee   : > { %v3791_v26 = vpop.f32.mrb[29].mxu1  ;;  %v3772_v27 = vpop.f32.mrb[31].mxu0 }
 0x1ef   : > { %v3072_v28 = vadd.f32 %v3770_v42, %v3032_v22  ;;  %v3792_v29 = vadd.f32 %v3791_v26, %v3790_v25  ;;  %v3793_v30 = vpop.f32.mrb[30].mxu1 }
 0x1f0   : > { %v3794_v31 = vpop.f32.mrb[31].mxu1 }
 0x1f1   : > { %v3112_v33 = vadd.f32 %v3792_v29, %v3072_v28 }
 0x1f3   : > { %v3117_v34 = vadd.f32 %v3112_v33, %v192_v32 }
 0x1f5   : > { %3119 = vst.msk [vmem:[#allocation2] sm:$0x3] %vm3118_vm1, %v3117_v34 }
 0x1f6   : > { %4085 = shalt.err (!%p4082_p13)
}
 0x1f7   : > { %s4086_s30 = scalar_lea.hbm %s4493_s3, 32 }
 0x1f8   : > { %p4087_p0 = scmp.ne.s32.totalorder %s4493_s3, %s4086_s30  ;;  %p4092_p3 = scmp.lt.u32.totalorder %s4086_s30, %s4493_s3 }
 0x1fa   : > { %p4088_p1 = pnand %p4087_p0, %p3800_p6 }
 0x1fc   : > { %p4089_p2 = pneg %p4088_p1 }
 0x1fe   : > { %p4094_p4 = pnand %p4092_p3, %p4089_p2 }
 0x200   : > { %4097 = shalt.err (!%p4094_p4)
}
 0x201   : > { %3797 = dma.vmem_to_hbm [thread:$0]  (%p3800_p6), %s3128_s26, 32, %s4493_s3, [#allocation3]  }
 0x202   : > { %4103 = dma.done.wait (%p3800_p6), [#allocation3], 32  }
 0x203   : > { %4105 = vsyncadd (%p3800_p6), [#allocation3], 4294967264 }
 0x204 PF: > { %s14_s12 = sadd.s32 1, %s4108_s12  }
 0x205   : > { %p11_p5 = scmp.ge.s32.totalorder %s14_s12, 10  }
 0x207   :  { %13 = sbr.rel (!%p11_p5) target bundleno = 1 (0x1), region = 66 }
 0x20e   :  { %3140 = vsyncpa [#allocation3], 1 }
 0x20f   :  { %3142 = vsyncpa [#allocation3 + $0x1], 1 }

</bundles_post_ra>
